<compile_context>
chip_gen: v5e
topology: v5e:2x2
jax: 0.10.0
libtpu: 0.0.40
codegen_flags: <defaults>
</compile_context>

<pallas_src>
import jax
import jax.numpy as jnp
from jax import lax
from jax.experimental import pallas as pl
from jax.experimental.pallas import tpu as pltpu

BN_EPS = 1e-5
MATMUL_DTYPE = jnp.float32     # set jnp.bfloat16 for 2x MXU rate / half footprint


# ----------------------------------------------------------------------------
# Fused Pallas kernel (one grid step == NB images)
# ----------------------------------------------------------------------------
def _inception_a_kernel(x_ref, w_in_ref, w_mid_ref, w43_ref, b_ref, o_ref,
                        pad_in, pad_a, pad_b):
    NB, H, W, Cin = x_ref.shape
    M = NB * H * W
    L, R = 8, 8 + W                 # sublane-aligned interior column window
    Wp = W + 16

    # Zero only the 1-wide halo border; the interior is fully rewritten every
    # step.  (Per-step, not @program_id==0, so it is safe under megacore
    # sharding where a core may never see program_id 0.)
    def zero_border(ref, c):
        zrow = jnp.zeros((NB, 1, Wp, c), jnp.float32)
        zcol = jnp.zeros((NB, H + 2, 1, c), jnp.float32)
        ref[:, 0:1, :, :] = zrow
        ref[:, H + 1:H + 2, :, :] = zrow
        ref[:, :, L - 1:L, :] = zcol
        ref[:, :, R:R + 1, :] = zcol

    # 3x3 im2col patch: 3 sublane-shifted W slices (one per kx); the 3 ky
    # offsets slice an outer dim (free).  Tap order (ky-major, kx-minor)
    # matches the host-side HWIO weight reshape.
    def patch9(ref, c):
        cols = [ref[:, :, L - 1 + kx:L - 1 + kx + W, :] for kx in range(3)]
        taps = [cols[kx][:, ky:ky + H].reshape(M, c)
                for ky in range(3) for kx in range(3)]
        return jnp.concatenate(taps, axis=1)               # [M, 9*c]

    mm_dtype = w_in_ref.dtype

    # ---- stage 1: avg-pool+1x1 branch and all three 1x1 convs, one matmul ---
    zero_border(pad_in, Cin)
    pad_in[:, 1:H + 1, L:R, :] = x_ref[...]
    p0 = patch9(pad_in, Cin).astype(mm_dtype)               # [M, 9*Cin]
    y1 = jnp.dot(p0, w_in_ref[...], preferred_element_type=jnp.float32)
    y1 = jnp.maximum(y1 + b_ref[:, 0:320], 0.0)
    # y1 columns: x1 (0:96) | x2 (96:192) | t3 (192:256) | t4 (256:320)
    o_ref[:, :, :, 0:192] = (
        y1[:, 0:192].reshape(NB, H, W, 192).astype(o_ref.dtype))

    # ---- stage 2: branch-3 3x3 and branch-4 first 3x3 on one 128-lane patch -
    zero_border(pad_a, 128)
    pad_a[:, 1:H + 1, L:R, :] = y1[:, 192:320].reshape(NB, H, W, 128)
    p1 = patch9(pad_a, 128).astype(mm_dtype)                # [M, 1152]
    y2 = jnp.dot(p1, w_mid_ref[...], preferred_element_type=jnp.float32)
    y2 = jnp.maximum(y2 + b_ref[:, 384:576], 0.0)
    # y2 columns: x3 (0:96) | x4_mid (96:192)
    o_ref[:, :, :, 192:288] = (
        y2[:, 0:96].reshape(NB, H, W, 96).astype(o_ref.dtype))

    # ---- stage 3: branch-4 second 3x3 (96 ch zero-padded to 128 lanes) ------
    zero_border(pad_b, 128)
    pad_b[:, 1:H + 1, L:R, 0:96] = y2[:, 96:192].reshape(NB, H, W, 96)
    pad_b[:, 1:H + 1, L:R, 96:128] = jnp.zeros((NB, H, W, 32), jnp.float32)
    p2 = patch9(pad_b, 128).astype(mm_dtype)                # [M, 1152]
    y3 = jnp.dot(p2, w43_ref[...], preferred_element_type=jnp.float32)
    x4 = jnp.maximum(y3 + b_ref[:, 640:736], 0.0)
    o_ref[:, :, :, 288:384] = x4.reshape(NB, H, W, 96).astype(o_ref.dtype)


# ----------------------------------------------------------------------------
# BN folding + merged-weight construction + wrapper
# ----------------------------------------------------------------------------
def fold_bn(w, b, bn):
    """Fold inference-mode BatchNorm into conv weight/bias.

    w: [kh, kw, Cin, Cout] (HWIO), b: [Cout], bn = (gamma, beta, mean, var).
    """
    gamma, beta, mean, var = bn
    scale = gamma / jnp.sqrt(var + BN_EPS)                  # [Cout]
    return w * scale, (b - mean) * scale + beta


def inception_a_pallas(x_nchw, params, num_blocks=None):
    x = jnp.transpose(x_nchw, (0, 2, 3, 1)).astype(jnp.float32)   # NCHW -> NHWC
    N, H, W, Cin = x.shape

    # 2 equal parallel blocks feed both v7x TensorCores; use num_blocks=1 on
    # v5e/v6e (single TC) to amortize per-step overhead over the whole batch.
    if num_blocks is None:
        num_blocks = 2 if N % 2 == 0 else 1
    assert N % num_blocks == 0, (N, num_blocks)
    NB = N // num_blocks

    def fold(name, bn_name):
        w, b = params[name]
        return fold_bn(w, b, params[bn_name])

    w12, b12 = fold("p1_2", "bn1_2")        # [1,1,Cin,96]
    w2,  b2  = fold("p2",   "bn2")          # [1,1,Cin,96]
    w31, b31 = fold("p3_1", "bn3_1")        # [1,1,Cin,64]
    w41, b41 = fold("p4_1", "bn4_1")        # [1,1,Cin,64]
    w32, b32 = fold("p3_2", "bn3_2")        # [3,3,64,96]
    w42, b42 = fold("p4_2", "bn4_2")        # [3,3,64,96]
    w43, b43 = fold("p4_3", "bn4_3")        # [3,3,96,96]

    # Stage-1 weight [9*Cin, 320]: branch-1 (avgpool+1x1) = w12/9 in every tap
    # block; the three 1x1 convs live only in the center tap.
    w_in = jnp.zeros((9 * Cin, 320), jnp.float32)
    w12m = w12[0, 0] / 9.0
    for t in range(9):
        w_in = w_in.at[t * Cin:(t + 1) * Cin, 0:96].set(w12m)
    ctr = 4 * Cin                                           # center tap (ky=1,kx=1)
    w_in = w_in.at[ctr:ctr + Cin, 96:192].set(w2[0, 0])
    w_in = w_in.at[ctr:ctr + Cin, 192:256].set(w31[0, 0])
    w_in = w_in.at[ctr:ctr + Cin, 256:320].set(w41[0, 0])
    b_in = jnp.concatenate([b12, b2, b31, b41])             # [320]

    # Stage-2 weight [9*128, 192]: block-diagonal so one 128-lane patch drives
    # both 3x3 convs (t3 -> x3 via w32, t4 -> x4_mid via w42).
    w32r = w32.reshape(9, 64, 96)
    w42r = w42.reshape(9, 64, 96)
    w_mid = jnp.zeros((9 * 128, 192), jnp.float32)
    for t in range(9):
        w_mid = w_mid.at[t * 128:t * 128 + 64, 0:96].set(w32r[t])
        w_mid = w_mid.at[t * 128 + 64:t * 128 + 128, 96:192].set(w42r[t])
    b_mid = jnp.concatenate([b32, b42])                     # [192]

    # Stage-3 weight [9*128, 96]: 96-ch activation zero-padded to 128 lanes per
    # tap; the padding rows are zero.
    w43r = w43.reshape(9, 96, 96)
    w43p = jnp.zeros((9 * 128, 96), jnp.float32)
    for t in range(9):
        w43p = w43p.at[t * 128:t * 128 + 96, :].set(w43r[t])

    # All biases in one operand at lane-aligned offsets: 0..320 | 384..576 | 640..736
    b_all = jnp.zeros((1, 736), jnp.float32)
    b_all = b_all.at[0, 0:320].set(b_in)
    b_all = b_all.at[0, 384:576].set(b_mid)
    b_all = b_all.at[0, 640:736].set(b43)

    w_in = w_in.astype(MATMUL_DTYPE)
    w_mid = w_mid.astype(MATMUL_DTYPE)
    w43p = w43p.astype(MATMUL_DTYPE)

    out = pl.pallas_call(
        _inception_a_kernel,
        out_shape=jax.ShapeDtypeStruct((N, H, W, 384), jnp.float32),
        grid=(num_blocks,),
        in_specs=[
            pl.BlockSpec((NB, H, W, Cin), lambda n: (n, 0, 0, 0)),
            pl.BlockSpec(w_in.shape, lambda n: (0, 0)),
            pl.BlockSpec(w_mid.shape, lambda n: (0, 0)),
            pl.BlockSpec(w43p.shape, lambda n: (0, 0)),
            pl.BlockSpec(b_all.shape, lambda n: (0, 0)),
        ],
        out_specs=pl.BlockSpec((NB, H, W, 384), lambda n: (n, 0, 0, 0)),
        scratch_shapes=[
            pltpu.VMEM((NB, H + 2, W + 16, Cin), jnp.float32),   # padded input
            pltpu.VMEM((NB, H + 2, W + 16, 128), jnp.float32),   # padded t3||t4
            pltpu.VMEM((NB, H + 2, W + 16, 128), jnp.float32),   # padded x4_mid
        ],
        compiler_params=pltpu.CompilerParams(
            dimension_semantics=("parallel",),
            vmem_limit_bytes=32 * 1024 * 1024),
    )(x, w_in, w_mid, w43p, b_all)

    return jnp.transpose(out, (0, 3, 1, 2))                 # NHWC -> NCHW


# ----------------------------------------------------------------------------
# Parameter setup (deterministic, synthetic)
# ----------------------------------------------------------------------------
def init_params(key, cin):
    # 7 convs * 2 keys + 7 batchnorms * 4 keys = 42 keys needed.
    keys = iter(jax.random.split(key, 48))

    def conv(kh, kw, ci, co):
        w = jax.random.normal(next(keys), (kh, kw, ci, co), jnp.float32) * 0.1
        b = jax.random.normal(next(keys), (co,), jnp.float32) * 0.1
        return w, b

    def bn(c):
        gamma = 1.0 + 0.1 * jax.random.normal(next(keys), (c,), jnp.float32)
        beta = 0.1 * jax.random.normal(next(keys), (c,), jnp.float32)
        mean = 0.1 * jax.random.normal(next(keys), (c,), jnp.float32)
        var = 1.0 + 0.1 * jax.random.uniform(next(keys), (c,), jnp.float32)
        return (gamma, beta, mean, var)

    p = {}
    p["p1_2"], p["bn1_2"] = conv(1, 1, cin, 96), bn(96)
    p["p2"], p["bn2"] = conv(1, 1, cin, 96), bn(96)
    p["p3_1"], p["bn3_1"] = conv(1, 1, cin, 64), bn(64)
    p["p3_2"], p["bn3_2"] = conv(3, 3, 64, 96), bn(96)
    p["p4_1"], p["bn4_1"] = conv(1, 1, cin, 64), bn(64)
    p["p4_2"], p["bn4_2"] = conv(3, 3, 64, 96), bn(96)
    p["p4_3"], p["bn4_3"] = conv(3, 3, 96, 96), bn(96)
    return p


# ----------------------------------------------------------------------------
# Pure-JAX reference (unfolded BN) for correctness cross-check
# ----------------------------------------------------------------------------
def inception_a_ref(x_nchw, params):
    x = jnp.transpose(x_nchw, (0, 2, 3, 1))

    def conv(inp, name, pad):
        w, b = params[name]
        y = lax.conv_general_dilated(
            inp, w, (1, 1), [(pad, pad), (pad, pad)],
            dimension_numbers=("NHWC", "HWIO", "NHWC"))
        return y + b

    def bn_relu(y, bn_name):
        gamma, beta, mean, var = params[bn_name]
        y = (y - mean) / jnp.sqrt(var + BN_EPS) * gamma + beta
        return jnp.maximum(y, 0.0)

    pool = lax.reduce_window(x, 0.0, lax.add, (1, 3, 3, 1), (1, 1, 1, 1),
                             [(0, 0), (1, 1), (1, 1), (0, 0)]) / 9.0
    x1 = bn_relu(conv(pool, "p1_2", 0), "bn1_2")
    x2 = bn_relu(conv(x, "p2", 0), "bn2")
    x3 = bn_relu(conv(bn_relu(conv(x, "p3_1", 0), "bn3_1"), "p3_2", 1),
                 "bn3_2")
    x4 = bn_relu(conv(x, "p4_1", 0), "bn4_1")
    x4 = bn_relu(conv(x4, "p4_2", 1), "bn4_2")
    x4 = bn_relu(conv(x4, "p4_3", 1), "bn4_3")
    out = jnp.concatenate([x1, x2, x3, x4], axis=-1)
    return jnp.transpose(out, (0, 3, 1, 2))


if __name__ == "__main__":
    key = jax.random.PRNGKey(0)
    k_x, k_p = jax.random.split(key)

    N, Cin, H, W = 2, 4, 16, 16
    x = jax.random.normal(k_x, (N, Cin, H, W), jnp.float32)
    params = init_params(k_p, Cin)

    out = jax.block_until_ready(inception_a_pallas(x, params))
    assert out.shape == (N, 96 * 4, H, W), out.shape

    ref = jax.block_until_ready(inception_a_ref(x, params))
    max_err = float(jnp.max(jnp.abs(out - ref)))
    assert jnp.allclose(out, ref, atol=2e-3, rtol=2e-3), max_err

    print("KERNEL_OK")
</pallas_src>

<mosaic_0001>
module attributes {stable_mosaic.version = 11 : i64} {
  func.func @_inception_a_kernel(%arg0: i32, %arg1: memref<1x16x16x4xf32, #tpu.memory_space<vmem>>, %arg2: memref<36x320xf32, #tpu.memory_space<vmem>>, %arg3: memref<1152x192xf32, #tpu.memory_space<vmem>>, %arg4: memref<1152x96xf32, #tpu.memory_space<vmem>>, %arg5: memref<1x736xf32, #tpu.memory_space<vmem>>, %arg6: memref<1x16x16x384xf32, #tpu.memory_space<vmem>>, %arg7: memref<1x18x32x4xf32, #tpu.memory_space<vmem>>, %arg8: memref<1x18x32x128xf32, #tpu.memory_space<vmem>>, %arg9: memref<1x18x32x128xf32, #tpu.memory_space<vmem>>) attributes {dimension_semantics = [#tpu.dimension_semantics<parallel>], iteration_bounds = array<i64: 2>, scalar_prefetch = 0 : i64, scratch_operands = 3 : i64, tpu.core_type = #tpu.core_type<tc>, window_params = [{transform_indices = @transform_0, window_bounds = array<i64: 1, 16, 16, 4>}, {pipeline_mode = #tpu.pipeline_mode<synchronous>, transform_indices = @transform_1, window_bounds = array<i64: 36, 320>}, {pipeline_mode = #tpu.pipeline_mode<synchronous>, transform_indices = @transform_2, window_bounds = array<i64: 1152, 192>}, {pipeline_mode = #tpu.pipeline_mode<synchronous>, transform_indices = @transform_3, window_bounds = array<i64: 1152, 96>}, {pipeline_mode = #tpu.pipeline_mode<synchronous>, transform_indices = @transform_4, window_bounds = array<i64: 1, 736>}, {transform_indices = @transform_5, window_bounds = array<i64: 1, 16, 16, 384>}]} {
    %cst = arith.constant 0.000000e+00 : f32
    %0 = vector.broadcast %cst : f32 to vector<1x1x32x4xf32>
    %cst_0 = arith.constant 0.000000e+00 : f32
    %1 = vector.broadcast %cst_0 : f32 to vector<1x18x1x4xf32>
    %c0 = arith.constant 0 : index
    %c0_1 = arith.constant 0 : index
    %c0_2 = arith.constant 0 : index
    %c0_3 = arith.constant 0 : index
    %2 = vector.load %arg7[%c0, %c0_1, %c0_2, %c0_3] : memref<1x18x32x4xf32, #tpu.memory_space<vmem>>, vector<1x1x32x4xf32>
    tpu.vector_store %arg7[%c0, %c0_1, %c0_2, %c0_3], %0 {strides = array<i32>} : memref<1x18x32x4xf32, #tpu.memory_space<vmem>>, vector<1x1x32x4xf32>,
    %c0_4 = arith.constant 0 : index
    %c17 = arith.constant 17 : index
    %c0_5 = arith.constant 0 : index
    %c0_6 = arith.constant 0 : index
    %3 = vector.load %arg7[%c0_4, %c17, %c0_5, %c0_6] : memref<1x18x32x4xf32, #tpu.memory_space<vmem>>, vector<1x1x32x4xf32>
    tpu.vector_store %arg7[%c0_4, %c17, %c0_5, %c0_6], %0 {strides = array<i32>} : memref<1x18x32x4xf32, #tpu.memory_space<vmem>>, vector<1x1x32x4xf32>,
    %c0_7 = arith.constant 0 : index
    %c0_8 = arith.constant 0 : index
    %c7 = arith.constant 7 : index
    %c0_9 = arith.constant 0 : index
    %4 = vector.load %arg7[%c0_7, %c0_8, %c7, %c0_9] : memref<1x18x32x4xf32, #tpu.memory_space<vmem>>, vector<1x18x1x4xf32>
    tpu.vector_store %arg7[%c0_7, %c0_8, %c7, %c0_9], %1 {strides = array<i32>} : memref<1x18x32x4xf32, #tpu.memory_space<vmem>>, vector<1x18x1x4xf32>,
    %c0_10 = arith.constant 0 : index
    %c0_11 = arith.constant 0 : index
    %c24 = arith.constant 24 : index
    %c0_12 = arith.constant 0 : index
    %5 = vector.load %arg7[%c0_10, %c0_11, %c24, %c0_12] : memref<1x18x32x4xf32, #tpu.memory_space<vmem>>, vector<1x18x1x4xf32>
    tpu.vector_store %arg7[%c0_10, %c0_11, %c24, %c0_12], %1 {strides = array<i32>} : memref<1x18x32x4xf32, #tpu.memory_space<vmem>>, vector<1x18x1x4xf32>,
    %c0_13 = arith.constant 0 : index
    %c0_14 = arith.constant 0 : index
    %c0_15 = arith.constant 0 : index
    %c0_16 = arith.constant 0 : index
    %6 = vector.load %arg1[%c0_13, %c0_14, %c0_15, %c0_16] : memref<1x16x16x4xf32, #tpu.memory_space<vmem>>, vector<1x16x16x4xf32>
    %c0_17 = arith.constant 0 : index
    %c1 = arith.constant 1 : index
    %c8 = arith.constant 8 : index
    %c0_18 = arith.constant 0 : index
    %7 = vector.load %arg7[%c0_17, %c1, %c8, %c0_18] : memref<1x18x32x4xf32, #tpu.memory_space<vmem>>, vector<1x16x16x4xf32>
    tpu.vector_store %arg7[%c0_17, %c1, %c8, %c0_18], %6 {strides = array<i32>} : memref<1x18x32x4xf32, #tpu.memory_space<vmem>>, vector<1x16x16x4xf32>,
    %c0_19 = arith.constant 0 : index
    %c0_20 = arith.constant 0 : index
    %c7_21 = arith.constant 7 : index
    %c0_22 = arith.constant 0 : index
    %8 = vector.load %arg7[%c0_19, %c0_20, %c7_21, %c0_22] : memref<1x18x32x4xf32, #tpu.memory_space<vmem>>, vector<1x18x16x4xf32>
    %c0_23 = arith.constant 0 : index
    %c0_24 = arith.constant 0 : index
    %c8_25 = arith.constant 8 : index
    %c0_26 = arith.constant 0 : index
    %9 = vector.load %arg7[%c0_23, %c0_24, %c8_25, %c0_26] : memref<1x18x32x4xf32, #tpu.memory_space<vmem>>, vector<1x18x16x4xf32>
    %c0_27 = arith.constant 0 : index
    %c0_28 = arith.constant 0 : index
    %c9 = arith.constant 9 : index
    %c0_29 = arith.constant 0 : index
    %10 = vector.load %arg7[%c0_27, %c0_28, %c9, %c0_29] : memref<1x18x32x4xf32, #tpu.memory_space<vmem>>, vector<1x18x16x4xf32>
    %11 = vector.extract_strided_slice %8 {offsets = [0, 0, 0, 0], sizes = [1, 16, 16, 4], strides = [1, 1, 1, 1]} : vector<1x18x16x4xf32> to vector<1x16x16x4xf32>
    %12 = vector.shape_cast %11 : vector<1x16x16x4xf32> to vector<256x4xf32>
    %13 = vector.extract_strided_slice %9 {offsets = [0, 0, 0, 0], sizes = [1, 16, 16, 4], strides = [1, 1, 1, 1]} : vector<1x18x16x4xf32> to vector<1x16x16x4xf32>
    %14 = vector.shape_cast %13 : vector<1x16x16x4xf32> to vector<256x4xf32>
    %15 = vector.extract_strided_slice %10 {offsets = [0, 0, 0, 0], sizes = [1, 16, 16, 4], strides = [1, 1, 1, 1]} : vector<1x18x16x4xf32> to vector<1x16x16x4xf32>
    %16 = vector.shape_cast %15 : vector<1x16x16x4xf32> to vector<256x4xf32>
    %17 = vector.extract_strided_slice %8 {offsets = [0, 1, 0, 0], sizes = [1, 16, 16, 4], strides = [1, 1, 1, 1]} : vector<1x18x16x4xf32> to vector<1x16x16x4xf32>
    %18 = vector.shape_cast %17 : vector<1x16x16x4xf32> to vector<256x4xf32>
    %19 = vector.extract_strided_slice %9 {offsets = [0, 1, 0, 0], sizes = [1, 16, 16, 4], strides = [1, 1, 1, 1]} : vector<1x18x16x4xf32> to vector<1x16x16x4xf32>
    %20 = vector.shape_cast %19 : vector<1x16x16x4xf32> to vector<256x4xf32>
    %21 = vector.extract_strided_slice %10 {offsets = [0, 1, 0, 0], sizes = [1, 16, 16, 4], strides = [1, 1, 1, 1]} : vector<1x18x16x4xf32> to vector<1x16x16x4xf32>
    %22 = vector.shape_cast %21 : vector<1x16x16x4xf32> to vector<256x4xf32>
    %23 = vector.extract_strided_slice %8 {offsets = [0, 2, 0, 0], sizes = [1, 16, 16, 4], strides = [1, 1, 1, 1]} : vector<1x18x16x4xf32> to vector<1x16x16x4xf32>
    %24 = vector.shape_cast %23 : vector<1x16x16x4xf32> to vector<256x4xf32>
    %25 = vector.extract_strided_slice %9 {offsets = [0, 2, 0, 0], sizes = [1, 16, 16, 4], strides = [1, 1, 1, 1]} : vector<1x18x16x4xf32> to vector<1x16x16x4xf32>
    %26 = vector.shape_cast %25 : vector<1x16x16x4xf32> to vector<256x4xf32>
    %27 = vector.extract_strided_slice %10 {offsets = [0, 2, 0, 0], sizes = [1, 16, 16, 4], strides = [1, 1, 1, 1]} : vector<1x18x16x4xf32> to vector<1x16x16x4xf32>
    %28 = vector.shape_cast %27 : vector<1x16x16x4xf32> to vector<256x4xf32>
    %29 = tpu.concatenate %12, %14, %16, %18, %20, %22, %24, %26, %28 in 1 : vector<256x4xf32>, vector<256x4xf32>, vector<256x4xf32>, vector<256x4xf32>, vector<256x4xf32>, vector<256x4xf32>, vector<256x4xf32>, vector<256x4xf32>, vector<256x4xf32> -> vector<256x36xf32>
    %c0_30 = arith.constant 0 : index
    %c0_31 = arith.constant 0 : index
    %30 = vector.load %arg2[%c0_30, %c0_31] : memref<36x320xf32, #tpu.memory_space<vmem>>, vector<36x320xf32>
    %cst_32 = arith.constant dense<0.000000e+00> : vector<256x320xf32>
    %31 = tpu.matmul %29, %30, %cst_32 {dimension_numbers = #tpu.dot_dimension_numbers<[1], [0], [0], [1], [0, 0, 1, 1], [], []>} : vector<256x36xf32>, vector<36x320xf32>, vector<256x320xf32> -> vector<256x320xf32>
    %c0_33 = arith.constant 0 : index
    %c0_34 = arith.constant 0 : index
    %32 = vector.load %arg5[%c0_33, %c0_34] : memref<1x736xf32, #tpu.memory_space<vmem>>, vector<1x320xf32>
    %33 = vector.broadcast %32 : vector<1x320xf32> to vector<256x320xf32>
    %34 = arith.addf %31, %33 : vector<256x320xf32>
    %cst_35 = arith.constant 0.000000e+00 : f32
    %35 = vector.broadcast %cst_35 : f32 to vector<256x320xf32>
    %36 = arith.maximumf %34, %35 : vector<256x320xf32>
    %37 = vector.extract_strided_slice %36 {offsets = [0, 0], sizes = [256, 192], strides = [1, 1]} : vector<256x320xf32> to vector<256x192xf32>
    %38 = vector.shape_cast %37 : vector<256x192xf32> to vector<1x16x16x192xf32>
    %c0_36 = arith.constant 0 : index
    %c0_37 = arith.constant 0 : index
    %c0_38 = arith.constant 0 : index
    %c0_39 = arith.constant 0 : index
    %39 = vector.load %arg6[%c0_36, %c0_37, %c0_38, %c0_39] : memref<1x16x16x384xf32, #tpu.memory_space<vmem>>, vector<1x16x16x192xf32>
    tpu.vector_store %arg6[%c0_36, %c0_37, %c0_38, %c0_39], %38 {strides = array<i32>} : memref<1x16x16x384xf32, #tpu.memory_space<vmem>>, vector<1x16x16x192xf32>,
    %cst_40 = arith.constant 0.000000e+00 : f32
    %40 = vector.broadcast %cst_40 : f32 to vector<1x1x32x128xf32>
    %cst_41 = arith.constant 0.000000e+00 : f32
    %41 = vector.broadcast %cst_41 : f32 to vector<1x18x1x128xf32>
    %c0_42 = arith.constant 0 : index
    %c0_43 = arith.constant 0 : index
    %c0_44 = arith.constant 0 : index
    %c0_45 = arith.constant 0 : index
    %42 = vector.load %arg8[%c0_42, %c0_43, %c0_44, %c0_45] : memref<1x18x32x128xf32, #tpu.memory_space<vmem>>, vector<1x1x32x128xf32>
    tpu.vector_store %arg8[%c0_42, %c0_43, %c0_44, %c0_45], %40 {strides = array<i32>} : memref<1x18x32x128xf32, #tpu.memory_space<vmem>>, vector<1x1x32x128xf32>,
    %c0_46 = arith.constant 0 : index
    %c17_47 = arith.constant 17 : index
    %c0_48 = arith.constant 0 : index
    %c0_49 = arith.constant 0 : index
    %43 = vector.load %arg8[%c0_46, %c17_47, %c0_48, %c0_49] : memref<1x18x32x128xf32, #tpu.memory_space<vmem>>, vector<1x1x32x128xf32>
    tpu.vector_store %arg8[%c0_46, %c17_47, %c0_48, %c0_49], %40 {strides = array<i32>} : memref<1x18x32x128xf32, #tpu.memory_space<vmem>>, vector<1x1x32x128xf32>,
    %c0_50 = arith.constant 0 : index
    %c0_51 = arith.constant 0 : index
    %c7_52 = arith.constant 7 : index
    %c0_53 = arith.constant 0 : index
    %44 = vector.load %arg8[%c0_50, %c0_51, %c7_52, %c0_53] : memref<1x18x32x128xf32, #tpu.memory_space<vmem>>, vector<1x18x1x128xf32>
    tpu.vector_store %arg8[%c0_50, %c0_51, %c7_52, %c0_53], %41 {strides = array<i32>} : memref<1x18x32x128xf32, #tpu.memory_space<vmem>>, vector<1x18x1x128xf32>,
    %c0_54 = arith.constant 0 : index
    %c0_55 = arith.constant 0 : index
    %c24_56 = arith.constant 24 : index
    %c0_57 = arith.constant 0 : index
    %45 = vector.load %arg8[%c0_54, %c0_55, %c24_56, %c0_57] : memref<1x18x32x128xf32, #tpu.memory_space<vmem>>, vector<1x18x1x128xf32>
    tpu.vector_store %arg8[%c0_54, %c0_55, %c24_56, %c0_57], %41 {strides = array<i32>} : memref<1x18x32x128xf32, #tpu.memory_space<vmem>>, vector<1x18x1x128xf32>,
    %46 = vector.extract_strided_slice %36 {offsets = [0, 192], sizes = [256, 128], strides = [1, 1]} : vector<256x320xf32> to vector<256x128xf32>
    %47 = vector.shape_cast %46 : vector<256x128xf32> to vector<1x16x16x128xf32>
    %c0_58 = arith.constant 0 : index
    %c1_59 = arith.constant 1 : index
    %c8_60 = arith.constant 8 : index
    %c0_61 = arith.constant 0 : index
    %48 = vector.load %arg8[%c0_58, %c1_59, %c8_60, %c0_61] : memref<1x18x32x128xf32, #tpu.memory_space<vmem>>, vector<1x16x16x128xf32>
    tpu.vector_store %arg8[%c0_58, %c1_59, %c8_60, %c0_61], %47 {strides = array<i32>} : memref<1x18x32x128xf32, #tpu.memory_space<vmem>>, vector<1x16x16x128xf32>,
    %c0_62 = arith.constant 0 : index
    %c0_63 = arith.constant 0 : index
    %c7_64 = arith.constant 7 : index
    %c0_65 = arith.constant 0 : index
    %49 = vector.load %arg8[%c0_62, %c0_63, %c7_64, %c0_65] : memref<1x18x32x128xf32, #tpu.memory_space<vmem>>, vector<1x18x16x128xf32>
    %c0_66 = arith.constant 0 : index
    %c0_67 = arith.constant 0 : index
    %c8_68 = arith.constant 8 : index
    %c0_69 = arith.constant 0 : index
    %50 = vector.load %arg8[%c0_66, %c0_67, %c8_68, %c0_69] : memref<1x18x32x128xf32, #tpu.memory_space<vmem>>, vector<1x18x16x128xf32>
    %c0_70 = arith.constant 0 : index
    %c0_71 = arith.constant 0 : index
    %c9_72 = arith.constant 9 : index
    %c0_73 = arith.constant 0 : index
    %51 = vector.load %arg8[%c0_70, %c0_71, %c9_72, %c0_73] : memref<1x18x32x128xf32, #tpu.memory_space<vmem>>, vector<1x18x16x128xf32>
    %52 = vector.extract_strided_slice %49 {offsets = [0, 0, 0, 0], sizes = [1, 16, 16, 128], strides = [1, 1, 1, 1]} : vector<1x18x16x128xf32> to vector<1x16x16x128xf32>
    %53 = vector.shape_cast %52 : vector<1x16x16x128xf32> to vector<256x128xf32>
    %54 = vector.extract_strided_slice %50 {offsets = [0, 0, 0, 0], sizes = [1, 16, 16, 128], strides = [1, 1, 1, 1]} : vector<1x18x16x128xf32> to vector<1x16x16x128xf32>
    %55 = vector.shape_cast %54 : vector<1x16x16x128xf32> to vector<256x128xf32>
    %56 = vector.extract_strided_slice %51 {offsets = [0, 0, 0, 0], sizes = [1, 16, 16, 128], strides = [1, 1, 1, 1]} : vector<1x18x16x128xf32> to vector<1x16x16x128xf32>
    %57 = vector.shape_cast %56 : vector<1x16x16x128xf32> to vector<256x128xf32>
    %58 = vector.extract_strided_slice %49 {offsets = [0, 1, 0, 0], sizes = [1, 16, 16, 128], strides = [1, 1, 1, 1]} : vector<1x18x16x128xf32> to vector<1x16x16x128xf32>
    %59 = vector.shape_cast %58 : vector<1x16x16x128xf32> to vector<256x128xf32>
    %60 = vector.extract_strided_slice %50 {offsets = [0, 1, 0, 0], sizes = [1, 16, 16, 128], strides = [1, 1, 1, 1]} : vector<1x18x16x128xf32> to vector<1x16x16x128xf32>
    %61 = vector.shape_cast %60 : vector<1x16x16x128xf32> to vector<256x128xf32>
    %62 = vector.extract_strided_slice %51 {offsets = [0, 1, 0, 0], sizes = [1, 16, 16, 128], strides = [1, 1, 1, 1]} : vector<1x18x16x128xf32> to vector<1x16x16x128xf32>
    %63 = vector.shape_cast %62 : vector<1x16x16x128xf32> to vector<256x128xf32>
    %64 = vector.extract_strided_slice %49 {offsets = [0, 2, 0, 0], sizes = [1, 16, 16, 128], strides = [1, 1, 1, 1]} : vector<1x18x16x128xf32> to vector<1x16x16x128xf32>
    %65 = vector.shape_cast %64 : vector<1x16x16x128xf32> to vector<256x128xf32>
    %66 = vector.extract_strided_slice %50 {offsets = [0, 2, 0, 0], sizes = [1, 16, 16, 128], strides = [1, 1, 1, 1]} : vector<1x18x16x128xf32> to vector<1x16x16x128xf32>
    %67 = vector.shape_cast %66 : vector<1x16x16x128xf32> to vector<256x128xf32>
    %68 = vector.extract_strided_slice %51 {offsets = [0, 2, 0, 0], sizes = [1, 16, 16, 128], strides = [1, 1, 1, 1]} : vector<1x18x16x128xf32> to vector<1x16x16x128xf32>
    %69 = vector.shape_cast %68 : vector<1x16x16x128xf32> to vector<256x128xf32>
    %70 = tpu.concatenate %53, %55, %57, %59, %61, %63, %65, %67, %69 in 1 : vector<256x128xf32>, vector<256x128xf32>, vector<256x128xf32>, vector<256x128xf32>, vector<256x128xf32>, vector<256x128xf32>, vector<256x128xf32>, vector<256x128xf32>, vector<256x128xf32> -> vector<256x1152xf32>
    %c0_74 = arith.constant 0 : index
    %c0_75 = arith.constant 0 : index
    %71 = vector.load %arg3[%c0_74, %c0_75] : memref<1152x192xf32, #tpu.memory_space<vmem>>, vector<1152x192xf32>
    %cst_76 = arith.constant dense<0.000000e+00> : vector<256x192xf32>
    %72 = tpu.matmul %70, %71, %cst_76 {dimension_numbers = #tpu.dot_dimension_numbers<[1], [0], [0], [1], [0, 0, 1, 1], [], []>} : vector<256x1152xf32>, vector<1152x192xf32>, vector<256x192xf32> -> vector<256x192xf32>
    %c0_77 = arith.constant 0 : index
    %c384 = arith.constant 384 : index
    %73 = vector.load %arg5[%c0_77, %c384] : memref<1x736xf32, #tpu.memory_space<vmem>>, vector<1x192xf32>
    %74 = vector.broadcast %73 : vector<1x192xf32> to vector<256x192xf32>
    %75 = arith.addf %72, %74 : vector<256x192xf32>
    %cst_78 = arith.constant 0.000000e+00 : f32
    %76 = vector.broadcast %cst_78 : f32 to vector<256x192xf32>
    %77 = arith.maximumf %75, %76 : vector<256x192xf32>
    %78 = vector.extract_strided_slice %77 {offsets = [0, 0], sizes = [256, 96], strides = [1, 1]} : vector<256x192xf32> to vector<256x96xf32>
    %79 = vector.shape_cast %78 : vector<256x96xf32> to vector<1x16x16x96xf32>
    %c0_79 = arith.constant 0 : index
    %c0_80 = arith.constant 0 : index
    %c0_81 = arith.constant 0 : index
    %c192 = arith.constant 192 : index
    %80 = vector.load %arg6[%c0_79, %c0_80, %c0_81, %c192] : memref<1x16x16x384xf32, #tpu.memory_space<vmem>>, vector<1x16x16x96xf32>
    tpu.vector_store %arg6[%c0_79, %c0_80, %c0_81, %c192], %79 {strides = array<i32>} : memref<1x16x16x384xf32, #tpu.memory_space<vmem>>, vector<1x16x16x96xf32>,
    %cst_82 = arith.constant 0.000000e+00 : f32
    %81 = vector.broadcast %cst_82 : f32 to vector<1x1x32x128xf32>
    %cst_83 = arith.constant 0.000000e+00 : f32
    %82 = vector.broadcast %cst_83 : f32 to vector<1x18x1x128xf32>
    %c0_84 = arith.constant 0 : index
    %c0_85 = arith.constant 0 : index
    %c0_86 = arith.constant 0 : index
    %c0_87 = arith.constant 0 : index
    %83 = vector.load %arg9[%c0_84, %c0_85, %c0_86, %c0_87] : memref<1x18x32x128xf32, #tpu.memory_space<vmem>>, vector<1x1x32x128xf32>
    tpu.vector_store %arg9[%c0_84, %c0_85, %c0_86, %c0_87], %81 {strides = array<i32>} : memref<1x18x32x128xf32, #tpu.memory_space<vmem>>, vector<1x1x32x128xf32>,
    %c0_88 = arith.constant 0 : index
    %c17_89 = arith.constant 17 : index
    %c0_90 = arith.constant 0 : index
    %c0_91 = arith.constant 0 : index
    %84 = vector.load %arg9[%c0_88, %c17_89, %c0_90, %c0_91] : memref<1x18x32x128xf32, #tpu.memory_space<vmem>>, vector<1x1x32x128xf32>
    tpu.vector_store %arg9[%c0_88, %c17_89, %c0_90, %c0_91], %81 {strides = array<i32>} : memref<1x18x32x128xf32, #tpu.memory_space<vmem>>, vector<1x1x32x128xf32>,
    %c0_92 = arith.constant 0 : index
    %c0_93 = arith.constant 0 : index
    %c7_94 = arith.constant 7 : index
    %c0_95 = arith.constant 0 : index
    %85 = vector.load %arg9[%c0_92, %c0_93, %c7_94, %c0_95] : memref<1x18x32x128xf32, #tpu.memory_space<vmem>>, vector<1x18x1x128xf32>
    tpu.vector_store %arg9[%c0_92, %c0_93, %c7_94, %c0_95], %82 {strides = array<i32>} : memref<1x18x32x128xf32, #tpu.memory_space<vmem>>, vector<1x18x1x128xf32>,
    %c0_96 = arith.constant 0 : index
    %c0_97 = arith.constant 0 : index
    %c24_98 = arith.constant 24 : index
    %c0_99 = arith.constant 0 : index
    %86 = vector.load %arg9[%c0_96, %c0_97, %c24_98, %c0_99] : memref<1x18x32x128xf32, #tpu.memory_space<vmem>>, vector<1x18x1x128xf32>
    tpu.vector_store %arg9[%c0_96, %c0_97, %c24_98, %c0_99], %82 {strides = array<i32>} : memref<1x18x32x128xf32, #tpu.memory_space<vmem>>, vector<1x18x1x128xf32>,
    %87 = vector.extract_strided_slice %77 {offsets = [0, 96], sizes = [256, 96], strides = [1, 1]} : vector<256x192xf32> to vector<256x96xf32>
    %88 = vector.shape_cast %87 : vector<256x96xf32> to vector<1x16x16x96xf32>
    %c0_100 = arith.constant 0 : index
    %c1_101 = arith.constant 1 : index
    %c8_102 = arith.constant 8 : index
    %c0_103 = arith.constant 0 : index
    %89 = vector.load %arg9[%c0_100, %c1_101, %c8_102, %c0_103] : memref<1x18x32x128xf32, #tpu.memory_space<vmem>>, vector<1x16x16x96xf32>
    tpu.vector_store %arg9[%c0_100, %c1_101, %c8_102, %c0_103], %88 {strides = array<i32>} : memref<1x18x32x128xf32, #tpu.memory_space<vmem>>, vector<1x16x16x96xf32>,
    %cst_104 = arith.constant 0.000000e+00 : f32
    %90 = vector.broadcast %cst_104 : f32 to vector<1x16x16x32xf32>
    %c0_105 = arith.constant 0 : index
    %c1_106 = arith.constant 1 : index
    %c8_107 = arith.constant 8 : index
    %c96 = arith.constant 96 : index
    %91 = vector.load %arg9[%c0_105, %c1_106, %c8_107, %c96] : memref<1x18x32x128xf32, #tpu.memory_space<vmem>>, vector<1x16x16x32xf32>
    tpu.vector_store %arg9[%c0_105, %c1_106, %c8_107, %c96], %90 {strides = array<i32>} : memref<1x18x32x128xf32, #tpu.memory_space<vmem>>, vector<1x16x16x32xf32>,
    %c0_108 = arith.constant 0 : index
    %c0_109 = arith.constant 0 : index
    %c7_110 = arith.constant 7 : index
    %c0_111 = arith.constant 0 : index
    %92 = vector.load %arg9[%c0_108, %c0_109, %c7_110, %c0_111] : memref<1x18x32x128xf32, #tpu.memory_space<vmem>>, vector<1x18x16x128xf32>
    %c0_112 = arith.constant 0 : index
    %c0_113 = arith.constant 0 : index
    %c8_114 = arith.constant 8 : index
    %c0_115 = arith.constant 0 : index
    %93 = vector.load %arg9[%c0_112, %c0_113, %c8_114, %c0_115] : memref<1x18x32x128xf32, #tpu.memory_space<vmem>>, vector<1x18x16x128xf32>
    %c0_116 = arith.constant 0 : index
    %c0_117 = arith.constant 0 : index
    %c9_118 = arith.constant 9 : index
    %c0_119 = arith.constant 0 : index
    %94 = vector.load %arg9[%c0_116, %c0_117, %c9_118, %c0_119] : memref<1x18x32x128xf32, #tpu.memory_space<vmem>>, vector<1x18x16x128xf32>
    %95 = vector.extract_strided_slice %92 {offsets = [0, 0, 0, 0], sizes = [1, 16, 16, 128], strides = [1, 1, 1, 1]} : vector<1x18x16x128xf32> to vector<1x16x16x128xf32>
    %96 = vector.shape_cast %95 : vector<1x16x16x128xf32> to vector<256x128xf32>
    %97 = vector.extract_strided_slice %93 {offsets = [0, 0, 0, 0], sizes = [1, 16, 16, 128], strides = [1, 1, 1, 1]} : vector<1x18x16x128xf32> to vector<1x16x16x128xf32>
    %98 = vector.shape_cast %97 : vector<1x16x16x128xf32> to vector<256x128xf32>
    %99 = vector.extract_strided_slice %94 {offsets = [0, 0, 0, 0], sizes = [1, 16, 16, 128], strides = [1, 1, 1, 1]} : vector<1x18x16x128xf32> to vector<1x16x16x128xf32>
    %100 = vector.shape_cast %99 : vector<1x16x16x128xf32> to vector<256x128xf32>
    %101 = vector.extract_strided_slice %92 {offsets = [0, 1, 0, 0], sizes = [1, 16, 16, 128], strides = [1, 1, 1, 1]} : vector<1x18x16x128xf32> to vector<1x16x16x128xf32>
    %102 = vector.shape_cast %101 : vector<1x16x16x128xf32> to vector<256x128xf32>
    %103 = vector.extract_strided_slice %93 {offsets = [0, 1, 0, 0], sizes = [1, 16, 16, 128], strides = [1, 1, 1, 1]} : vector<1x18x16x128xf32> to vector<1x16x16x128xf32>
    %104 = vector.shape_cast %103 : vector<1x16x16x128xf32> to vector<256x128xf32>
    %105 = vector.extract_strided_slice %94 {offsets = [0, 1, 0, 0], sizes = [1, 16, 16, 128], strides = [1, 1, 1, 1]} : vector<1x18x16x128xf32> to vector<1x16x16x128xf32>
    %106 = vector.shape_cast %105 : vector<1x16x16x128xf32> to vector<256x128xf32>
    %107 = vector.extract_strided_slice %92 {offsets = [0, 2, 0, 0], sizes = [1, 16, 16, 128], strides = [1, 1, 1, 1]} : vector<1x18x16x128xf32> to vector<1x16x16x128xf32>
    %108 = vector.shape_cast %107 : vector<1x16x16x128xf32> to vector<256x128xf32>
    %109 = vector.extract_strided_slice %93 {offsets = [0, 2, 0, 0], sizes = [1, 16, 16, 128], strides = [1, 1, 1, 1]} : vector<1x18x16x128xf32> to vector<1x16x16x128xf32>
    %110 = vector.shape_cast %109 : vector<1x16x16x128xf32> to vector<256x128xf32>
    %111 = vector.extract_strided_slice %94 {offsets = [0, 2, 0, 0], sizes = [1, 16, 16, 128], strides = [1, 1, 1, 1]} : vector<1x18x16x128xf32> to vector<1x16x16x128xf32>
    %112 = vector.shape_cast %111 : vector<1x16x16x128xf32> to vector<256x128xf32>
    %113 = tpu.concatenate %96, %98, %100, %102, %104, %106, %108, %110, %112 in 1 : vector<256x128xf32>, vector<256x128xf32>, vector<256x128xf32>, vector<256x128xf32>, vector<256x128xf32>, vector<256x128xf32>, vector<256x128xf32>, vector<256x128xf32>, vector<256x128xf32> -> vector<256x1152xf32>
    %c0_120 = arith.constant 0 : index
    %c0_121 = arith.constant 0 : index
    %114 = vector.load %arg4[%c0_120, %c0_121] : memref<1152x96xf32, #tpu.memory_space<vmem>>, vector<1152x96xf32>
    %cst_122 = arith.constant dense<0.000000e+00> : vector<256x96xf32>
    %115 = tpu.matmul %113, %114, %cst_122 {dimension_numbers = #tpu.dot_dimension_numbers<[1], [0], [0], [1], [0, 0, 1, 1], [], []>} : vector<256x1152xf32>, vector<1152x96xf32>, vector<256x96xf32> -> vector<256x96xf32>
    %c0_123 = arith.constant 0 : index
    %c640 = arith.constant 640 : index
    %116 = vector.load %arg5[%c0_123, %c640] : memref<1x736xf32, #tpu.memory_space<vmem>>, vector<1x96xf32>
    %117 = vector.broadcast %116 : vector<1x96xf32> to vector<256x96xf32>
    %118 = arith.addf %115, %117 : vector<256x96xf32>
    %cst_124 = arith.constant 0.000000e+00 : f32
    %119 = vector.broadcast %cst_124 : f32 to vector<256x96xf32>
    %120 = arith.maximumf %118, %119 : vector<256x96xf32>
    %121 = vector.shape_cast %120 : vector<256x96xf32> to vector<1x16x16x96xf32>
    %c0_125 = arith.constant 0 : index
    %c0_126 = arith.constant 0 : index
    %c0_127 = arith.constant 0 : index
    %c288 = arith.constant 288 : index
    %122 = vector.load %arg6[%c0_125, %c0_126, %c0_127, %c288] : memref<1x16x16x384xf32, #tpu.memory_space<vmem>>, vector<1x16x16x96xf32>
    tpu.vector_store %arg6[%c0_125, %c0_126, %c0_127, %c288], %121 {strides = array<i32>} : memref<1x16x16x384xf32, #tpu.memory_space<vmem>>, vector<1x16x16x96xf32>,
    return
  }
  func.func @transform_0(%arg0: i32) -> (i32, i32, i32, i32) {
    %c0_i32 = arith.constant 0 : i32
    %c0_i32_0 = arith.constant 0 : i32
    %c0_i32_1 = arith.constant 0 : i32
    %c0_i32_2 = arith.constant 0 : i32
    return %arg0, %c0_i32, %c0_i32_0, %c0_i32_1 : i32, i32, i32, i32
  }
  func.func @transform_1(%arg0: i32) -> (i32, i32) {
    %c0_i32 = arith.constant 0 : i32
    %c0_i32_0 = arith.constant 0 : i32
    %c0_i32_1 = arith.constant 0 : i32
    return %c0_i32, %c0_i32_0 : i32, i32
  }
  func.func @transform_2(%arg0: i32) -> (i32, i32) {
    %c0_i32 = arith.constant 0 : i32
    %c0_i32_0 = arith.constant 0 : i32
    %c0_i32_1 = arith.constant 0 : i32
    return %c0_i32, %c0_i32_0 : i32, i32
  }
  func.func @transform_3(%arg0: i32) -> (i32, i32) {
    %c0_i32 = arith.constant 0 : i32
    %c0_i32_0 = arith.constant 0 : i32
    %c0_i32_1 = arith.constant 0 : i32
    return %c0_i32, %c0_i32_0 : i32, i32
  }
  func.func @transform_4(%arg0: i32) -> (i32, i32) {
    %c0_i32 = arith.constant 0 : i32
    %c0_i32_0 = arith.constant 0 : i32
    %c0_i32_1 = arith.constant 0 : i32
    return %c0_i32, %c0_i32_0 : i32, i32
  }
  func.func @transform_5(%arg0: i32) -> (i32, i32, i32, i32) {
    %c0_i32 = arith.constant 0 : i32
    %c0_i32_0 = arith.constant 0 : i32
    %c0_i32_1 = arith.constant 0 : i32
    %c0_i32_2 = arith.constant 0 : i32
    return %arg0, %c0_i32, %c0_i32_0, %c0_i32_1 : i32, i32, i32, i32
  }
}

</mosaic_0001>

<bundles_post_ra>
// kernel: tpu_custom_call.1
= control target key start
LH: loop header
LB: loop body
LE: loop exit
PB: predicated region body
PF: predicated region fallthrough
CT: control target
= control target key end

     0   :  { %10 = vsyncpa [#allocation6], 0  ;;  %s14020_s0 = inlined_call_operand.vmem [shape: f32[2,16,16,4], index: 0, kind: input, shape index: {}]   ;;  %s14021_s1 = inlined_call_operand.vmem [shape: f32[36,320], index: 1, kind: input, shape index: {}]   ;;  %s14022_s2 = inlined_call_operand.vmem [shape: f32[1152,192], index: 2, kind: input, shape index: {}]   ;;  %s14023_s3 = inlined_call_operand.vmem [shape: f32[1152,96], index: 3, kind: input, shape index: {}]   ;;  %s14024_s4 = inlined_call_operand.vmem [shape: f32[1,736], index: 4, kind: input, shape index: {}]   ;;  %s14025_s5 = inlined_call_operand.hbm [shape: f32[2,16,16,384], index: 5, kind: output, shape index: {}]  }
   0x1   :  { %12 = vsyncpa [#allocation6 + $0x1], 0  ;;  %s7734_s18 = smov 0   ;;  %s7736_s19 = smov 0  }
   0x2   :  { %s7738_s20 = smov 0   ;;  %s7740_s21 = smov 0  }
   0x3 LB: > { %s7755_s22 = sadd.s32 4294967295, %s7691_s21   ;;  %s7117_s23 = sadd.s32 4294967294, %s7691_s21   ;;  %s7691_s21 = sphi %s7740_s21, %s14718_s21   ;;  %s7687_s20 = sphi %s7738_s20, %s14717_s20   ;;  %s7683_s19 = sphi %s7736_s19, %s14716_s19   ;;  %s7679_s18 = sphi %s7734_s18, %s14715_s18  }
   0x4   : > { %s7759_s24 = sadd.s32 1, %s7691_s21   ;;  %s135_s25 = sadd.s32 1, %s7687_s20 }
   0x5   : > { %s132_s26 = ssub.s32 %s7691_s21, %s7759_s24  ;;  %p145_p0 = scmp.ne.s32.totalorder %s7687_s20, %s7683_s19 }
   0x6   : > { %p133_p1 = scmp.eq.s32.totalorder %s132_s26, 0  ;;  %p146_p2 = scmp.eq.s32.totalorder %s7755_s22, 1 }
   0x7   : > { %p151_p3 = scmp.ne.s32.totalorder %s7683_s19, %s7679_s18  ;;  %p152_p4 = scmp.eq.s32.totalorder %s7117_s23, 1 }
   0x8   : > { %s7770_s27 = scalar_select %p133_p1, %s7687_s20, %s135_s25  }
   0x9   : > { %p7772_p5 = por %p146_p2, %p145_p0  ;;  %p7776_p6 = por %p152_p4, %p151_p3 }
   0xa   : > { %p7120_p7 = scmp.ge.s32.totalorder %s7691_s21, 1  ;;  %p190_p8 = scmp.lt.s32.totalorder %s7691_s21, 3 }
   0xc   : > { %p191_p9 = pnand %p7120_p7, %p190_p8 }
   0xe   : > { %194 = sbr.rel (%p191_p9) target bundleno = 3366 (0xd26), region = 40 }
  0x13   : > { %p218_p10 = scmp.lt.s32.totalorder %s7755_s22, 1  ;;  %vm233_vm0 = vcmask 24576   ;;  %vm223_vm1 = vcmask 31744   ;;  %v7693_v0 = vmov 0.0   ;;  %s7694_s10 = smov 20   ;;  %vm1700_vm2 = vcmask 1043456  }
  0x14   : > { %261 = vst.msk [vmem:[#allocation2 + $0x138] sm:$0x1] %vm233_vm0, %v7693_v0  ;;  %s7695_s11 = smov 12   ;;  %s7696_s12 = smov 16   ;;  %v1592_v38 = vld [vmem:[%s14021_s1 + $0x60] sm:$0xf] }
  0x15   : > { %s219_s30 = scalar_select %p218_p10, %s7755_s22, 1  ;;  %224 = vst.msk [vmem:[#allocation2] sm:$0xff] %vm223_vm1, %v7693_v0  ;;  %7226 = vmatpush.msk.msra.mxu2 %vm1700_vm2, %v1592_v38  ;;  %7123 = vmatpush.msk.msra.mxu0 %vm1700_vm2, %v1592_v38  ;;  %v1589_v40 = vld [vmem:[%s14021_s1 + $0x48] sm:$0xff]  ;;  %v1586_v41 = vld [vmem:[%s14021_s1 + $0x30] sm:$0xff]  ;;  %v1583_v42 = vld [vmem:[%s14021_s1 + $0x18] sm:$0xff]  ;;  %vm1349_vm3 = vcmask 64512  }
  0x16   : > { %225 = vst.msk [vmem:[#allocation2 + $0x8] sm:$0xff] %vm223_vm1, %v7693_v0  ;;  %s7697_s13 = smov 4   ;;  %s14029_s14 = smov 24   ;;  %v1580_v43 = vld [vmem:[%s14021_s1] sm:$0xff]  ;;  %vm1382_vm4 = vcmask 97280   ;;  %vm1415_vm5 = vcmask 130048  }
  0x17   : > { %s7225_s6 = sshll.u32 %s219_s30, 8  ;;  %226 = vst.msk [vmem:[#allocation2 + $0x10] sm:$0xff] %vm223_vm1, %v7693_v0  ;;  %s7699_s15 = smov 32   ;;  %7227 = vmatpush.msra.mxu2 %v1589_v40  ;;  %1722 = vmatpush.msra.mxu0 %v1589_v40  ;;  %vm1448_vm6 = vcmask 162816   ;;  %vm1481_vm7 = vcmask 195584   ;;  %vm1514_vm8 = vcmask 228352  }
  0x18   : > { %s7795_s9 = scalar_lea.vmem %s14020_s0, %s7225_s6  ;;  %227 = vst.msk [vmem:[#allocation2 + $0x18] sm:$0xff] %vm223_vm1, %v7693_v0  ;;  %s7700_s16 = smov 8   ;;  %vm1547_vm9 = vcmask 261120   ;;  %vm1603_vm10 = vcmask 293888   ;;  %vm2146_vm11 = vcmask 523264   ;;  %vm5507_vm12 = vcmask 785408  }
  0x19   : > { %v287_v1 = vld [vmem:[%s7795_s9 + $0x88] sm:$0xff]  ;;  %229 = vst.msk [vmem:[#allocation2 + $0x220] sm:$0xff] %vm223_vm1, %v7693_v0  ;;  %v286_v3 = vld [vmem:[%s7795_s9 + $0x80] sm:$0xff]  ;;  %v285_v5 = vld [vmem:[%s7795_s9 + $0x78] sm:$0xff]  ;;  %s14027_s17 = smov 28   ;;  %7228 = vmatpush.msra.mxu2 %v1586_v41  ;;  %1723 = vmatpush.msra.mxu0 %v1586_v41  ;;  %s14026_s7 = sand.u32 1, %s7683_s19  }
  0x1a   : > { %320 = vst.msk [vmem:[#allocation2 + $0x130] sm:$0xff] %vm223_vm1, %v287_v1  ;;  %v288_v6 = vld [vmem:[%s7795_s9 + $0x90] sm:$0xff]  ;;  %v289_v7 = vld [vmem:[%s7795_s9 + $0x98] sm:$0xff]  ;;  %v290_v9 = vld [vmem:[%s7795_s9 + $0xa0] sm:$0xff]  ;;  %s7252_s8 = smul.u32 768, %s14026_s7  ;;  %vm5540_vm13 = vcmask 1048320  }
  0x1b   : > { %230 = vst.msk [vmem:[#allocation2 + $0x228] sm:$0xff] %vm223_vm1, %v7693_v0  ;;  %v291_v11 = vld [vmem:[%s7795_s9 + $0xa8] sm:$0xff]  ;;  %v292_v23 = vld [vmem:[%s7795_s9 + $0xb0] sm:$0xff]  ;;  %v293_v25 = vld [vmem:[%s7795_s9 + $0xb8] sm:$0xff]  ;;  %7229 = vmatpush.msra.mxu2 %v1583_v42  ;;  %1724 = vmatpush.msra.mxu0 %v1583_v42  ;;  %vm5172_vm14 = vcmask 1048064   ;;  %vm7006_vm15 = vcmask 1047808  }
  0x1c   : > { %231 = vst.msk [vmem:[#allocation2 + $0x230] sm:$0xff] %vm223_vm1, %v7693_v0  ;;  %v284_v31 = vld [vmem:[%s7795_s9 + $0x70] sm:$0xff]  ;;  %v294_v33 = vld [vmem:[%s7795_s9 + $0xc0] sm:$0xff]  ;;  %v295_v34 = vld [vmem:[%s7795_s9 + $0xc8] sm:$0xff]  ;;  %s8394_s23 = scalar_lea.vmem [#allocation5], %s7252_s8  ;;  %s14714_s25 = sand.u32 1, %s7683_s19  }
  0x1d   : > { %232 = vst.msk [vmem:[#allocation2 + $0x238] sm:$0xff] %vm223_vm1, %v7693_v0  ;;  %7230 = vmatpush.msra.mxu2 %v1580_v43  ;;  %1725 = vmatpush.msra.mxu0 %v1580_v43  ;;  %v296_v56 = vld [vmem:[%s7795_s9 + $0xd0] sm:$0xff]  ;;  %v298_v40 = vld [vmem:[%s7795_s9 + $0xe0] sm:$0xff]  ;;  %s7040_s26 = scalar_lea.sflag [#allocation6], %s14714_s25 }
  0x1e   : > { %235 = vst.msk [vmem:[#allocation2 + $0x27] sm:$0x1] %vm233_vm0, %v7693_v0 }
  0x1f   : > { %236 = vst.msk [vmem:[#allocation2 + $0x47] sm:$0x1] %vm233_vm0, %v7693_v0 }
  0x20   : > { %237 = vst.msk [vmem:[#allocation2 + $0x67] sm:$0x1] %vm233_vm0, %v7693_v0 }
  0x21   : > { %v7815_v2 = vld [vmem:[#allocation2 + $0x131] sm:$0xff]  ;;  %238 = vst.msk [vmem:[#allocation2 + $0x87] sm:$0x1] %vm233_vm0, %v7693_v0 }
  0x22   : > { %961 = vrot.lane.b32.xlu2 %v7815_v2, %s7694_s10  ;;  %239 = vst.msk [vmem:[#allocation2 + $0xa7] sm:$0x1] %vm233_vm0, %v7693_v0  ;;  %v390_v8 = vld [vmem:[#allocation2 + $0x130] sm:$0xff] }
  0x23   : > { %240 = vst.msk [vmem:[#allocation2 + $0xc7] sm:$0x1] %vm233_vm0, %v7693_v0 }
  0x24   : > { %241 = vst.msk [vmem:[#allocation2 + $0xe7] sm:$0x1] %vm233_vm0, %v7693_v0 }
  0x25   : > { %242 = vst.msk [vmem:[#allocation2 + $0x107] sm:$0x1] %vm233_vm0, %v7693_v0 }
  0x26   : > { %243 = vst.msk [vmem:[#allocation2 + $0x127] sm:$0x1] %vm233_vm0, %v7693_v0 }
  0x27   : > { %244 = vst.msk [vmem:[#allocation2 + $0x147] sm:$0x1] %vm233_vm0, %v7693_v0 }
  0x28   : > { %245 = vst.msk [vmem:[#allocation2 + $0x167] sm:$0x1] %vm233_vm0, %v7693_v0 }
  0x29   : > { %246 = vst.msk [vmem:[#allocation2 + $0x187] sm:$0x1] %vm233_vm0, %v7693_v0 }
  0x2a   : > { %247 = vst.msk [vmem:[#allocation2 + $0x1a7] sm:$0x1] %vm233_vm0, %v7693_v0 }
  0x2b   : > { %248 = vst.msk [vmem:[#allocation2 + $0x1c7] sm:$0x1] %vm233_vm0, %v7693_v0 }
  0x2c   : > { %249 = vst.msk [vmem:[#allocation2 + $0x1e7] sm:$0x1] %vm233_vm0, %v7693_v0 }
  0x2d   : > { %250 = vst.msk [vmem:[#allocation2 + $0x207] sm:$0x1] %vm233_vm0, %v7693_v0 }
  0x2e   : > { %253 = vst.msk [vmem:[#allocation2 + $0x38] sm:$0x1] %vm233_vm0, %v7693_v0 }
  0x2f   : > { %254 = vst.msk [vmem:[#allocation2 + $0x58] sm:$0x1] %vm233_vm0, %v7693_v0 }
  0x30   : > { %255 = vst.msk [vmem:[#allocation2 + $0x78] sm:$0x1] %vm233_vm0, %v7693_v0 }
  0x31   : > { %256 = vst.msk [vmem:[#allocation2 + $0x98] sm:$0x1] %vm233_vm0, %v7693_v0 }
  0x32   : > { %257 = vst.msk [vmem:[#allocation2 + $0xb8] sm:$0x1] %vm233_vm0, %v7693_v0 }
  0x33   : > { %258 = vst.msk [vmem:[#allocation2 + $0xd8] sm:$0x1] %vm233_vm0, %v7693_v0 }
  0x34   : > { %259 = vst.msk [vmem:[#allocation2 + $0xf8] sm:$0x1] %vm233_vm0, %v7693_v0 }
  0x35   : > { %260 = vst.msk [vmem:[#allocation2 + $0x118] sm:$0x1] %vm233_vm0, %v7693_v0 }
  0x36   : > { %262 = vst.msk [vmem:[#allocation2 + $0x158] sm:$0x1] %vm233_vm0, %v7693_v0 }
  0x37   : > { %263 = vst.msk [vmem:[#allocation2 + $0x178] sm:$0x1] %vm233_vm0, %v7693_v0 }
  0x38   : > { %264 = vst.msk [vmem:[#allocation2 + $0x198] sm:$0x1] %vm233_vm0, %v7693_v0 }
  0x39   : > { %265 = vst.msk [vmem:[#allocation2 + $0x1b8] sm:$0x1] %vm233_vm0, %v7693_v0 }
  0x3a   : > { %266 = vst.msk [vmem:[#allocation2 + $0x1d8] sm:$0x1] %vm233_vm0, %v7693_v0 }
  0x3b   : > { %267 = vst.msk [vmem:[#allocation2 + $0x1f8] sm:$0x1] %vm233_vm0, %v7693_v0 }
  0x3c   : > { %268 = vst.msk [vmem:[#allocation2 + $0x218] sm:$0x1] %vm233_vm0, %v7693_v0 }
  0x3d   : > { %2210 = vst [vmem:[#allocation3] sm:$0xff] %v7693_v0 }
  0x3e   : > { %2211 = vst [vmem:[#allocation3 + $0x8] sm:$0xff] %v7693_v0 }
  0x3f   : > { %2212 = vst [vmem:[#allocation3 + $0x10] sm:$0xff] %v7693_v0 }
  0x40   : > { %2213 = vst [vmem:[#allocation3 + $0x18] sm:$0xff] %v7693_v0 }
  0x41   : > { %2215 = vst [vmem:[#allocation3 + $0x220] sm:$0xff] %v7693_v0 }
  0x42   : > { %2216 = vst [vmem:[#allocation3 + $0x228] sm:$0xff] %v7693_v0 }
  0x43   : > { %2217 = vst [vmem:[#allocation3 + $0x230] sm:$0xff] %v7693_v0 }
  0x44   : > { %2218 = vst [vmem:[#allocation3 + $0x238] sm:$0xff] %v7693_v0 }
  0x45   : > { %2220 = vst [vmem:[#allocation3 + $0x27] sm:$0x1] %v7693_v0 }
  0x46   : > { %2221 = vst [vmem:[#allocation3 + $0x47] sm:$0x1] %v7693_v0 }
  0x47   : > { %2222 = vst [vmem:[#allocation3 + $0x67] sm:$0x1] %v7693_v0 }
  0x48   : > { %2223 = vst [vmem:[#allocation3 + $0x87] sm:$0x1] %v7693_v0 }
  0x49   : > { %2224 = vst [vmem:[#allocation3 + $0xa7] sm:$0x1] %v7693_v0 }
  0x4a   : > { %2225 = vst [vmem:[#allocation3 + $0xc7] sm:$0x1] %v7693_v0 }
  0x4b   : > { %2226 = vst [vmem:[#allocation3 + $0xe7] sm:$0x1] %v7693_v0 }
  0x4c   : > { %2227 = vst [vmem:[#allocation3 + $0x107] sm:$0x1] %v7693_v0 }
  0x4d   : > { %2228 = vst [vmem:[#allocation3 + $0x127] sm:$0x1] %v7693_v0 }
  0x4e   : > { %2229 = vst [vmem:[#allocation3 + $0x147] sm:$0x1] %v7693_v0 }
  0x4f   : > { %2230 = vst [vmem:[#allocation3 + $0x167] sm:$0x1] %v7693_v0 }
  0x50   : > { %2231 = vst [vmem:[#allocation3 + $0x187] sm:$0x1] %v7693_v0 }
  0x51   : > { %2232 = vst [vmem:[#allocation3 + $0x1a7] sm:$0x1] %v7693_v0 }
  0x52   : > { %2233 = vst [vmem:[#allocation3 + $0x1c7] sm:$0x1] %v7693_v0 }
  0x53   : > { %2234 = vst [vmem:[#allocation3 + $0x1e7] sm:$0x1] %v7693_v0 }
  0x54   : > { %2235 = vst [vmem:[#allocation3 + $0x207] sm:$0x1] %v7693_v0 }
  0x55   : > { %2238 = vst [vmem:[#allocation3 + $0x38] sm:$0x1] %v7693_v0 }
  0x56   : > { %2239 = vst [vmem:[#allocation3 + $0x58] sm:$0x1] %v7693_v0 }
  0x57   : > { %2240 = vst [vmem:[#allocation3 + $0x78] sm:$0x1] %v7693_v0 }
  0x58   : > { %2241 = vst [vmem:[#allocation3 + $0x98] sm:$0x1] %v7693_v0 }
  0x59   : > { %2242 = vst [vmem:[#allocation3 + $0xb8] sm:$0x1] %v7693_v0 }
  0x5a   : > { %2243 = vst [vmem:[#allocation3 + $0xd8] sm:$0x1] %v7693_v0 }
  0x5b   : > { %2244 = vst [vmem:[#allocation3 + $0xf8] sm:$0x1] %v7693_v0 }
  0x5c   : > { %2245 = vst [vmem:[#allocation3 + $0x118] sm:$0x1] %v7693_v0 }
  0x5d   : > { %2246 = vst [vmem:[#allocation3 + $0x138] sm:$0x1] %v7693_v0 }
  0x5e   : > { %2247 = vst [vmem:[#allocation3 + $0x158] sm:$0x1] %v7693_v0 }
  0x5f   : > { %2248 = vst [vmem:[#allocation3 + $0x178] sm:$0x1] %v7693_v0 }
  0x60   : > { %2249 = vst [vmem:[#allocation3 + $0x198] sm:$0x1] %v7693_v0 }
  0x61   : > { %2250 = vst [vmem:[#allocation3 + $0x1b8] sm:$0x1] %v7693_v0 }
  0x62   : > { %2251 = vst [vmem:[#allocation3 + $0x1d8] sm:$0x1] %v7693_v0 }
  0x63   : > { %2252 = vst [vmem:[#allocation3 + $0x1f8] sm:$0x1] %v7693_v0 }
  0x64   : > { %2253 = vst [vmem:[#allocation3 + $0x218] sm:$0x1] %v7693_v0 }
  0x65   : > { %5237 = vst [vmem:[#allocation4] sm:$0xff] %v7693_v0 }
  0x66   : > { %5238 = vst [vmem:[#allocation4 + $0x8] sm:$0xff] %v7693_v0 }
  0x67   : > { %5239 = vst [vmem:[#allocation4 + $0x10] sm:$0xff] %v7693_v0 }
  0x68   : > { %5240 = vst [vmem:[#allocation4 + $0x18] sm:$0xff] %v7693_v0 }
  0x69   : > { %5242 = vst [vmem:[#allocation4 + $0x220] sm:$0xff] %v7693_v0 }
  0x6a   : > { %5243 = vst [vmem:[#allocation4 + $0x228] sm:$0xff] %v7693_v0 }
  0x6b   : > { %5244 = vst [vmem:[#allocation4 + $0x230] sm:$0xff] %v7693_v0 }
  0x6c   : > { %5245 = vst [vmem:[#allocation4 + $0x238] sm:$0xff] %v7693_v0 }
  0x6d   : > { %5247 = vst [vmem:[#allocation4 + $0x27] sm:$0x1] %v7693_v0 }
  0x6e   : > { %5248 = vst [vmem:[#allocation4 + $0x47] sm:$0x1] %v7693_v0 }
  0x6f   : > { %5249 = vst [vmem:[#allocation4 + $0x67] sm:$0x1] %v7693_v0 }
  0x70   : > { %5250 = vst [vmem:[#allocation4 + $0x87] sm:$0x1] %v7693_v0 }
  0x71   : > { %5251 = vst [vmem:[#allocation4 + $0xa7] sm:$0x1] %v7693_v0 }
  0x72   : > { %5252 = vst [vmem:[#allocation4 + $0xc7] sm:$0x1] %v7693_v0 }
  0x73   : > { %5253 = vst [vmem:[#allocation4 + $0xe7] sm:$0x1] %v7693_v0 }
  0x74   : > { %5254 = vst [vmem:[#allocation4 + $0x107] sm:$0x1] %v7693_v0 }
  0x75   : > { %5255 = vst [vmem:[#allocation4 + $0x127] sm:$0x1] %v7693_v0 }
  0x76   : > { %5256 = vst [vmem:[#allocation4 + $0x147] sm:$0x1] %v7693_v0 }
  0x77   : > { %5257 = vst [vmem:[#allocation4 + $0x167] sm:$0x1] %v7693_v0 }
  0x78   : > { %5258 = vst [vmem:[#allocation4 + $0x187] sm:$0x1] %v7693_v0 }
  0x79   : > { %5259 = vst [vmem:[#allocation4 + $0x1a7] sm:$0x1] %v7693_v0 }
  0x7a   : > { %5260 = vst [vmem:[#allocation4 + $0x1c7] sm:$0x1] %v7693_v0 }
  0x7b   : > { %5261 = vst [vmem:[#allocation4 + $0x1e7] sm:$0x1] %v7693_v0 }
  0x7c   : > { %5262 = vst [vmem:[#allocation4 + $0x207] sm:$0x1] %v7693_v0  ;;  %v962_v36 = vpop.permute.xlu2 %961 }
  0x7d   : > { %5265 = vst [vmem:[#allocation4 + $0x38] sm:$0x1] %v7693_v0 }
  0x7e   : > { %5266 = vst [vmem:[#allocation4 + $0x58] sm:$0x1] %v7693_v0 }
  0x7f   : > { %5267 = vst [vmem:[#allocation4 + $0x78] sm:$0x1] %v7693_v0 }
  0x80   : > { %5268 = vst [vmem:[#allocation4 + $0x98] sm:$0x1] %v7693_v0 }
  0x81   : > { %5269 = vst [vmem:[#allocation4 + $0xb8] sm:$0x1] %v7693_v0 }
  0x82   : > { %5270 = vst [vmem:[#allocation4 + $0xd8] sm:$0x1] %v7693_v0 }
  0x83   : > { %5271 = vst [vmem:[#allocation4 + $0xf8] sm:$0x1] %v7693_v0 }
  0x84   : > { %5272 = vst [vmem:[#allocation4 + $0x118] sm:$0x1] %v7693_v0 }
  0x85   : > { %5273 = vst [vmem:[#allocation4 + $0x138] sm:$0x1] %v7693_v0 }
  0x86   : > { %5274 = vst [vmem:[#allocation4 + $0x158] sm:$0x1] %v7693_v0 }
  0x87   : > { %5275 = vst [vmem:[#allocation4 + $0x178] sm:$0x1] %v7693_v0 }
  0x88   : > { %5276 = vst [vmem:[#allocation4 + $0x198] sm:$0x1] %v7693_v0 }
  0x89   : > { %5277 = vst [vmem:[#allocation4 + $0x1b8] sm:$0x1] %v7693_v0 }
  0x8a   : > { %5278 = vst [vmem:[#allocation4 + $0x1d8] sm:$0x1] %v7693_v0 }
  0x8b   : > { %5279 = vst [vmem:[#allocation4 + $0x1f8] sm:$0x1] %v7693_v0 }
  0x8c   : > { %5280 = vst [vmem:[#allocation4 + $0x218] sm:$0x1] %v7693_v0 }
  0x8d   : > { %319 = vst.msk [vmem:[#allocation2 + $0x128] sm:$0xff] %vm223_vm1, %v286_v3 }
  0x8e   : > { %234 = vst.msk [vmem:[#allocation2 + $0x7] sm:$0x1] %vm233_vm0, %v7693_v0 }
  0x8f   : > { %251 = vst.msk [vmem:[#allocation2 + $0x227] sm:$0x1] %vm233_vm0, %v7693_v0 }
  0x90   : > { %252 = vst.msk [vmem:[#allocation2 + $0x18] sm:$0x1] %vm233_vm0, %v7693_v0 }
  0x91   : > { %269 = vst.msk [vmem:[#allocation2 + $0x238] sm:$0x1] %vm233_vm0, %v7693_v0 }
  0x92   : > { %2219 = vst [vmem:[#allocation3 + $0x7] sm:$0x1] %v7693_v0 }
  0x93   : > { %2236 = vst [vmem:[#allocation3 + $0x227] sm:$0x1] %v7693_v0 }
  0x94   : > { %v7967_v4 = vld [vmem:[#allocation2 + $0x12f] sm:$0xff]  ;;  %2237 = vst [vmem:[#allocation3 + $0x18] sm:$0x1] %v7693_v0 }
  0x95   : > { %765 = vrot.lane.b32.xlu1 %v7967_v4, %s7695_s11  ;;  %2254 = vst [vmem:[#allocation3 + $0x238] sm:$0x1] %v7693_v0  ;;  %v389_v15 = vld [vmem:[#allocation2 + $0x128] sm:$0xff] }
  0x96   : > { %5246 = vst [vmem:[#allocation4 + $0x7] sm:$0x1] %v7693_v0  ;;  %v425_v20 = vld [vmem:[#allocation2 + $0x129] sm:$0xff] }
  0x97   : > { %5263 = vst [vmem:[#allocation4 + $0x227] sm:$0x1] %v7693_v0 }
  0x98   : > { %5264 = vst [vmem:[#allocation4 + $0x18] sm:$0x1] %v7693_v0 }
  0x99   : > { %5281 = vst [vmem:[#allocation4 + $0x238] sm:$0x1] %v7693_v0 }
  0x9a   : > { %318 = vst.msk [vmem:[#allocation2 + $0x110] sm:$0xff] %vm223_vm1, %v285_v5 }
  0x9b   : > { %321 = vst.msk [vmem:[#allocation2 + $0x148] sm:$0xff] %vm223_vm1, %v288_v6 }
  0x9c   : > { %322 = vst.msk [vmem:[#allocation2 + $0x150] sm:$0xff] %vm223_vm1, %v289_v7 }
  0x9d   : > { %863 = vrot.lane.b32.xlu1 %v390_v8, %s7696_s12  ;;  %323 = vst.msk [vmem:[#allocation2 + $0x168] sm:$0xff] %vm223_vm1, %v290_v9 }
  0x9e   : > { %324 = vst.msk [vmem:[#allocation2 + $0x170] sm:$0xff] %vm223_vm1, %v291_v11  ;;  %v8156_v11 = vld [vmem:[#allocation2 + $0x127] sm:$0xff] }
  0x9f   : > { %325 = vst.msk [vmem:[#allocation2 + $0x188] sm:$0xff] %vm223_vm1, %v292_v23 }
  0xa0   : > { %326 = vst.msk [vmem:[#allocation2 + $0x190] sm:$0xff] %vm223_vm1, %v293_v25 }
  0xa1   : > { %v388_v10 = vld [vmem:[#allocation2 + $0x110] sm:$0xff]  ;;  %317 = vst.msk [vmem:[#allocation2 + $0x108] sm:$0xff] %vm223_vm1, %v284_v31 }
  0xa2   : > { %509 = vrot.lane.b32.xlu0 %v388_v10, %s7697_s13  ;;  %v424_v14 = vld [vmem:[#allocation2 + $0x111] sm:$0xff]  ;;  %v7998_v16 = vld [vmem:[#allocation2 + $0x147] sm:$0xff]  ;;  %327 = vst.msk [vmem:[#allocation2 + $0x1a8] sm:$0xff] %vm223_vm1, %v294_v33 }
  0xa3   : > { %v7989_v12 = vld [vmem:[#allocation2 + $0x14f] sm:$0xff]  ;;  %328 = vst.msk [vmem:[#allocation2 + $0x1b0] sm:$0xff] %vm223_vm1, %v295_v34 }
  0xa4   : > { %v7991_v13 = vld [vmem:[#allocation2 + $0x151] sm:$0xff]  ;;  %1059 = vrot.lane.b32.xlu2 %v7989_v12, %s14029_s14  ;;  %v391_v18 = vld [vmem:[#allocation2 + $0x148] sm:$0xff]  ;;  %329 = vst.msk [vmem:[#allocation2 + $0x1c8] sm:$0xff] %vm223_vm1, %v296_v56 }
  0xa5   : > { %1255 = vrot.lane.b32.xlu1 %v7991_v13, %s7699_s15  ;;  %v392_v17 = vld [vmem:[#allocation2 + $0x150] sm:$0xff]  ;;  %v8004_v19 = vld [vmem:[#allocation2 + $0x167] sm:$0xff]  ;;  %331 = vst.msk [vmem:[#allocation2 + $0x1e8] sm:$0xff] %vm223_vm1, %v298_v40 }
  0xa6   : > { %v393_v21 = vld [vmem:[#allocation2 + $0x168] sm:$0xff]  ;;  %v8020_v26 = vld [vmem:[#allocation2 + $0x170] sm:$0xff] }
  0xa7   : > { %v427_v22 = vld [vmem:[#allocation2 + $0x149] sm:$0xff]  ;;  %v8027_v27 = vld [vmem:[#allocation2 + $0x171] sm:$0xff] }
  0xa8   : > { %v429_v24 = vld [vmem:[#allocation2 + $0x169] sm:$0xff]  ;;  %v8101_v45 = vld [vmem:[#allocation2 + $0x191] sm:$0xff] }
  0xa9   : > { %v8034_v28 = vld [vmem:[#allocation2 + $0x16f] sm:$0xff]  ;;  %v8041_v29 = vld [vmem:[#allocation2 + $0x187] sm:$0xff] }
  0xaa   : > { %637 = vrot.lane.b32.xlu0 %v424_v14, %s7700_s16  ;;  %v8044_v30 = vld [vmem:[#allocation2 + $0x189] sm:$0xff]  ;;  %v8141_v3 = vld [vmem:[#allocation2 + $0x1b1] sm:$0xff] }
  0xab   : > { %v8056_v32 = vld [vmem:[#allocation2 + $0x188] sm:$0xff]  ;;  %v8070_v37 = vld [vmem:[#allocation2 + $0x190] sm:$0xff] }
  0xac   : > { %511 = vrot.lane.b32.xlu2 %v389_v15, %s7697_s13  ;;  %v8062_v35 = vld [vmem:[#allocation2 + $0x18f] sm:$0xff]  ;;  %v8121_v53 = vld [vmem:[#allocation2 + $0x1a7] sm:$0xff] }
  0xad   : > { %767 = vrot.lane.b32.xlu1 %v7998_v16, %s7695_s11  ;;  %v8105_v47 = vld [vmem:[#allocation2 + $0x1a8] sm:$0xff] }
  0xae   : > { %v8111_v50 = vld [vmem:[#allocation2 + $0x1a9] sm:$0xff] }
  0xaf   : > { %v352_v55 = vld [vmem:[#allocation2 + $0x10f] sm:$0xff] }
  0xb0   : > { %v8136_v1 = vld [vmem:[#allocation2 + $0x1af] sm:$0xff] }
  0xb2   : > { %1157 = vrot.lane.b32.xlu0 %v392_v17, %s14027_s17 }
  0xb4   : > { %865 = vrot.lane.b32.xlu2 %v391_v18, %s7696_s12 }
  0xb5   : > { %1061 = vrot.lane.b32.xlu1 %v8004_v19, %s14029_s14 }
  0xba   : > { %639 = vrot.lane.b32.xlu0 %v425_v20, %s7700_s16 }
  0xbc   : > { %1159 = vrot.lane.b32.xlu2 %v393_v21, %s14027_s17 }
  0xbd   : > { %513 = vrot.lane.b32.xlu1 %v390_v8, %s7697_s13 }
  0xc2   : > { %963 = vrot.lane.b32.xlu0 %v427_v22, %s7694_s10 }
  0xc4   : > { %641 = vrot.lane.b32.xlu2 %v7815_v2, %s7700_s16  ;;  %v297_v2 = vld [vmem:[%s7795_s9 + $0xd8] sm:$0xff] }
  0xc5   : > { %867 = vrot.lane.b32.xlu1 %v392_v17, %s7696_s12  ;;  %330 = vst.msk [vmem:[#allocation2 + $0x1d0] sm:$0xff] %vm223_vm1, %v297_v2 }
  0xca   : > { %1257 = vrot.lane.b32.xlu0 %v429_v24, %s7699_s15 }
  0xcc   : > { %965 = vrot.lane.b32.xlu2 %v7991_v13, %s7694_s10 }
  0xcd   : > { %1161 = vrot.lane.b32.xlu1 %v8020_v26, %s14027_s17 }
  0xd2   : > { %769 = vrot.lane.b32.xlu0 %v7989_v12, %s7695_s11 }
  0xd4   : > { %1259 = vrot.lane.b32.xlu2 %v8027_v27, %s7699_s15 }
  0xd5   : > { %643 = vrot.lane.b32.xlu1 %v427_v22, %s7700_s16  ;;  %v8172_v22 = vld [vmem:[#allocation2 + $0x1c7] sm:$0xff] }
  0xda   : > { %1063 = vrot.lane.b32.xlu0 %v8034_v28, %s14029_s14 }
  0xdc   : > { %771 = vrot.lane.b32.xlu2 %v8004_v19, %s7695_s11 }
  0xdd   : > { %967 = vrot.lane.b32.xlu1 %v429_v24, %s7694_s10 }
  0xe2   : > { %515 = vrot.lane.b32.xlu0 %v391_v18, %s7697_s13  ;;  %v8167_v18 = vld [vmem:[#allocation2 + $0x1b0] sm:$0xff] }
  0xe4   : > { %1065 = vrot.lane.b32.xlu2 %v8041_v29, %s14029_s14 }
  0xe5   : > { %1261 = vrot.lane.b32.xlu1 %v8044_v30, %s7699_s15 }
  0xea   : > { %869 = vrot.lane.b32.xlu0 %v393_v21, %s7696_s12 }
  0xec   : > { %517 = vrot.lane.b32.xlu2 %v392_v17, %s7697_s13 }
  0xed   : > { %773 = vrot.lane.b32.xlu1 %v8034_v28, %s7695_s11 }
  0xf2   : > { %1163 = vrot.lane.b32.xlu0 %v8056_v32, %s14027_s17 }
  0xf4   : > { %871 = vrot.lane.b32.xlu2 %v8020_v26, %s7696_s12 }
  0xf5   : > { %1067 = vrot.lane.b32.xlu1 %v8062_v35, %s14029_s14 }
  0xfa   : > { %645 = vrot.lane.b32.xlu0 %v7991_v13, %s7700_s16 }
  0xfc   : > { %1165 = vrot.lane.b32.xlu2 %v8070_v37, %s14027_s17 }
  0xfd   : > { %519 = vrot.lane.b32.xlu1 %v393_v21, %s7697_s13 }
  0xfe   : > { %v8080_v39 = vpop.permute.xlu2 %1059 }
 0x102   : > { %969 = vrot.lane.b32.xlu0 %v8027_v27, %s7694_s10 }
 0x104   : > { %647 = vrot.lane.b32.xlu2 %v429_v24, %s7700_s16 }
 0x105   : > { %873 = vrot.lane.b32.xlu1 %v8056_v32, %s7696_s12 }
 0x106   : > { %v512_v44 = vpop.permute.xlu2 %511 }
 0x107   : > { %v766_v46 = vpop.permute.xlu1 %765  ;;  %v1335_v13 = vsel %vm223_vm1, %v8156_v11, %v512_v44  ;;  %v8208_v44 = vld [vmem:[#allocation2 + $0x1c9] sm:$0xff] }
 0x10a   : > { %1263 = vrot.lane.b32.xlu0 %v8101_v45, %s7699_s15 }
 0x10c   : > { %971 = vrot.lane.b32.xlu2 %v8044_v30, %s7694_s10 }
 0x10d   : > { %1167 = vrot.lane.b32.xlu1 %v8105_v47, %s14027_s17 }
 0x10e   : > { %v866_v48 = vpop.permute.xlu2 %865 }
 0x10f   : > { %v864_v49 = vpop.permute.xlu1 %863 }
 0x112   : > { %775 = vrot.lane.b32.xlu0 %v8041_v29, %s7695_s11 }
 0x114   : > { %v510_v51 = vpop.permute.xlu0 %509  ;;  %1265 = vrot.lane.b32.xlu2 %v8111_v50, %s7699_s15 }
 0x115   : > { %649 = vrot.lane.b32.xlu1 %v8027_v27, %s7700_s16  ;;  %v1334_v57 = vsel %vm223_vm1, %v352_v55, %v510_v51 }
 0x116   : > { %v8119_v52 = vpop.permute.xlu2 %1159 }
 0x117   : > { %v1256_v54 = vpop.permute.xlu1 %1255 }
 0x11a   : > { %1069 = vrot.lane.b32.xlu0 %v8121_v53, %s14029_s14 }
 0x11c   : > { %v638_v58 = vpop.permute.xlu0 %637  ;;  %777 = vrot.lane.b32.xlu2 %v8062_v35, %s7695_s11 }
 0x11d   : > { %v1367_v59 = vsel %vm1349_vm3, %v1334_v57, %v638_v58  ;;  %973 = vrot.lane.b32.xlu1 %v8101_v45, %s7694_s10  ;;  %v8229_v58 = vld [vmem:[#allocation2 + $0x1d1] sm:$0xff] }
 0x11e   : > { %v1400_v60 = vsel %vm1382_vm4, %v1367_v59, %v766_v46  ;;  %v642_v61 = vpop.permute.xlu2 %641 }
 0x11f   : > { %v1433_v62 = vsel %vm1415_vm5, %v1400_v60, %v864_v49  ;;  %v768_v63 = vpop.permute.xlu1 %767  ;;  %v8214_v49 = vld [vmem:[#allocation2 + $0x1d0] sm:$0xff] }
 0x120   : > { %v1466_v0 = vsel %vm1448_vm6, %v1433_v62, %v962_v36  ;;  %v8239_v62 = vld [vmem:[#allocation2 + $0x1cf] sm:$0xff] }
 0x121   : > { %v1499_v6 = vsel %vm1481_vm7, %v1466_v0, %v8080_v39 }
 0x122   : > { %521 = vrot.lane.b32.xlu0 %v8020_v26, %s7697_s13 }
 0x124   : > { %v1158_v5 = vpop.permute.xlu0 %1157  ;;  %1071 = vrot.lane.b32.xlu2 %v8136_v1, %s14029_s14 }
 0x125   : > { %v1532_v7 = vsel %vm1514_vm8, %v1499_v6, %v1158_v5  ;;  %1267 = vrot.lane.b32.xlu1 %v8141_v3, %s7699_s15 }
 0x126   : > { %v8152_v8 = vsel %vm1547_vm9, %v1532_v7, %v1256_v54  ;;  %v966_v9 = vpop.permute.xlu2 %965 }
 0x127   : > { %7141 = vmatmul.msk.f32.vlgmr.msra.gmra.mxu2 %vm1603_vm10, %v8152_v8  ;;  %v1062_v10 = vpop.permute.xlu1 %1061 }
 0x12a   : > { %875 = vrot.lane.b32.xlu0 %v8070_v37, %s7696_s12 }
 0x12c   : > { %v640_v14 = vpop.permute.xlu0 %639  ;;  %523 = vrot.lane.b32.xlu2 %v8056_v32, %s7697_s13  ;;  %v8181_v32 = vld [vmem:[#allocation2 + $0x1c8] sm:$0xff] }
 0x12d   : > { %779 = vrot.lane.b32.xlu1 %v8121_v53, %s7695_s11  ;;  %v1368_v17 = vsel %vm1349_vm3, %v1335_v13, %v640_v14 }
 0x12e   : > { %v1260_v15 = vpop.permute.xlu2 %1259  ;;  %v1401_v21 = vsel %vm1382_vm4, %v1368_v17, %v768_v63 }
 0x12f   : > { %v514_v20 = vpop.permute.xlu1 %513  ;;  %v1434_v24 = vsel %vm1415_vm5, %v1401_v21, %v866_v48  ;;  %v299_v48 = vld [vmem:[%s7795_s9 + $0xe8] sm:$0xff] }
 0x130   : > { %332 = vst.msk [vmem:[#allocation2 + $0x1f0] sm:$0xff] %vm223_vm1, %v299_v48 }
 0x132   : > { %1169 = vrot.lane.b32.xlu0 %v8167_v18, %s14027_s17 }
 0x134   : > { %v964_v23 = vpop.permute.xlu0 %963  ;;  %877 = vrot.lane.b32.xlu2 %v8105_v47, %s7696_s12 }
 0x135   : > { %1073 = vrot.lane.b32.xlu1 %v8172_v22, %s14029_s14  ;;  %v1467_v25 = vsel %vm1448_vm6, %v1434_v24, %v964_v23 }
 0x136   : > { %v772_v26 = vpop.permute.xlu2 %771  ;;  %v1500_v31 = vsel %vm1481_vm7, %v1467_v25, %v1062_v10 }
 0x137   : > { %v868_v27 = vpop.permute.xlu1 %867  ;;  %v1533_v34 = vsel %vm1514_vm8, %v1500_v31, %v8119_v52  ;;  %v8255_v10 = vld [vmem:[#allocation2 + $0x1e9] sm:$0xff] }
 0x138   : > { %v300_v31 = vld [vmem:[%s7795_s9 + $0xf0] sm:$0xff] }
 0x139   : > { %333 = vst.msk [vmem:[#allocation2 + $0x208] sm:$0xff] %vm223_vm1, %v300_v31  ;;  %v1595_v31 = vld [vmem:[%s14024_s4] sm:$0x7] }
 0x13a   : > { %651 = vrot.lane.b32.xlu0 %v8044_v30, %s7700_s16  ;;  %v1336_v30 = vsel %vm223_vm1, %v7967_v4, %v514_v20 }
 0x13b   : > { %v1369_v41 = vsel %vm1349_vm3, %v1336_v30, %v642_v61 }
 0x13c   : > { %v1258_v33 = vpop.permute.xlu0 %1257  ;;  %1171 = vrot.lane.b32.xlu2 %v8181_v32, %s14027_s17 }
 0x13d   : > { %v8190_v36 = vsel %vm1547_vm9, %v1533_v34, %v1258_v33  ;;  %525 = vrot.lane.b32.xlu1 %v8070_v37, %s7697_s13  ;;  %v301_v33 = vld [vmem:[%s7795_s9 + $0xf8] sm:$0xff] }
 0x13e   : > { %7142 = vmatmul.msk.f32.gmra.mxu2 %vm1603_vm10, %v8190_v36  ;;  %v1066_v38 = vpop.permute.xlu2 %1065  ;;  %334 = vst.msk [vmem:[#allocation2 + $0x210] sm:$0xff] %vm223_vm1, %v301_v33 }
 0x13f   : > { %v1162_v39 = vpop.permute.xlu1 %1161 }
 0x142   : > { %975 = vrot.lane.b32.xlu0 %v8111_v50, %s7694_s10 }
 0x144   : > { %v770_v42 = vpop.permute.xlu0 %769  ;;  %653 = vrot.lane.b32.xlu2 %v8101_v45, %s7700_s16 }
 0x145   : > { %879 = vrot.lane.b32.xlu1 %v8167_v18, %s7696_s12  ;;  %v1402_v37 = vsel %vm1382_vm4, %v1369_v41, %v770_v42  ;;  %v8295_v42 = vld [vmem:[#allocation2 + $0x1f0] sm:$0xff] }
 0x146   : > { %v518_v43 = vpop.permute.xlu2 %517  ;;  %v1435_v46 = vsel %vm1415_vm5, %v1402_v37, %v868_v27 }
 0x147   : > { %v644_v4 = vpop.permute.xlu1 %643  ;;  %v1468_v45 = vsel %vm1448_vm6, %v1435_v46, %v966_v9  ;;  %v8251_v9 = vld [vmem:[#allocation2 + $0x1e7] sm:$0xff]  ;;  %v1338_v21 = vsel %vm223_vm1, %v7989_v12, %v518_v43  ;;  %v8284_v12 = vld [vmem:[#allocation2 + $0x1ef] sm:$0xff] }
 0x14a   : > { %1269 = vrot.lane.b32.xlu0 %v8208_v44, %s7699_s15 }
 0x14c   : > { %v1064_v51 = vpop.permute.xlu0 %1063  ;;  %977 = vrot.lane.b32.xlu2 %v8141_v3, %s7694_s10 }
 0x14d   : > { %v1501_v52 = vsel %vm1481_vm7, %v1468_v45, %v1064_v51  ;;  %1173 = vrot.lane.b32.xlu1 %v8214_v49, %s14027_s17 }
 0x14e   : > { %v1534_v54 = vsel %vm1514_vm8, %v1501_v52, %v1162_v39  ;;  %v872_v55 = vpop.permute.xlu2 %871 }
 0x14f   : > { %v8225_v56 = vsel %vm1547_vm9, %v1534_v54, %v1260_v15  ;;  %v968_v57 = vpop.permute.xlu1 %967  ;;  %v8319_v54 = vld [vmem:[#allocation2 + $0x1f1] sm:$0xff] }
 0x150   : > { %7143 = vmatmul.msk.f32.gmra.mxu2 %vm1603_vm10, %v8225_v56 }
 0x152   : > { %781 = vrot.lane.b32.xlu0 %v8136_v1, %s7695_s11 }
 0x154   : > { %v516_v59 = vpop.permute.xlu0 %515  ;;  %1271 = vrot.lane.b32.xlu2 %v8229_v58, %s7699_s15 }
 0x155   : > { %655 = vrot.lane.b32.xlu1 %v8111_v50, %s7700_s16  ;;  %v1337_v61 = vsel %vm223_vm1, %v7998_v16, %v516_v59 }
 0x156   : > { %v1166_v60 = vpop.permute.xlu2 %1165  ;;  %v1370_v0 = vsel %vm1349_vm3, %v1337_v61, %v644_v4 }
 0x157   : > { %v1262_v63 = vpop.permute.xlu1 %1261  ;;  %v1403_v5 = vsel %vm1382_vm4, %v1370_v0, %v772_v26  ;;  %v8277_v26 = vld [vmem:[#allocation2 + $0x1e8] sm:$0xff] }
 0x15a   : > { %1075 = vrot.lane.b32.xlu0 %v8239_v62, %s14029_s14 }
 0x15c   : > { %v870_v2 = vpop.permute.xlu0 %869  ;;  %783 = vrot.lane.b32.xlu2 %v8172_v22, %s7695_s11 }
 0x15d   : > { %979 = vrot.lane.b32.xlu1 %v8208_v44, %s7694_s10  ;;  %v1436_v50 = vsel %vm1415_vm5, %v1403_v5, %v870_v2  ;;  %v8338_v5 = vld [vmem:[#allocation2 + $0x209] sm:$0xff] }
 0x15e   : > { %v648_v16 = vpop.permute.xlu2 %647  ;;  %v1469_v7 = vsel %vm1448_vm6, %v1436_v50, %v968_v57  ;;  %v8324_v57 = vld [vmem:[#allocation2 + $0x208] sm:$0xff] }
 0x15f   : > { %v774_v6 = vpop.permute.xlu1 %773  ;;  %v1502_v13 = vsel %vm1481_vm7, %v1469_v7, %v1066_v38  ;;  %v367_v7 = vld [vmem:[#allocation2 + $0x207] sm:$0xff] }
 0x162   : > { %527 = vrot.lane.b32.xlu0 %v8105_v47, %s7697_s13 }
 0x164   : > { %v1164_v14 = vpop.permute.xlu0 %1163  ;;  %1077 = vrot.lane.b32.xlu2 %v8251_v9, %s14029_s14 }
 0x165   : > { %v1535_v15 = vsel %vm1514_vm8, %v1502_v13, %v1164_v14  ;;  %1273 = vrot.lane.b32.xlu1 %v8255_v10, %s7699_s15 }
 0x166   : > { %v8264_v17 = vsel %vm1547_vm9, %v1535_v15, %v1262_v63  ;;  %v972_v20 = vpop.permute.xlu2 %971 }
 0x167   : > { %7144 = vmatmul.msk.f32.gmra.mxu2 %vm1603_vm10, %v8264_v17  ;;  %v1068_v47 = vpop.permute.xlu1 %1067 }
 0x16a   : > { %881 = vrot.lane.b32.xlu0 %v8181_v32, %s7696_s12 }
 0x16c   : > { %v646_v23 = vpop.permute.xlu0 %645  ;;  %529 = vrot.lane.b32.xlu2 %v8167_v18, %s7697_s13 }
 0x16d   : > { %785 = vrot.lane.b32.xlu1 %v8239_v62, %s7695_s11  ;;  %v1371_v25 = vsel %vm1349_vm3, %v1338_v21, %v646_v23  ;;  %v8359_v23 = vld [vmem:[#allocation2 + $0x20f] sm:$0xff] }
 0x16e   : > { %v1266_v24 = vpop.permute.xlu2 %1265  ;;  %v1404_v34 = vsel %vm1382_vm4, %v1371_v25, %v774_v6 }
 0x16f   : > { %v520_v27 = vpop.permute.xlu1 %519  ;;  %v1437_v38 = vsel %vm1415_vm5, %v1404_v34, %v872_v55 }
 0x172   : > { %1175 = vrot.lane.b32.xlu0 %v8277_v26, %s14027_s17 }
 0x174   : > { %v970_v18 = vpop.permute.xlu0 %969  ;;  %883 = vrot.lane.b32.xlu2 %v8214_v49, %s7696_s12 }
 0x175   : > { %1079 = vrot.lane.b32.xlu1 %v8284_v12, %s14029_s14  ;;  %v1470_v39 = vsel %vm1448_vm6, %v1437_v38, %v970_v18  ;;  %v8382_v18 = vperm.slane %v1595_v31, 0 }
 0x176   : > { %v778_v30 = vpop.permute.xlu2 %777  ;;  %v1503_v41 = vsel %vm1481_vm7, %v1470_v39, %v1068_v47 }
 0x177   : > { %v874_v40 = vpop.permute.xlu1 %873  ;;  %v1536_v43 = vsel %vm1514_vm8, %v1503_v41, %v1166_v60 }
 0x17a   : > { %657 = vrot.lane.b32.xlu0 %v8141_v3, %s7700_s16  ;;  %v1339_v3 = vsel %vm223_vm1, %v8004_v19, %v520_v27 }
 0x17b   : > { %v1372_v45 = vsel %vm1349_vm3, %v1339_v3, %v648_v16 }
 0x17c   : > { %v1264_v37 = vpop.permute.xlu0 %1263  ;;  %1177 = vrot.lane.b32.xlu2 %v8295_v42, %s14027_s17 }
 0x17d   : > { %v8303_v4 = vsel %vm1547_vm9, %v1536_v43, %v1264_v37  ;;  %531 = vrot.lane.b32.xlu1 %v8181_v32, %s7697_s13 }
 0x17e   : > { %7145 = vmatmul.msk.f32.gmra.mxu2 %vm1603_vm10, %v8303_v4  ;;  %v1072_v46 = vpop.permute.xlu2 %1071 }
 0x17f   : > { %v1168_v48 = vpop.permute.xlu1 %1167 }
 0x182   : > { %981 = vrot.lane.b32.xlu0 %v8229_v58, %s7694_s10 }
 0x184   : > { %v776_v51 = vpop.permute.xlu0 %775  ;;  %659 = vrot.lane.b32.xlu2 %v8208_v44, %s7700_s16 }
 0x185   : > { %885 = vrot.lane.b32.xlu1 %v8277_v26, %s7696_s12  ;;  %v1405_v32 = vsel %vm1382_vm4, %v1372_v45, %v776_v51 }
 0x186   : > { %v524_v52 = vpop.permute.xlu2 %523  ;;  %v1438_v19 = vsel %vm1415_vm5, %v1405_v32, %v874_v40 }
 0x187   : > { %v650_v55 = vpop.permute.xlu1 %649  ;;  %v1471_v59 = vsel %vm1448_vm6, %v1438_v19, %v972_v20  ;;  %v1341_v40 = vsel %vm223_vm1, %v8041_v29, %v524_v52  ;;  %v369_v29 = vld [vmem:[#allocation2 + $0x227] sm:$0xff] }
 0x18a   : > { %1275 = vrot.lane.b32.xlu0 %v8319_v54, %s7699_s15 }
 0x18c   : > { %v1070_v60 = vpop.permute.xlu0 %1069  ;;  %983 = vrot.lane.b32.xlu2 %v8255_v10, %s7694_s10 }
 0x18d   : > { %v1504_v44 = vsel %vm1481_vm7, %v1471_v59, %v1070_v60  ;;  %1179 = vrot.lane.b32.xlu1 %v8324_v57, %s14027_s17  ;;  %v405_v59 = vld [vmem:[#allocation2 + $0x228] sm:$0xff]  ;;  %v270_v60 = vld [vmem:[%s7795_s9] sm:$0xff] }
 0x18e   : > { %v1537_v61 = vsel %vm1514_vm8, %v1504_v44, %v1168_v48  ;;  %v878_v63 = vpop.permute.xlu2 %877  ;;  %v404_v48 = vld [vmem:[#allocation2 + $0x210] sm:$0xff]  ;;  %303 = vst.msk [vmem:[#allocation2 + $0x28] sm:$0xff] %vm223_vm1, %v270_v60 }
 0x18f   : > { %v8334_v0 = vsel %vm1547_vm9, %v1537_v61, %v1266_v24  ;;  %v974_v2 = vpop.permute.xlu1 %973  ;;  %v8363_v24 = vld [vmem:[#allocation2 + $0x211] sm:$0xff] }
 0x190   : > { %7146 = vmatmul.msk.f32.gmra.mxu2 %vm1603_vm10, %v8334_v0 }
 0x192   : > { %787 = vrot.lane.b32.xlu0 %v8251_v9, %s7695_s11 }
 0x194   : > { %v522_v50 = vpop.permute.xlu0 %521  ;;  %1277 = vrot.lane.b32.xlu2 %v8338_v5, %s7699_s15 }
 0x195   : > { %661 = vrot.lane.b32.xlu1 %v8229_v58, %s7700_s16  ;;  %v1340_v6 = vsel %vm223_vm1, %v8034_v28, %v522_v50 }
 0x196   : > { %v1172_v16 = vpop.permute.xlu2 %1171  ;;  %v1373_v14 = vsel %vm1349_vm3, %v1340_v6, %v650_v55  ;;  %v272_v6 = vld [vmem:[%s7795_s9 + $0x10] sm:$0xff] }
 0x197   : > { %v1268_v13 = vpop.permute.xlu1 %1267  ;;  %v1406_v20 = vsel %vm1382_vm4, %v1373_v14, %v778_v30  ;;  %305 = vst.msk [vmem:[#allocation2 + $0x48] sm:$0xff] %vm223_vm1, %v272_v6 }
 0x19a   : > { %1081 = vrot.lane.b32.xlu0 %v367_v7, %s14029_s14 }
 0x19c   : > { %v876_v15 = vpop.permute.xlu0 %875  ;;  %789 = vrot.lane.b32.xlu2 %v8284_v12, %s7695_s11 }
 0x19d   : > { %985 = vrot.lane.b32.xlu1 %v8319_v54, %s7694_s10  ;;  %v1439_v58 = vsel %vm1415_vm5, %v1406_v20, %v876_v15 }
 0x19e   : > { %v8356_v47 = vpop.permute.xlu2 %653  ;;  %v1472_v21 = vsel %vm1448_vm6, %v1439_v58, %v974_v2 }
 0x19f   : > { %v780_v28 = vpop.permute.xlu1 %779  ;;  %v1505_v25 = vsel %vm1481_vm7, %v1472_v21, %v1072_v46 }
 0x1a2   : > { %533 = vrot.lane.b32.xlu0 %v8214_v49, %s7697_s13 }
 0x1a4   : > { %v1170_v27 = vpop.permute.xlu0 %1169  ;;  %1083 = vrot.lane.b32.xlu2 %v8359_v23, %s14029_s14 }
 0x1a5   : > { %v1538_v33 = vsel %vm1514_vm8, %v1505_v25, %v1170_v27  ;;  %1279 = vrot.lane.b32.xlu1 %v8363_v24, %s7699_s15 }
 0x1a6   : > { %v8376_v49 = vsel %vm1547_vm9, %v1538_v33, %v1268_v13  ;;  %v8378_v34 = vpop.permute.xlu2 %977 }
 0x1a7   : > { %7147 = vmatmul.msk.f32.gmra.mxu2 %vm1603_vm10, %v8376_v49  ;;  %v1074_v38 = vpop.permute.xlu1 %1073 }
 0x1aa   : > { %887 = vrot.lane.b32.xlu0 %v8295_v42, %s7696_s12  ;;  %v1778_v39 = vpop.f32.mrf.mxu2 }
 0x1ab   : > { %v1779_v30 = vadd.f32 %v1778_v39, %v8382_v18 }
 0x1ac   : > { %v652_v41 = vpop.permute.xlu0 %651  ;;  %535 = vrot.lane.b32.xlu2 %v8277_v26, %s7697_s13 }
 0x1ad   : > { %v2100_v37 = vmax.f32 %v1779_v30, 0.0  ;;  %791 = vrot.lane.b32.xlu1 %v367_v7, %s7695_s11  ;;  %v1374_v46 = vsel %vm1349_vm3, %v1341_v40, %v652_v41 }
 0x1ae   : > { %v1272_v43 = vpop.permute.xlu2 %1271  ;;  %v1407_v45 = vsel %vm1382_vm4, %v1374_v46, %v780_v28  ;;  %v273_v28 = vld [vmem:[%s7795_s9 + $0x18] sm:$0xff]  ;;  %v370_v46 = vld [vmem:[#allocation2 + $0x22f] sm:$0xff] }
 0x1af   : > { %2180 = vst [vmem:[%s8394_s23 + $0x198] sm:$0xff] %v2100_v37  ;;  %v526_v3 = vpop.permute.xlu1 %525  ;;  %v1440_v26 = vsel %vm1415_vm5, %v1407_v45, %v878_v63 }
 0x1b0   : > { %v1342_v2 = vsel %vm223_vm1, %v8062_v35, %v526_v3  ;;  %306 = vst.msk [vmem:[#allocation2 + $0x50] sm:$0xff] %vm223_vm1, %v273_v28  ;;  %v8469_v3 = vld [vmem:[#allocation2 + $0x27] sm:$0xff] }
 0x1b2   : > { %1181 = vrot.lane.b32.xlu0 %v404_v48, %s14027_s17 }
 0x1b4   : > { %v976_v51 = vpop.permute.xlu0 %975  ;;  %889 = vrot.lane.b32.xlu2 %v8324_v57, %s7696_s12 }
 0x1b5   : > { %1085 = vrot.lane.b32.xlu1 %v369_v29, %s14029_s14  ;;  %v1473_v32 = vsel %vm1448_vm6, %v1440_v26, %v976_v51 }
 0x1b6   : > { %v8405_v52 = vpop.permute.xlu2 %783  ;;  %v1506_v19 = vsel %vm1481_vm7, %v1473_v32, %v1074_v38  ;;  %v371_v32 = vld [vmem:[#allocation2 + $0x8] sm:$0xff] }
 0x1b7   : > { %v880_v55 = vpop.permute.xlu1 %879  ;;  %v1539_v44 = vsel %vm1514_vm8, %v1506_v19, %v1172_v16  ;;  %v271_v16 = vld [vmem:[%s7795_s9 + $0x8] sm:$0xff] }
 0x1b8   : > { %304 = vst.msk [vmem:[#allocation2 + $0x30] sm:$0xff] %vm223_vm1, %v271_v16  ;;  %v8488_v60 = vld [vmem:[#allocation2 + $0x49] sm:$0xff] }
 0x1b9   : > { %v372_v16 = vld [vmem:[#allocation2 + $0x10] sm:$0xff] }
 0x1ba   : > { %663 = vrot.lane.b32.xlu0 %v8255_v10, %s7700_s16 }
 0x1bc   : > { %v1270_v57 = vpop.permute.xlu0 %1269  ;;  %1183 = vrot.lane.b32.xlu2 %v405_v59, %s14027_s17  ;;  %v8485_v59 = vld [vmem:[#allocation2 + $0x47] sm:$0xff] }
 0x1bd   : > { %v8415_v61 = vsel %vm1547_vm9, %v1539_v44, %v1270_v57  ;;  %537 = vrot.lane.b32.xlu1 %v8295_v42, %s7697_s13  ;;  %v1375_v42 = vsel %vm1349_vm3, %v1342_v2, %v8356_v47  ;;  %v406_v47 = vld [vmem:[#allocation2 + $0x230] sm:$0xff] }
 0x1be   : > { %7148 = vmatmul.msk.f32.gmra.mxu2 %vm1603_vm10, %v8415_v61  ;;  %v8421_v63 = vpop.permute.xlu2 %1077 }
 0x1bf   : > { %v1174_v10 = vpop.permute.xlu1 %1173  ;;  %v8473_v45 = vld [vmem:[#allocation2 + $0x29] sm:$0xff] }
 0x1c1   : > { %v1781_v50 = vpop.f32.mrf.mxu2 }
 0x1c2   : > { %v1782_v7 = vadd.f32 %v1781_v50, %v8382_v18  ;;  %987 = vrot.lane.b32.xlu0 %v8338_v5, %s7694_s10  ;;  %v441_v5 = vld [vmem:[#allocation2 + $0x229] sm:$0xff] }
 0x1c3   : > { %v373_v50 = vld [vmem:[#allocation2 + $0x28] sm:$0xff] }
 0x1c4   : > { %v2103_v13 = vmax.f32 %v1782_v7, 0.0  ;;  %v782_v14 = vpop.permute.xlu0 %781  ;;  %665 = vrot.lane.b32.xlu2 %v8319_v54, %s7700_s16  ;;  %v8505_v7 = vld [vmem:[#allocation2 + $0x2f] sm:$0xff] }
 0x1c5   : > { %891 = vrot.lane.b32.xlu1 %v404_v48, %s7696_s12  ;;  %v1408_v35 = vsel %vm1382_vm4, %v1375_v42, %v782_v14 }
 0x1c6   : > { %2182 = vst [vmem:[%s8394_s23 + $0x1b0] sm:$0xff] %v2103_v13  ;;  %v8439_v15 = vpop.permute.xlu2 %529  ;;  %v1441_v58 = vsel %vm1415_vm5, %v1408_v35, %v880_v55 }
 0x1c7   : > { %v656_v20 = vpop.permute.xlu1 %655  ;;  %v1474_v54 = vsel %vm1448_vm6, %v1441_v58, %v8378_v34  ;;  %v442_v34 = vld [vmem:[#allocation2 + $0x231] sm:$0xff]  ;;  %v1344_v13 = vsel %vm223_vm1, %v8136_v1, %v8439_v15  ;;  %v8516_v58 = vld [vmem:[#allocation2 + $0x48] sm:$0xff] }
 0x1c8   : > { %v8525_v15 = vld [vmem:[#allocation2 + $0x4f] sm:$0xff] }
 0x1ca   : > { %1281 = vrot.lane.b32.xlu0 %v441_v5, %s7699_s15 }
 0x1cc   : > { %v1076_v21 = vpop.permute.xlu0 %1075  ;;  %989 = vrot.lane.b32.xlu2 %v8363_v24, %s7694_s10  ;;  %v407_v24 = vld [vmem:[#allocation2 + $0x9] sm:$0xff] }
 0x1cd   : > { %v1507_v25 = vsel %vm1481_vm7, %v1474_v54, %v1076_v21  ;;  %1185 = vrot.lane.b32.xlu1 %v406_v47, %s14027_s17  ;;  %v8518_v47 = vld [vmem:[#allocation2 + $0x30] sm:$0xff]  ;;  %v274_v54 = vld [vmem:[%s7795_s9 + $0x20] sm:$0xff]  ;;  %v275_v21 = vld [vmem:[%s7795_s9 + $0x28] sm:$0xff] }
 0x1ce   : > { %v1540_v27 = vsel %vm1514_vm8, %v1507_v25, %v1174_v10  ;;  %v8452_v31 = vpop.permute.xlu2 %883  ;;  %307 = vst.msk [vmem:[#allocation2 + $0x68] sm:$0xff] %vm223_vm1, %v274_v54 }
 0x1cf   : > { %v8455_v33 = vsel %vm1547_vm9, %v1540_v27, %v1272_v43  ;;  %v980_v38 = vpop.permute.xlu1 %979  ;;  %308 = vst.msk [vmem:[#allocation2 + $0x70] sm:$0xff] %vm223_vm1, %v275_v21 }
 0x1d0   : > { %7149 = vmatmul.msk.f32.gmra.mxu2 %vm1603_vm10, %v8455_v33 }
 0x1d2   : > { %793 = vrot.lane.b32.xlu0 %v8359_v23, %s7695_s11 }
 0x1d3   : > { %v1784_v39 = vpop.f32.mrf.mxu2 }
 0x1d4   : > { %v1785_v30 = vadd.f32 %v1784_v39, %v8382_v18  ;;  %v528_v40 = vpop.permute.xlu0 %527  ;;  %1283 = vrot.lane.b32.xlu2 %v442_v34, %s7699_s15 }
 0x1d5   : > { %603 = vrot.lane.b32.xlu1 %v407_v24, %s7700_s16  ;;  %v1343_v43 = vsel %vm223_vm1, %v8121_v53, %v528_v40  ;;  %v408_v24 = vld [vmem:[#allocation2 + $0x11] sm:$0xff]  ;;  %v8592_v21 = vld [vmem:[#allocation2 + $0x67] sm:$0xff] }
 0x1d6   : > { %v2106_v41 = vmax.f32 %v1785_v30, 0.0  ;;  %v8464_v37 = vpop.permute.xlu2 %1177  ;;  %v1376_v23 = vsel %vm1349_vm3, %v1343_v43, %v656_v20  ;;  %v8537_v40 = vld [vmem:[#allocation2 + $0x50] sm:$0xff] }
 0x1d7   : > { %v1274_v48 = vpop.permute.xlu1 %1273  ;;  %v1409_v51 = vsel %vm1382_vm4, %v1376_v23, %v8405_v52 }
 0x1d8   : > { %2184 = vst [vmem:[%s8394_s23 + $0x1c8] sm:$0xff] %v2106_v41 }
 0x1da   : > { %1087 = vrot.lane.b32.xlu0 %v370_v46, %s14029_s14 }
 0x1dc   : > { %v882_v29 = vpop.permute.xlu0 %881  ;;  %731 = vrot.lane.b32.xlu2 %v8469_v3, %s7695_s11 }
 0x1dd   : > { %927 = vrot.lane.b32.xlu1 %v8473_v45, %s7694_s10  ;;  %v1442_v53 = vsel %vm1415_vm5, %v1409_v51, %v882_v29 }
 0x1de   : > { %v8482_v26 = vpop.permute.xlu2 %659  ;;  %v1475_v19 = vsel %vm1448_vm6, %v1442_v53, %v980_v38 }
 0x1df   : > { %v786_v55 = vpop.permute.xlu1 %785  ;;  %v1508_v52 = vsel %vm1481_vm7, %v1475_v19, %v8421_v63 }
 0x1e2   : > { %475 = vrot.lane.b32.xlu0 %v371_v32, %s7697_s13 }
 0x1e4   : > { %v1176_v57 = vpop.permute.xlu0 %1175  ;;  %1025 = vrot.lane.b32.xlu2 %v8485_v59, %s14029_s14 }
 0x1e5   : > { %v1541_v44 = vsel %vm1514_vm8, %v1508_v52, %v1176_v57  ;;  %1221 = vrot.lane.b32.xlu1 %v8488_v60, %s7699_s15  ;;  %v8562_v52 = vld [vmem:[#allocation2 + $0x51] sm:$0xff] }
 0x1e6   : > { %v8498_v10 = vsel %vm1547_vm9, %v1541_v44, %v1274_v48  ;;  %v8500_v2 = vpop.permute.xlu2 %983  ;;  %v410_v48 = vld [vmem:[#allocation2 + $0x31] sm:$0xff] }
 0x1e7   : > { %7150 = vmatmul.msk.f32.gmra.mxu2 %vm1603_vm10, %v8498_v10  ;;  %v1080_v63 = vpop.permute.xlu1 %1079 }
 0x1ea   : > { %v1787_v6 = vpop.f32.mrf.mxu2  ;;  %829 = vrot.lane.b32.xlu0 %v373_v50, %s7696_s12 }
 0x1eb   : > { %v1788_v42 = vadd.f32 %v1787_v6, %v8382_v18 }
 0x1ec   : > { %v658_v14 = vpop.permute.xlu0 %657  ;;  %477 = vrot.lane.b32.xlu2 %v372_v16, %s7697_s13 }
 0x1ed   : > { %v2109_v35 = vmax.f32 %v1788_v42, 0.0  ;;  %733 = vrot.lane.b32.xlu1 %v8505_v7, %s7695_s11  ;;  %v1377_v20 = vsel %vm1349_vm3, %v1344_v13, %v658_v14 }
 0x1ee   : > { %v1278_v5 = vpop.permute.xlu2 %1277  ;;  %v1410_v1 = vsel %vm1382_vm4, %v1377_v20, %v786_v55 }
 0x1ef   : > { %2186 = vst [vmem:[%s8394_s23 + $0x1e0] sm:$0xff] %v2109_v35  ;;  %v532_v28 = vpop.permute.xlu1 %531  ;;  %v1443_v27 = vsel %vm1415_vm5, %v1410_v1, %v8452_v31 }
 0x1f0   : > { %v1345_v29 = vsel %vm223_vm1, %v8172_v22, %v532_v28 }
 0x1f1   : > { %v1378_v53 = vsel %vm1349_vm3, %v1345_v29, %v8482_v26  ;;  %v8567_v26 = vld [vmem:[#allocation2 + $0x68] sm:$0xff] }
 0x1f2   : > { %1123 = vrot.lane.b32.xlu0 %v8516_v58, %s14027_s17 }
 0x1f4   : > { %v982_v25 = vpop.permute.xlu0 %981  ;;  %831 = vrot.lane.b32.xlu2 %v8518_v47, %s7696_s12 }
 0x1f5   : > { %1027 = vrot.lane.b32.xlu1 %v8525_v15, %s14029_s14  ;;  %v1476_v38 = vsel %vm1448_vm6, %v1443_v27, %v982_v25  ;;  %v276_v25 = vld [vmem:[%s7795_s9 + $0x30] sm:$0xff] }
 0x1f6   : > { %v790_v34 = vpop.permute.xlu2 %789  ;;  %v1509_v30 = vsel %vm1481_vm7, %v1476_v38, %v1080_v63  ;;  %309 = vst.msk [vmem:[#allocation2 + $0x88] sm:$0xff] %vm223_vm1, %v276_v25  ;;  %v1593_v25 = vld [vmem:[%s14021_s1 + $0x68] sm:$0xf] }
 0x1f7   : > { %v886_v39 = vpop.permute.xlu1 %885  ;;  %v1542_v43 = vsel %vm1514_vm8, %v1509_v30, %v8464_v37  ;;  %7156 = vmatpush.msk.msra.mxu1 %vm1700_vm2, %v1593_v25  ;;  %7231 = vmatpush.msk.msra.mxu3 %vm1700_vm2, %v1593_v25 }
 0x1fa   : > { %605 = vrot.lane.b32.xlu0 %v408_v24, %s7700_s16 }
 0x1fc   : > { %v1276_v41 = vpop.permute.xlu0 %1275  ;;  %1125 = vrot.lane.b32.xlu2 %v8537_v40, %s14027_s17 }
 0x1fd   : > { %v8545_v31 = vsel %vm1547_vm9, %v1542_v43, %v1276_v41  ;;  %479 = vrot.lane.b32.xlu1 %v373_v50, %s7697_s13  ;;  %v8609_v43 = vld [vmem:[#allocation2 + $0x6f] sm:$0xff] }
 0x1fe   : > { %7151 = vmatmul.msk.f32.gmra.mxu2 %vm1603_vm10, %v8545_v31  ;;  %v1084_v46 = vpop.permute.xlu2 %1083 }
 0x1ff   : > { %v1180_v23 = vpop.permute.xlu1 %1179 }
 0x201   : > { %v1790_v51 = vpop.f32.mrf.mxu2 }
 0x202   : > { %v1791_v37 = vadd.f32 %v1790_v51, %v8382_v18  ;;  %929 = vrot.lane.b32.xlu0 %v410_v48, %s7694_s10 }
 0x204   : > { %v2112_v32 = vmax.f32 %v1791_v37, 0.0  ;;  %v788_v55 = vpop.permute.xlu0 %787  ;;  %607 = vrot.lane.b32.xlu2 %v8473_v45, %s7700_s16 }
 0x205   : > { %833 = vrot.lane.b32.xlu1 %v8516_v58, %s7696_s12  ;;  %v1411_v19 = vsel %vm1382_vm4, %v1378_v53, %v788_v55 }
 0x206   : > { %2188 = vst [vmem:[%s8394_s23 + $0x1f8] sm:$0xff] %v2112_v32  ;;  %v536_v22 = vpop.permute.xlu2 %535  ;;  %v1444_v44 = vsel %vm1415_vm5, %v1411_v19, %v886_v39 }
 0x207   : > { %v662_v57 = vpop.permute.xlu1 %661  ;;  %v1477_v45 = vsel %vm1448_vm6, %v1444_v44, %v8500_v2  ;;  %v8582_v2 = vld [vmem:[#allocation2 + $0x69] sm:$0xff]  ;;  %v1347_v55 = vsel %vm223_vm1, %v8251_v9, %v536_v22 }
 0x208   : > { %v8648_v9 = vld [vmem:[#allocation2 + $0x87] sm:$0xff] }
 0x20a   : > { %1223 = vrot.lane.b32.xlu0 %v8562_v52, %s7699_s15 }
 0x20c   : > { %v1082_v50 = vpop.permute.xlu0 %1081  ;;  %931 = vrot.lane.b32.xlu2 %v8488_v60, %s7694_s10 }
 0x20d   : > { %v1510_v63 = vsel %vm1481_vm7, %v1477_v45, %v1082_v50  ;;  %1127 = vrot.lane.b32.xlu1 %v8567_v26, %s14027_s17  ;;  %v8643_v50 = vld [vmem:[#allocation2 + $0x70] sm:$0xff] }
 0x20e   : > { %v1543_v16 = vsel %vm1514_vm8, %v1510_v63, %v1180_v23  ;;  %v890_v6 = vpop.permute.xlu2 %889  ;;  %v8614_v23 = vld [vmem:[#allocation2 + $0x71] sm:$0xff] }
 0x20f   : > { %v8578_v42 = vsel %vm1547_vm9, %v1543_v16, %v1278_v5  ;;  %v986_v13 = vpop.permute.xlu1 %985 }
 0x210   : > { %7152 = vmatmul.msk.f32.gmra.mxu2 %vm1603_vm10, %v8578_v42 }
 0x212   : > { %735 = vrot.lane.b32.xlu0 %v8485_v59, %s7695_s11 }
 0x213   : > { %v1793_v14 = vpop.f32.mrf.mxu2 }
 0x214   : > { %v1794_v35 = vadd.f32 %v1793_v14, %v8382_v18  ;;  %v534_v20 = vpop.permute.xlu0 %533  ;;  %1225 = vrot.lane.b32.xlu2 %v8582_v2, %s7699_s15 }
 0x215   : > { %609 = vrot.lane.b32.xlu1 %v410_v48, %s7700_s16  ;;  %v1346_v54 = vsel %vm223_vm1, %v8239_v62, %v534_v20  ;;  %v277_v48 = vld [vmem:[%s7795_s9 + $0x38] sm:$0xff] }
 0x216   : > { %v2115_v5 = vmax.f32 %v1794_v35, 0.0  ;;  %v1184_v28 = vpop.permute.xlu2 %1183  ;;  %v1379_v27 = vsel %vm1349_vm3, %v1346_v54, %v662_v57  ;;  %310 = vst.msk [vmem:[#allocation2 + $0x90] sm:$0xff] %vm223_vm1, %v277_v48  ;;  %v8698_v48 = vld [vmem:[#allocation2 + $0x108] sm:$0xff] }
 0x217   : > { %v1280_v1 = vpop.permute.xlu1 %1279  ;;  %v1412_v24 = vsel %vm1382_vm4, %v1379_v27, %v790_v34  ;;  %v1590_v27 = vld [vmem:[%s14021_s1 + $0x50] sm:$0xff] }
 0x218   : > { %2190 = vst [vmem:[%s8394_s23 + $0x210] sm:$0xff] %v2115_v5  ;;  %v8659_v5 = vld [vmem:[#allocation2 + $0x88] sm:$0xff]  ;;  %1835 = vmatpush.msra.mxu1 %v1590_v27  ;;  %7232 = vmatpush.msra.mxu3 %v1590_v27 }
 0x21a   : > { %1029 = vrot.lane.b32.xlu0 %v8592_v21, %s14029_s14 }
 0x21c   : > { %v888_v38 = vpop.permute.xlu0 %887  ;;  %737 = vrot.lane.b32.xlu2 %v8525_v15, %s7695_s11 }
 0x21d   : > { %933 = vrot.lane.b32.xlu1 %v8562_v52, %s7694_s10  ;;  %v1445_v62 = vsel %vm1415_vm5, %v1412_v24, %v888_v38  ;;  %v1587_v24 = vld [vmem:[%s14021_s1 + $0x38] sm:$0xff] }
 0x21e   : > { %v8606_v39 = vpop.permute.xlu2 %665  ;;  %v1478_v41 = vsel %vm1448_vm6, %v1445_v62, %v986_v13  ;;  %1836 = vmatpush.msra.mxu1 %v1587_v24  ;;  %7233 = vmatpush.msra.mxu3 %v1587_v24 }
 0x21f   : > { %v792_v30 = vpop.permute.xlu1 %791  ;;  %v1511_v34 = vsel %vm1481_vm7, %v1478_v41, %v1084_v46 }
 0x222   : > { %481 = vrot.lane.b32.xlu0 %v8518_v47, %s7697_s13 }
 0x224   : > { %v1182_v29 = vpop.permute.xlu0 %1181  ;;  %1031 = vrot.lane.b32.xlu2 %v8609_v43, %s14029_s14 }
 0x225   : > { %v1544_v51 = vsel %vm1514_vm8, %v1511_v34, %v1182_v29  ;;  %1227 = vrot.lane.b32.xlu1 %v8614_v23, %s7699_s15  ;;  %v8703_v29 = vld [vmem:[#allocation2 + $0x109] sm:$0xff] }
 0x226   : > { %v8624_v37 = vsel %vm1547_vm9, %v1544_v51, %v1280_v1  ;;  %v8626_v47 = vpop.permute.xlu2 %989  ;;  %v1585_v51 = vld [vmem:[%s14021_s1 + $0x28] sm:$0xff] }
 0x227   : > { %7153 = vmatmul.msk.f32.gmra.mxu2 %vm1603_vm10, %v8624_v37  ;;  %v1086_v53 = vpop.permute.xlu1 %1085 }
 0x22a   : > { %v1796_v46 = vpop.f32.mrf.mxu2  ;;  %835 = vrot.lane.b32.xlu0 %v8537_v40, %s7696_s12 }
 0x22b   : > { %v1797_v32 = vadd.f32 %v1796_v46, %v8382_v18 }
 0x22c   : > { %v664_v19 = vpop.permute.xlu0 %663  ;;  %483 = vrot.lane.b32.xlu2 %v8516_v58, %s7697_s13 }
 0x22d   : > { %v2118_v57 = vmax.f32 %v1797_v32, 0.0  ;;  %739 = vrot.lane.b32.xlu1 %v8592_v21, %s7695_s11  ;;  %v1380_v45 = vsel %vm1349_vm3, %v1347_v55, %v664_v19  ;;  %v1581_v55 = vld [vmem:[%s14021_s1 + $0x8] sm:$0xff] }
 0x22e   : > { %v8639_v44 = vpop.permute.xlu2 %1283  ;;  %v1413_v16 = vsel %vm1382_vm4, %v1380_v45, %v792_v30  ;;  %v1588_v30 = vld [vmem:[%s14021_s1 + $0x40] sm:$0xff]  ;;  %v8727_v45 = vld [vmem:[#allocation2 + $0x89] sm:$0xff] }
 0x22f   : > { %2192 = vst [vmem:[%s8394_s23 + $0x228] sm:$0xff] %v2118_v57  ;;  %v538_v63 = vpop.permute.xlu1 %537  ;;  %v1446_v22 = vsel %vm1415_vm5, %v1413_v16, %v890_v6 }
 0x230   : > { %v1348_v62 = vsel %vm223_vm1, %v8284_v12, %v538_v63  ;;  %v1584_v12 = vld [vmem:[%s14021_s1 + $0x20] sm:$0xff] }
 0x231   : > { %1837 = vmatpush.msra.mxu1 %v1584_v12  ;;  %7234 = vmatpush.msra.mxu3 %v1584_v12  ;;  %v278_v12 = vld [vmem:[%s7795_s9 + $0x40] sm:$0xff] }
 0x232   : > { %1129 = vrot.lane.b32.xlu0 %v8643_v50, %s14027_s17  ;;  %311 = vst.msk [vmem:[#allocation2 + $0xa8] sm:$0xff] %vm223_vm1, %v278_v12 }
 0x233   : > { %1838 = vmatpush.msra.mxu1 %v1581_v55  ;;  %7235 = vmatpush.msra.mxu3 %v1581_v55 }
 0x234   : > { %v988_v58 = vpop.permute.xlu0 %987  ;;  %837 = vrot.lane.b32.xlu2 %v8567_v26, %s7696_s12 }
 0x235   : > { %1033 = vrot.lane.b32.xlu1 %v8648_v9, %s14029_s14  ;;  %v1479_v13 = vsel %vm1448_vm6, %v1446_v22, %v988_v58  ;;  %s14168_s14 = smov 24  }
 0x236   : > { %v8656_v14 = vpop.permute.xlu2 %731  ;;  %v1512_v20 = vsel %vm1481_vm7, %v1479_v13, %v1086_v53  ;;  %v1381_v53 = vsel %vm1349_vm3, %v1348_v62, %v8606_v39  ;;  %v1582_v39 = vld [vmem:[%s14021_s1 + $0x10] sm:$0xff] }
 0x237   : > { %v892_v35 = vpop.permute.xlu1 %891  ;;  %v1545_v1 = vsel %vm1514_vm8, %v1512_v20, %v1184_v28 }
 0x23a   : > { %611 = vrot.lane.b32.xlu0 %v8488_v60, %s7700_s16  ;;  %v1594_v60 = vld [vmem:[%s14021_s1 + $0x70] sm:$0xf] }
 0x23b   : > { %7189 = vmatpush.msk.msrb.mxu2 %vm1700_vm2, %v1594_v60  ;;  %v335_v60 = vld [vmem:[#allocation2 + $0x7] sm:$0xff] }
 0x23c   : > { %v1282_v54 = vpop.permute.xlu0 %1281  ;;  %1131 = vrot.lane.b32.xlu2 %v8659_v5, %s14027_s17  ;;  %s14169_s17 = smov 28  }
 0x23d   : > { %v8667_v6 = vsel %vm1547_vm9, %v1545_v1, %v1282_v54  ;;  %485 = vrot.lane.b32.xlu1 %v8537_v40, %s7697_s13  ;;  %v1591_v40 = vld [vmem:[%s14021_s1 + $0x58] sm:$0xff] }
 0x23e   : > { %7154 = vmatmul.msk.f32.gmra.mxu2 %vm1603_vm10, %v8667_v6  ;;  %v8679_v28 = vpop.permute.xlu2 %1025 }
 0x23f   : > { %v1186_v38 = vpop.permute.xlu1 %1185  ;;  %1948 = vmatpush.msrb.mxu2 %v1591_v40  ;;  %v8751_v40 = vld [vmem:[#allocation2 + $0x128] sm:$0xff] }
 0x241   : > { %v1799_v41 = vpop.f32.mrf.mxu2  ;;  %1949 = vmatpush.msrb.mxu2 %v1588_v30  ;;  %v8763_v30 = vld [vmem:[#allocation2 + $0x8f] sm:$0xff] }
 0x242   : > { %v1800_v34 = vadd.f32 %v1799_v41, %v8382_v18  ;;  %935 = vrot.lane.b32.xlu0 %v8582_v2, %s7694_s10 }
 0x243   : > { %1950 = vmatpush.msrb.mxu2 %v1585_v51 }
 0x244   : > { %v2121_v46 = vmax.f32 %v1800_v34, 0.0  ;;  %v794_v32 = vpop.permute.xlu0 %793  ;;  %507 = vrot.lane.b32.xlu2 %v8698_v48, %s7697_s13  ;;  %v8768_v34 = vld [vmem:[#allocation2 + $0x90] sm:$0xff] }
 0x245   : > { %635 = vrot.lane.b32.xlu1 %v8703_v29, %s7700_s16  ;;  %v1414_v19 = vsel %vm1382_vm4, %v1381_v53, %v794_v32  ;;  %1951 = vmatpush.msrb.mxu2 %v1582_v39  ;;  %v279_v39 = vld [vmem:[%s7795_s9 + $0x48] sm:$0xff] }
 0x246   : > { %2194 = vst [vmem:[%s8394_s23 + $0x240] sm:$0xff] %v2121_v46  ;;  %v8725_v57 = vpop.permute.xlu2 %477  ;;  %v1447_v16 = vsel %vm1415_vm5, %v1414_v19, %v892_v35 }
 0x247   : > { %v604_v63 = vpop.permute.xlu1 %603  ;;  %v1480_v58 = vsel %vm1448_vm6, %v1447_v16, %v8626_v47  ;;  %312 = vst.msk [vmem:[#allocation2 + $0xb0] sm:$0xff] %vm223_vm1, %v279_v39 }
 0x24a   : > { %1229 = vrot.lane.b32.xlu0 %v8727_v45, %s7699_s15 }
 0x24c   : > { %v1088_v22 = vpop.permute.xlu0 %1087  ;;  %741 = vrot.lane.b32.xlu2 %v8609_v43, %s7695_s11 }
 0x24d   : > { %v1513_v13 = vsel %vm1481_vm7, %v1480_v58, %v1088_v22  ;;  %839 = vrot.lane.b32.xlu1 %v8643_v50, %s7696_s12  ;;  %v7308_v58 = vld [vmem:[#allocation2 + $0x149] sm:$0xff] }
 0x24e   : > { %v1546_v20 = vsel %vm1514_vm8, %v1513_v13, %v1186_v38  ;;  %v8740_v54 = vpop.permute.xlu2 %831 }
 0x24f   : > { %v8744_v35 = vsel %vm1547_vm9, %v1546_v20, %v8639_v44  ;;  %v928_v1 = vpop.permute.xlu1 %927  ;;  %v8755_v44 = vld [vmem:[#allocation2 + $0x129] sm:$0xff] }
 0x250   : > { %7155 = vmatmul.msk.f32.gmra.mxu2 %vm1603_vm10, %v8744_v35 }
 0x252   : > { %613 = vrot.lane.b32.xlu0 %v8562_v52, %s7700_s16 }
 0x253   : > { %v1802_v47 = vpop.f32.mrf.mxu2 }
 0x254   : > { %v1803_v25 = vadd.f32 %v1802_v47, %v8382_v18  ;;  %v476_v27 = vpop.permute.xlu0 %475  ;;  %861 = vrot.lane.b32.xlu2 %v8751_v40, %s7696_s12  ;;  %v7309_v47 = vld [vmem:[#allocation2 + $0x147] sm:$0xff] }
 0x255   : > { %959 = vrot.lane.b32.xlu1 %v8755_v44, %s7694_s10  ;;  %v1317_v52 = vsel %vm223_vm1, %v335_v60, %v476_v27 }
 0x256   : > { %v2124_v38 = vmax.f32 %v1803_v25, 0.0  ;;  %v8759_v24 = vpop.permute.xlu2 %1125  ;;  %v1350_v41 = vsel %vm1349_vm3, %v1317_v52, %v604_v63  ;;  %v7307_v63 = vld [vmem:[#allocation2 + $0x148] sm:$0xff] }
 0x257   : > { %v1222_v62 = vpop.permute.xlu1 %1221  ;;  %v1383_v53 = vsel %vm1382_vm4, %v1350_v41, %v8656_v14  ;;  %v8807_v41 = vld [vmem:[#allocation2 + $0x91] sm:$0xff] }
 0x258   : > { %2196 = vst [vmem:[%s8394_s23 + $0x258] sm:$0xff] %v2124_v38 }
 0x25a   : > { %763 = vrot.lane.b32.xlu0 %v8156_v11, %s7695_s11 }
 0x25c   : > { %v830_v51 = vpop.permute.xlu0 %829  ;;  %1035 = vrot.lane.b32.xlu2 %v8763_v30, %s14168_s14 }
 0x25d   : > { %1133 = vrot.lane.b32.xlu1 %v8768_v34, %s14169_s17  ;;  %v1416_v46 = vsel %vm1415_vm5, %v1383_v53, %v830_v51 }
 0x25e   : > { %v8779_v32 = vpop.permute.xlu2 %607  ;;  %v1449_v55 = vsel %vm1448_vm6, %v1416_v46, %v928_v1 }
 0x25f   : > { %v734_v11 = vpop.permute.xlu1 %733  ;;  %v1482_v14 = vsel %vm1481_vm7, %v1449_v55, %v8679_v28  ;;  %v336_v28 = vld [vmem:[#allocation2 + $0xf] sm:$0xff] }
 0x260   : > { %v1318_v60 = vsel %vm223_vm1, %v336_v28, %v8725_v57  ;;  %v8812_v57 = vld [vmem:[#allocation2 + $0xa7] sm:$0xff] }
 0x262   : > { %937 = vrot.lane.b32.xlu0 %v8614_v23, %s7694_s10 }
 0x264   : > { %v1124_v19 = vpop.permute.xlu0 %1123  ;;  %1155 = vrot.lane.b32.xlu2 %v7307_v63, %s14169_s17 }
 0x265   : > { %v1515_v16 = vsel %vm1514_vm8, %v1482_v14, %v1124_v19  ;;  %1253 = vrot.lane.b32.xlu1 %v7308_v58, %s7699_s15  ;;  %v8824_v19 = vld [vmem:[#allocation2 + $0xa8] sm:$0xff] }
 0x266   : > { %v1548_v22 = vsel %vm1547_vm9, %v1515_v16, %v1222_v62  ;;  %v8792_v13 = vpop.permute.xlu2 %931 }
 0x267   : > { %7124 = vmatmul.msk.f32.vlgmr.msra.gmra.mxu0 %vm1603_vm10, %v1548_v22  ;;  %7157 = vmatmul.msk.f32.vlgmr.msra.gmra.mxu1 %vm1603_vm10, %v1548_v22  ;;  %v1028_v20 = vpop.permute.xlu1 %1027 }
 0x268   : > { %7190 = vmatmul.msk.f32.vlgmr.msrb.gmra.mxu2 %vm1603_vm10, %v1548_v22 }
 0x26a   : > { %v1805_v1 = vpop.f32.mrf.mxu2  ;;  %1057 = vrot.lane.b32.xlu0 %v7309_v47, %s14168_s14 }
 0x26b   : > { %v1806_v25 = vadd.f32 %v1805_v1, %v8382_v18 }
 0x26c   : > { %v606_v27 = vpop.permute.xlu0 %605  ;;  %487 = vrot.lane.b32.xlu2 %v8567_v26, %s7697_s13 }
 0x26d   : > { %v2127_v38 = vmax.f32 %v1806_v25, 0.0  ;;  %743 = vrot.lane.b32.xlu1 %v8648_v9, %s7695_s11  ;;  %v1351_v62 = vsel %vm1349_vm3, %v1318_v60, %v606_v27  ;;  %v8855_v25 = vld [vmem:[#allocation2 + $0xa9] sm:$0xff] }
 0x26e   : > { %v1226_v52 = vpop.permute.xlu2 %1225  ;;  %v1384_v51 = vsel %vm1382_vm4, %v1351_v62, %v734_v11 }
 0x26f   : > { %2198 = vst [vmem:[%s8394_s23 + $0x270] sm:$0xff] %v2127_v38  ;;  %v480_v12 = vpop.permute.xlu1 %479  ;;  %v1417_v26 = vsel %vm1415_vm5, %v1384_v51, %v8740_v54  ;;  %v281_v38 = vld [vmem:[%s7795_s9 + $0x58] sm:$0xff] }
 0x270   : > { %314 = vst.msk [vmem:[#allocation2 + $0xd0] sm:$0xff] %vm223_vm1, %v281_v38 }
 0x272   : > { %1231 = vrot.lane.b32.xlu0 %v8807_v41, %s7699_s15 }
 0x274   : > { %v930_v53 = vpop.permute.xlu0 %929  ;;  %841 = vrot.lane.b32.xlu2 %v8659_v5, %s7696_s12 }
 0x275   : > { %1037 = vrot.lane.b32.xlu1 %v8812_v57, %s14168_s14  ;;  %v1450_v46 = vsel %vm1448_vm6, %v1417_v26, %v930_v53 }
 0x276   : > { %v8821_v55 = vpop.permute.xlu2 %737  ;;  %v1483_v39 = vsel %vm1481_vm7, %v1450_v46, %v1028_v20 }
 0x277   : > { %v834_v11 = vpop.permute.xlu1 %833  ;;  %v1516_v54 = vsel %vm1514_vm8, %v1483_v39, %v8759_v24  ;;  %v1319_v24 = vsel %vm223_vm1, %v8469_v3, %v480_v12 }
 0x278   : > { %v1352_v20 = vsel %vm1349_vm3, %v1319_v24, %v8779_v32  ;;  %v8860_v32 = vld [vmem:[#allocation2 + $0xb0] sm:$0xff] }
 0x27a   : > { %615 = vrot.lane.b32.xlu0 %v8582_v2, %s7700_s16 }
 0x27c   : > { %v1224_v14 = vpop.permute.xlu0 %1223  ;;  %1135 = vrot.lane.b32.xlu2 %v8824_v19, %s14169_s17 }
 0x27d   : > { %v1549_v63 = vsel %vm1547_vm9, %v1516_v54, %v1224_v14  ;;  %489 = vrot.lane.b32.xlu1 %v8643_v50, %s7697_s13  ;;  %v280_v50 = vld [vmem:[%s7795_s9 + $0x50] sm:$0xff] }
 0x27e   : > { %7125 = vmatmul.msk.f32.gmra.mxu0 %vm1603_vm10, %v1549_v63  ;;  %7158 = vmatmul.msk.f32.gmra.mxu1 %vm1603_vm10, %v1549_v63  ;;  %v8837_v16 = vpop.permute.xlu2 %1031  ;;  %313 = vst.msk [vmem:[#allocation2 + $0xc8] sm:$0xff] %vm223_vm1, %v280_v50 }
 0x27f   : > { %7191 = vmatmul.msk.f32.gmra.mxu2 %vm1603_vm10, %v1549_v63  ;;  %v1128_v2 = vpop.permute.xlu1 %1127 }
 0x281   : > { %v1808_v58 = vpop.f32.mrf.mxu2 }
 0x282   : > { %v1809_v22 = vadd.f32 %v1808_v58, %v8382_v18  ;;  %939 = vrot.lane.b32.xlu0 %v8727_v45, %s7694_s10 }
 0x284   : > { %v2130_v28 = vmax.f32 %v1809_v22, 0.0  ;;  %v736_v1 = vpop.permute.xlu0 %735  ;;  %617 = vrot.lane.b32.xlu2 %v8614_v23, %s7700_s16 }
 0x285   : > { %843 = vrot.lane.b32.xlu1 %v8768_v34, %s7696_s12  ;;  %v1385_v3 = vsel %vm1382_vm4, %v1352_v20, %v736_v1  ;;  %v8905_v1 = vld [vmem:[#allocation2 + $0xc7] sm:$0xff] }
 0x286   : > { %2200 = vst [vmem:[%s8394_s23 + $0x288] sm:$0xff] %v2130_v28  ;;  %v484_v47 = vpop.permute.xlu2 %483  ;;  %v1418_v27 = vsel %vm1415_vm5, %v1385_v3, %v834_v11  ;;  %v8909_v3 = vld [vmem:[#allocation2 + $0xc9] sm:$0xff] }
 0x287   : > { %v610_v60 = vpop.permute.xlu1 %609  ;;  %v1451_v62 = vsel %vm1448_vm6, %v1418_v27, %v8792_v13  ;;  %v8878_v13 = vld [vmem:[#allocation2 + $0xb1] sm:$0xff] }
 0x28a   : > { %1233 = vrot.lane.b32.xlu0 %v8855_v25, %s7699_s15 }
 0x28c   : > { %v1030_v23 = vpop.permute.xlu0 %1029  ;;  %941 = vrot.lane.b32.xlu2 %v8807_v41, %s7694_s10 }
 0x28d   : > { %v1484_v12 = vsel %vm1481_vm7, %v1451_v62, %v1030_v23  ;;  %1137 = vrot.lane.b32.xlu1 %v8860_v32, %s14169_s17 }
 0x28e   : > { %v1517_v51 = vsel %vm1514_vm8, %v1484_v12, %v1128_v2  ;;  %v8872_v53 = vpop.permute.xlu2 %837  ;;  %v8889_v2 = vld [vmem:[#allocation2 + $0xaf] sm:$0xff]  ;;  %v1321_v12 = vsel %vm223_vm1, %v8485_v59, %v484_v47 }
 0x28f   : > { %v1550_v26 = vsel %vm1547_vm9, %v1517_v51, %v1226_v52  ;;  %v934_v46 = vpop.permute.xlu1 %933  ;;  %v8942_v59 = vld [vmem:[#allocation2 + $0xcf] sm:$0xff] }
 0x290   : > { %7126 = vmatmul.msk.f32.gmra.mxu0 %vm1603_vm10, %v1550_v26  ;;  %7159 = vmatmul.msk.f32.gmra.mxu1 %vm1603_vm10, %v1550_v26  ;;  %v283_v47 = vld [vmem:[%s7795_s9 + $0x68] sm:$0xff] }
 0x291   : > { %7192 = vmatmul.msk.f32.gmra.mxu2 %vm1603_vm10, %v1550_v26  ;;  %316 = vst.msk [vmem:[#allocation2 + $0xf0] sm:$0xff] %vm223_vm1, %v283_v47 }
 0x292   : > { %745 = vrot.lane.b32.xlu0 %v8763_v30, %s7695_s11 }
 0x293   : > { %v1811_v11 = vpop.f32.mrf.mxu2 }
 0x294   : > { %v1812_v39 = vadd.f32 %v1811_v11, %v8382_v18  ;;  %v482_v14 = vpop.permute.xlu0 %481  ;;  %1235 = vrot.lane.b32.xlu2 %v8878_v13, %s7699_s15 }
 0x295   : > { %619 = vrot.lane.b32.xlu1 %v8727_v45, %s7700_s16  ;;  %v1320_v63 = vsel %vm223_vm1, %v8505_v7, %v482_v14 }
 0x296   : > { %v2133_v52 = vmax.f32 %v1812_v39, 0.0  ;;  %v1132_v54 = vpop.permute.xlu2 %1131  ;;  %v1353_v58 = vsel %vm1349_vm3, %v1320_v63, %v610_v60  ;;  %v8937_v39 = vld [vmem:[#allocation2 + $0xc8] sm:$0xff] }
 0x297   : > { %v1228_v24 = vpop.permute.xlu1 %1227  ;;  %v1386_v45 = vsel %vm1382_vm4, %v1353_v58, %v8821_v55 }
 0x298   : > { %2202 = vst [vmem:[%s8394_s23 + $0x2a0] sm:$0xff] %v2133_v52 }
 0x29a   : > { %1039 = vrot.lane.b32.xlu0 %v8889_v2, %s14168_s14 }
 0x29c   : > { %v836_v22 = vpop.permute.xlu0 %835  ;;  %747 = vrot.lane.b32.xlu2 %v8812_v57, %s7695_s11 }
 0x29d   : > { %943 = vrot.lane.b32.xlu1 %v8855_v25, %s7694_s10  ;;  %v1419_v7 = vsel %vm1415_vm5, %v1386_v45, %v836_v22 }
 0x29e   : > { %v8902_v50 = vpop.permute.xlu2 %507  ;;  %v1452_v28 = vsel %vm1448_vm6, %v1419_v7, %v934_v46 }
 0x29f   : > { %v740_v20 = vpop.permute.xlu1 %739  ;;  %v1485_v55 = vsel %vm1481_vm7, %v1452_v28, %v8837_v16 }
 0x2a2   : > { %491 = vrot.lane.b32.xlu0 %v8659_v5, %s7697_s13 }
 0x2a4   : > { %v1130_v60 = vpop.permute.xlu0 %1129  ;;  %1041 = vrot.lane.b32.xlu2 %v8905_v1, %s14168_s14 }
 0x2a5   : > { %v1518_v27 = vsel %vm1514_vm8, %v1485_v55, %v1130_v60  ;;  %1237 = vrot.lane.b32.xlu1 %v8909_v3, %s7699_s15 }
 0x2a6   : > { %v1551_v38 = vsel %vm1547_vm9, %v1518_v27, %v1228_v24  ;;  %v8919_v23 = vpop.permute.xlu2 %741 }
 0x2a7   : > { %7127 = vmatmul.msk.f32.gmra.mxu0 %vm1603_vm10, %v1551_v38  ;;  %7160 = vmatmul.msk.f32.gmra.mxu1 %vm1603_vm10, %v1551_v38  ;;  %v1034_v5 = vpop.permute.xlu1 %1033 }
 0x2a8   : > { %7193 = vmatmul.msk.f32.gmra.mxu2 %vm1603_vm10, %v1551_v38 }
 0x2aa   : > { %v1814_v16 = vpop.f32.mrf.mxu2  ;;  %845 = vrot.lane.b32.xlu0 %v8824_v19, %s7696_s12 }
 0x2ab   : > { %v1815_v62 = vadd.f32 %v1814_v16, %v8382_v18  ;;  %v8981_v16 = vld [vmem:[#allocation2 + $0xd1] sm:$0xff] }
 0x2ac   : > { %v612_v51 = vpop.permute.xlu0 %611  ;;  %493 = vrot.lane.b32.xlu2 %v8768_v34, %s7697_s13  ;;  %v282_v34 = vld [vmem:[%s7795_s9 + $0x60] sm:$0xff]  ;;  %s7649_s9 = scalar_lea.hbm %s14025_s5, 1536 }
 0x2ad   : > { %v2136_v26 = vmax.f32 %v1815_v62, 0.0  ;;  %749 = vrot.lane.b32.xlu1 %v8889_v2, %s7695_s11  ;;  %v1354_v11 = vsel %vm1349_vm3, %v1321_v12, %v612_v51  ;;  %315 = vst.msk [vmem:[#allocation2 + $0xe8] sm:$0xff] %vm223_vm1, %v282_v34 }
 0x2ae   : > { %v8933_v46 = vpop.permute.xlu2 %861  ;;  %v1387_v52 = vsel %vm1382_vm4, %v1354_v11, %v740_v20  ;;  %v8958_v20 = vld [vmem:[#allocation2 + $0xd0] sm:$0xff]  ;;  %v8993_v11 = vld [vmem:[#allocation2 + $0x107] sm:$0xff] }
 0x2af   : > { %2204 = vst [vmem:[%s8394_s23 + $0x2b8] sm:$0xff] %v2136_v26  ;;  %v486_v14 = vpop.permute.xlu1 %485  ;;  %v1420_v24 = vsel %vm1415_vm5, %v1387_v52, %v8872_v53  ;;  %v1333_v47 = vsel %vm223_vm1, %v8993_v11, %v8902_v50 }
 0x2b0   : > { %v1322_v50 = vsel %vm223_vm1, %v8525_v15, %v486_v14 }
 0x2b2   : > { %1139 = vrot.lane.b32.xlu0 %v8937_v39, %s14169_s17 }
 0x2b4   : > { %v936_v63 = vpop.permute.xlu0 %935  ;;  %847 = vrot.lane.b32.xlu2 %v8860_v32, %s7696_s12  ;;  %v8985_v12 = vld [vmem:[#allocation2 + $0xe8] sm:$0xff] }
 0x2b5   : > { %1043 = vrot.lane.b32.xlu1 %v8942_v59, %s14168_s14  ;;  %v1453_v58 = vsel %vm1448_vm6, %v1420_v24, %v936_v63  ;;  %v8995_v52 = vld [vmem:[#allocation2 + $0xe9] sm:$0xff] }
 0x2b6   : > { %v8955_v22 = vpop.permute.xlu2 %1035  ;;  %v1486_v7 = vsel %vm1481_vm7, %v1453_v58, %v1034_v5 }
 0x2b7   : > { %v636_v45 = vpop.permute.xlu1 %635  ;;  %v1519_v60 = vsel %vm1514_vm8, %v1486_v7, %v1132_v54 }
 0x2ba   : > { %621 = vrot.lane.b32.xlu0 %v8807_v41, %s7700_s16 }
 0x2bc   : > { %v1230_v28 = vpop.permute.xlu0 %1229  ;;  %1141 = vrot.lane.b32.xlu2 %v8958_v20, %s14169_s17 }
 0x2bd   : > { %v1552_v53 = vsel %vm1547_vm9, %v1519_v60, %v1230_v28  ;;  %495 = vrot.lane.b32.xlu1 %v8824_v19, %s7697_s13  ;;  %v1366_v28 = vsel %vm1349_vm3, %v1333_v47, %v636_v45  ;;  %v9010_v60 = vld [vmem:[#allocation2 + $0xe7] sm:$0xff] }
 0x2be   : > { %7128 = vmatmul.msk.f32.gmra.mxu0 %vm1603_vm10, %v1552_v53  ;;  %7161 = vmatmul.msk.f32.gmra.mxu1 %vm1603_vm10, %v1552_v53  ;;  %v1156_v55 = vpop.permute.xlu2 %1155 }
 0x2bf   : > { %7194 = vmatmul.msk.f32.gmra.mxu2 %vm1603_vm10, %v1552_v53  ;;  %v840_v41 = vpop.permute.xlu1 %839 }
 0x2c1   : > { %v1817_v27 = vpop.f32.mrf.mxu2 }
 0x2c2   : > { %v1818_v54 = vadd.f32 %v1817_v27, %v8382_v18  ;;  %945 = vrot.lane.b32.xlu0 %v8878_v13, %s7694_s10 }
 0x2c4   : > { %v2139_v38 = vmax.f32 %v1818_v54, 0.0  ;;  %v614_v5 = vpop.permute.xlu0 %613  ;;  %623 = vrot.lane.b32.xlu2 %v8855_v25, %s7700_s16 }
 0x2c5   : > { %849 = vrot.lane.b32.xlu1 %v8937_v39, %s7696_s12  ;;  %v1355_v54 = vsel %vm1349_vm3, %v1322_v50, %v614_v5 }
 0x2c6   : > { %2206 = vst [vmem:[%s8394_s23 + $0x2d0] sm:$0xff] %v2139_v38  ;;  %v8979_v19 = vpop.permute.xlu2 %487  ;;  %v1388_v15 = vsel %vm1382_vm4, %v1355_v54, %v8919_v23  ;;  %v9046_v23 = vld [vmem:[%s14024_s4] sm:$0x7] }
 0x2c7   : > { %v960_v62 = vpop.permute.xlu1 %959 }
 0x2ca   : > { %1239 = vrot.lane.b32.xlu0 %v8981_v16, %s7699_s15 }
 0x2cc   : > { %v764_v51 = vpop.permute.xlu0 %763  ;;  %947 = vrot.lane.b32.xlu2 %v8909_v3, %s7694_s10 }
 0x2cd   : > { %1143 = vrot.lane.b32.xlu1 %v8985_v12, %s14169_s17  ;;  %v1399_v27 = vsel %vm1382_vm4, %v1366_v28, %v764_v51 }
 0x2ce   : > { %v8991_v25 = vpop.permute.xlu2 %841 }
 0x2cf   : > { %v1134_v26 = vpop.permute.xlu1 %1133 }
 0x2d2   : > { %751 = vrot.lane.b32.xlu0 %v8905_v1, %s7695_s11 }
 0x2d3   : > { %v1820_v34 = vpop.f32.mrf.mxu2 }
 0x2d4   : > { %v1821_v63 = vadd.f32 %v1820_v34, %v8382_v18  ;;  %v938_v24 = vpop.permute.xlu0 %937  ;;  %1241 = vrot.lane.b32.xlu2 %v8995_v52, %s7699_s15 }
 0x2d5   : > { %625 = vrot.lane.b32.xlu1 %v8878_v13, %s7700_s16  ;;  %v1432_v13 = vsel %vm1415_vm5, %v1399_v27, %v8933_v46  ;;  %v1421_v46 = vsel %vm1415_vm5, %v1388_v15, %v840_v41  ;;  %v9051_v41 = vld [vmem:[#allocation2 + $0xf1] sm:$0xff] }
 0x2d6   : > { %v2142_v58 = vmax.f32 %v1821_v63, 0.0  ;;  %v9007_v7 = vpop.permute.xlu2 %1135  ;;  %v1465_v38 = vsel %vm1448_vm6, %v1432_v13, %v960_v62  ;;  %v1454_v47 = vsel %vm1448_vm6, %v1421_v46, %v938_v24  ;;  %v9039_v63 = vld [vmem:[#allocation2 + $0xef] sm:$0xff] }
 0x2d7   : > { %v1254_v53 = vpop.permute.xlu1 %1253  ;;  %v1487_v24 = vsel %vm1481_vm7, %v1454_v47, %v8955_v22  ;;  %v9088_v46 = vld [vmem:[#allocation2 + $0xf0] sm:$0xff] }
 0x2d8   : > { %2208 = vst [vmem:[%s8394_s23 + $0x2e8] sm:$0xff] %v2142_v58  ;;  %v1520_v58 = vsel %vm1514_vm8, %v1487_v24, %v1134_v26 }
 0x2da   : > { %1045 = vrot.lane.b32.xlu0 %v9010_v60, %s14168_s14 }
 0x2dc   : > { %v1058_v45 = vpop.permute.xlu0 %1057  ;;  %753 = vrot.lane.b32.xlu2 %v8942_v59, %s7695_s11 }
 0x2dd   : > { %v1498_v34 = vsel %vm1481_vm7, %v1465_v38, %v1058_v45  ;;  %949 = vrot.lane.b32.xlu1 %v8981_v16, %s7694_s10  ;;  %v1323_v45 = vsel %vm223_vm1, %v8592_v21, %v8979_v19 }
 0x2de   : > { %v9029_v14 = vpop.permute.xlu2 %617  ;;  %v1531_v5 = vsel %vm1514_vm8, %v1498_v34, %v1156_v55  ;;  %v9049_v55 = vperm.slane %v9046_v23, 1 }
 0x2df   : > { %v9034_v62 = vsel %vm1547_vm9, %v1531_v5, %v1254_v53  ;;  %v744_v51 = vpop.permute.xlu1 %743 }
 0x2e0   : > { %7173 = vmatmul.msk.f32.vlgmr.msra.gmra.mxu3 %vm1603_vm10, %v9034_v62 }
 0x2e2   : > { %497 = vrot.lane.b32.xlu0 %v8860_v32, %s7697_s13 }
 0x2e4   : > { %v1232_v28 = vpop.permute.xlu0 %1231  ;;  %v1727_v53 = vpop.f32.mrf.mxu0  ;;  %1047 = vrot.lane.b32.xlu2 %v9039_v63, %s14168_s14 }
 0x2e5   : > { %v1728_v32 = vadd.f32 %v1727_v53, %v8382_v18  ;;  %v1840_v50 = vpop.f32.mrf.mxu1  ;;  %v1553_v27 = vsel %vm1547_vm9, %v1520_v58, %v1232_v28  ;;  %1243 = vrot.lane.b32.xlu1 %v9051_v41, %s7699_s15 }
 0x2e6   : > { %v9063_v54 = vadd.f32 %v1840_v50, %v9049_v55  ;;  %7129 = vmatmul.msk.f32.gmra.mxu0 %vm1603_vm10, %v1553_v27  ;;  %7162 = vmatmul.msk.f32.gmra.mxu1 %vm1603_vm10, %v1553_v27  ;;  %v9067_v22 = vpop.permute.xlu2 %941 }
 0x2e7   : > { %v2049_v26 = vmax.f32 %v1728_v32, 0.0  ;;  %7195 = vmatmul.msk.f32.gmra.mxu2 %vm1603_vm10, %v1553_v27  ;;  %v1038_v13 = vpop.permute.xlu1 %1037 }
 0x2e8   : > { %v2050_v38 = vmax.f32 %v9063_v54, 0.0  ;;  %7174 = vmatmul.msk.f32.gmra.mxu3 %vm1603_vm10, %v8152_v8 }
 0x2e9   : > { %2145 = vst [vmem:[%s8394_s23] sm:$0xff] %v2049_v26 }
 0x2ea   : > { %2147 = vst.msk [vmem:[%s8394_s23 + $0x8] sm:$0xff] %vm2146_vm11, %v2050_v38  ;;  %851 = vrot.lane.b32.xlu0 %v8958_v20, %s7696_s12 }
 0x2ec   : > { %v616_v34 = vpop.permute.xlu0 %615  ;;  %499 = vrot.lane.b32.xlu2 %v8937_v39, %s7697_s13 }
 0x2ed   : > { %755 = vrot.lane.b32.xlu1 %v9010_v60, %s7695_s11  ;;  %v1356_v5 = vsel %vm1349_vm3, %v1323_v45, %v616_v34 }
 0x2ee   : > { %v1236_v15 = vpop.permute.xlu2 %1235  ;;  %v1389_v24 = vsel %vm1382_vm4, %v1356_v5, %v744_v51 }
 0x2ef   : > { %v490_v47 = vpop.permute.xlu1 %489  ;;  %v1422_v39 = vsel %vm1415_vm5, %v1389_v24, %v8991_v25 }
 0x2f0   : > { %7175 = vmatmul.msk.f32.gmra.mxu3 %vm1603_vm10, %v8190_v36  ;;  %v1324_v5 = vsel %vm223_vm1, %v8609_v43, %v490_v47 }
 0x2f2   : > { %1145 = vrot.lane.b32.xlu0 %v9088_v46, %s14169_s17 }
 0x2f4   : > { %v940_v21 = vpop.permute.xlu0 %939  ;;  %853 = vrot.lane.b32.xlu2 %v8985_v12, %s7696_s12 }
 0x2f5   : > { %1049 = vrot.lane.b32.xlu1 %v8993_v11, %s14168_s14  ;;  %v1455_v19 = vsel %vm1448_vm6, %v1422_v39, %v940_v21 }
 0x2f6   : > { %v9102_v58 = vpop.permute.xlu2 %747  ;;  %v1488_v51 = vsel %vm1481_vm7, %v1455_v19, %v1038_v13 }
 0x2f7   : > { %v844_v28 = vpop.permute.xlu1 %843  ;;  %v1521_v26 = vsel %vm1514_vm8, %v1488_v51, %v9007_v7 }
 0x2f8   : > { %7176 = vmatmul.msk.f32.gmra.mxu3 %vm1603_vm10, %v8225_v56 }
 0x2fa   : > { %627 = vrot.lane.b32.xlu0 %v8909_v3, %s7700_s16 }
 0x2fb   : > { %v1730_v53 = vpop.f32.mrf.mxu0  ;;  %v1843_v32 = vpop.f32.mrf.mxu1 }
 0x2fc   : > { %v1731_v25 = vadd.f32 %v1730_v53, %v8382_v18  ;;  %v9111_v50 = vadd.f32 %v1843_v32, %v9049_v55  ;;  %v1234_v27 = vpop.permute.xlu0 %1233  ;;  %1147 = vrot.lane.b32.xlu2 %v8698_v48, %s14169_s17  ;;  %v9156_v32 = vld [vmem:[#allocation2 + $0x110] sm:$0xff] }
 0x2fd   : > { %v1554_v13 = vsel %vm1547_vm9, %v1521_v26, %v1234_v27  ;;  %501 = vrot.lane.b32.xlu1 %v8958_v20, %s7697_s13  ;;  %v1357_v20 = vsel %vm1349_vm3, %v1324_v5, %v9029_v14 }
 0x2fe   : > { %v2052_v3 = vmax.f32 %v1731_v25, 0.0  ;;  %v2053_v45 = vmax.f32 %v9111_v50, 0.0  ;;  %7130 = vmatmul.msk.f32.gmra.mxu0 %vm1603_vm10, %v1554_v13  ;;  %7163 = vmatmul.msk.f32.gmra.mxu1 %vm1603_vm10, %v1554_v13  ;;  %v9123_v34 = vpop.permute.xlu2 %1041 }
 0x2ff   : > { %7196 = vmatmul.msk.f32.gmra.mxu2 %vm1603_vm10, %v1554_v13  ;;  %v1138_v7 = vpop.permute.xlu1 %1137 }
 0x300   : > { %2148 = vst [vmem:[%s8394_s23 + $0x18] sm:$0xff] %v2052_v3  ;;  %7177 = vmatmul.msk.f32.gmra.mxu3 %vm1603_vm10, %v8264_v17 }
 0x301   : > { %2149 = vst.msk [vmem:[%s8394_s23 + $0x20] sm:$0xff] %vm2146_vm11, %v2053_v45 }
 0x302   : > { %951 = vrot.lane.b32.xlu0 %v8995_v52, %s7694_s10 }
 0x304   : > { %v746_v24 = vpop.permute.xlu0 %745  ;;  %629 = vrot.lane.b32.xlu2 %v8981_v16, %s7700_s16 }
 0x305   : > { %855 = vrot.lane.b32.xlu1 %v9088_v46, %s7696_s12  ;;  %v1390_v43 = vsel %vm1382_vm4, %v1357_v20, %v746_v24 }
 0x306   : > { %v9144_v47 = vpop.permute.xlu2 %493  ;;  %v1423_v39 = vsel %vm1415_vm5, %v1390_v43, %v844_v28 }
 0x307   : > { %v620_v21 = vpop.permute.xlu1 %619  ;;  %v1456_v16 = vsel %vm1448_vm6, %v1423_v39, %v9067_v22 }
 0x308   : > { %7178 = vmatmul.msk.f32.gmra.mxu3 %vm1603_vm10, %v8303_v4 }
 0x30a   : > { %1245 = vrot.lane.b32.xlu0 %v8703_v29, %s7699_s15 }
 0x30c   : > { %v1040_v14 = vpop.permute.xlu0 %1039  ;;  %953 = vrot.lane.b32.xlu2 %v9051_v41, %s7694_s10 }
 0x30d   : > { %v1489_v19 = vsel %vm1481_vm7, %v1456_v16, %v1040_v14  ;;  %v1733_v51 = vpop.f32.mrf.mxu0  ;;  %v1846_v53 = vpop.f32.mrf.mxu1  ;;  %1149 = vrot.lane.b32.xlu1 %v9156_v32, %s14169_s17  ;;  %v7313_v14 = vld [vmem:[#allocation2 + $0x10f] sm:$0xff] }
 0x30e   : > { %v1522_v28 = vsel %vm1514_vm8, %v1489_v19, %v1138_v7  ;;  %v1734_v25 = vadd.f32 %v1733_v51, %v8382_v18  ;;  %v9163_v22 = vadd.f32 %v1846_v53, %v9049_v55  ;;  %v9165_v27 = vpop.permute.xlu2 %847  ;;  %v9181_v7 = vld [vmem:[#allocation2 + $0x111] sm:$0xff] }
 0x30f   : > { %v1555_v26 = vsel %vm1547_vm9, %v1522_v28, %v1236_v15  ;;  %v944_v13 = vpop.permute.xlu1 %943 }
 0x310   : > { %v2055_v3 = vmax.f32 %v1734_v25, 0.0  ;;  %v2056_v5 = vmax.f32 %v9163_v22, 0.0  ;;  %7131 = vmatmul.msk.f32.gmra.mxu0 %vm1603_vm10, %v1555_v26  ;;  %7164 = vmatmul.msk.f32.gmra.mxu1 %vm1603_vm10, %v1555_v26 }
 0x311   : > { %7197 = vmatmul.msk.f32.gmra.mxu2 %vm1603_vm10, %v1555_v26  ;;  %7179 = vmatmul.msk.f32.gmra.mxu3 %vm1603_vm10, %v8334_v0 }
 0x312   : > { %2150 = vst [vmem:[%s8394_s23 + $0x30] sm:$0xff] %v2055_v3  ;;  %757 = vrot.lane.b32.xlu0 %v9039_v63, %s7695_s11 }
 0x313   : > { %2151 = vst.msk [vmem:[%s8394_s23 + $0x38] sm:$0xff] %vm2146_vm11, %v2056_v5 }
 0x314   : > { %v492_v15 = vpop.permute.xlu0 %491  ;;  %1247 = vrot.lane.b32.xlu2 %v9181_v7, %s7699_s15 }
 0x315   : > { %631 = vrot.lane.b32.xlu1 %v8995_v52, %s7700_s16  ;;  %v1325_v24 = vsel %vm223_vm1, %v8648_v9, %v492_v15 }
 0x316   : > { %v9187_v20 = vpop.permute.xlu2 %1141  ;;  %v1358_v39 = vsel %vm1349_vm3, %v1325_v24, %v620_v21 }
 0x317   : > { %v1238_v43 = vpop.permute.xlu1 %1237  ;;  %v1391_v52 = vsel %vm1382_vm4, %v1358_v39, %v9102_v58 }
 0x319   : > { %7180 = vmatmul.msk.f32.gmra.mxu3 %vm1603_vm10, %v8376_v49 }
 0x31a   : > { %1051 = vrot.lane.b32.xlu0 %v7313_v14, %s14168_s14 }
 0x31c   : > { %v846_v16 = vpop.permute.xlu0 %845  ;;  %759 = vrot.lane.b32.xlu2 %v8993_v11, %s7695_s11 }
 0x31d   : > { %955 = vrot.lane.b32.xlu1 %v8703_v29, %s7694_s10  ;;  %v1424_v9 = vsel %vm1415_vm5, %v1391_v52, %v846_v16  ;;  %v7314_v29 = vld [vmem:[#allocation2 + $0x127] sm:$0xff] }
 0x31e   : > { %v9202_v19 = vpop.permute.xlu2 %623  ;;  %v1457_v21 = vsel %vm1448_vm6, %v1424_v9, %v944_v13 }
 0x31f   : > { %v750_v51 = vpop.permute.xlu1 %749  ;;  %v1490_v58 = vsel %vm1481_vm7, %v1457_v21, %v9123_v34 }
 0x321   : > { %7181 = vmatmul.msk.f32.gmra.mxu3 %vm1603_vm10, %v8415_v61 }
 0x322   : > { %503 = vrot.lane.b32.xlu0 %v8985_v12, %s7697_s13 }
 0x324   : > { %v1140_v11 = vpop.permute.xlu0 %1139  ;;  %v1736_v53 = vpop.f32.mrf.mxu0  ;;  %1053 = vrot.lane.b32.xlu2 %v7314_v29, %s14168_s14 }
 0x325   : > { %v1523_v28 = vsel %vm1514_vm8, %v1490_v58, %v1140_v11  ;;  %v1737_v25 = vadd.f32 %v1736_v53, %v8382_v18  ;;  %v1849_v26 = vpop.f32.mrf.mxu1  ;;  %1249 = vrot.lane.b32.xlu1 %v8755_v44, %s7699_s15  ;;  %v1953_v44 = vpop.f32.mrf.mxu2 }
 0x326   : > { %v9217_v12 = vadd.f32 %v1849_v26, %v9049_v55  ;;  %v1556_v13 = vsel %vm1547_vm9, %v1523_v28, %v1238_v43  ;;  %v9220_v34 = vpop.permute.xlu2 %947  ;;  %v1326_v43 = vsel %vm223_vm1, %v8763_v30, %v9144_v47 }
 0x327   : > { %v2058_v3 = vmax.f32 %v1737_v25, 0.0  ;;  %7132 = vmatmul.msk.f32.gmra.mxu0 %vm1603_vm10, %v1556_v13  ;;  %7165 = vmatmul.msk.f32.gmra.mxu1 %vm1603_vm10, %v1556_v13  ;;  %v1044_v15 = vpop.permute.xlu1 %1043 }
 0x328   : > { %v2059_v24 = vmax.f32 %v9217_v12, 0.0  ;;  %7198 = vmatmul.msk.f32.gmra.mxu2 %vm1603_vm10, %v1556_v13  ;;  %v7316_v13 = vld [vmem:[#allocation2 + $0x130] sm:$0xff] }
 0x329   : > { %2152 = vst [vmem:[%s8394_s23 + $0x48] sm:$0xff] %v2058_v3  ;;  %7182 = vmatmul.msk.f32.gmra.mxu3 %vm1603_vm10, %v8455_v33 }
 0x32a   : > { %2153 = vst.msk [vmem:[%s8394_s23 + $0x50] sm:$0xff] %vm2146_vm11, %v2059_v24  ;;  %857 = vrot.lane.b32.xlu0 %v8698_v48, %s7696_s12 }
 0x32c   : > { %v622_v39 = vpop.permute.xlu0 %621  ;;  %505 = vrot.lane.b32.xlu2 %v9088_v46, %s7697_s13 }
 0x32d   : > { %761 = vrot.lane.b32.xlu1 %v7313_v14, %s7695_s11  ;;  %v1359_v52 = vsel %vm1349_vm3, %v1326_v43, %v622_v39  ;;  %v1956_v30 = vpop.f32.mrf.mxu2  ;;  %v7315_v14 = vld [vmem:[#allocation2 + $0x12f] sm:$0xff]  ;;  %s7702_s11 = smov 64  }
 0x32e   : > { %v9241_v16 = vpop.permute.xlu2 %1241  ;;  %v1392_v48 = vsel %vm1382_vm4, %v1359_v52, %v750_v51 }
 0x32f   : > { %v496_v9 = vpop.permute.xlu1 %495  ;;  %v1425_v46 = vsel %vm1415_vm5, %v1392_v48, %v9165_v27 }
 0x330   : > { %v1327_v54 = vsel %vm223_vm1, %v8812_v57, %v496_v9 }
 0x331   : > { %7183 = vmatmul.msk.f32.gmra.mxu3 %vm1603_vm10, %v8498_v10  ;;  %v1360_v52 = vsel %vm1349_vm3, %v1327_v54, %v9202_v19 }
 0x332   : > { %1151 = vrot.lane.b32.xlu0 %v8751_v40, %s14169_s17  ;;  %v9261_v40 = vperm.slane %v9046_v23, 2 }
 0x334   : > { %v946_v47 = vpop.permute.xlu0 %945  ;;  %859 = vrot.lane.b32.xlu2 %v9156_v32, %s7696_s12  ;;  %v1957_v43 = vadd.f32 %v1956_v30, %v9261_v40 }
 0x335   : > { %1055 = vrot.lane.b32.xlu1 %v7315_v14, %s14168_s14  ;;  %v1458_v21 = vsel %vm1448_vm6, %v1425_v46, %v946_v47  ;;  %v1959_v53 = vpop.f32.mrf.mxu2 }
 0x336   : > { %v9255_v11 = vpop.permute.xlu2 %753  ;;  %v1491_v51 = vsel %vm1481_vm7, %v1458_v21, %v1044_v15  ;;  %v1960_v12 = vadd.f32 %v1959_v53, %v9261_v40 }
 0x337   : > { %v850_v58 = vpop.permute.xlu1 %849  ;;  %v1524_v26 = vsel %vm1514_vm8, %v1491_v51, %v9187_v20 }
 0x339   : > { %7184 = vmatmul.msk.f32.gmra.mxu3 %vm1603_vm10, %v8545_v31 }
 0x33a   : > { %633 = vrot.lane.b32.xlu0 %v9051_v41, %s7700_s16  ;;  %v1954_v41 = vadd.f32 %v1953_v44, %v9261_v40  ;;  %v2054_v44 = vmax.f32 %v1957_v43, 0.0 }
 0x33b   : > { %v1739_v32 = vpop.f32.mrf.mxu0  ;;  %v1852_v27 = vpop.f32.mrf.mxu1 }
 0x33c   : > { %v1740_v29 = vadd.f32 %v1739_v32, %v8382_v18  ;;  %v9267_v28 = vadd.f32 %v1852_v27, %v9049_v55  ;;  %v1240_v25 = vpop.permute.xlu0 %1239  ;;  %1153 = vrot.lane.b32.xlu2 %v7316_v13, %s14169_s17 }
 0x33d   : > { %v1557_v23 = vsel %vm1547_vm9, %v1524_v26, %v1240_v25  ;;  %2319 = vrot.lane.b32.xlu1 %v2050_v38, %s7702_s11  ;;  %v2051_v38 = vmax.f32 %v1954_v41, 0.0  ;;  %v1962_v48 = vpop.f32.mrf.mxu2 }
 0x33e   : > { %v2061_v3 = vmax.f32 %v1740_v29, 0.0  ;;  %v2062_v15 = vmax.f32 %v9267_v28, 0.0  ;;  %7133 = vmatmul.msk.f32.gmra.mxu0 %vm1603_vm10, %v1557_v23  ;;  %7166 = vmatmul.msk.f32.gmra.mxu1 %vm1603_vm10, %v1557_v23  ;;  %v9280_v20 = vpop.permute.xlu2 %1047 }
 0x33f   : > { %7199 = vmatmul.msk.f32.gmra.mxu2 %vm1603_vm10, %v1557_v23  ;;  %v1144_v39 = vpop.permute.xlu1 %1143  ;;  %v2057_v23 = vmax.f32 %v1960_v12, 0.0 }
 0x340   : > { %2154 = vst [vmem:[%s8394_s23 + $0x60] sm:$0xff] %v2061_v3 }
 0x341   : > { %2155 = vst.msk [vmem:[%s8394_s23 + $0x68] sm:$0xff] %vm2146_vm11, %v2062_v15  ;;  %7185 = vmatmul.msk.f32.gmra.mxu3 %vm1603_vm10, %v8578_v42 }
 0x342   : > { %957 = vrot.lane.b32.xlu0 %v9181_v7, %s7694_s10  ;;  %v7317_v7 = vld [vmem:[#allocation2 + $0x131] sm:$0xff] }
 0x344   : > { %v752_v30 = vpop.permute.xlu0 %751  ;;  %2321 = vrot.lane.b32.xlu2 %v2051_v38, %s7702_s11 }
 0x345   : > { %2325 = vrot.lane.b32.xlu1 %v2054_v44, %s7702_s11  ;;  %v1393_v57 = vsel %vm1382_vm4, %v1360_v52, %v752_v30  ;;  %v1965_v19 = vpop.f32.mrf.mxu2 }
 0x346   : > { %v9300_v9 = vpop.permute.xlu2 %499  ;;  %v1426_v46 = vsel %vm1415_vm5, %v1393_v57, %v850_v58  ;;  %v1963_v58 = vadd.f32 %v1962_v48, %v9261_v40  ;;  %v1966_v29 = vadd.f32 %v1965_v19, %v9261_v40 }
 0x347   : > { %v626_v47 = vpop.permute.xlu1 %625  ;;  %v1459_v21 = vsel %vm1448_vm6, %v1426_v46, %v9220_v34 }
 0x348   : > { %v2060_v22 = vmax.f32 %v1963_v58, 0.0 }
 0x349   : > { %7186 = vmatmul.msk.f32.gmra.mxu3 %vm1603_vm10, %v8624_v37 }
 0x34a   : > { %1251 = vrot.lane.b32.xlu0 %v7317_v7, %s7699_s15 }
 0x34c   : > { %v1046_v14 = vpop.permute.xlu0 %1045  ;;  %2327 = vrot.lane.b32.xlu2 %v2056_v5, %s7702_s11  ;;  %v2063_v5 = vmax.f32 %v1966_v29, 0.0 }
 0x34d   : > { %v1492_v51 = vsel %vm1481_vm7, %v1459_v21, %v1046_v14  ;;  %2331 = vrot.lane.b32.xlu1 %v2059_v24, %s7702_s11  ;;  %v1329_v21 = vsel %vm223_vm1, %v8905_v1, %v9300_v9 }
 0x34e   : > { %v1525_v32 = vsel %vm1514_vm8, %v1492_v51, %v1144_v39  ;;  %v9317_v27 = vpop.permute.xlu2 %853 }
 0x34f   : > { %v1558_v34 = vsel %vm1547_vm9, %v1525_v32, %v9241_v16  ;;  %v950_v25 = vpop.permute.xlu1 %949 }
 0x350   : > { %7134 = vmatmul.msk.f32.gmra.mxu0 %vm1603_vm10, %v1558_v34  ;;  %7167 = vmatmul.msk.f32.gmra.mxu1 %vm1603_vm10, %v1558_v34 }
 0x351   : > { %7200 = vmatmul.msk.f32.gmra.mxu2 %vm1603_vm10, %v1558_v34  ;;  %7187 = vmatmul.msk.f32.gmra.mxu3 %vm1603_vm10, %v8667_v6 }
 0x352   : > { %2323 = vrot.lane.b32.xlu0 %v2053_v45, %s7702_s11 }
 0x354   : > { %v498_v24 = vpop.permute.xlu0 %497  ;;  %2333 = vrot.lane.b32.xlu2 %v2060_v22, %s7702_s11 }
 0x355   : > { %2337 = vrot.lane.b32.xlu1 %v2063_v5, %s7702_s11  ;;  %v1328_v26 = vsel %vm223_vm1, %v8889_v2, %v498_v24 }
 0x356   : > { %v9333_v16 = vpop.permute.xlu2 %1147  ;;  %v1361_v50 = vsel %vm1349_vm3, %v1328_v26, %v626_v47 }
 0x357   : > { %v1244_v13 = vpop.permute.xlu1 %1243  ;;  %v1394_v53 = vsel %vm1382_vm4, %v1361_v50, %v9255_v11 }
 0x359   : > { %7188 = vmatmul.msk.f32.gmra.mxu3 %vm1603_vm10, %v8744_v35 }
 0x35a   : > { %2329 = vrot.lane.b32.xlu0 %v2057_v23, %s7702_s11 }
 0x35c   : > { %v852_v45 = vpop.permute.xlu0 %851 }
 0x35d   : > { %v1427_v41 = vsel %vm1415_vm5, %v1394_v53, %v852_v45  ;;  %v2682_v53 = vld [vmem:[%s14022_s2 + $0xf0] sm:$0xff] }
 0x35e   : > { %v9344_v3 = vpop.permute.xlu2 %629  ;;  %v1460_v2 = vsel %vm1448_vm6, %v1427_v41, %v950_v25  ;;  %2946 = vmatpush.msrb.mxu3 %v2682_v53 }
 0x35f   : > { %v756_v43 = vpop.permute.xlu1 %755  ;;  %v1493_v11 = vsel %vm1481_vm7, %v1460_v2, %v9280_v20 }
 0x362   : > { %2335 = vrot.lane.b32.xlu0 %v2062_v15, %s7702_s11 }
 0x363   : > { %v1742_v39 = vpop.f32.mrf.mxu0  ;;  %v1855_v54 = vpop.f32.mrf.mxu1 }
 0x364   : > { %v1743_v38 = vadd.f32 %v1742_v39, %v8382_v18  ;;  %v1856_v44 = vadd.f32 %v1855_v54, %v9049_v55  ;;  %v1146_v52 = vpop.permute.xlu0 %1145  ;;  %v1888_v48 = vpop.f32.mrf.mxu3 }
 0x365   : > { %v1526_v30 = vsel %vm1514_vm8, %v1493_v11, %v1146_v52  ;;  %v9356_v57 = vadd.f32 %v1888_v48, %v9049_v55 }
 0x366   : > { %v2064_v28 = vmax.f32 %v1743_v38, 0.0  ;;  %v2065_v15 = vmax.f32 %v1856_v44, 0.0  ;;  %v1559_v47 = vsel %vm1547_vm9, %v1526_v30, %v1244_v13  ;;  %v9359_v46 = vpop.permute.xlu2 %953 }
 0x367   : > { %7135 = vmatmul.msk.f32.gmra.mxu0 %vm1603_vm10, %v1559_v47  ;;  %7168 = vmatmul.msk.f32.gmra.mxu1 %vm1603_vm10, %v1559_v47  ;;  %v2098_v7 = vmax.f32 %v9356_v57, 0.0  ;;  %v1050_v20 = vpop.permute.xlu1 %1049 }
 0x368   : > { %2156 = vst [vmem:[%s8394_s23 + $0x78] sm:$0xff] %v2064_v28  ;;  %7201 = vmatmul.msk.f32.gmra.mxu2 %vm1603_vm10, %v1559_v47  ;;  %2339 = vrot.lane.b32.xlu2 %v2065_v15, %s7702_s11  ;;  %v2676_v28 = vld [vmem:[%s14022_s2 + $0xc0] sm:$0xff] }
 0x369   : > { %2157 = vst.msk [vmem:[%s8394_s23 + $0x80] sm:$0xff] %vm2146_vm11, %v2065_v15 }
 0x36a   : > { %2179 = vst.msk [vmem:[%s8394_s23 + $0x188] sm:$0xff] %vm2146_vm11, %v2098_v7  ;;  %v1968_v19 = vpop.f32.mrf.mxu2 }
 0x36b   : > { %v1969_v14 = vadd.f32 %v1968_v19, %v9261_v40 }
 0x36c   : > { %v628_v51 = vpop.permute.xlu0 %627  ;;  %v1891_v58 = vpop.f32.mrf.mxu3 }
 0x36d   : > { %v2066_v32 = vmax.f32 %v1969_v14, 0.0  ;;  %v9378_v29 = vadd.f32 %v1891_v58, %v9049_v55  ;;  %v1362_v25 = vsel %vm1349_vm3, %v1329_v21, %v628_v51  ;;  %v2672_v51 = vld [vmem:[%s14022_s2 + $0xa0] sm:$0xff] }
 0x36e   : > { %v9380_v34 = vpop.permute.xlu2 %1247  ;;  %v1395_v1 = vsel %vm1382_vm4, %v1362_v25, %v756_v43  ;;  %v2678_v43 = vld [vmem:[%s14022_s2 + $0xd0] sm:$0xff] }
 0x36f   : > { %2341 = vrot.lane.b32.xlu0 %v2066_v32, %s7702_s11  ;;  %v2101_v22 = vmax.f32 %v9378_v29, 0.0  ;;  %v502_v5 = vpop.permute.xlu1 %501  ;;  %v1428_v24 = vsel %vm1415_vm5, %v1395_v1, %v9317_v27  ;;  %v2680_v27 = vld [vmem:[%s14022_s2 + $0xe0] sm:$0xff] }
 0x370   : > { %2947 = vmatpush.msrb.mxu3 %v2680_v27  ;;  %v1330_v14 = vsel %vm223_vm1, %v8942_v59, %v502_v5  ;;  %v2670_v59 = vld [vmem:[%s14022_s2 + $0x90] sm:$0xff] }
 0x371   : > { %2181 = vst.msk [vmem:[%s8394_s23 + $0x1a0] sm:$0xff] %vm2146_vm11, %v2101_v22  ;;  %v1363_v25 = vsel %vm1349_vm3, %v1330_v14, %v9344_v3  ;;  %v2746_v27 = vld [vmem:[%s14022_s2 + $0x2f0] sm:$0xff]  ;;  %v2740_v14 = vld [vmem:[%s14022_s2 + $0x2c0] sm:$0xff] }
 0x372   : > { %2948 = vmatpush.msrb.mxu3 %v2678_v43  ;;  %3172 = vmatpush.msrb.mxu1 %v2746_v27  ;;  %v2654_v27 = vld [vmem:[%s14022_s2 + $0x10] sm:$0xff] }
 0x374   : > { %v952_v9 = vpop.permute.xlu0 %951  ;;  %v1894_v12 = vpop.f32.mrf.mxu3  ;;  %2949 = vmatpush.msrb.mxu3 %v2676_v28 }
 0x375   : > { %v9393_v26 = vadd.f32 %v1894_v12, %v9049_v55  ;;  %v1461_v13 = vsel %vm1448_vm6, %v1428_v24, %v952_v9  ;;  %v2668_v24 = vld [vmem:[%s14022_s2 + $0x80] sm:$0xff] }
 0x376   : > { %v9397_v50 = vpop.permute.xlu2 %759  ;;  %v1494_v41 = vsel %vm1481_vm7, %v1461_v13, %v1050_v20 }
 0x377   : > { %v2104_v23 = vmax.f32 %v9393_v26, 0.0  ;;  %v856_v45 = vpop.permute.xlu1 %855  ;;  %v1527_v52 = vsel %vm1514_vm8, %v1494_v41, %v9333_v16  ;;  %v2674_v16 = vld [vmem:[%s14022_s2 + $0xb0] sm:$0xff] }
 0x378   : > { %2950 = vmatpush.msrb.mxu3 %v2674_v16  ;;  %v2666_v41 = vld [vmem:[%s14022_s2 + $0x70] sm:$0xff]  ;;  %v2660_v16 = vld [vmem:[%s14022_s2 + $0x40] sm:$0xff] }
 0x379   : > { %2183 = vst.msk [vmem:[%s8394_s23 + $0x1b8] sm:$0xff] %vm2146_vm11, %v2104_v23 }
 0x37a   : > { %2951 = vmatpush.msrb.mxu3 %v2672_v51 }
 0x37b   : > { %v1745_v2 = vpop.f32.mrf.mxu0  ;;  %v1858_v39 = vpop.f32.mrf.mxu1 }
 0x37c   : > { %v1746_v54 = vadd.f32 %v1745_v2, %v8382_v18  ;;  %v1859_v38 = vadd.f32 %v1858_v39, %v9049_v55  ;;  %v1246_v44 = vpop.permute.xlu0 %1245  ;;  %v1897_v11 = vpop.f32.mrf.mxu3  ;;  %2952 = vmatpush.msrb.mxu3 %v2670_v59  ;;  %v2664_v2 = vld [vmem:[%s14022_s2 + $0x60] sm:$0xff]  ;;  %v2658_v59 = vld [vmem:[%s14022_s2 + $0x30] sm:$0xff] }
 0x37d   : > { %v1560_v48 = vsel %vm1547_vm9, %v1527_v52, %v1246_v44  ;;  %v9419_v30 = vadd.f32 %v1897_v11, %v9049_v55  ;;  %v2744_v39 = vld [vmem:[%s14022_s2 + $0x2e0] sm:$0xff] }
 0x37e   : > { %v2067_v15 = vmax.f32 %v1746_v54, 0.0  ;;  %v2068_v47 = vmax.f32 %v1859_v38, 0.0  ;;  %7136 = vmatmul.msk.f32.gmra.mxu0 %vm1603_vm10, %v1560_v48  ;;  %7169 = vmatmul.msk.f32.gmra.mxu1 %vm1603_vm10, %v1560_v48  ;;  %v9437_v21 = vpop.permute.xlu2 %1053  ;;  %v2742_v38 = vld [vmem:[%s14022_s2 + $0x2d0] sm:$0xff] }
 0x37f   : > { %7202 = vmatmul.msk.f32.gmra.mxu2 %vm1603_vm10, %v1560_v48  ;;  %v2107_v20 = vmax.f32 %v9419_v30, 0.0  ;;  %v1150_v19 = vpop.permute.xlu1 %1149  ;;  %2953 = vmatpush.msrb.mxu3 %v2668_v24 }
 0x380   : > { %2158 = vst [vmem:[%s8394_s23 + $0x90] sm:$0xff] %v2067_v15  ;;  %2343 = vrot.lane.b32.xlu1 %v2068_v47, %s7702_s11  ;;  %3173 = vmatpush.msrb.mxu1 %v2744_v39 }
 0x381   : > { %2159 = vst.msk [vmem:[%s8394_s23 + $0x98] sm:$0xff] %vm2146_vm11, %v2068_v47  ;;  %2954 = vmatpush.msrb.mxu3 %v2666_v41  ;;  %v2736_v41 = vld [vmem:[%s14022_s2 + $0x2a0] sm:$0xff] }
 0x382   : > { %2185 = vst.msk [vmem:[%s8394_s23 + $0x1d0] sm:$0xff] %vm2146_vm11, %v2107_v20  ;;  %v1971_v58 = vpop.f32.mrf.mxu2  ;;  %3174 = vmatpush.msrb.mxu1 %v2742_v38 }
 0x383   : > { %v1972_v32 = vadd.f32 %v1971_v58, %v9261_v40  ;;  %2955 = vmatpush.msrb.mxu3 %v2664_v2  ;;  %v2734_v2 = vld [vmem:[%s14022_s2 + $0x290] sm:$0xff] }
 0x384   : > { %v758_v5 = vpop.permute.xlu0 %757  ;;  %v1900_v1 = vpop.f32.mrf.mxu3  ;;  %3175 = vmatpush.msrb.mxu1 %v2740_v14 }
 0x385   : > { %v2069_v9 = vmax.f32 %v1972_v32, 0.0  ;;  %v9453_v12 = vadd.f32 %v1900_v1, %v9049_v55  ;;  %v1396_v13 = vsel %vm1382_vm4, %v1363_v25, %v758_v5  ;;  %v2714_v32 = vld [vmem:[%s14022_s2 + $0x1f0] sm:$0xff] }
 0x386   : > { %v1429_v43 = vsel %vm1415_vm5, %v1396_v13, %v856_v45  ;;  %v9480_v54 = vpop.permute.xlu2 %505  ;;  %v2662_v45 = vld [vmem:[%s14022_s2 + $0x50] sm:$0xff]  ;;  %3059 = vmatpush.msrb.mxu0 %v2714_v32  ;;  %v2712_v13 = vld [vmem:[%s14022_s2 + $0x1e0] sm:$0xff] }
 0x387   : > { %2345 = vrot.lane.b32.xlu2 %v2069_v9, %s7702_s11  ;;  %v2110_v53 = vmax.f32 %v9453_v12, 0.0  ;;  %v9461_v3 = vpop.permute.xlu1 %631  ;;  %v1462_v52 = vsel %vm1448_vm6, %v1429_v43, %v9359_v46  ;;  %2956 = vmatpush.msrb.mxu3 %v2662_v45  ;;  %v2738_v1 = vld [vmem:[%s14022_s2 + $0x2b0] sm:$0xff] }
 0x388   : > { %3176 = vmatpush.msrb.mxu1 %v2738_v1  ;;  %v2710_v43 = vld [vmem:[%s14022_s2 + $0x1d0] sm:$0xff]  ;;  %3060 = vmatpush.msrb.mxu0 %v2712_v13 }
 0x389   : > { %2187 = vst.msk [vmem:[%s8394_s23 + $0x1e8] sm:$0xff] %vm2146_vm11, %v2110_v53  ;;  %2957 = vmatpush.msrb.mxu3 %v2660_v16  ;;  %v2706_v16 = vld [vmem:[%s14022_s2 + $0x1b0] sm:$0xff] }
 0x38a   : > { %3177 = vmatpush.msrb.mxu1 %v2736_v41  ;;  %3061 = vmatpush.msrb.mxu0 %v2710_v43  ;;  %v2700_v41 = vld [vmem:[%s14022_s2 + $0x180] sm:$0xff] }
 0x38b   : > { %2958 = vmatpush.msrb.mxu3 %v2658_v59  ;;  %v2730_v59 = vld [vmem:[%s14022_s2 + $0x270] sm:$0xff] }
 0x38c   : > { %v1052_v44 = vpop.permute.xlu0 %1051  ;;  %v1903_v11 = vpop.f32.mrf.mxu3  ;;  %3178 = vmatpush.msrb.mxu1 %v2734_v2 }
 0x38d   : > { %v1495_v48 = vsel %vm1481_vm7, %v1462_v52, %v1052_v44  ;;  %v1748_v28 = vpop.f32.mrf.mxu0  ;;  %v1861_v15 = vpop.f32.mrf.mxu1  ;;  %v9492_v47 = vadd.f32 %v1903_v11, %v9049_v55  ;;  %v2652_v52 = vld [vmem:[%s14022_s2] sm:$0xff] }
 0x38e   : > { %v1528_v46 = vsel %vm1514_vm8, %v1495_v48, %v1150_v19  ;;  %v1749_v51 = vadd.f32 %v1748_v28, %v8382_v18  ;;  %v1862_v58 = vadd.f32 %v1861_v15, %v9049_v55  ;;  %v2708_v11 = vld [vmem:[%s14022_s2 + $0x1c0] sm:$0xff] }
 0x38f   : > { %v1561_v25 = vsel %vm1547_vm9, %v1528_v46, %v9380_v34  ;;  %v2113_v19 = vmax.f32 %v9492_v47, 0.0  ;;  %v9512_v5 = vpop.permute.xlu1 %955  ;;  %v2656_v34 = vld [vmem:[%s14022_s2 + $0x20] sm:$0xff]  ;;  %3062 = vmatpush.msrb.mxu0 %v2708_v11 }
 0x390   : > { %v2070_v9 = vmax.f32 %v1749_v51, 0.0  ;;  %v2071_v24 = vmax.f32 %v1862_v58, 0.0  ;;  %7137 = vmatmul.msk.f32.gmra.mxu0 %vm1603_vm10, %v1561_v25  ;;  %7170 = vmatmul.msk.f32.gmra.mxu1 %vm1603_vm10, %v1561_v25  ;;  %v2732_v48 = vld [vmem:[%s14022_s2 + $0x280] sm:$0xff]  ;;  %v9564_v51 = vpop.permute.xlu2 %859 }
 0x391   : > { %7203 = vmatmul.msk.f32.gmra.mxu2 %vm1603_vm10, %v1561_v25  ;;  %2189 = vst.msk [vmem:[%s8394_s23 + $0x200] sm:$0xff] %vm2146_vm11, %v2113_v19  ;;  %2959 = vmatpush.msrb.mxu3 %v2656_v34  ;;  %v2544_v15 = vld [vmem:[#allocation3 + $0x7] sm:$0xff] }
 0x392   : > { %2160 = vst [vmem:[%s8394_s23 + $0xa8] sm:$0xff] %v2070_v9  ;;  %2347 = vrot.lane.b32.xlu0 %v2071_v24, %s7702_s11  ;;  %3179 = vmatpush.msrb.mxu1 %v2732_v48  ;;  %v2728_v25 = vld [vmem:[%s14022_s2 + $0x260] sm:$0xff]  ;;  %v2702_v9 = vld [vmem:[%s14022_s2 + $0x190] sm:$0xff] }
 0x393   : > { %2161 = vst.msk [vmem:[%s8394_s23 + $0xb0] sm:$0xff] %vm2146_vm11, %v2071_v24  ;;  %2960 = vmatpush.msrb.mxu3 %v2654_v27  ;;  %3063 = vmatpush.msrb.mxu0 %v2706_v16  ;;  %v2726_v24 = vld [vmem:[%s14022_s2 + $0x250] sm:$0xff]  ;;  %v2724_v27 = vld [vmem:[%s14022_s2 + $0x240] sm:$0xff] }
 0x394   : > { %v1974_v39 = vpop.f32.mrf.mxu2  ;;  %v504_v45 = vpop.permute.xlu0 %503  ;;  %3180 = vmatpush.msrb.mxu1 %v2730_v59  ;;  %v2696_v48 = vld [vmem:[%s14022_s2 + $0x160] sm:$0xff]  ;;  %v2718_v16 = vld [vmem:[%s14022_s2 + $0x210] sm:$0xff] }
 0x395   : > { %v1975_v38 = vadd.f32 %v1974_v39, %v9261_v40  ;;  %v1906_v44 = vpop.f32.mrf.mxu3  ;;  %v1331_v46 = vsel %vm223_vm1, %v9010_v60, %v504_v45  ;;  %2961 = vmatpush.msrb.mxu3 %v2652_v52  ;;  %v2704_v60 = vld [vmem:[%s14022_s2 + $0x1a0] sm:$0xff]  ;;  %v2545_v39 = vld [vmem:[#allocation3 + $0xf] sm:$0xff] }
 0x396   : > { %v9557_v28 = vadd.f32 %v1906_v44, %v9049_v55  ;;  %2962 = vmatmul.f32.vlgmr.msrb.gmra.mxu3 %v2544_v15  ;;  %v1364_v1 = vsel %vm1349_vm3, %v1331_v46, %v9461_v3  ;;  %3064 = vmatpush.msrb.mxu0 %v2704_v60  ;;  %v2720_v15 = vld [vmem:[%s14022_s2 + $0x220] sm:$0xff] }
 0x397   : > { %v2072_v14 = vmax.f32 %v1975_v38, 0.0  ;;  %v1250_v58 = vpop.permute.xlu1 %1249  ;;  %3181 = vmatpush.msrb.mxu1 %v2728_v25  ;;  %v1397_v13 = vsel %vm1382_vm4, %v1364_v1, %v9397_v50  ;;  %v2698_v50 = vld [vmem:[%s14022_s2 + $0x170] sm:$0xff] }
 0x398   : > { %v2116_v32 = vmax.f32 %v9557_v28, 0.0  ;;  %3065 = vmatpush.msrb.mxu0 %v2702_v9  ;;  %v2722_v38 = vld [vmem:[%s14022_s2 + $0x230] sm:$0xff]  ;;  %v9612_v11 = vpop.permute.xlu2 %1153 }
 0x399   : > { %2349 = vrot.lane.b32.xlu1 %v2072_v14, %s7702_s11  ;;  %3182 = vmatpush.msrb.mxu1 %v2726_v24  ;;  %v2692_v24 = vld [vmem:[%s14022_s2 + $0x140] sm:$0xff] }
 0x39a   : > { %2191 = vst.msk [vmem:[%s8394_s23 + $0x218] sm:$0xff] %vm2146_vm11, %v2116_v32  ;;  %3066 = vmatpush.msrb.mxu0 %v2700_v41 }
 0x39b   : > { %3183 = vmatpush.msrb.mxu1 %v2724_v27 }
 0x39c   : > { %v858_v34 = vpop.permute.xlu0 %857  ;;  %3067 = vmatpush.msrb.mxu0 %v2698_v50  ;;  %v2688_v50 = vld [vmem:[%s14022_s2 + $0x120] sm:$0xff] }
 0x39d   : > { %v1909_v3 = vpop.f32.mrf.mxu3  ;;  %v1430_v43 = vsel %vm1415_vm5, %v1397_v13, %v858_v34  ;;  %3184 = vmatpush.msrb.mxu1 %v2722_v38 }
 0x39e   : > { %v9599_v2 = vadd.f32 %v1909_v3, %v9049_v55  ;;  %2965 = vmatmul.f32.gmra.mxu3 %v2545_v39  ;;  %v1463_v52 = vsel %vm1448_vm6, %v1430_v43, %v9512_v5  ;;  %3068 = vmatpush.msrb.mxu0 %v2696_v48  ;;  %v2694_v5 = vld [vmem:[%s14022_s2 + $0x150] sm:$0xff]  ;;  %v2716_v3 = vld [vmem:[%s14022_s2 + $0x200] sm:$0xff] }
 0x39f   : > { %v9601_v45 = vpop.permute.xlu1 %761  ;;  %v1496_v46 = vsel %vm1481_vm7, %v1463_v52, %v9437_v21  ;;  %3185 = vmatpush.msrb.mxu1 %v2720_v15  ;;  %v2686_v48 = vld [vmem:[%s14022_s2 + $0x110] sm:$0xff]  ;;  %v1332_v15 = vsel %vm223_vm1, %v9039_v63, %v9480_v54 }
 0x3a0   : > { %v2119_v44 = vmax.f32 %v9599_v2, 0.0  ;;  %3069 = vmatpush.msrb.mxu0 %v2694_v5  ;;  %v2322_v38 = vpop.permute.xlu2 %2321 }
 0x3a1   : > { %3186 = vmatpush.msrb.mxu1 %v2718_v16 }
 0x3a2   : > { %2193 = vst.msk [vmem:[%s8394_s23 + $0x230] sm:$0xff] %vm2146_vm11, %v2119_v44  ;;  %3070 = vmatpush.msrb.mxu0 %v2692_v24 }
 0x3a3   : > { %3187 = vmatpush.msrb.mxu1 %v2716_v3 }
 0x3a4   : > { %v1152_v14 = vpop.permute.xlu0 %1151  ;;  %v1751_v59 = vpop.f32.mrf.mxu0 }
 0x3a5   : > { %v1529_v60 = vsel %vm1514_vm8, %v1496_v46, %v1152_v14  ;;  %v1752_v25 = vadd.f32 %v1751_v59, %v8382_v18  ;;  %v1864_v1 = vpop.f32.mrf.mxu1  ;;  %v1912_v9 = vpop.f32.mrf.mxu3  ;;  %v2684_v46 = vld [vmem:[%s14022_s2 + $0x100] sm:$0xff] }
 0x3a6   : > { %v1865_v34 = vadd.f32 %v1864_v1, %v9049_v55  ;;  %v1562_v13 = vsel %vm1547_vm9, %v1529_v60, %v1250_v58  ;;  %v9640_v21 = vadd.f32 %v1912_v9, %v9049_v55  ;;  %v2690_v58 = vld [vmem:[%s14022_s2 + $0x130] sm:$0xff] }
 0x3a7   : > { %v2073_v41 = vmax.f32 %v1752_v25, 0.0  ;;  %7138 = vmatmul.msk.f32.gmra.mxu0 %vm1603_vm10, %v1562_v13  ;;  %7171 = vmatmul.msk.f32.gmra.mxu1 %vm1603_vm10, %v1562_v13  ;;  %v1056_v27 = vpop.permute.xlu1 %1055 }
 0x3a8   : > { %v2074_v43 = vmax.f32 %v1865_v34, 0.0  ;;  %7204 = vmatmul.msk.f32.gmra.mxu2 %vm1603_vm10, %v1562_v13  ;;  %v2122_v39 = vmax.f32 %v9640_v21, 0.0  ;;  %3071 = vmatpush.msrb.mxu0 %v2690_v58  ;;  %v2328_v34 = vpop.permute.xlu2 %2327 }
 0x3a9   : > { %2162 = vst [vmem:[%s8394_s23 + $0xc0] sm:$0xff] %v2073_v41 }
 0x3aa   : > { %2163 = vst.msk [vmem:[%s8394_s23 + $0xc8] sm:$0xff] %vm2146_vm11, %v2074_v43  ;;  %2351 = vrot.lane.b32.xlu2 %v2074_v43, %s7702_s11  ;;  %3072 = vmatpush.msrb.mxu0 %v2688_v50 }
 0x3ab   : > { %2195 = vst.msk [vmem:[%s8394_s23 + $0x248] sm:$0xff] %vm2146_vm11, %v2122_v39  ;;  %v1977_v52 = vpop.f32.mrf.mxu2 }
 0x3ac   : > { %v1978_v5 = vadd.f32 %v1977_v52, %v9261_v40  ;;  %v634_v16 = vpop.permute.xlu0 %633  ;;  %3073 = vmatpush.msrb.mxu0 %v2686_v48 }
 0x3ad   : > { %v1915_v14 = vpop.f32.mrf.mxu3  ;;  %v1365_v25 = vsel %vm1349_vm3, %v1332_v15, %v634_v16 }
 0x3ae   : > { %v2075_v59 = vmax.f32 %v1978_v5, 0.0  ;;  %v9674_v60 = vadd.f32 %v1915_v14, %v9049_v55  ;;  %3074 = vmatpush.msrb.mxu0 %v2684_v46  ;;  %v1398_v9 = vsel %vm1382_vm4, %v1365_v25, %v9601_v45 }
 0x3af   : > { %v2320_v1 = vpop.permute.xlu1 %2319  ;;  %v1431_v13 = vsel %vm1415_vm5, %v1398_v9, %v9564_v51 }
 0x3b0   : > { %2353 = vrot.lane.b32.xlu0 %v2075_v59, %s7702_s11  ;;  %v2125_v63 = vmax.f32 %v9674_v60, 0.0  ;;  %v9680_v54 = vsel %vm2146_vm11, %v2320_v1, %v2322_v38  ;;  %v2334_v1 = vpop.permute.xlu2 %2333 }
 0x3b1   : > { %2512 = vst [vmem:[#allocation3 + $0x28] sm:$0xff] %v9680_v54 }
 0x3b2   : > { %2197 = vst.msk [vmem:[%s8394_s23 + $0x260] sm:$0xff] %vm2146_vm11, %v2125_v63 }
 0x3b4   : > { %v958_v24 = vpop.permute.xlu0 %957 }
 0x3b5   : > { %v1918_v3 = vpop.f32.mrf.mxu3  ;;  %v1464_v41 = vsel %vm1448_vm6, %v1431_v13, %v958_v24 }
 0x3b6   : > { %v9693_v58 = vadd.f32 %v1918_v3, %v9049_v55  ;;  %v1497_v45 = vsel %vm1481_vm7, %v1464_v41, %v1056_v27  ;;  %v2616_v41 = vld [vmem:[#allocation3 + $0x9] sm:$0xff] }
 0x3b7   : > { %v2326_v43 = vpop.permute.xlu1 %2325  ;;  %v1530_v16 = vsel %vm1514_vm8, %v1497_v45, %v9612_v11 }
 0x3b8   : > { %v2128_v50 = vmax.f32 %v9693_v58, 0.0  ;;  %v9696_v38 = vld [vmem:[#allocation3 + $0x27] sm:$0xff] }
 0x3b9   : > { %2968 = vmatmul.f32.gmra.mxu3 %v9696_v38 }
 0x3ba   : > { %2199 = vst.msk [vmem:[%s8394_s23 + $0x278] sm:$0xff] %vm2146_vm11, %v2128_v50 }
 0x3bb   : > { %v1754_v51 = vpop.f32.mrf.mxu0  ;;  %v1867_v52 = vpop.f32.mrf.mxu1 }
 0x3bc   : > { %v1755_v48 = vadd.f32 %v1754_v51, %v8382_v18  ;;  %v1868_v15 = vadd.f32 %v1867_v52, %v9049_v55  ;;  %v1252_v5 = vpop.permute.xlu0 %1251 }
 0x3bd   : > { %v1563_v27 = vsel %vm1547_vm9, %v1530_v16, %v1252_v5  ;;  %v1921_v14 = vpop.f32.mrf.mxu3  ;;  %v2617_v16 = vld [vmem:[#allocation3 + $0x11] sm:$0xff] }
 0x3be   : > { %v2076_v46 = vmax.f32 %v1755_v48, 0.0  ;;  %v2077_v59 = vmax.f32 %v1868_v15, 0.0  ;;  %7139 = vmatmul.msk.f32.gmra.mxu0 %vm1603_vm10, %v1563_v27  ;;  %7172 = vmatmul.msk.f32.gmra.mxu1 %vm1603_vm10, %v1563_v27  ;;  %v9712_v25 = vadd.f32 %v1921_v14, %v9049_v55 }
 0x3bf   : > { %7205 = vmatmul.msk.f32.gmra.mxu2 %vm1603_vm10, %v1563_v27  ;;  %v2332_v9 = vpop.permute.xlu1 %2331 }
 0x3c0   : > { %2164 = vst [vmem:[%s8394_s23 + $0xd8] sm:$0xff] %v2076_v46  ;;  %2355 = vrot.lane.b32.xlu1 %v2077_v59, %s7702_s11  ;;  %v2131_v11 = vmax.f32 %v9712_v25, 0.0  ;;  %v9719_v24 = vsel %vm2146_vm11, %v2332_v9, %v2334_v1  ;;  %v7318_v9 = vld [vmem:[#allocation3 + $0x8] sm:$0xff] }
 0x3c1   : > { %2165 = vst.msk [vmem:[%s8394_s23 + $0xe0] sm:$0xff] %vm2146_vm11, %v2077_v59 }
 0x3c2   : > { %2201 = vst.msk [vmem:[%s8394_s23 + $0x290] sm:$0xff] %vm2146_vm11, %v2131_v11  ;;  %v1980_v13 = vpop.f32.mrf.mxu2 }
 0x3c3   : > { %v1981_v3 = vadd.f32 %v1980_v13, %v9261_v40  ;;  %2515 = vst [vmem:[#allocation3 + $0x50] sm:$0xff] %v9719_v24 }
 0x3c4   : > { %v2324_v45 = vpop.permute.xlu0 %2323 }
 0x3c5   : > { %v2078_v51 = vmax.f32 %v1981_v3, 0.0  ;;  %v9730_v52 = vsel %vm2146_vm11, %v2324_v45, %v2326_v43  ;;  %v1924_v48 = vpop.f32.mrf.mxu3 }
 0x3c6   : > { %2513 = vst [vmem:[#allocation3 + $0x30] sm:$0xff] %v9730_v52  ;;  %3188 = vmatmul.f32.vlgmr.msrb.gmra.mxu1 %v2616_v41  ;;  %7140 = vmatmul.msk.f32.gmra.mxu0 %vm1603_vm10, %v9034_v62  ;;  %v9736_v15 = vadd.f32 %v1924_v48, %v9049_v55 }
 0x3c7   : > { %7206 = vmatmul.msk.f32.gmra.mxu2 %vm1603_vm10, %v9034_v62  ;;  %2357 = vrot.lane.b32.xlu2 %v2078_v51, %s7702_s11  ;;  %v2338_v51 = vpop.permute.xlu1 %2337 }
 0x3c8   : > { %v2134_v5 = vmax.f32 %v9736_v15, 0.0 }
 0x3ca   : > { %2203 = vst.msk [vmem:[%s8394_s23 + $0x2a8] sm:$0xff] %vm2146_vm11, %v2134_v5 }
 0x3cc   : > { %v2330_v43 = vpop.permute.xlu0 %2329 }
 0x3cd   : > { %v9747_v27 = vsel %vm2146_vm11, %v2328_v34, %v2330_v43  ;;  %v1757_v14 = vpop.f32.mrf.mxu0  ;;  %v1870_v46 = vpop.f32.mrf.mxu1  ;;  %v9749_v59 = vld [vmem:[#allocation3 + $0x2f] sm:$0xff] }
 0x3ce   : > { %2514 = vst [vmem:[#allocation3 + $0x48] sm:$0xff] %v9747_v27  ;;  %v1758_v62 = vadd.f32 %v1757_v14, %v8382_v18  ;;  %v1871_v1 = vadd.f32 %v1870_v46, %v9049_v55  ;;  %2971 = vmatmul.f32.gmra.mxu3 %v9749_v59  ;;  %3075 = vmatmul.f32.vlgmr.msrb.gmra.mxu0 %v7318_v9  ;;  %v1927_v13 = vpop.f32.mrf.mxu3  ;;  %v2618_v46 = vld [vmem:[#allocation3 + $0x29] sm:$0xff] }
 0x3cf   : > { %7207 = vmatmul.msk.f32.gmra.mxu2 %vm1603_vm10, %v8152_v8  ;;  %3191 = vmatmul.f32.gmra.mxu1 %v2617_v16  ;;  %v9758_v34 = vadd.f32 %v1927_v13, %v9049_v55 }
 0x3d0   : > { %v2079_v3 = vmax.f32 %v1758_v62, 0.0  ;;  %v2080_v41 = vmax.f32 %v1871_v1, 0.0 }
 0x3d1   : > { %v2137_v45 = vmax.f32 %v9758_v34, 0.0 }
 0x3d2   : > { %2166 = vst [vmem:[%s8394_s23 + $0xf0] sm:$0xff] %v2079_v3  ;;  %2359 = vrot.lane.b32.xlu0 %v2080_v41, %s7702_s11 }
 0x3d3   : > { %2167 = vst.msk [vmem:[%s8394_s23 + $0xf8] sm:$0xff] %vm2146_vm11, %v2080_v41 }
 0x3d4   : > { %2205 = vst.msk [vmem:[%s8394_s23 + $0x2c0] sm:$0xff] %vm2146_vm11, %v2137_v45  ;;  %v1983_v48 = vpop.f32.mrf.mxu2  ;;  %v2336_v8 = vpop.permute.xlu0 %2335 }
 0x3d5   : > { %v1984_v43 = vadd.f32 %v1983_v48, %v9261_v40  ;;  %v9771_v16 = vsel %vm2146_vm11, %v2336_v8, %v2338_v51  ;;  %v9773_v14 = vld [vmem:[#allocation3 + $0x47] sm:$0xff]  ;;  %v2340_v48 = vpop.permute.xlu2 %2339 }
 0x3d6   : > { %2516 = vst [vmem:[#allocation3 + $0x68] sm:$0xff] %v9771_v16  ;;  %2974 = vmatmul.f32.gmra.mxu3 %v9773_v14  ;;  %3078 = vmatmul.f32.gmra.mxu0 %v7318_v9  ;;  %v1930_v62 = vpop.f32.mrf.mxu3  ;;  %v9788_v9 = vld [vmem:[#allocation3 + $0x4f] sm:$0xff] }
 0x3d7   : > { %v2081_v1 = vmax.f32 %v1984_v43, 0.0  ;;  %7208 = vmatmul.msk.f32.gmra.mxu2 %vm1603_vm10, %v8190_v36  ;;  %3194 = vmatmul.f32.gmra.mxu1 %v2618_v46  ;;  %v9780_v13 = vadd.f32 %v1930_v62, %v9049_v55  ;;  %v2619_v36 = vld [vmem:[#allocation3 + $0x31] sm:$0xff] }
 0x3d9   : > { %2361 = vrot.lane.b32.xlu1 %v2081_v1, %s7702_s11  ;;  %v14032_v3 = vmax.f32 %v9780_v13, 0.0 }
 0x3db   : > { %2207 = vst.msk [vmem:[%s8394_s23 + $0x2d8] sm:$0xff] %vm2146_vm11, %v14032_v3 }
 0x3de   : > { %2977 = vmatmul.f32.gmra.mxu3 %v9788_v9  ;;  %3081 = vmatmul.f32.gmra.mxu0 %v9680_v54  ;;  %v1933_v41 = vpop.f32.mrf.mxu3 }
 0x3df   : > { %7209 = vmatmul.msk.f32.gmra.mxu2 %vm1603_vm10, %v8225_v56  ;;  %3197 = vmatmul.f32.gmra.mxu1 %v2619_v36  ;;  %v9795_v51 = vadd.f32 %v1933_v41, %v9049_v55  ;;  %v9805_v36 = vld [vmem:[#allocation3 + $0x67] sm:$0xff] }
 0x3e0   : > { %v2620_v41 = vld [vmem:[#allocation3 + $0x49] sm:$0xff] }
 0x3e1   : > { %v2342_v8 = vpop.permute.xlu0 %2341  ;;  %v14031_v43 = vmax.f32 %v9795_v51, 0.0 }
 0x3e2   : > { %v2452_v46 = vsel %vm2146_vm11, %v2340_v48, %v2342_v8 }
 0x3e3   : > { %2517 = vst [vmem:[#allocation3 + $0x70] sm:$0xff] %v2452_v46 }
 0x3e4   : > { %2209 = vst.msk [vmem:[%s8394_s23 + $0x2f0] sm:$0xff] %vm2146_vm11, %v14031_v43  ;;  %v1760_v54 = vpop.f32.mrf.mxu0  ;;  %v1873_v62 = vpop.f32.mrf.mxu1 }
 0x3e5   : > { %v1761_v56 = vadd.f32 %v1760_v54, %v8382_v18  ;;  %v1874_v1 = vadd.f32 %v1873_v62, %v9049_v55 }
 0x3e6   : > { %2980 = vmatmul.f32.gmra.mxu3 %v9805_v36  ;;  %3084 = vmatmul.f32.gmra.mxu0 %v9730_v52  ;;  %v2621_v52 = vld [vmem:[#allocation3 + $0x51] sm:$0xff] }
 0x3e7   : > { %v2082_v48 = vmax.f32 %v1761_v56, 0.0  ;;  %v2083_v8 = vmax.f32 %v1874_v1, 0.0  ;;  %7210 = vmatmul.msk.f32.gmra.mxu2 %vm1603_vm10, %v8264_v17  ;;  %3200 = vmatmul.f32.gmra.mxu1 %v2620_v41  ;;  %v2346_v17 = vpop.permute.xlu2 %2345 }
 0x3e9   : > { %2168 = vst [vmem:[%s8394_s23 + $0x108] sm:$0xff] %v2082_v48  ;;  %2363 = vrot.lane.b32.xlu2 %v2083_v8, %s7702_s11 }
 0x3ea   : > { %2169 = vst.msk [vmem:[%s8394_s23 + $0x110] sm:$0xff] %vm2146_vm11, %v2083_v8  ;;  %v9816_v43 = vld [vmem:[#allocation3 + $0x6f] sm:$0xff] }
 0x3eb   : > { %v1986_v54 = vpop.f32.mrf.mxu2  ;;  %v2622_v41 = vld [vmem:[#allocation3 + $0x69] sm:$0xff] }
 0x3ec   : > { %v1987_v62 = vadd.f32 %v1986_v54, %v9261_v40 }
 0x3ee   : > { %v2084_v3 = vmax.f32 %v1987_v62, 0.0  ;;  %2983 = vmatmul.f32.gmra.mxu3 %v9816_v43  ;;  %3087 = vmatmul.f32.gmra.mxu0 %v9747_v27 }
 0x3ef   : > { %7211 = vmatmul.msk.f32.gmra.mxu2 %vm1603_vm10, %v8303_v4  ;;  %3203 = vmatmul.f32.gmra.mxu1 %v2621_v52 }
 0x3f0   : > { %2365 = vrot.lane.b32.xlu0 %v2084_v3, %s7702_s11 }
 0x3f2   : > { %v2344_v56 = vpop.permute.xlu1 %2343 }
 0x3f3   : > { %v2453_v1 = vsel %vm2146_vm11, %v2344_v56, %v2346_v17 }
 0x3f4   : > { %2518 = vst [vmem:[#allocation3 + $0x88] sm:$0xff] %v2453_v1 }
 0x3f6   : > { %3090 = vmatmul.f32.gmra.mxu0 %v9719_v24  ;;  %v2623_v24 = vld [vmem:[#allocation3 + $0x71] sm:$0xff] }
 0x3f7   : > { %7212 = vmatmul.msk.f32.gmra.mxu2 %vm1603_vm10, %v8334_v0  ;;  %3206 = vmatmul.f32.gmra.mxu1 %v2622_v41 }
 0x3fb   : > { %v1763_v27 = vpop.f32.mrf.mxu0  ;;  %v1876_v48 = vpop.f32.mrf.mxu1  ;;  %v9827_v4 = vld [vmem:[#allocation3 + $0x87] sm:$0xff] }
 0x3fc   : > { %v1764_v3 = vadd.f32 %v1763_v27, %v8382_v18  ;;  %v1877_v8 = vadd.f32 %v1876_v48, %v9049_v55  ;;  %2986 = vmatmul.f32.gmra.mxu3 %v9827_v4 }
 0x3fe   : > { %v2085_v54 = vmax.f32 %v1764_v3, 0.0  ;;  %v2086_v62 = vmax.f32 %v1877_v8, 0.0  ;;  %3093 = vmatmul.f32.gmra.mxu0 %v9771_v16  ;;  %v2776_v16 = vld [vmem:[%s14022_s2 + $0x3e0] sm:$0xff] }
 0x3ff   : > { %7213 = vmatmul.msk.f32.gmra.mxu2 %vm1603_vm10, %v8376_v49  ;;  %3209 = vmatmul.f32.gmra.mxu1 %v2623_v24  ;;  %v2778_v49 = vld [vmem:[%s14022_s2 + $0x3f0] sm:$0xff]  ;;  %v2772_v3 = vld [vmem:[%s14022_s2 + $0x3c0] sm:$0xff] }
 0x400   : > { %2170 = vst [vmem:[%s8394_s23 + $0x120] sm:$0xff] %v2085_v54  ;;  %2367 = vrot.lane.b32.xlu1 %v2086_v62, %s7702_s11  ;;  %3285 = vmatpush.msra.mxu2 %v2778_v49 }
 0x401   : > { %2171 = vst.msk [vmem:[%s8394_s23 + $0x128] sm:$0xff] %vm2146_vm11, %v2086_v62  ;;  %v2770_v62 = vld [vmem:[%s14022_s2 + $0x3b0] sm:$0xff] }
 0x402   : > { %v1989_v0 = vpop.f32.mrf.mxu2  ;;  %3286 = vmatpush.msra.mxu2 %v2776_v16 }
 0x403   : > { %v1990_v52 = vadd.f32 %v1989_v0, %v9261_v40 }
 0x404   : > { %v2348_v56 = vpop.permute.xlu0 %2347 }
 0x405   : > { %v2087_v17 = vmax.f32 %v1990_v52, 0.0  ;;  %v2768_v52 = vld [vmem:[%s14022_s2 + $0x3a0] sm:$0xff] }
 0x406   : > { %3096 = vmatmul.f32.gmra.mxu0 %v2452_v46  ;;  %v2774_v46 = vld [vmem:[%s14022_s2 + $0x3d0] sm:$0xff] }
 0x407   : > { %7214 = vmatmul.msk.f32.gmra.mxu2 %vm1603_vm10, %v8415_v61  ;;  %2369 = vrot.lane.b32.xlu2 %v2087_v17, %s7702_s11 }
 0x408   : > { %3287 = vmatpush.msra.mxu2 %v2774_v46  ;;  %v2762_v46 = vld [vmem:[%s14022_s2 + $0x370] sm:$0xff] }
 0x40a   : > { %3288 = vmatpush.msra.mxu2 %v2772_v3  ;;  %v2756_v3 = vld [vmem:[%s14022_s2 + $0x340] sm:$0xff] }
 0x40b   : > { %v2350_v41 = vpop.permute.xlu1 %2349 }
 0x40c   : > { %v2454_v61 = vsel %vm2146_vm11, %v2348_v56, %v2350_v41  ;;  %3289 = vmatpush.msra.mxu2 %v2770_v62  ;;  %v2764_v56 = vld [vmem:[%s14022_s2 + $0x380] sm:$0xff]  ;;  %v2352_v62 = vpop.permute.xlu2 %2351 }
 0x40d   : > { %2519 = vst [vmem:[#allocation3 + $0x90] sm:$0xff] %v2454_v61  ;;  %v1766_v27 = vpop.f32.mrf.mxu0  ;;  %v1879_v48 = vpop.f32.mrf.mxu1 }
 0x40e   : > { %v1767_v8 = vadd.f32 %v1766_v27, %v8382_v18  ;;  %v1880_v54 = vadd.f32 %v1879_v48, %v9049_v55  ;;  %3099 = vmatmul.f32.gmra.mxu0 %v2453_v1  ;;  %3290 = vmatpush.msra.mxu2 %v2768_v52  ;;  %v2760_v27 = vld [vmem:[%s14022_s2 + $0x360] sm:$0xff]  ;;  %v2810_v48 = vld [vmem:[%s14022_s2 + $0x4f0] sm:$0xff] }
 0x40f   : > { %7215 = vmatmul.msk.f32.gmra.mxu2 %vm1603_vm10, %v8455_v33  ;;  %v2766_v33 = vld [vmem:[%s14022_s2 + $0x390] sm:$0xff]  ;;  %3398 = vmatpush.msra.mxu3 %v2810_v48 }
 0x410   : > { %v2088_v24 = vmax.f32 %v1767_v8, 0.0  ;;  %v2089_v0 = vmax.f32 %v1880_v54, 0.0  ;;  %3291 = vmatpush.msra.mxu2 %v2766_v33  ;;  %v2754_v8 = vld [vmem:[%s14022_s2 + $0x330] sm:$0xff]  ;;  %v2752_v54 = vld [vmem:[%s14022_s2 + $0x320] sm:$0xff] }
 0x411   : > { %v2750_v52 = vld [vmem:[%s14022_s2 + $0x310] sm:$0xff] }
 0x412   : > { %2172 = vst [vmem:[%s8394_s23 + $0x138] sm:$0xff] %v2088_v24  ;;  %2371 = vrot.lane.b32.xlu0 %v2089_v0, %s7702_s11  ;;  %3292 = vmatpush.msra.mxu2 %v2764_v56  ;;  %v2748_v56 = vld [vmem:[%s14022_s2 + $0x300] sm:$0xff] }
 0x413   : > { %2173 = vst.msk [vmem:[%s8394_s23 + $0x140] sm:$0xff] %vm2146_vm11, %v2089_v0 }
 0x414   : > { %v1992_v1 = vpop.f32.mrf.mxu2  ;;  %v9873_v17 = vld [vmem:[#allocation3 + $0x8f] sm:$0xff]  ;;  %3293 = vmatpush.msra.mxu2 %v2762_v46 }
 0x415   : > { %v2624_v49 = vld [vmem:[#allocation3 + $0x89] sm:$0xff]  ;;  %v1993_v16 = vadd.f32 %v1992_v1, %v9261_v40  ;;  %2989 = vmatmul.f32.gmra.mxu3 %v9873_v17 }
 0x416   : > { %3212 = vmatmul.f32.gmra.mxu1 %v2624_v49  ;;  %3102 = vmatmul.f32.gmra.mxu0 %v2454_v61  ;;  %v2625_v61 = vld [vmem:[#allocation3 + $0x91] sm:$0xff] }
 0x417   : > { %v2090_v41 = vmax.f32 %v1993_v16, 0.0  ;;  %7216 = vmatmul.msk.f32.gmra.mxu2 %vm1603_vm10, %v8498_v10  ;;  %v2758_v10 = vld [vmem:[%s14022_s2 + $0x350] sm:$0xff] }
 0x418   : > { %3294 = vmatpush.msra.mxu2 %v2760_v27  ;;  %v2842_v16 = vld [vmem:[%s14022_s2 + $0x5f0] sm:$0xff] }
 0x419   : > { %2373 = vrot.lane.b32.xlu1 %v2090_v41, %s7702_s11  ;;  %3511 = vmatpush.msra.mxu0 %v2842_v16 }
 0x41a   : > { %3295 = vmatpush.msra.mxu2 %v2758_v10 }
 0x41c   : > { %3296 = vmatpush.msra.mxu2 %v2756_v3 }
 0x41e   : > { %3215 = vmatmul.f32.gmra.mxu1 %v2625_v61  ;;  %3297 = vmatpush.msra.mxu2 %v2754_v8  ;;  %v2808_v61 = vld [vmem:[%s14022_s2 + $0x4e0] sm:$0xff] }
 0x41f   : > { %7217 = vmatmul.msk.f32.gmra.mxu2 %vm1603_vm10, %v8545_v31  ;;  %3399 = vmatpush.msra.mxu3 %v2808_v61 }
 0x420   : > { %3298 = vmatpush.msra.mxu2 %v2752_v54 }
 0x422   : > { %v2354_v24 = vpop.permute.xlu0 %2353  ;;  %3299 = vmatpush.msra.mxu2 %v2750_v52 }
 0x423   : > { %v2455_v0 = vsel %vm2146_vm11, %v2352_v62, %v2354_v24  ;;  %v2840_v62 = vld [vmem:[%s14022_s2 + $0x5e0] sm:$0xff] }
 0x424   : > { %2520 = vst [vmem:[#allocation3 + $0xa8] sm:$0xff] %v2455_v0  ;;  %v1769_v31 = vpop.f32.mrf.mxu0  ;;  %v1882_v33 = vpop.f32.mrf.mxu1  ;;  %3105 = vmatmul.f32.gmra.mxu0 %v2455_v0  ;;  %3300 = vmatpush.msra.mxu2 %v2748_v56 }
 0x425   : > { %v1770_v1 = vadd.f32 %v1769_v31, %v8382_v18  ;;  %v1883_v49 = vadd.f32 %v1882_v33, %v9049_v55  ;;  %3512 = vmatpush.msra.mxu0 %v2840_v62 }
 0x427   : > { %v2091_v41 = vmax.f32 %v1770_v1, 0.0  ;;  %v2092_v46 = vmax.f32 %v1883_v49, 0.0  ;;  %7218 = vmatmul.msk.f32.gmra.mxu2 %vm1603_vm10, %v8578_v42  ;;  %v2358_v42 = vpop.permute.xlu2 %2357 }
 0x429   : > { %2174 = vst [vmem:[%s8394_s23 + $0x150] sm:$0xff] %v2091_v41  ;;  %2375 = vrot.lane.b32.xlu2 %v2092_v46, %s7702_s11 }
 0x42a   : > { %2175 = vst.msk [vmem:[%s8394_s23 + $0x158] sm:$0xff] %vm2146_vm11, %v2092_v46  ;;  %v2838_v46 = vld [vmem:[%s14022_s2 + $0x5d0] sm:$0xff] }
 0x42b   : > { %v1995_v27 = vpop.f32.mrf.mxu2  ;;  %v9924_v48 = vld [vmem:[#allocation3 + $0xa7] sm:$0xff]  ;;  %3513 = vmatpush.msra.mxu0 %v2838_v46 }
 0x42c   : > { %v1996_v10 = vadd.f32 %v1995_v27, %v9261_v40  ;;  %2992 = vmatmul.f32.gmra.mxu3 %v9924_v48  ;;  %v2832_v46 = vld [vmem:[%s14022_s2 + $0x5a0] sm:$0xff] }
 0x42e   : > { %v2093_v3 = vmax.f32 %v1996_v10, 0.0 }
 0x42f   : > { %7219 = vmatmul.msk.f32.gmra.mxu2 %vm1603_vm10, %v8624_v37 }
 0x430   : > { %2377 = vrot.lane.b32.xlu0 %v2093_v3, %s7702_s11 }
 0x432   : > { %v2356_v8 = vpop.permute.xlu1 %2355 }
 0x433   : > { %v2456_v54 = vsel %vm2146_vm11, %v2356_v8, %v2358_v42 }
 0x434   : > { %2521 = vst [vmem:[#allocation3 + $0xb0] sm:$0xff] %v2456_v54  ;;  %3108 = vmatmul.f32.gmra.mxu0 %v2456_v54 }
 0x437   : > { %7220 = vmatmul.msk.f32.gmra.mxu2 %vm1603_vm10, %v8667_v6  ;;  %v2806_v6 = vld [vmem:[%s14022_s2 + $0x4d0] sm:$0xff] }
 0x438   : > { %2383 = vrot.lane.b32.xlu0 %v2098_v7, %s7702_s11  ;;  %3400 = vmatpush.msra.mxu3 %v2806_v6 }
 0x43b   : > { %v1772_v37 = vpop.f32.mrf.mxu0  ;;  %v1885_v24 = vpop.f32.mrf.mxu1  ;;  %v9943_v0 = vld [vmem:[#allocation3 + $0xaf] sm:$0xff] }
 0x43c   : > { %v2626_v52 = vld [vmem:[#allocation3 + $0xa9] sm:$0xff]  ;;  %v1773_v31 = vadd.f32 %v1772_v37, %v8382_v18  ;;  %v1886_v33 = vadd.f32 %v1885_v24, %v9049_v55  ;;  %2995 = vmatmul.f32.gmra.mxu3 %v9943_v0  ;;  %v2627_v49 = vld [vmem:[#allocation3 + $0xb1] sm:$0xff]  ;;  %v2836_v24 = vld [vmem:[%s14022_s2 + $0x5c0] sm:$0xff] }
 0x43d   : > { %3218 = vmatmul.f32.gmra.mxu1 %v2626_v52  ;;  %3514 = vmatpush.msra.mxu0 %v2836_v24  ;;  %v2802_v52 = vld [vmem:[%s14022_s2 + $0x4b0] sm:$0xff] }
 0x43e   : > { %v2094_v1 = vmax.f32 %v1773_v31, 0.0  ;;  %v2095_v57 = vmax.f32 %v1886_v33, 0.0 }
 0x43f   : > { %7221 = vmatmul.msk.f32.gmra.mxu2 %vm1603_vm10, %v8744_v35 }
 0x440   : > { %2176 = vst [vmem:[%s8394_s23 + $0x168] sm:$0xff] %v2094_v1  ;;  %2379 = vrot.lane.b32.xlu1 %v2095_v57, %s7702_s11  ;;  %v2834_v1 = vld [vmem:[%s14022_s2 + $0x5b0] sm:$0xff] }
 0x441   : > { %2177 = vst.msk [vmem:[%s8394_s23 + $0x170] sm:$0xff] %vm2146_vm11, %v2095_v57  ;;  %3515 = vmatpush.msra.mxu0 %v2834_v1  ;;  %v10097_v1 = vpop.f32.mrf.mxu3 }
 0x442   : > { %v1998_v55 = vpop.f32.mrf.mxu2 }
 0x443   : > { %v1999_v7 = vadd.f32 %v1998_v55, %v9261_v40  ;;  %v1775_v16 = vpop.f32.mrf.mxu0  ;;  %v2364_v26 = vpop.permute.xlu2 %2363  ;;  %3516 = vmatpush.msra.mxu0 %v2832_v46 }
 0x444   : > { %v1776_v41 = vadd.f32 %v1775_v16, %v8382_v18  ;;  %v2360_v10 = vpop.permute.xlu0 %2359  ;;  %v2804_v18 = vld [vmem:[%s14022_s2 + $0x4c0] sm:$0xff]  ;;  %v10086_v25 = vpop.f32.mrf.mxu1 }
 0x445   : > { %3221 = vmatmul.f32.gmra.mxu1 %v2627_v49  ;;  %v2096_v56 = vmax.f32 %v1999_v7, 0.0  ;;  %3401 = vmatpush.msra.mxu3 %v2804_v18  ;;  %v2800_v7 = vld [vmem:[%s14022_s2 + $0x4a0] sm:$0xff] }
 0x446   : > { %v2097_v35 = vmax.f32 %v1776_v41, 0.0 }
 0x447   : > { %3301 = vmatmul.f32.vlgmr.msra.gmra.mxu2 %v9696_v38  ;;  %2381 = vrot.lane.b32.xlu2 %v2096_v56, %s7702_s11 }
 0x448   : > { %2178 = vst [vmem:[%s8394_s23 + $0x180] sm:$0xff] %v2097_v35  ;;  %3402 = vmatpush.msra.mxu3 %v2802_v52 }
 0x44a   : > { %v2001_v27 = vpop.f32.mrf.mxu2  ;;  %3403 = vmatpush.msra.mxu3 %v2800_v7  ;;  %v2824_v7 = vld [vmem:[%s14022_s2 + $0x560] sm:$0xff] }
 0x44b   : > { %v2002_v61 = vadd.f32 %v2001_v27, %v9261_v40  ;;  %v2362_v3 = vpop.permute.xlu1 %2361  ;;  %v2798_v27 = vld [vmem:[%s14022_s2 + $0x490] sm:$0xff] }
 0x44c   : > { %v2457_v42 = vsel %vm2146_vm11, %v2360_v10, %v2362_v3  ;;  %3404 = vmatpush.msra.mxu3 %v2798_v27  ;;  %v2830_v10 = vld [vmem:[%s14022_s2 + $0x590] sm:$0xff] }
 0x44d   : > { %v2099_v8 = vmax.f32 %v2002_v61, 0.0  ;;  %2522 = vst [vmem:[#allocation3 + $0xc8] sm:$0xff] %v2457_v42  ;;  %3111 = vmatmul.f32.gmra.mxu0 %v2457_v42 }
 0x44e   : > { %3517 = vmatpush.msra.mxu0 %v2830_v10 }
 0x44f   : > { %3304 = vmatmul.f32.gmra.mxu2 %v9749_v59  ;;  %2385 = vrot.lane.b32.xlu1 %v2099_v8, %s7702_s11  ;;  %v2796_v8 = vld [vmem:[%s14022_s2 + $0x480] sm:$0xff] }
 0x450   : > { %2387 = vrot.lane.b32.xlu2 %v2101_v22, %s7702_s11  ;;  %3405 = vmatpush.msra.mxu3 %v2796_v8 }
 0x452   : > { %v2004_v38 = vpop.f32.mrf.mxu2 }
 0x453   : > { %v2005_v54 = vadd.f32 %v2004_v38, %v9261_v40 }
 0x454   : > { %v9976_v62 = vld [vmem:[#allocation3 + $0xc7] sm:$0xff] }
 0x455   : > { %v2102_v37 = vmax.f32 %v2005_v54, 0.0  ;;  %2998 = vmatmul.f32.gmra.mxu3 %v9976_v62  ;;  %v2828_v54 = vld [vmem:[%s14022_s2 + $0x580] sm:$0xff] }
 0x456   : > { %3518 = vmatpush.msra.mxu0 %v2828_v54 }
 0x457   : > { %2389 = vrot.lane.b32.xlu0 %v2102_v37, %s7702_s11  ;;  %2391 = vrot.lane.b32.xlu1 %v2104_v23, %s7702_s11 }
 0x458   : > { %3307 = vmatmul.f32.gmra.mxu2 %v9773_v14 }
 0x45a   : > { %v2007_v29 = vpop.f32.mrf.mxu2 }
 0x45b   : > { %v2008_v22 = vadd.f32 %v2007_v29, %v9261_v40  ;;  %v2794_v29 = vld [vmem:[%s14022_s2 + $0x470] sm:$0xff] }
 0x45c   : > { %3406 = vmatpush.msra.mxu3 %v2794_v29 }
 0x45d   : > { %v2105_v59 = vmax.f32 %v2008_v22, 0.0 }
 0x45f   : > { %2395 = vrot.lane.b32.xlu0 %v2107_v20, %s7702_s11  ;;  %2393 = vrot.lane.b32.xlu2 %v2105_v59, %s7702_s11 }
 0x460   : > { %3310 = vmatmul.f32.gmra.mxu2 %v9788_v9 }
 0x461   : > { %v2370_v12 = vpop.permute.xlu2 %2369 }
 0x462   : > { %v2010_v23 = vpop.f32.mrf.mxu2  ;;  %v2366_v14 = vpop.permute.xlu0 %2365 }
 0x463   : > { %v2011_v31 = vadd.f32 %v2010_v23, %v9261_v40  ;;  %v2458_v33 = vsel %vm2146_vm11, %v2364_v26, %v2366_v14  ;;  %v2826_v26 = vld [vmem:[%s14022_s2 + $0x570] sm:$0xff] }
 0x464   : > { %2523 = vst [vmem:[#allocation3 + $0xd0] sm:$0xff] %v2458_v33  ;;  %3114 = vmatmul.f32.gmra.mxu0 %v2458_v33  ;;  %v2792_v33 = vld [vmem:[%s14022_s2 + $0x460] sm:$0xff] }
 0x465   : > { %v2108_v6 = vmax.f32 %v2011_v31, 0.0  ;;  %3519 = vmatpush.msra.mxu0 %v2826_v26  ;;  %3407 = vmatpush.msra.mxu3 %v2792_v33 }
 0x467   : > { %2397 = vrot.lane.b32.xlu1 %v2108_v6, %s7702_s11  ;;  %2399 = vrot.lane.b32.xlu2 %v2110_v53, %s7702_s11 }
 0x468   : > { %3313 = vmatmul.f32.gmra.mxu2 %v9805_v36  ;;  %3520 = vmatpush.msra.mxu0 %v2824_v7 }
 0x46a   : > { %v2013_v30 = vpop.f32.mrf.mxu2 }
 0x46b   : > { %v2014_v20 = vadd.f32 %v2013_v30, %v9261_v40  ;;  %v10007_v9 = vld [vmem:[#allocation3 + $0xcf] sm:$0xff] }
 0x46c   : > { %v2628_v57 = vld [vmem:[#allocation3 + $0xc9] sm:$0xff]  ;;  %3001 = vmatmul.f32.gmra.mxu3 %v10007_v9  ;;  %v2629_v56 = vld [vmem:[#allocation3 + $0xd1] sm:$0xff] }
 0x46d   : > { %3224 = vmatmul.f32.gmra.mxu1 %v2628_v57  ;;  %v2111_v55 = vmax.f32 %v2014_v20, 0.0 }
 0x46f   : > { %2401 = vrot.lane.b32.xlu0 %v2111_v55, %s7702_s11  ;;  %2403 = vrot.lane.b32.xlu1 %v2113_v19, %s7702_s11 }
 0x470   : > { %3316 = vmatmul.f32.gmra.mxu2 %v9816_v43 }
 0x472   : > { %v2016_v53 = vpop.f32.mrf.mxu2  ;;  %v2368_v36 = vpop.permute.xlu1 %2367 }
 0x473   : > { %v2017_v49 = vadd.f32 %v2016_v53, %v9261_v40  ;;  %v2459_v16 = vsel %vm2146_vm11, %v2368_v36, %v2370_v12  ;;  %v10116_v12 = vpop.f32.mrf.mxu3 }
 0x474   : > { %2524 = vst [vmem:[#allocation3 + $0xe8] sm:$0xff] %v2459_v16  ;;  %3117 = vmatmul.f32.gmra.mxu0 %v2459_v16 }
 0x475   : > { %3227 = vmatmul.f32.gmra.mxu1 %v2629_v56  ;;  %v2114_v41 = vmax.f32 %v2017_v49, 0.0 }
 0x477   : > { %2407 = vrot.lane.b32.xlu0 %v2116_v32, %s7702_s11  ;;  %2405 = vrot.lane.b32.xlu2 %v2114_v41, %s7702_s11 }
 0x478   : > { %3319 = vmatmul.f32.gmra.mxu2 %v9827_v4 }
 0x47a   : > { %v2019_v47 = vpop.f32.mrf.mxu2 }
 0x47b   : > { %v2020_v19 = vadd.f32 %v2019_v47, %v9261_v40  ;;  %v10029_v43 = vld [vmem:[#allocation3 + $0xe7] sm:$0xff]  ;;  %v14171_v47 = vmax.f32 %v9795_v51, 0.0 }
 0x47c   : > { %3004 = vmatmul.f32.gmra.mxu3 %v10029_v43 }
 0x47d   : > { %v2117_v35 = vmax.f32 %v2020_v19, 0.0 }
 0x47f   : > { %2409 = vrot.lane.b32.xlu1 %v2117_v35, %s7702_s11  ;;  %2411 = vrot.lane.b32.xlu2 %v2119_v44, %s7702_s11 }
 0x480   : > { %3322 = vmatmul.f32.gmra.mxu2 %v9873_v17 }
 0x482   : > { %v2022_v28 = vpop.f32.mrf.mxu2 }
 0x483   : > { %v2023_v32 = vadd.f32 %v2022_v28, %v9261_v40  ;;  %v2376_v58 = vpop.permute.xlu2 %2375 }
 0x484   : > { %v2372_v44 = vpop.permute.xlu0 %2371 }
 0x485   : > { %v2120_v4 = vmax.f32 %v2023_v32, 0.0  ;;  %v10138_v32 = vpop.f32.mrf.mxu3 }
 0x487   : > { %2413 = vrot.lane.b32.xlu0 %v2120_v4, %s7702_s11  ;;  %2415 = vrot.lane.b32.xlu1 %v2122_v39, %s7702_s11 }
 0x488   : > { %3325 = vmatmul.f32.gmra.mxu2 %v9924_v48 }
 0x48a   : > { %v2025_v2 = vpop.f32.mrf.mxu2 }
 0x48b   : > { %v2026_v17 = vadd.f32 %v2025_v2, %v9261_v40  ;;  %v2374_v61 = vpop.permute.xlu1 %2373  ;;  %v2822_v2 = vld [vmem:[%s14022_s2 + $0x550] sm:$0xff] }
 0x48c   : > { %v2460_v3 = vsel %vm2146_vm11, %v2372_v44, %v2374_v61  ;;  %3521 = vmatpush.msra.mxu0 %v2822_v2 }
 0x48d   : > { %v2123_v42 = vmax.f32 %v2026_v17, 0.0  ;;  %2525 = vst [vmem:[#allocation3 + $0xf0] sm:$0xff] %v2460_v3  ;;  %3120 = vmatmul.f32.gmra.mxu0 %v2460_v3 }
 0x48f   : > { %2419 = vrot.lane.b32.xlu0 %v2125_v63, %s7702_s11  ;;  %2417 = vrot.lane.b32.xlu2 %v2123_v42, %s7702_s11 }
 0x490   : > { %3328 = vmatmul.f32.gmra.mxu2 %v9943_v0  ;;  %v10069_v0 = vpop.f32.mrf.mxu0 }
 0x492   : > { %v2028_v21 = vpop.f32.mrf.mxu2 }
 0x493   : > { %v2029_v39 = vadd.f32 %v2028_v21, %v9261_v40 }
 0x494   : > { %v2559_v48 = vld [vmem:[#allocation3 + $0xef] sm:$0xff] }
 0x495   : > { %v2630_v18 = vld [vmem:[#allocation3 + $0xe9] sm:$0xff]  ;;  %v2126_v38 = vmax.f32 %v2029_v39, 0.0  ;;  %3007 = vmatmul.f32.gmra.mxu3 %v2559_v48  ;;  %v2631_v37 = vld [vmem:[#allocation3 + $0xf1] sm:$0xff] }
 0x496   : > { %3230 = vmatmul.f32.gmra.mxu1 %v2630_v18  ;;  %v10163_v18 = vpop.f32.mrf.mxu3 }
 0x497   : > { %2421 = vrot.lane.b32.xlu1 %v2126_v38, %s7702_s11  ;;  %2423 = vrot.lane.b32.xlu2 %v2128_v50, %s7702_s11 }
 0x498   : > { %3331 = vmatmul.f32.gmra.mxu2 %v9976_v62  ;;  %v10084_v23 = vpop.f32.mrf.mxu0 }
 0x49a   : > { %v2031_v60 = vpop.f32.mrf.mxu2 }
 0x49b   : > { %v2032_v63 = vadd.f32 %v2031_v60, %v9261_v40 }
 0x49d   : > { %v2129_v24 = vmax.f32 %v2032_v63, 0.0 }
 0x49e   : > { %3233 = vmatmul.f32.gmra.mxu1 %v2631_v37  ;;  %v10181_v29 = vpop.f32.mrf.mxu3 }
 0x49f   : > { %2425 = vrot.lane.b32.xlu0 %v2129_v24, %s7702_s11  ;;  %2427 = vrot.lane.b32.xlu1 %v2131_v11, %s7702_s11  ;;  %v2820_v24 = vld [vmem:[%s14022_s2 + $0x540] sm:$0xff] }
 0x4a0   : > { %3334 = vmatmul.f32.gmra.mxu2 %v10007_v9  ;;  %v10103_v15 = vpop.f32.mrf.mxu0  ;;  %3522 = vmatpush.msra.mxu0 %v2820_v24 }
 0x4a1   : > { %v2382_v30 = vpop.permute.xlu2 %2381 }
 0x4a2   : > { %v2034_v50 = vpop.f32.mrf.mxu2  ;;  %v2378_v62 = vpop.permute.xlu0 %2377 }
 0x4a3   : > { %v2035_v22 = vadd.f32 %v2034_v50, %v9261_v40  ;;  %v2461_v59 = vsel %vm2146_vm11, %v2376_v58, %v2378_v62 }
 0x4a4   : > { %2526 = vst [vmem:[#allocation3 + $0x108] sm:$0xff] %v2461_v59  ;;  %3123 = vmatmul.f32.gmra.mxu0 %v2461_v59 }
 0x4a5   : > { %v2132_v52 = vmax.f32 %v2035_v22, 0.0 }
 0x4a7   : > { %2431 = vrot.lane.b32.xlu0 %v2134_v5, %s7702_s11  ;;  %2429 = vrot.lane.b32.xlu2 %v2132_v52, %s7702_s11  ;;  %v10105_v5 = vpop.f32.mrf.mxu1 }
 0x4a8   : > { %3337 = vmatmul.f32.gmra.mxu2 %v10029_v43  ;;  %v10118_v53 = vpop.f32.mrf.mxu0 }
 0x4aa   : > { %v2037_v11 = vpop.f32.mrf.mxu2  ;;  %v2388_v19 = vpop.permute.xlu2 %2387 }
 0x4ab   : > { %v2038_v14 = vadd.f32 %v2037_v11, %v9261_v40  ;;  %v2560_v31 = vld [vmem:[#allocation3 + $0x107] sm:$0xff]  ;;  %v2384_v43 = vpop.permute.xlu0 %2383 }
 0x4ac   : > { %3010 = vmatmul.f32.gmra.mxu3 %v2560_v31 }
 0x4ad   : > { %v2135_v6 = vmax.f32 %v2038_v14, 0.0 }
 0x4af   : > { %2433 = vrot.lane.b32.xlu1 %v2135_v6, %s7702_s11  ;;  %2435 = vrot.lane.b32.xlu2 %v2137_v45, %s7702_s11  ;;  %v14170_v45 = vmax.f32 %v9780_v13, 0.0  ;;  %v10125_v41 = vpop.f32.mrf.mxu1  ;;  %v2790_v13 = vld [vmem:[%s14022_s2 + $0x450] sm:$0xff] }
 0x4b0   : > { %3340 = vmatmul.f32.gmra.mxu2 %v2559_v48  ;;  %3408 = vmatpush.msra.mxu3 %v2790_v13  ;;  %v10143_v51 = vpop.f32.mrf.mxu0  ;;  %v2788_v48 = vld [vmem:[%s14022_s2 + $0x440] sm:$0xff] }
 0x4b2   : > { %v2040_v20 = vpop.f32.mrf.mxu2  ;;  %v2380_v9 = vpop.permute.xlu1 %2379  ;;  %3409 = vmatpush.msra.mxu3 %v2788_v48 }
 0x4b3   : > { %v2041_v57 = vadd.f32 %v2040_v20, %v9261_v40  ;;  %v2462_v55 = vsel %vm2146_vm11, %v2380_v9, %v2382_v30  ;;  %v10200_v20 = vpop.f32.mrf.mxu3 }
 0x4b4   : > { %2527 = vst [vmem:[#allocation3 + $0x110] sm:$0xff] %v2462_v55  ;;  %3126 = vmatmul.f32.gmra.mxu0 %v2462_v55 }
 0x4b5   : > { %v2138_v34 = vmax.f32 %v2041_v57, 0.0 }
 0x4b7   : > { %2437 = vrot.lane.b32.xlu0 %v2138_v34, %s7702_s11  ;;  %2439 = vrot.lane.b32.xlu1 %v14170_v45, %s7702_s11  ;;  %v10149_v17 = vpop.f32.mrf.mxu1 }
 0x4b8   : > { %3343 = vmatmul.f32.gmra.mxu2 %v2560_v31  ;;  %v10165_v38 = vpop.f32.mrf.mxu0  ;;  %v2786_v31 = vld [vmem:[%s14022_s2 + $0x430] sm:$0xff] }
 0x4b9   : > { %v2394_v61 = vpop.permute.xlu2 %2393  ;;  %3410 = vmatpush.msra.mxu3 %v2786_v31 }
 0x4ba   : > { %v2043_v36 = vpop.f32.mrf.mxu2 }
 0x4bb   : > { %v2044_v49 = vadd.f32 %v2043_v36, %v9261_v40  ;;  %v10121_v16 = vld [vmem:[#allocation3 + $0x10f] sm:$0xff] }
 0x4bc   : > { %v10123_v56 = vld [vmem:[#allocation3 + $0x109] sm:$0xff]  ;;  %3013 = vmatmul.f32.gmra.mxu3 %v10121_v16  ;;  %v10141_v10 = vld [vmem:[#allocation3 + $0x111] sm:$0xff] }
 0x4bd   : > { %3236 = vmatmul.f32.gmra.mxu1 %v10123_v56  ;;  %v2141_v46 = vmax.f32 %v2044_v49, 0.0  ;;  %v2818_v49 = vld [vmem:[%s14022_s2 + $0x530] sm:$0xff] }
 0x4be   : > { %3523 = vmatpush.msra.mxu0 %v2818_v49 }
 0x4bf   : > { %2443 = vrot.lane.b32.xlu0 %v14171_v47, %s7702_s11  ;;  %2441 = vrot.lane.b32.xlu2 %v2141_v46, %s7702_s11  ;;  %v10167_v54 = vpop.f32.mrf.mxu1 }
 0x4c0   : > { %3346 = vmatmul.f32.gmra.mxu2 %v10121_v16  ;;  %v10183_v58 = vpop.f32.mrf.mxu0 }
 0x4c1   : > { %v2386_v35 = vpop.permute.xlu1 %2385  ;;  %v2400_v50 = vpop.permute.xlu2 %2399 }
 0x4c2   : > { %v2463_v27 = vsel %vm2146_vm11, %v2384_v43, %v2386_v35  ;;  %v2046_v28 = vpop.f32.mrf.mxu2  ;;  %v2784_v43 = vld [vmem:[%s14022_s2 + $0x420] sm:$0xff] }
 0x4c3   : > { %2528 = vst [vmem:[#allocation3 + $0x128] sm:$0xff] %v2463_v27  ;;  %v2047_v4 = vadd.f32 %v2046_v28, %v9261_v40  ;;  %3129 = vmatmul.f32.gmra.mxu0 %v2463_v27  ;;  %3411 = vmatpush.msra.mxu3 %v2784_v43 }
 0x4c5   : > { %3239 = vmatmul.f32.gmra.mxu1 %v10141_v10  ;;  %v2144_v44 = vmax.f32 %v2047_v4, 0.0 }
 0x4c7   : > { %2445 = vrot.lane.b32.xlu1 %v2144_v44, %s7702_s11  ;;  %v10185_v59 = vpop.f32.mrf.mxu1 }
 0x4c8   : > { %v10208_v34 = vpop.f32.mrf.mxu0 }
 0x4c9   : > { %v2390_v3 = vpop.permute.xlu0 %2389  ;;  %v2392_v40 = vpop.permute.xlu1 %2391  ;;  %14172 = vst [vmem:[#allocation8_spill] sm:$0xff] %v10208_v34 }
 0x4ca   : > { %v2464_v42 = vsel %vm2146_vm11, %v2388_v19, %v2390_v3  ;;  %v2465_v8 = vsel %vm2146_vm11, %v2392_v40, %v2394_v61  ;;  %v10154_v21 = vpop.f32.mrf.mxu2  ;;  %v10156_v39 = vld [vmem:[#allocation3 + $0x127] sm:$0xff]  ;;  %v10228_v19 = vpop.f32.mrf.mxu3 }
 0x4cb   : > { %2529 = vst [vmem:[#allocation3 + $0x130] sm:$0xff] %v2464_v42  ;;  %3016 = vmatmul.f32.gmra.mxu3 %v10156_v39  ;;  %3349 = vmatmul.f32.gmra.mxu2 %v10156_v39 }
 0x4cc   : > { %2530 = vst [vmem:[#allocation3 + $0x148] sm:$0xff] %v2465_v8  ;;  %3132 = vmatmul.f32.gmra.mxu0 %v2464_v42  ;;  %v2816_v42 = vld [vmem:[%s14022_s2 + $0x520] sm:$0xff] }
 0x4cd   : > { %3524 = vmatpush.msra.mxu0 %v2816_v42  ;;  %v2874_v42 = vld [vmem:[%s14022_s2 + $0x6f0] sm:$0xff] }
 0x4ce   : > { %3624 = vmatpush.msra.mxu1 %v2874_v42  ;;  %v2868_v42 = vld [vmem:[%s14022_s2 + $0x6c0] sm:$0xff] }
 0x4cf   : > { %v10214_v36 = vpop.f32.mrf.mxu1 }
 0x4d0   : > { %v10234_v35 = vpop.f32.mrf.mxu0 }
 0x4d1   : > { %v2396_v62 = vpop.permute.xlu0 %2395  ;;  %v2406_v33 = vpop.permute.xlu2 %2405  ;;  %14173 = vst [vmem:[#allocation9_spill] sm:$0xff] %v10234_v35 }
 0x4d2   : > { %v10169_v60 = vpop.f32.mrf.mxu2  ;;  %v10171_v63 = vld [vmem:[#allocation3 + $0x12f] sm:$0xff] }
 0x4d3   : > { %v10173_v37 = vld [vmem:[#allocation3 + $0x129] sm:$0xff]  ;;  %3019 = vmatmul.f32.gmra.mxu3 %v10171_v63  ;;  %3352 = vmatmul.f32.gmra.mxu2 %v10171_v63  ;;  %v10190_v11 = vld [vmem:[#allocation3 + $0x131] sm:$0xff] }
 0x4d4   : > { %3242 = vmatmul.f32.gmra.mxu1 %v10173_v37  ;;  %3135 = vmatmul.f32.gmra.mxu0 %v2465_v8  ;;  %v10188_v26 = vld [vmem:[#allocation3 + $0x147] sm:$0xff]  ;;  %v10251_v8 = vpop.f32.mrf.mxu3 }
 0x4d5   : > { %14175 = vst [vmem:[#allocation11_spill] sm:$0xff] %v10251_v8 }
 0x4d7   : > { %v10236_v27 = vpop.f32.mrf.mxu1 }
 0x4d8   : > { %14174 = vst [vmem:[#allocation10_spill] sm:$0xff] %v10236_v27  ;;  %v10255_v24 = vpop.f32.mrf.mxu0 }
 0x4d9   : > { %v2398_v22 = vpop.permute.xlu1 %2397  ;;  %v2412_v28 = vpop.permute.xlu2 %2411  ;;  %14177 = vst [vmem:[#allocation13_spill] sm:$0xff] %v10255_v24 }
 0x4da   : > { %v2466_v52 = vsel %vm2146_vm11, %v2396_v62, %v2398_v22 }
 0x4db   : > { %2531 = vst [vmem:[#allocation3 + $0x150] sm:$0xff] %v2466_v52  ;;  %v10192_v14 = vpop.f32.mrf.mxu2  ;;  %3022 = vmatmul.f32.gmra.mxu3 %v10188_v26  ;;  %3355 = vmatmul.f32.gmra.mxu2 %v10188_v26 }
 0x4dc   : > { %3245 = vmatmul.f32.gmra.mxu1 %v10190_v11  ;;  %3138 = vmatmul.f32.gmra.mxu0 %v2466_v52 }
 0x4df   : > { %v10253_v48 = vpop.f32.mrf.mxu1 }
 0x4e0   : > { %14176 = vst [vmem:[#allocation12_spill] sm:$0xff] %v10253_v48  ;;  %v10273_v49 = vpop.f32.mrf.mxu0 }
 0x4e1   : > { %v2402_v6 = vpop.permute.xlu0 %2401  ;;  %v2404_v30 = vpop.permute.xlu1 %2403  ;;  %14180 = vst [vmem:[#allocation16_spill] sm:$0xff] %v10273_v49 }
 0x4e2   : > { %v2467_v9 = vsel %vm2146_vm11, %v2400_v50, %v2402_v6  ;;  %v2468_v57 = vsel %vm2146_vm11, %v2404_v30, %v2406_v33  ;;  %v10204_v55 = vld [vmem:[#allocation3 + $0x14f] sm:$0xff] }
 0x4e3   : > { %v10206_v7 = vld [vmem:[#allocation3 + $0x149] sm:$0xff]  ;;  %2532 = vst [vmem:[#allocation3 + $0x168] sm:$0xff] %v2467_v9  ;;  %v10210_v45 = vpop.f32.mrf.mxu2  ;;  %3025 = vmatmul.f32.gmra.mxu3 %v10204_v55  ;;  %3358 = vmatmul.f32.gmra.mxu2 %v10204_v55  ;;  %v10222_v46 = vld [vmem:[#allocation3 + $0x151] sm:$0xff] }
 0x4e4   : > { %3248 = vmatmul.f32.gmra.mxu1 %v10206_v7  ;;  %2533 = vst [vmem:[#allocation3 + $0x170] sm:$0xff] %v2468_v57  ;;  %3141 = vmatmul.f32.gmra.mxu0 %v2467_v9  ;;  %v2782_v9 = vld [vmem:[%s14022_s2 + $0x410] sm:$0xff] }
 0x4e5   : > { %3412 = vmatpush.msra.mxu3 %v2782_v9 }
 0x4e7   : > { %v10275_v43 = vpop.f32.mrf.mxu1 }
 0x4e8   : > { %14181 = vst [vmem:[#allocation17_spill] sm:$0xff] %v10275_v43 }
 0x4e9   : > { %v2408_v4 = vpop.permute.xlu0 %2407  ;;  %v2418_v50 = vpop.permute.xlu2 %2417 }
 0x4ea   : > { %v10220_v13 = vld [vmem:[#allocation3 + $0x167] sm:$0xff] }
 0x4eb   : > { %v10224_v47 = vpop.f32.mrf.mxu2  ;;  %3028 = vmatmul.f32.gmra.mxu3 %v10220_v13  ;;  %3361 = vmatmul.f32.gmra.mxu2 %v10220_v13  ;;  %v10239_v61 = vld [vmem:[#allocation3 + $0x16f] sm:$0xff] }
 0x4ec   : > { %3251 = vmatmul.f32.gmra.mxu1 %v10222_v46  ;;  %3144 = vmatmul.f32.gmra.mxu0 %v2468_v57  ;;  %v10241_v3 = vld [vmem:[#allocation3 + $0x169] sm:$0xff]  ;;  %v10261_v6 = vld [vmem:[#allocation3 + $0x171] sm:$0xff]  ;;  %v10271_v57 = vpop.f32.mrf.mxu3 }
 0x4ed   : > { %14179 = vst [vmem:[#allocation15_spill] sm:$0xff] %v10271_v57 }
 0x4f1   : > { %v2410_v2 = vpop.permute.xlu1 %2409  ;;  %v2424_v9 = vpop.permute.xlu2 %2423 }
 0x4f2   : > { %v2469_v44 = vsel %vm2146_vm11, %v2408_v4, %v2410_v2 }
 0x4f3   : > { %2534 = vst [vmem:[#allocation3 + $0x188] sm:$0xff] %v2469_v44  ;;  %v10243_v40 = vpop.f32.mrf.mxu2  ;;  %3031 = vmatmul.f32.gmra.mxu3 %v10239_v61  ;;  %3364 = vmatmul.f32.gmra.mxu2 %v10239_v61 }
 0x4f4   : > { %3254 = vmatmul.f32.gmra.mxu1 %v10241_v3  ;;  %3147 = vmatmul.f32.gmra.mxu0 %v2469_v44  ;;  %v2814_v44 = vld [vmem:[%s14022_s2 + $0x510] sm:$0xff] }
 0x4f5   : > { %3525 = vmatpush.msra.mxu0 %v2814_v44 }
 0x4f9   : > { %v2414_v62 = vpop.permute.xlu0 %2413  ;;  %v2416_v22 = vpop.permute.xlu1 %2415 }
 0x4fa   : > { %v2470_v52 = vsel %vm2146_vm11, %v2412_v28, %v2414_v62  ;;  %v2471_v31 = vsel %vm2146_vm11, %v2416_v22, %v2418_v50  ;;  %v10259_v33 = vld [vmem:[#allocation3 + $0x187] sm:$0xff]  ;;  %v10295_v62 = vpop.f32.mrf.mxu3  ;;  %v2870_v22 = vld [vmem:[%s14022_s2 + $0x6d0] sm:$0xff] }
 0x4fb   : > { %2535 = vst [vmem:[#allocation3 + $0x190] sm:$0xff] %v2470_v52  ;;  %v10263_v30 = vpop.f32.mrf.mxu2  ;;  %3034 = vmatmul.f32.gmra.mxu3 %v10259_v33  ;;  %3367 = vmatmul.f32.gmra.mxu2 %v10259_v33  ;;  %v2872_v50 = vld [vmem:[%s14022_s2 + $0x6e0] sm:$0xff] }
 0x4fc   : > { %14178 = vst [vmem:[#allocation14_spill] sm:$0xff] %v10263_v30  ;;  %3257 = vmatmul.f32.gmra.mxu1 %v10261_v6  ;;  %3150 = vmatmul.f32.gmra.mxu0 %v2470_v52  ;;  %v10300_v52 = vpop.f32.mrf.mxu0 }
 0x4fd   : > { %2536 = vst [vmem:[#allocation3 + $0x1a8] sm:$0xff] %v2471_v31  ;;  %3625 = vmatpush.msra.mxu1 %v2872_v50  ;;  %v2906_v50 = vld [vmem:[%s14022_s2 + $0x7f0] sm:$0xff] }
 0x4fe   : > { %14183 = vst [vmem:[#allocation19_spill] sm:$0xff] %v10295_v62  ;;  %3737 = vmatpush.msrb.mxu2 %v2906_v50 }
 0x4ff   : > { %14184 = vst [vmem:[#allocation20_spill] sm:$0xff] %v10300_v52  ;;  %3626 = vmatpush.msra.mxu1 %v2870_v22  ;;  %v2904_v22 = vld [vmem:[%s14022_s2 + $0x7e0] sm:$0xff] }
 0x500   : > { %3738 = vmatpush.msrb.mxu2 %v2904_v22  ;;  %v2862_v22 = vld [vmem:[%s14022_s2 + $0x690] sm:$0xff] }
 0x501   : > { %v2420_v49 = vpop.permute.xlu0 %2419  ;;  %3627 = vmatpush.msra.mxu1 %v2868_v42  ;;  %v2902_v42 = vld [vmem:[%s14022_s2 + $0x7d0] sm:$0xff] }
 0x502   : > { %v10277_v28 = vld [vmem:[#allocation3 + $0x18f] sm:$0xff]  ;;  %v10329_v52 = vpop.f32.mrf.mxu3  ;;  %3739 = vmatpush.msrb.mxu2 %v2902_v42 }
 0x503   : > { %v10279_v4 = vld [vmem:[#allocation3 + $0x189] sm:$0xff]  ;;  %v10281_v2 = vpop.f32.mrf.mxu2  ;;  %3037 = vmatmul.f32.gmra.mxu3 %v10277_v28  ;;  %3370 = vmatmul.f32.gmra.mxu2 %v10277_v28  ;;  %v10307_v44 = vld [vmem:[#allocation3 + $0x191] sm:$0xff]  ;;  %14189 = vst [vmem:[#allocation25_spill] sm:$0xff] %v10329_v52 }
 0x504   : > { %14182 = vst [vmem:[#allocation18_spill] sm:$0xff] %v10281_v2  ;;  %3260 = vmatmul.f32.gmra.mxu1 %v10279_v4  ;;  %3153 = vmatmul.f32.gmra.mxu0 %v2471_v31  ;;  %v10302_v31 = vpop.f32.mrf.mxu1  ;;  %v10305_v48 = vld [vmem:[#allocation3 + $0x1a7] sm:$0xff] }
 0x505   : > { %14185 = vst [vmem:[#allocation21_spill] sm:$0xff] %v10302_v31  ;;  %v10334_v31 = vpop.f32.mrf.mxu0 }
 0x506   : > { %14186 = vst [vmem:[#allocation22_spill] sm:$0xff] %v10305_v48 }
 0x507   : > { %14187 = vst [vmem:[#allocation23_spill] sm:$0xff] %v10307_v44 }
 0x508   : > { %14190 = vst [vmem:[#allocation26_spill] sm:$0xff] %v10334_v31 }
 0x509   : > { %v2422_v43 = vpop.permute.xlu1 %2421 }
 0x50a   : > { %v2472_v24 = vsel %vm2146_vm11, %v2420_v49, %v2422_v43  ;;  %v2780_v49 = vld [vmem:[%s14022_s2 + $0x400] sm:$0xff]  ;;  %v2866_v43 = vld [vmem:[%s14022_s2 + $0x6b0] sm:$0xff]  ;;  %v10367_v42 = vpop.f32.mrf.mxu3 }
 0x50b   : > { %2537 = vst [vmem:[#allocation3 + $0x1b0] sm:$0xff] %v2472_v24  ;;  %v10312_v62 = vpop.f32.mrf.mxu2  ;;  %3040 = vmatmul.f32.gmra.mxu3 %v10305_v48  ;;  %3373 = vmatmul.f32.gmra.mxu2 %v10305_v48 }
 0x50c   : > { %14188 = vst [vmem:[#allocation24_spill] sm:$0xff] %v10312_v62  ;;  %3263 = vmatmul.f32.gmra.mxu1 %v10307_v44  ;;  %3156 = vmatmul.f32.gmra.mxu0 %v2472_v24  ;;  %v2864_v24 = vld [vmem:[%s14022_s2 + $0x6a0] sm:$0xff]  ;;  %v2430_v62 = vpop.permute.xlu2 %2429  ;;  %v10339_v57 = vpop.f32.mrf.mxu1  ;;  %v7330_v44 = vld [vmem:[#allocation3 + $0x69] sm:$0xff] }
 0x50d   : > { %3413 = vmatpush.msra.mxu3 %v2780_v49  ;;  %3628 = vmatpush.msra.mxu1 %v2866_v43  ;;  %14191 = vst [vmem:[#allocation27_spill] sm:$0xff] %v10339_v57  ;;  %v10375_v57 = vpop.f32.mrf.mxu0 }
 0x50e   : > { %14195 = vst [vmem:[#allocation31_spill] sm:$0xff] %v10367_v42  ;;  %v2894_v42 = vld [vmem:[%s14022_s2 + $0x790] sm:$0xff] }
 0x50f   : > { %3629 = vmatpush.msra.mxu1 %v2864_v24  ;;  %v2898_v24 = vld [vmem:[%s14022_s2 + $0x7b0] sm:$0xff]  ;;  %14196 = vst [vmem:[#allocation32_spill] sm:$0xff] %v10375_v57 }
 0x511   : > { %v2426_v49 = vpop.permute.xlu0 %2425  ;;  %v2428_v35 = vpop.permute.xlu1 %2427  ;;  %3630 = vmatpush.msra.mxu1 %v2862_v22 }
 0x512   : > { %v2473_v50 = vsel %vm2146_vm11, %v2424_v9, %v2426_v49  ;;  %v2474_v52 = vsel %vm2146_vm11, %v2428_v35, %v2430_v62  ;;  %v10343_v2 = vld [vmem:[#allocation3 + $0x1af] sm:$0xff]  ;;  %v2900_v35 = vld [vmem:[%s14022_s2 + $0x7c0] sm:$0xff]  ;;  %v10403_v57 = vpop.f32.mrf.mxu3 }
 0x513   : > { %14192 = vst [vmem:[#allocation28_spill] sm:$0xff] %v10343_v2  ;;  %v10345_v43 = vld [vmem:[#allocation3 + $0x1a9] sm:$0xff]  ;;  %v10350_v31 = vpop.f32.mrf.mxu2  ;;  %3043 = vmatmul.f32.gmra.mxu3 %v10343_v2  ;;  %v2812_v62 = vld [vmem:[%s14022_s2 + $0x500] sm:$0xff]  ;;  %3376 = vmatmul.f32.gmra.mxu2 %v10343_v2 }
 0x514   : > { %14193 = vst [vmem:[#allocation29_spill] sm:$0xff] %v10345_v43  ;;  %3266 = vmatmul.f32.gmra.mxu1 %v10345_v43  ;;  %3159 = vmatmul.f32.gmra.mxu0 %v2473_v50  ;;  %v2860_v9 = vld [vmem:[%s14022_s2 + $0x680] sm:$0xff]  ;;  %v2858_v49 = vld [vmem:[%s14022_s2 + $0x670] sm:$0xff]  ;;  %v10379_v22 = vpop.f32.mrf.mxu1 }
 0x515   : > { %2538 = vst [vmem:[#allocation3 + $0x1c8] sm:$0xff] %v2473_v50  ;;  %3740 = vmatpush.msrb.mxu2 %v2900_v35  ;;  %3526 = vmatpush.msra.mxu0 %v2812_v62  ;;  %v2896_v50 = vld [vmem:[%s14022_s2 + $0x7a0] sm:$0xff] }
 0x516   : > { %14194 = vst [vmem:[#allocation30_spill] sm:$0xff] %v10350_v31  ;;  %3631 = vmatpush.msra.mxu1 %v2860_v9  ;;  %v10377_v31 = vld [vmem:[#allocation3 + $0x1b1] sm:$0xff]  ;;  %v2856_v62 = vld [vmem:[%s14022_s2 + $0x660] sm:$0xff] }
 0x517   : > { %2539 = vst [vmem:[#allocation3 + $0x1d0] sm:$0xff] %v2474_v52  ;;  %3741 = vmatpush.msrb.mxu2 %v2898_v24  ;;  %v2854_v24 = vld [vmem:[%s14022_s2 + $0x650] sm:$0xff] }
 0x518   : > { %14197 = vst [vmem:[#allocation33_spill] sm:$0xff] %v10377_v31  ;;  %3632 = vmatpush.msra.mxu1 %v2858_v49  ;;  %v2892_v49 = vld [vmem:[%s14022_s2 + $0x780] sm:$0xff] }
 0x519   : > { %3742 = vmatpush.msrb.mxu2 %v2896_v50  ;;  %14198 = vst [vmem:[#allocation34_spill] sm:$0xff] %v10379_v22  ;;  %v2938_v50 = vld [vmem:[%s14022_s2 + $0x8f0] sm:$0xff] }
 0x51a   : > { %3633 = vmatpush.msra.mxu1 %v2856_v62  ;;  %14201 = vst [vmem:[#allocation37_spill] sm:$0xff] %v10403_v57  ;;  %3850 = vmatpush.msrb.mxu3 %v2938_v50  ;;  %v2890_v22 = vld [vmem:[%s14022_s2 + $0x770] sm:$0xff] }
 0x51b   : > { %v10389_v9 = vpop.f32.mrf.mxu2  ;;  %3743 = vmatpush.msrb.mxu2 %v2894_v42  ;;  %v2850_v50 = vld [vmem:[%s14022_s2 + $0x630] sm:$0xff] }
 0x51c   : > { %v10381_v35 = vld [vmem:[#allocation3 + $0x1c7] sm:$0xff]  ;;  %14200 = vst [vmem:[#allocation36_spill] sm:$0xff] %v10389_v9  ;;  %3269 = vmatmul.f32.gmra.mxu1 %v10377_v31  ;;  %3162 = vmatmul.f32.gmra.mxu0 %v2474_v52  ;;  %v10411_v9 = vpop.f32.mrf.mxu0  ;;  %v2432_v31 = vpop.permute.xlu0 %2431 }
 0x51d   : > { %14199 = vst [vmem:[#allocation35_spill] sm:$0xff] %v10381_v35  ;;  %3046 = vmatmul.f32.gmra.mxu3 %v10381_v35  ;;  %3379 = vmatmul.f32.gmra.mxu2 %v10381_v35  ;;  %v2852_v52 = vld [vmem:[%s14022_s2 + $0x640] sm:$0xff]  ;;  %v2436_v35 = vpop.permute.xlu2 %2435 }
 0x51e   : > { %3634 = vmatpush.msra.mxu1 %v2854_v24  ;;  %3744 = vmatpush.msrb.mxu2 %v2892_v49  ;;  %14202 = vst [vmem:[#allocation38_spill] sm:$0xff] %v10411_v9  ;;  %v10413_v62 = vld [vmem:[#allocation3 + $0x1cf] sm:$0xff]  ;;  %v2888_v24 = vld [vmem:[%s14022_s2 + $0x760] sm:$0xff]  ;;  %v10440_v9 = vpop.f32.mrf.mxu3 }
 0x51f   : > { %14203 = vst [vmem:[#allocation39_spill] sm:$0xff] %v10413_v62  ;;  %v10416_v57 = vld [vmem:[#allocation3 + $0x1c9] sm:$0xff] }
 0x520   : > { %3635 = vmatpush.msra.mxu1 %v2852_v52  ;;  %3745 = vmatpush.msrb.mxu2 %v2890_v22  ;;  %14204 = vst [vmem:[#allocation40_spill] sm:$0xff] %v10416_v57  ;;  %v10428_v22 = vpop.f32.mrf.mxu1  ;;  %v2683_v52 = vld [vmem:[%s14022_s2 + $0xf8] sm:$0xff] }
 0x521   : > { %v2434_v2 = vpop.permute.xlu1 %2433  ;;  %14206 = vst [vmem:[#allocation42_spill] sm:$0xff] %v10428_v22  ;;  %v2884_v22 = vld [vmem:[%s14022_s2 + $0x740] sm:$0xff]  ;;  %3963 = vmatpush.msrb.mxu0 %v2683_v52 }
 0x522   : > { %v2475_v42 = vsel %vm2146_vm11, %v2432_v31, %v2434_v2  ;;  %v2848_v2 = vld [vmem:[%s14022_s2 + $0x620] sm:$0xff]  ;;  %v2886_v31 = vld [vmem:[%s14022_s2 + $0x750] sm:$0xff]  ;;  %3636 = vmatpush.msra.mxu1 %v2850_v50  ;;  %3746 = vmatpush.msrb.mxu2 %v2888_v24  ;;  %14207 = vst [vmem:[#allocation43_spill] sm:$0xff] %v10440_v9 }
 0x523   : > { %2540 = vst [vmem:[#allocation3 + $0x1e8] sm:$0xff] %v2475_v42  ;;  %v10424_v49 = vpop.f32.mrf.mxu2  ;;  %v10450_v50 = vld [vmem:[#allocation3 + $0x1d1] sm:$0xff] }
 0x524   : > { %14205 = vst [vmem:[#allocation41_spill] sm:$0xff] %v10424_v49  ;;  %3272 = vmatmul.f32.gmra.mxu1 %v10416_v57  ;;  %3165 = vmatmul.f32.gmra.mxu0 %v2475_v42  ;;  %v2846_v42 = vld [vmem:[%s14022_s2 + $0x610] sm:$0xff]  ;;  %v10448_v49 = vpop.f32.mrf.mxu0 }
 0x525   : > { %3049 = vmatmul.f32.gmra.mxu3 %v10413_v62  ;;  %3382 = vmatmul.f32.gmra.mxu2 %v10413_v62  ;;  %14208 = vst [vmem:[#allocation44_spill] sm:$0xff] %v10448_v49  ;;  %v2442_v62 = vpop.permute.xlu2 %2441 }
 0x526   : > { %3637 = vmatpush.msra.mxu1 %v2848_v2  ;;  %3747 = vmatpush.msrb.mxu2 %v2886_v31  ;;  %14209 = vst [vmem:[#allocation45_spill] sm:$0xff] %v10450_v50  ;;  %v2844_v2 = vld [vmem:[%s14022_s2 + $0x600] sm:$0xff]  ;;  %v2882_v31 = vld [vmem:[%s14022_s2 + $0x730] sm:$0xff] }
 0x528   : > { %3638 = vmatpush.msra.mxu1 %v2846_v42  ;;  %3748 = vmatpush.msrb.mxu2 %v2884_v22  ;;  %v2878_v22 = vld [vmem:[%s14022_s2 + $0x710] sm:$0xff] }
 0x529   : > { %v2438_v57 = vpop.permute.xlu0 %2437  ;;  %v2440_v43 = vpop.permute.xlu1 %2439 }
 0x52a   : > { %v2476_v24 = vsel %vm2146_vm11, %v2436_v35, %v2438_v57  ;;  %v2477_v9 = vsel %vm2146_vm11, %v2440_v43, %v2442_v62  ;;  %v10454_v48 = vld [vmem:[#allocation3 + $0x1e7] sm:$0xff]  ;;  %v10466_v57 = vpop.f32.mrf.mxu1  ;;  %3639 = vmatpush.msra.mxu1 %v2844_v2  ;;  %3749 = vmatpush.msrb.mxu2 %v2882_v31  ;;  %v10475_v62 = vpop.f32.mrf.mxu3 }
 0x52b   : > { %14210 = vst [vmem:[#allocation46_spill] sm:$0xff] %v10454_v48  ;;  %v10462_v52 = vpop.f32.mrf.mxu2  ;;  %v2880_v43 = vld [vmem:[%s14022_s2 + $0x720] sm:$0xff] }
 0x52c   : > { %2541 = vst [vmem:[#allocation3 + $0x1f0] sm:$0xff] %v2476_v24  ;;  %3275 = vmatmul.f32.gmra.mxu1 %v10450_v50  ;;  %3168 = vmatmul.f32.gmra.mxu0 %v2476_v24  ;;  %v2936_v35 = vld [vmem:[%s14022_s2 + $0x8e0] sm:$0xff] }
 0x52d   : > { %14211 = vst [vmem:[#allocation47_spill] sm:$0xff] %v10462_v52  ;;  %3052 = vmatmul.f32.gmra.mxu3 %v10454_v48  ;;  %3385 = vmatmul.f32.gmra.mxu2 %v10454_v48  ;;  %v2876_v2 = vld [vmem:[%s14022_s2 + $0x700] sm:$0xff] }
 0x52e   : > { %14212 = vst [vmem:[#allocation48_spill] sm:$0xff] %v10466_v57  ;;  %3851 = vmatpush.msrb.mxu3 %v2936_v35  ;;  %3750 = vmatpush.msrb.mxu2 %v2880_v43  ;;  %v7319_v43 = vld [vmem:[#allocation3 + $0x29] sm:$0xff] }
 0x52f   : > { %2542 = vst [vmem:[#allocation3 + $0x208] sm:$0xff] %v2477_v9  ;;  %v10480_v9 = vpop.f32.mrf.mxu0  ;;  %v2681_v35 = vld [vmem:[%s14022_s2 + $0xe8] sm:$0xff] }
 0x530   : > { %14213 = vst [vmem:[#allocation49_spill] sm:$0xff] %v10475_v62  ;;  %3751 = vmatpush.msrb.mxu2 %v2878_v22  ;;  %3964 = vmatpush.msrb.mxu0 %v2681_v35  ;;  %v7321_v35 = vld [vmem:[#allocation3 + $0x31] sm:$0xff] }
 0x531   : > { %14214 = vst [vmem:[#allocation50_spill] sm:$0xff] %v10480_v9  ;;  %v2444_v57 = vpop.permute.xlu0 %2443 }
 0x532   : > { %3752 = vmatpush.msrb.mxu2 %v2876_v2  ;;  %v10497_v22 = vpop.f32.mrf.mxu3  ;;  %v10499_v9 = vpop.f32.mrf.mxu1 }
 0x533   : > { %v10482_v42 = vld [vmem:[#allocation3 + $0x1ef] sm:$0xff]  ;;  %v10489_v31 = vpop.f32.mrf.mxu2  ;;  %14218 = vst [vmem:[#allocation54_spill] sm:$0xff] %v10497_v22 }
 0x534   : > { %14215 = vst [vmem:[#allocation51_spill] sm:$0xff] %v10482_v42  ;;  %v10484_v24 = vld [vmem:[#allocation3 + $0x1e9] sm:$0xff]  ;;  %3527 = vmatmul.f32.vlgmr.msra.gmra.mxu0 %v7319_v43  ;;  %v10502_v52 = vld [vmem:[#allocation3 + $0x1f1] sm:$0xff] }
 0x535   : > { %14216 = vst [vmem:[#allocation52_spill] sm:$0xff] %v10484_v24  ;;  %3055 = vmatmul.f32.gmra.mxu3 %v10482_v42  ;;  %3278 = vmatmul.f32.gmra.mxu1 %v10484_v24 }
 0x536   : > { %14217 = vst [vmem:[#allocation53_spill] sm:$0xff] %v10489_v31  ;;  %3388 = vmatmul.f32.gmra.mxu2 %v10482_v42  ;;  %v10505_v43 = vld [vmem:[#allocation3 + $0x207] sm:$0xff] }
 0x537   : > { %14219 = vst [vmem:[#allocation55_spill] sm:$0xff] %v10499_v9  ;;  %v3127_v49 = vpop.f32.mrf.mxu0  ;;  %v7320_v42 = vld [vmem:[#allocation3 + $0x28] sm:$0xff]  ;;  %v2934_v9 = vld [vmem:[%s14022_s2 + $0x8d0] sm:$0xff] }
 0x538   : > { %14220 = vst [vmem:[#allocation56_spill] sm:$0xff] %v10502_v52  ;;  %3852 = vmatpush.msrb.mxu3 %v2934_v9 }
 0x539   : > { %v2446_v31 = vpop.permute.xlu1 %2445  ;;  %14221 = vst [vmem:[#allocation57_spill] sm:$0xff] %v10505_v43 }
 0x53a   : > { %v2478_v62 = vsel %vm2146_vm11, %v2444_v57, %v2446_v31  ;;  %v10513_v57 = vpop.f32.mrf.mxu3 }
 0x53b   : > { %2543 = vst [vmem:[#allocation3 + $0x210] sm:$0xff] %v2478_v62  ;;  %v10507_v2 = vpop.f32.mrf.mxu2  ;;  %v10515_v62 = vpop.f32.mrf.mxu1 }
 0x53c   : > { %14222 = vst [vmem:[#allocation58_spill] sm:$0xff] %v10507_v2  ;;  %3530 = vmatmul.f32.gmra.mxu0 %v7321_v35  ;;  %v7324_v2 = vld [vmem:[#allocation3 + $0x49] sm:$0xff]  ;;  %v2679_v35 = vld [vmem:[%s14022_s2 + $0xd8] sm:$0xff] }
 0x53d   : > { %3281 = vmatmul.f32.gmra.mxu1 %v10502_v52  ;;  %3414 = vmatmul.f32.vlgmr.msra.gmra.mxu3 %v7320_v42  ;;  %14223 = vst [vmem:[#allocation59_spill] sm:$0xff] %v10513_v57  ;;  %v7322_v52 = vld [vmem:[#allocation3 + $0x30] sm:$0xff]  ;;  %v7323_v42 = vld [vmem:[#allocation3 + $0x47] sm:$0xff] }
 0x53e   : > { %3391 = vmatmul.f32.gmra.mxu2 %v10505_v43  ;;  %14224 = vst [vmem:[#allocation60_spill] sm:$0xff] %v10515_v62  ;;  %3965 = vmatpush.msrb.mxu0 %v2679_v35  ;;  %v2940_v62 = vld [vmem:[%s14024_s4 + $0x3] sm:$0x3] }
 0x53f   : > { %v2932_v35 = vld [vmem:[%s14022_s2 + $0x8c0] sm:$0xff] }
 0x540   : > { %v3130_v31 = vpop.f32.mrf.mxu0  ;;  %3853 = vmatpush.msrb.mxu3 %v2932_v35 }
 0x542   : > { %v2577_v22 = vld [vmem:[#allocation3 + $0x20f] sm:$0xff]  ;;  %v3014_v43 = vpop.f32.mrf.mxu3 }
 0x543   : > { %v10520_v9 = vpop.f32.mrf.mxu2  ;;  %v3240_v57 = vpop.f32.mrf.mxu1 }
 0x544   : > { %3533 = vmatmul.f32.gmra.mxu0 %v7324_v2  ;;  %14225 = vst [vmem:[#allocation61_spill] sm:$0xff] %v10520_v9  ;;  %v7327_v2 = vld [vmem:[#allocation3 + $0x51] sm:$0xff] }
 0x545   : > { %3417 = vmatmul.f32.gmra.mxu3 %v7322_v52  ;;  %3640 = vmatmul.f32.vlgmr.msra.gmra.mxu1 %v7323_v42  ;;  %v7325_v52 = vld [vmem:[#allocation3 + $0x48] sm:$0xff] }
 0x546   : > { %3394 = vmatmul.f32.gmra.mxu2 %v2577_v22  ;;  %v7326_v42 = vld [vmem:[#allocation3 + $0x4f] sm:$0xff]  ;;  %v10525_v22 = vperm.slane %v2940_v62, 0 }
 0x548   : > { %v3015_v9 = vadd.f32 %v3014_v43, %v10525_v22  ;;  %v2677_v43 = vld [vmem:[%s14022_s2 + $0xc8] sm:$0xff] }
 0x549   : > { %v3133_v24 = vpop.f32.mrf.mxu0  ;;  %3966 = vmatpush.msrb.mxu0 %v2677_v43 }
 0x54a   : > { %v3128_v62 = vadd.f32 %v3127_v49, %v3015_v9 }
 0x54c   : > { %3536 = vmatmul.f32.gmra.mxu0 %v7327_v2  ;;  %v7329_v2 = vld [vmem:[#allocation3 + $0x67] sm:$0xff]  ;;  %v3241_v35 = vadd.f32 %v3240_v57, %v3128_v62  ;;  %v2930_v57 = vld [vmem:[%s14022_s2 + $0x8b0] sm:$0xff] }
 0x54d   : > { %3420 = vmatmul.f32.gmra.mxu3 %v7325_v52  ;;  %3643 = vmatmul.f32.gmra.mxu1 %v7326_v42 }
 0x54e   : > { %3753 = vmatmul.f32.vlgmr.msrb.gmra.mxu2 %v7325_v52  ;;  %v3017_v48 = vpop.f32.mrf.mxu3  ;;  %v10531_v50 = vpop.f32.mrf.mxu2  ;;  %v7328_v52 = vld [vmem:[#allocation3 + $0x50] sm:$0xff]  ;;  %3854 = vmatpush.msrb.mxu3 %v2930_v57 }
 0x54f   : > { %14226 = vst [vmem:[#allocation62_spill] sm:$0xff] %v10531_v50  ;;  %v3018_v27 = vadd.f32 %v3017_v48, %v10525_v22 }
 0x551   : > { %v3243_v34 = vpop.f32.mrf.mxu1  ;;  %v3131_v30 = vadd.f32 %v3130_v31, %v3018_v27  ;;  %v3136_v42 = vpop.f32.mrf.mxu0 }
 0x553   : > { %v3244_v8 = vadd.f32 %v3243_v34, %v3131_v30 }
 0x554   : > { %3539 = vmatmul.f32.gmra.mxu0 %v7330_v44  ;;  %v7333_v44 = vld [vmem:[#allocation3 + $0x71] sm:$0xff] }
 0x555   : > { %3423 = vmatmul.f32.gmra.mxu3 %v7328_v52  ;;  %3646 = vmatmul.f32.gmra.mxu1 %v7329_v2  ;;  %v7331_v2 = vld [vmem:[#allocation3 + $0x68] sm:$0xff] }
 0x556   : > { %3756 = vmatmul.f32.gmra.mxu2 %v7328_v52  ;;  %v3020_v50 = vpop.f32.mrf.mxu3  ;;  %v3353_v27 = vpop.f32.mrf.mxu2  ;;  %v7332_v52 = vld [vmem:[#allocation3 + $0x6f] sm:$0xff] }
 0x557   : > { %v3021_v48 = vadd.f32 %v3020_v50, %v10525_v22  ;;  %v10538_v31 = vadd.f32 %v3353_v27, %v3241_v35 }
 0x559   : > { %v3246_v34 = vpop.f32.mrf.mxu1  ;;  %v3134_v30 = vadd.f32 %v3133_v24, %v3021_v48  ;;  %v3139_v49 = vpop.f32.mrf.mxu0 }
 0x55b   : > { %v3247_v9 = vadd.f32 %v3246_v34, %v3134_v30  ;;  %v7334_v30 = vld [vmem:[#allocation3 + $0x70] sm:$0xff] }
 0x55c   : > { %3542 = vmatmul.f32.gmra.mxu0 %v7333_v44  ;;  %v2675_v44 = vld [vmem:[%s14022_s2 + $0xb8] sm:$0xff] }
 0x55d   : > { %3426 = vmatmul.f32.gmra.mxu3 %v7331_v2  ;;  %3649 = vmatmul.f32.gmra.mxu1 %v7332_v52  ;;  %v7336_v52 = vld [vmem:[#allocation3 + $0x89] sm:$0xff] }
 0x55e   : > { %3759 = vmatmul.f32.gmra.mxu2 %v7331_v2  ;;  %v3023_v50 = vpop.f32.mrf.mxu3  ;;  %v3356_v43 = vpop.f32.mrf.mxu2  ;;  %v7335_v2 = vld [vmem:[#allocation3 + $0x87] sm:$0xff]  ;;  %3967 = vmatpush.msrb.mxu0 %v2675_v44 }
 0x55f   : > { %v3024_v62 = vadd.f32 %v3023_v50, %v10525_v22  ;;  %v10544_v35 = vadd.f32 %v3356_v43, %v3244_v8 }
 0x561   : > { %14227 = vst [vmem:[#allocation63_spill] sm:$0xff] %v10544_v35  ;;  %v3249_v24 = vpop.f32.mrf.mxu1  ;;  %v3137_v48 = vadd.f32 %v3136_v42, %v3024_v62  ;;  %v3142_v27 = vpop.f32.mrf.mxu0  ;;  %v7337_v35 = vld [vmem:[#allocation3 + $0x88] sm:$0xff] }
 0x563   : > { %v3250_v34 = vadd.f32 %v3249_v24, %v3137_v48 }
 0x564   : > { %3545 = vmatmul.f32.gmra.mxu0 %v7336_v52  ;;  %v2928_v52 = vld [vmem:[%s14022_s2 + $0x8a0] sm:$0xff] }
 0x565   : > { %3429 = vmatmul.f32.gmra.mxu3 %v7334_v30  ;;  %3652 = vmatmul.f32.gmra.mxu1 %v7335_v2  ;;  %v7339_v2 = vld [vmem:[#allocation3 + $0x91] sm:$0xff] }
 0x566   : > { %3762 = vmatmul.f32.gmra.mxu2 %v7334_v30  ;;  %v3026_v57 = vpop.f32.mrf.mxu3  ;;  %v3359_v50 = vpop.f32.mrf.mxu2  ;;  %v7338_v30 = vld [vmem:[#allocation3 + $0x8f] sm:$0xff]  ;;  %3855 = vmatpush.msrb.mxu3 %v2928_v52 }
 0x567   : > { %v3027_v8 = vadd.f32 %v3026_v57, %v10525_v22  ;;  %v10550_v43 = vadd.f32 %v3359_v50, %v3247_v9 }
 0x569   : > { %14228 = vst [vmem:[#allocation64_spill] sm:$0xff] %v10550_v43  ;;  %v3252_v42 = vpop.f32.mrf.mxu1  ;;  %v3140_v62 = vadd.f32 %v3139_v49, %v3027_v8  ;;  %v3145_v24 = vpop.f32.mrf.mxu0  ;;  %v7340_v43 = vld [vmem:[#allocation3 + $0x90] sm:$0xff] }
 0x56b   : > { %v3253_v48 = vadd.f32 %v3252_v42, %v3140_v62 }
 0x56c   : > { %3548 = vmatmul.f32.gmra.mxu0 %v7339_v2  ;;  %v2673_v2 = vld [vmem:[%s14022_s2 + $0xa8] sm:$0xff] }
 0x56d   : > { %3432 = vmatmul.f32.gmra.mxu3 %v7337_v35  ;;  %3655 = vmatmul.f32.gmra.mxu1 %v7338_v30  ;;  %v7342_v30 = vld [vmem:[#allocation3 + $0xa9] sm:$0xff] }
 0x56e   : > { %3765 = vmatmul.f32.gmra.mxu2 %v7337_v35  ;;  %v3029_v44 = vpop.f32.mrf.mxu3  ;;  %v3362_v57 = vpop.f32.mrf.mxu2  ;;  %v7341_v35 = vld [vmem:[#allocation3 + $0xa7] sm:$0xff]  ;;  %3968 = vmatpush.msrb.mxu0 %v2673_v2 }
 0x56f   : > { %v3030_v9 = vadd.f32 %v3029_v44, %v10525_v22  ;;  %v10556_v50 = vadd.f32 %v3362_v57, %v3250_v34 }
 0x571   : > { %14229 = vst [vmem:[#allocation65_spill] sm:$0xff] %v10556_v50  ;;  %v3255_v49 = vpop.f32.mrf.mxu1  ;;  %v3143_v8 = vadd.f32 %v3142_v27, %v3030_v9  ;;  %v3148_v42 = vpop.f32.mrf.mxu0  ;;  %v7343_v50 = vld [vmem:[#allocation3 + $0xa8] sm:$0xff] }
 0x573   : > { %v3256_v62 = vadd.f32 %v3255_v49, %v3143_v8 }
 0x574   : > { %3551 = vmatmul.f32.gmra.mxu0 %v7342_v30  ;;  %v2926_v30 = vld [vmem:[%s14022_s2 + $0x890] sm:$0xff] }
 0x575   : > { %3435 = vmatmul.f32.gmra.mxu3 %v7340_v43  ;;  %3658 = vmatmul.f32.gmra.mxu1 %v7341_v35  ;;  %v7345_v35 = vld [vmem:[#allocation3 + $0xb1] sm:$0xff] }
 0x576   : > { %3768 = vmatmul.f32.gmra.mxu2 %v7340_v43  ;;  %v3032_v52 = vpop.f32.mrf.mxu3  ;;  %v3365_v44 = vpop.f32.mrf.mxu2  ;;  %v7344_v43 = vld [vmem:[#allocation3 + $0xaf] sm:$0xff]  ;;  %3856 = vmatpush.msrb.mxu3 %v2926_v30 }
 0x577   : > { %v3033_v34 = vadd.f32 %v3032_v52, %v10525_v22  ;;  %v10562_v57 = vadd.f32 %v3365_v44, %v3253_v48 }
 0x579   : > { %14230 = vst [vmem:[#allocation66_spill] sm:$0xff] %v10562_v57  ;;  %v3258_v27 = vpop.f32.mrf.mxu1  ;;  %v3146_v9 = vadd.f32 %v3145_v24, %v3033_v34  ;;  %v3151_v49 = vpop.f32.mrf.mxu0  ;;  %v7346_v57 = vld [vmem:[#allocation3 + $0xb0] sm:$0xff] }
 0x57b   : > { %v3259_v8 = vadd.f32 %v3258_v27, %v3146_v9 }
 0x57c   : > { %3554 = vmatmul.f32.gmra.mxu0 %v7345_v35  ;;  %v2671_v35 = vld [vmem:[%s14022_s2 + $0x98] sm:$0xff] }
 0x57d   : > { %3438 = vmatmul.f32.gmra.mxu3 %v7343_v50  ;;  %3661 = vmatmul.f32.gmra.mxu1 %v7344_v43  ;;  %v7348_v43 = vld [vmem:[#allocation3 + $0xc9] sm:$0xff] }
 0x57e   : > { %3771 = vmatmul.f32.gmra.mxu2 %v7343_v50  ;;  %v3035_v2 = vpop.f32.mrf.mxu3  ;;  %v3368_v52 = vpop.f32.mrf.mxu2  ;;  %v7347_v50 = vld [vmem:[#allocation3 + $0xc7] sm:$0xff]  ;;  %3969 = vmatpush.msrb.mxu0 %v2671_v35 }
 0x57f   : > { %v3036_v48 = vadd.f32 %v3035_v2, %v10525_v22  ;;  %v10568_v44 = vadd.f32 %v3368_v52, %v3256_v62 }
 0x581   : > { %14231 = vst [vmem:[#allocation67_spill] sm:$0xff] %v10568_v44  ;;  %v3261_v24 = vpop.f32.mrf.mxu1  ;;  %v3149_v34 = vadd.f32 %v3148_v42, %v3036_v48  ;;  %v3154_v27 = vpop.f32.mrf.mxu0  ;;  %v7349_v44 = vld [vmem:[#allocation3 + $0xc8] sm:$0xff] }
 0x583   : > { %v3262_v9 = vadd.f32 %v3261_v24, %v3149_v34 }
 0x584   : > { %3557 = vmatmul.f32.gmra.mxu0 %v7348_v43  ;;  %v2924_v43 = vld [vmem:[%s14022_s2 + $0x880] sm:$0xff] }
 0x585   : > { %3441 = vmatmul.f32.gmra.mxu3 %v7346_v57  ;;  %3664 = vmatmul.f32.gmra.mxu1 %v7347_v50  ;;  %v7351_v50 = vld [vmem:[#allocation3 + $0xd1] sm:$0xff] }
 0x586   : > { %3774 = vmatmul.f32.gmra.mxu2 %v7346_v57  ;;  %v3038_v30 = vpop.f32.mrf.mxu3  ;;  %v3371_v2 = vpop.f32.mrf.mxu2  ;;  %v7350_v57 = vld [vmem:[#allocation3 + $0xcf] sm:$0xff]  ;;  %3857 = vmatpush.msrb.mxu3 %v2924_v43 }
 0x587   : > { %v3039_v62 = vadd.f32 %v3038_v30, %v10525_v22  ;;  %v10574_v52 = vadd.f32 %v3371_v2, %v3259_v8 }
 0x589   : > { %14232 = vst [vmem:[#allocation68_spill] sm:$0xff] %v10574_v52  ;;  %v3264_v42 = vpop.f32.mrf.mxu1  ;;  %v3152_v48 = vadd.f32 %v3151_v49, %v3039_v62  ;;  %v3157_v24 = vpop.f32.mrf.mxu0  ;;  %v7352_v52 = vld [vmem:[#allocation3 + $0xd0] sm:$0xff] }
 0x58b   : > { %v3265_v34 = vadd.f32 %v3264_v42, %v3152_v48 }
 0x58c   : > { %3560 = vmatmul.f32.gmra.mxu0 %v7351_v50  ;;  %v2669_v50 = vld [vmem:[%s14022_s2 + $0x88] sm:$0xff] }
 0x58d   : > { %3444 = vmatmul.f32.gmra.mxu3 %v7349_v44  ;;  %3667 = vmatmul.f32.gmra.mxu1 %v7350_v57  ;;  %v7354_v57 = vld [vmem:[#allocation3 + $0xe9] sm:$0xff] }
 0x58e   : > { %3777 = vmatmul.f32.gmra.mxu2 %v7349_v44  ;;  %v3041_v35 = vpop.f32.mrf.mxu3  ;;  %v3374_v30 = vpop.f32.mrf.mxu2  ;;  %v7353_v44 = vld [vmem:[#allocation3 + $0xe7] sm:$0xff]  ;;  %3970 = vmatpush.msrb.mxu0 %v2669_v50 }
 0x58f   : > { %v3042_v8 = vadd.f32 %v3041_v35, %v10525_v22  ;;  %v10580_v2 = vadd.f32 %v3374_v30, %v3262_v9 }
 0x591   : > { %14233 = vst [vmem:[#allocation69_spill] sm:$0xff] %v10580_v2  ;;  %v3267_v49 = vpop.f32.mrf.mxu1  ;;  %v3155_v62 = vadd.f32 %v3154_v27, %v3042_v8  ;;  %v3160_v42 = vpop.f32.mrf.mxu0  ;;  %v7355_v2 = vld [vmem:[#allocation3 + $0xe8] sm:$0xff] }
 0x593   : > { %v3268_v48 = vadd.f32 %v3267_v49, %v3155_v62 }
 0x594   : > { %3563 = vmatmul.f32.gmra.mxu0 %v7354_v57  ;;  %v2922_v57 = vld [vmem:[%s14022_s2 + $0x870] sm:$0xff] }
 0x595   : > { %3447 = vmatmul.f32.gmra.mxu3 %v7352_v52  ;;  %3670 = vmatmul.f32.gmra.mxu1 %v7353_v44  ;;  %v7357_v44 = vld [vmem:[#allocation3 + $0xf1] sm:$0xff] }
 0x596   : > { %3780 = vmatmul.f32.gmra.mxu2 %v7352_v52  ;;  %v3044_v43 = vpop.f32.mrf.mxu3  ;;  %v3377_v35 = vpop.f32.mrf.mxu2  ;;  %v7356_v52 = vld [vmem:[#allocation3 + $0xef] sm:$0xff]  ;;  %3858 = vmatpush.msrb.mxu3 %v2922_v57 }
 0x597   : > { %v3045_v9 = vadd.f32 %v3044_v43, %v10525_v22  ;;  %v10586_v30 = vadd.f32 %v3377_v35, %v3265_v34 }
 0x599   : > { %14234 = vst [vmem:[#allocation70_spill] sm:$0xff] %v10586_v30  ;;  %v3270_v27 = vpop.f32.mrf.mxu1  ;;  %v3158_v8 = vadd.f32 %v3157_v24, %v3045_v9  ;;  %v3163_v49 = vpop.f32.mrf.mxu0  ;;  %v7358_v30 = vld [vmem:[#allocation3 + $0xf0] sm:$0xff] }
 0x59b   : > { %v3271_v62 = vadd.f32 %v3270_v27, %v3158_v8 }
 0x59c   : > { %3566 = vmatmul.f32.gmra.mxu0 %v7357_v44 }
 0x59d   : > { %3450 = vmatmul.f32.gmra.mxu3 %v7355_v2  ;;  %3673 = vmatmul.f32.gmra.mxu1 %v7356_v52  ;;  %v2667_v52 = vld [vmem:[%s14022_s2 + $0x78] sm:$0xff] }
 0x59e   : > { %3783 = vmatmul.f32.gmra.mxu2 %v7355_v2  ;;  %v7359_v2 = vld [vmem:[#allocation3 + $0x107] sm:$0xff]  ;;  %3971 = vmatpush.msrb.mxu0 %v2667_v52 }
 0x5a0   : > { %v3047_v50 = vpop.f32.mrf.mxu3  ;;  %v3380_v43 = vpop.f32.mrf.mxu2 }
 0x5a1   : > { %v3048_v34 = vadd.f32 %v3047_v50, %v10525_v22  ;;  %v10592_v35 = vadd.f32 %v3380_v43, %v3268_v48  ;;  %v3273_v24 = vpop.f32.mrf.mxu1  ;;  %v3166_v27 = vpop.f32.mrf.mxu0 }
 0x5a3   : > { %v3161_v9 = vadd.f32 %v3160_v42, %v3048_v34 }
 0x5a4   : > { %3569 = vmatmul.f32.gmra.mxu0 %v10123_v56  ;;  %v2920_v56 = vld [vmem:[%s14022_s2 + $0x860] sm:$0xff] }
 0x5a5   : > { %v3274_v8 = vadd.f32 %v3273_v24, %v3161_v9  ;;  %3453 = vmatmul.f32.gmra.mxu3 %v7358_v30  ;;  %3676 = vmatmul.f32.gmra.mxu1 %v7359_v2  ;;  %v7360_v9 = vld [vmem:[#allocation3 + $0x108] sm:$0xff] }
 0x5a6   : > { %3786 = vmatmul.f32.gmra.mxu2 %v7358_v30  ;;  %3859 = vmatpush.msrb.mxu3 %v2920_v56 }
 0x5a8   : > { %v3050_v44 = vpop.f32.mrf.mxu3  ;;  %v3383_v57 = vpop.f32.mrf.mxu2 }
 0x5a9   : > { %v3051_v48 = vadd.f32 %v3050_v44, %v10525_v22  ;;  %v10599_v50 = vadd.f32 %v3383_v57, %v3271_v62  ;;  %v3276_v42 = vpop.f32.mrf.mxu1  ;;  %v3169_v43 = vpop.f32.mrf.mxu0 }
 0x5ab   : > { %v3164_v34 = vadd.f32 %v3163_v49, %v3051_v48 }
 0x5ac   : > { %3572 = vmatmul.f32.gmra.mxu0 %v10141_v10  ;;  %v2665_v10 = vld [vmem:[%s14022_s2 + $0x68] sm:$0xff] }
 0x5ad   : > { %v3277_v24 = vadd.f32 %v3276_v42, %v3164_v34  ;;  %3456 = vmatmul.f32.gmra.mxu3 %v7360_v9  ;;  %3679 = vmatmul.f32.gmra.mxu1 %v10121_v16  ;;  %v2964_v16 = vadd.f32 %v10097_v1, %v10525_v22  ;;  %v7361_v42 = vld [vmem:[#allocation3 + $0x110] sm:$0xff] }
 0x5ae   : > { %3789 = vmatmul.f32.gmra.mxu2 %v7360_v9  ;;  %3972 = vmatpush.msrb.mxu0 %v2665_v10 }
 0x5b0   : > { %v3053_v30 = vpop.f32.mrf.mxu3  ;;  %v3386_v2 = vpop.f32.mrf.mxu2 }
 0x5b1   : > { %v3054_v62 = vadd.f32 %v3053_v30, %v10525_v22  ;;  %v10607_v52 = vadd.f32 %v3386_v2, %v3274_v8  ;;  %v3528_v48 = vpop.f32.mrf.mxu0 }
 0x5b2   : > { %v3279_v49 = vpop.f32.mrf.mxu1 }
 0x5b3   : > { %v3167_v44 = vadd.f32 %v3166_v27, %v3054_v62  ;;  %v3077_v27 = vadd.f32 %v10069_v0, %v2964_v16  ;;  %v2918_v0 = vld [vmem:[%s14022_s2 + $0x850] sm:$0xff] }
 0x5b4   : > { %3575 = vmatmul.f32.gmra.mxu0 %v10173_v37  ;;  %3860 = vmatpush.msrb.mxu3 %v2918_v0 }
 0x5b5   : > { %v3280_v57 = vadd.f32 %v3279_v49, %v3167_v44  ;;  %3459 = vmatmul.f32.gmra.mxu3 %v7361_v42  ;;  %3682 = vmatmul.f32.gmra.mxu1 %v10156_v39  ;;  %v2967_v39 = vadd.f32 %v10116_v12, %v10525_v22  ;;  %v3190_v37 = vadd.f32 %v10086_v25, %v3077_v27  ;;  %v7362_v49 = vld [vmem:[#allocation3 + $0x128] sm:$0xff]  ;;  %v7363_v27 = vld [vmem:[#allocation3 + $0x130] sm:$0xff] }
 0x5b6   : > { %3792 = vmatmul.f32.gmra.mxu2 %v7361_v42 }
 0x5b7   : > { %v3080_v12 = vadd.f32 %v10084_v23, %v2967_v39  ;;  %v2663_v23 = vld [vmem:[%s14022_s2 + $0x58] sm:$0xff] }
 0x5b8   : > { %v3056_v8 = vpop.f32.mrf.mxu3  ;;  %3973 = vmatpush.msrb.mxu0 %v2663_v23 }
 0x5b9   : > { %v3057_v34 = vadd.f32 %v3056_v8, %v10525_v22  ;;  %v3389_v9 = vpop.f32.mrf.mxu2  ;;  %v3531_v62 = vpop.f32.mrf.mxu0  ;;  %v3193_v8 = vadd.f32 %v10105_v5, %v3080_v12 }
 0x5ba   : > { %v10618_v1 = vadd.f32 %v3389_v9, %v3277_v24  ;;  %v3282_v56 = vpop.f32.mrf.mxu1 }
 0x5bb   : > { %v3170_v30 = vadd.f32 %v3169_v43, %v3057_v34  ;;  %v3303_v43 = vadd.f32 %v10154_v21, %v3190_v37  ;;  %v2970_v21 = vadd.f32 %v10138_v32, %v10525_v22  ;;  %v2973_v32 = vadd.f32 %v10163_v18, %v10525_v22 }
 0x5bc   : > { %3578 = vmatmul.f32.gmra.mxu0 %v10190_v11  ;;  %v2976_v18 = vadd.f32 %v10181_v29, %v10525_v22  ;;  %v2979_v29 = vadd.f32 %v10200_v20, %v10525_v22  ;;  %v2982_v20 = vadd.f32 %v10228_v19, %v10525_v22  ;;  %v14235_v19 = vld [vmem:[#allocation23_spill] sm:$0xff] }
 0x5bd   : > { %v3283_v2 = vadd.f32 %v3282_v56, %v3170_v30  ;;  %3462 = vmatmul.f32.gmra.mxu3 %v7362_v49  ;;  %3685 = vmatmul.f32.gmra.mxu1 %v10171_v63  ;;  %v3083_v5 = vadd.f32 %v10103_v15, %v2970_v21  ;;  %v2916_v15 = vld [vmem:[%s14022_s2 + $0x840] sm:$0xff]  ;;  %v7366_v21 = vld [vmem:[#allocation3 + $0x168] sm:$0xff] }
 0x5be   : > { %3795 = vmatmul.f32.gmra.mxu2 %v7362_v49  ;;  %v7364_v49 = vld [vmem:[#allocation3 + $0x148] sm:$0xff]  ;;  %3861 = vmatpush.msrb.mxu3 %v2916_v15 }
 0x5bf   : > { %v3196_v39 = vadd.f32 %v10125_v41, %v3083_v5  ;;  %v3086_v41 = vadd.f32 %v10118_v53, %v2973_v32  ;;  %v2661_v53 = vld [vmem:[%s14022_s2 + $0x48] sm:$0xff] }
 0x5c0   : > { %v3415_v24 = vpop.f32.mrf.mxu3  ;;  %3974 = vmatpush.msrb.mxu0 %v2661_v53 }
 0x5c1   : > { %v3392_v44 = vpop.f32.mrf.mxu2  ;;  %v3416_v25 = vadd.f32 %v3415_v24, %v3303_v43  ;;  %v3534_v63 = vpop.f32.mrf.mxu0  ;;  %v3199_v12 = vadd.f32 %v10149_v17, %v3086_v41  ;;  %v3089_v17 = vadd.f32 %v10143_v51, %v2976_v18  ;;  %v2914_v51 = vld [vmem:[%s14022_s2 + $0x830] sm:$0xff]  ;;  %v7368_v41 = vld [vmem:[#allocation3 + $0x188] sm:$0xff] }
 0x5c2   : > { %v10630_v16 = vadd.f32 %v3392_v44, %v3280_v57  ;;  %v3641_v42 = vpop.f32.mrf.mxu1  ;;  %3862 = vmatpush.msrb.mxu3 %v2914_v51 }
 0x5c3   : > { %v3529_v10 = vadd.f32 %v3528_v48, %v3416_v25  ;;  %v3306_v48 = vadd.f32 %v10169_v60, %v3193_v8  ;;  %v3309_v60 = vadd.f32 %v10192_v14, %v3196_v39  ;;  %v7365_v25 = vld [vmem:[#allocation3 + $0x150] sm:$0xff]  ;;  %v3312_v14 = vadd.f32 %v10210_v45, %v3199_v12 }
 0x5c4   : > { %3581 = vmatmul.f32.gmra.mxu0 %v10206_v7 }
 0x5c5   : > { %v3642_v11 = vadd.f32 %v3641_v42, %v3529_v10  ;;  %3465 = vmatmul.f32.gmra.mxu3 %v7363_v27  ;;  %3688 = vmatmul.f32.gmra.mxu1 %v10188_v26 }
 0x5c6   : > { %3798 = vmatmul.f32.gmra.mxu2 %v7363_v27  ;;  %v3202_v27 = vadd.f32 %v10167_v54, %v3089_v17  ;;  %v3092_v54 = vadd.f32 %v10165_v38, %v2979_v29  ;;  %v2659_v38 = vld [vmem:[%s14022_s2 + $0x38] sm:$0xff] }
 0x5c7   : > { %3975 = vmatpush.msrb.mxu0 %v2659_v38 }
 0x5c8   : > { %v3418_v57 = vpop.f32.mrf.mxu3  ;;  %v3315_v45 = vadd.f32 %v10224_v47, %v3202_v27 }
 0x5c9   : > { %v3395_v34 = vpop.f32.mrf.mxu2  ;;  %v3419_v9 = vadd.f32 %v3418_v57, %v3306_v48  ;;  %v3537_v7 = vpop.f32.mrf.mxu0 }
 0x5ca   : > { %v10642_v56 = vadd.f32 %v3395_v34, %v3283_v2  ;;  %v3644_v26 = vpop.f32.mrf.mxu1 }
 0x5cb   : > { %v3532_v30 = vadd.f32 %v3531_v62, %v3419_v9 }
 0x5cc   : > { %3584 = vmatmul.f32.gmra.mxu0 %v10222_v46 }
 0x5cd   : > { %v3645_v37 = vadd.f32 %v3644_v26, %v3532_v30  ;;  %3468 = vmatmul.f32.gmra.mxu3 %v7364_v49  ;;  %3691 = vmatmul.f32.gmra.mxu1 %v10204_v55  ;;  %v3205_v26 = vadd.f32 %v10185_v59, %v3092_v54  ;;  %v3095_v59 = vadd.f32 %v10183_v58, %v2982_v20  ;;  %v2912_v58 = vld [vmem:[%s14022_s2 + $0x820] sm:$0xff]  ;;  %v7370_v20 = vld [vmem:[#allocation3 + $0x1a8] sm:$0xff] }
 0x5ce   : > { %3801 = vmatmul.f32.gmra.mxu2 %v7364_v49  ;;  %3863 = vmatpush.msrb.mxu3 %v2912_v58 }
 0x5cf   : > { %v3318_v47 = vadd.f32 %v10243_v40, %v3205_v26  ;;  %v14236_v40 = vld [vmem:[#allocation11_spill] sm:$0xff] }
 0x5d0   : > { %v3421_v62 = vpop.f32.mrf.mxu3 }
 0x5d1   : > { %v3422_v2 = vadd.f32 %v3421_v62, %v3309_v60  ;;  %v3754_v0 = vpop.f32.mrf.mxu2  ;;  %v3540_v46 = vpop.f32.mrf.mxu0  ;;  %v3208_v60 = vadd.f32 %v10214_v36, %v3095_v59  ;;  %v14238_v36 = vld [vmem:[#allocation8_spill] sm:$0xff]  ;;  %v2910_v59 = vld [vmem:[%s14022_s2 + $0x810] sm:$0xff] }
 0x5d2   : > { %v10654_v43 = vadd.f32 %v3754_v0, %v3642_v11  ;;  %v3647_v55 = vpop.f32.mrf.mxu1  ;;  %v14237_v0 = vld [vmem:[#allocation14_spill] sm:$0xff]  ;;  %3864 = vmatpush.msrb.mxu3 %v2910_v59  ;;  %v2705_v59 = vld [vmem:[%s14022_s2 + $0x1a8] sm:$0xff] }
 0x5d3   : > { %v3535_v24 = vadd.f32 %v3534_v63, %v3422_v2  ;;  %v2985_v2 = vadd.f32 %v14236_v40, %v10525_v22 }
 0x5d4   : > { %3587 = vmatmul.f32.gmra.mxu0 %v10241_v3 }
 0x5d5   : > { %v3648_v44 = vadd.f32 %v3647_v55, %v3535_v24  ;;  %3471 = vmatmul.f32.gmra.mxu3 %v7365_v25  ;;  %3694 = vmatmul.f32.gmra.mxu1 %v10220_v13  ;;  %v3321_v55 = vadd.f32 %v14237_v0, %v3208_v60 }
 0x5d6   : > { %3804 = vmatmul.f32.gmra.mxu2 %v7365_v25 }
 0x5d8   : > { %v3424_v42 = vpop.f32.mrf.mxu3 }
 0x5d9   : > { %v3425_v10 = vadd.f32 %v3424_v42, %v3312_v14  ;;  %v3757_v63 = vpop.f32.mrf.mxu2  ;;  %v3543_v3 = vpop.f32.mrf.mxu0  ;;  %v14239_v14 = vld [vmem:[#allocation10_spill] sm:$0xff] }
 0x5da   : > { %v10666_v8 = vadd.f32 %v3757_v63, %v3645_v37  ;;  %v3650_v13 = vpop.f32.mrf.mxu1  ;;  %v14240_v63 = vld [vmem:[#allocation22_spill] sm:$0xff] }
 0x5db   : > { %v3538_v11 = vadd.f32 %v3537_v7, %v3425_v10  ;;  %v7367_v7 = vld [vmem:[#allocation3 + $0x170] sm:$0xff] }
 0x5dc   : > { %3590 = vmatmul.f32.gmra.mxu0 %v10261_v6  ;;  %v7369_v10 = vld [vmem:[#allocation3 + $0x190] sm:$0xff] }
 0x5dd   : > { %v3651_v23 = vadd.f32 %v3650_v13, %v3538_v11  ;;  %3474 = vmatmul.f32.gmra.mxu3 %v7366_v21  ;;  %3697 = vmatmul.f32.gmra.mxu1 %v10239_v61  ;;  %v14241_v13 = vld [vmem:[#allocation29_spill] sm:$0xff] }
 0x5de   : > { %3807 = vmatmul.f32.gmra.mxu2 %v7366_v21  ;;  %v2657_v11 = vld [vmem:[%s14022_s2 + $0x28] sm:$0xff]  ;;  %v14243_v21 = vld [vmem:[#allocation15_spill] sm:$0xff] }
 0x5df   : > { %3976 = vmatpush.msrb.mxu0 %v2657_v11  ;;  %v2988_v51 = vadd.f32 %v14243_v21, %v10525_v22 }
 0x5e0   : > { %v3427_v48 = vpop.f32.mrf.mxu3 }
 0x5e1   : > { %v3428_v57 = vadd.f32 %v3427_v48, %v3315_v45  ;;  %v3760_v5 = vpop.f32.mrf.mxu2  ;;  %v3546_v6 = vpop.f32.mrf.mxu0 }
 0x5e2   : > { %v10678_v34 = vadd.f32 %v3760_v5, %v3648_v44  ;;  %v3653_v61 = vpop.f32.mrf.mxu1 }
 0x5e3   : > { %v3541_v9 = vadd.f32 %v3540_v46, %v3428_v57  ;;  %v3098_v46 = vadd.f32 %v14238_v36, %v2985_v2  ;;  %v14244_v57 = vld [vmem:[#allocation9_spill] sm:$0xff]  ;;  %v14252_v36 = vld [vmem:[#allocation35_spill] sm:$0xff] }
 0x5e4   : > { %3593 = vmatmul.f32.gmra.mxu0 %v10279_v4  ;;  %v3101_v5 = vadd.f32 %v14244_v57, %v2988_v51  ;;  %v14251_v2 = vld [vmem:[#allocation17_spill] sm:$0xff]  ;;  %v14258_v57 = vld [vmem:[#allocation31_spill] sm:$0xff] }
 0x5e5   : > { %v3654_v30 = vadd.f32 %v3653_v61, %v3541_v9  ;;  %3477 = vmatmul.f32.gmra.mxu3 %v7367_v7  ;;  %3700 = vmatmul.f32.gmra.mxu1 %v10259_v33  ;;  %v3211_v42 = vadd.f32 %v14239_v14, %v3098_v46  ;;  %v14253_v46 = vld [vmem:[#allocation40_spill] sm:$0xff] }
 0x5e6   : > { %3810 = vmatmul.f32.gmra.mxu2 %v7367_v7 }
 0x5e8   : > { %v3430_v39 = vpop.f32.mrf.mxu3 }
 0x5e9   : > { %v3431_v37 = vadd.f32 %v3430_v39, %v3318_v47  ;;  %v3763_v49 = vpop.f32.mrf.mxu2  ;;  %v3549_v4 = vpop.f32.mrf.mxu0  ;;  %v14247_v47 = vld [vmem:[#allocation28_spill] sm:$0xff]  ;;  %v14248_v39 = vld [vmem:[#allocation33_spill] sm:$0xff] }
 0x5ea   : > { %v10690_v15 = vadd.f32 %v3763_v49, %v3651_v23  ;;  %v3656_v33 = vpop.f32.mrf.mxu1 }
 0x5eb   : > { %v3544_v32 = vadd.f32 %v3543_v3, %v3431_v37  ;;  %v14242_v3 = vld [vmem:[#allocation18_spill] sm:$0xff]  ;;  %v14249_v37 = vld [vmem:[#allocation24_spill] sm:$0xff] }
 0x5ec   : > { %3596 = vmatmul.f32.gmra.mxu0 %v14235_v19  ;;  %v3324_v27 = vadd.f32 %v14242_v3, %v3211_v42  ;;  %v2711_v3 = vld [vmem:[%s14022_s2 + $0x1d8] sm:$0xff] }
 0x5ed   : > { %v3657_v62 = vadd.f32 %v3656_v33, %v3544_v32  ;;  %3480 = vmatmul.f32.gmra.mxu3 %v7368_v41  ;;  %3703 = vmatmul.f32.gmra.mxu1 %v10277_v28  ;;  %v14250_v32 = vld [vmem:[#allocation13_spill] sm:$0xff] }
 0x5ee   : > { %3813 = vmatmul.f32.gmra.mxu2 %v7368_v41 }
 0x5f0   : > { %v3433_v24 = vpop.f32.mrf.mxu3 }
 0x5f1   : > { %v3434_v12 = vadd.f32 %v3433_v24, %v3321_v55  ;;  %v3766_v44 = vpop.f32.mrf.mxu2  ;;  %v3552_v18 = vpop.f32.mrf.mxu0  ;;  %v7371_v24 = vld [vmem:[#allocation3 + $0x1b0] sm:$0xff] }
 0x5f2   : > { %v10702_v25 = vadd.f32 %v3766_v44, %v3654_v30  ;;  %v3659_v28 = vpop.f32.mrf.mxu1  ;;  %v14246_v30 = vld [vmem:[#allocation19_spill] sm:$0xff] }
 0x5f3   : > { %v3547_v53 = vadd.f32 %v3546_v6, %v3434_v12  ;;  %v14245_v6 = vld [vmem:[#allocation12_spill] sm:$0xff]  ;;  %v2991_v7 = vadd.f32 %v14246_v30, %v10525_v22  ;;  %v2655_v12 = vld [vmem:[%s14022_s2 + $0x18] sm:$0xff]  ;;  %v14260_v30 = vld [vmem:[#allocation45_spill] sm:$0xff] }
 0x5f4   : > { %3599 = vmatmul.f32.gmra.mxu0 %v14241_v13  ;;  %v3214_v26 = vadd.f32 %v14245_v6, %v3101_v5  ;;  %v2715_v44 = vld [vmem:[%s14022_s2 + $0x1f8] sm:$0xff]  ;;  %v2997_v5 = vadd.f32 %v14258_v57, %v10525_v22  ;;  %v7372_v6 = vld [vmem:[#allocation3 + $0x1c8] sm:$0xff] }
 0x5f5   : > { %v3660_v17 = vadd.f32 %v3659_v28, %v3547_v53  ;;  %3483 = vmatmul.f32.gmra.mxu3 %v7369_v10  ;;  %3706 = vmatmul.f32.gmra.mxu1 %v14240_v63  ;;  %v14254_v28 = vld [vmem:[#allocation25_spill] sm:$0xff] }
 0x5f6   : > { %3816 = vmatmul.f32.gmra.mxu2 %v7369_v10  ;;  %v3327_v49 = vadd.f32 %v14249_v37, %v3214_v26  ;;  %v2994_v53 = vadd.f32 %v14254_v28, %v10525_v22  ;;  %3977 = vmatpush.msrb.mxu0 %v2655_v12  ;;  %v14259_v26 = vld [vmem:[#allocation39_spill] sm:$0xff]  ;;  %v2745_v37 = vld [vmem:[%s14022_s2 + $0x2e8] sm:$0xff]  ;;  %v7373_v12 = vld [vmem:[#allocation3 + $0x1d0] sm:$0xff] }
 0x5f7   : > { %4076 = vmatpush.msrb.mxu1 %v2715_v44  ;;  %v14264_v44 = vld [vmem:[#allocation46_spill] sm:$0xff]  ;;  %v14265_v28 = vld [vmem:[#allocation52_spill] sm:$0xff] }
 0x5f8   : > { %v3436_v23 = vpop.f32.mrf.mxu3 }
 0x5f9   : > { %v3437_v29 = vadd.f32 %v3436_v23, %v3324_v27  ;;  %v3769_v45 = vpop.f32.mrf.mxu2  ;;  %v3555_v9 = vpop.f32.mrf.mxu0  ;;  %v14256_v27 = vld [vmem:[#allocation16_spill] sm:$0xff] }
 0x5fa   : > { %v10713_v48 = vadd.f32 %v3769_v45, %v3657_v62  ;;  %v3662_v54 = vpop.f32.mrf.mxu1  ;;  %v3107_v23 = vadd.f32 %v14256_v27, %v2994_v53  ;;  %v14257_v45 = vld [vmem:[#allocation21_spill] sm:$0xff] }
 0x5fb   : > { %v3550_v61 = vadd.f32 %v3549_v4, %v3437_v29  ;;  %v3104_v4 = vadd.f32 %v14250_v32, %v2991_v7  ;;  %v2709_v29 = vld [vmem:[%s14022_s2 + $0x1c8] sm:$0xff]  ;;  %v2707_v7 = vld [vmem:[%s14022_s2 + $0x1b8] sm:$0xff] }
 0x5fc   : > { %3602 = vmatmul.f32.gmra.mxu0 %v14248_v39  ;;  %v2701_v53 = vld [vmem:[%s14022_s2 + $0x188] sm:$0xff] }
 0x5fd   : > { %v3663_v38 = vadd.f32 %v3662_v54, %v3550_v61  ;;  %3486 = vmatmul.f32.gmra.mxu3 %v7370_v20  ;;  %3709 = vmatmul.f32.gmra.mxu1 %v14247_v47  ;;  %v3217_v0 = vadd.f32 %v14251_v2, %v3104_v4  ;;  %v3220_v54 = vadd.f32 %v14257_v45, %v3107_v23  ;;  %v14268_v45 = vld [vmem:[#allocation26_spill] sm:$0xff] }
 0x5fe   : > { %3819 = vmatmul.f32.gmra.mxu2 %v7370_v20  ;;  %v14261_v20 = vld [vmem:[#allocation36_spill] sm:$0xff] }
 0x5ff   : > { %v3333_v47 = vadd.f32 %v14261_v20, %v3220_v54  ;;  %v7374_v20 = vld [vmem:[#allocation3 + $0x1e8] sm:$0xff] }
 0x600   : > { %v3439_v33 = vpop.f32.mrf.mxu3 }
 0x601   : > { %v3440_v60 = vadd.f32 %v3439_v33, %v3327_v49  ;;  %v3772_v62 = vpop.f32.mrf.mxu2  ;;  %v3558_v40 = vpop.f32.mrf.mxu0  ;;  %v14262_v49 = vld [vmem:[#allocation20_spill] sm:$0xff] }
 0x602   : > { %v10726_v41 = vadd.f32 %v3772_v62, %v3660_v17  ;;  %v3665_v19 = vpop.f32.mrf.mxu1  ;;  %v2713_v17 = vld [vmem:[%s14022_s2 + $0x1e8] sm:$0xff]  ;;  %v3110_v33 = vadd.f32 %v14262_v49, %v2997_v5  ;;  %v14273_v49 = vld [vmem:[#allocation47_spill] sm:$0xff] }
 0x603   : > { %v3553_v58 = vadd.f32 %v3552_v18, %v3440_v60  ;;  %v14255_v18 = vld [vmem:[#allocation30_spill] sm:$0xff]  ;;  %4077 = vmatpush.msrb.mxu1 %v2713_v17  ;;  %v14267_v17 = vld [vmem:[#allocation41_spill] sm:$0xff] }
 0x604   : > { %3605 = vmatmul.f32.gmra.mxu0 %v14253_v46  ;;  %v3330_v14 = vadd.f32 %v14255_v18, %v3217_v0  ;;  %v2703_v0 = vld [vmem:[%s14022_s2 + $0x198] sm:$0xff] }
 0x605   : > { %v3666_v55 = vadd.f32 %v3665_v19, %v3553_v58  ;;  %3489 = vmatmul.f32.gmra.mxu3 %v7371_v24  ;;  %3712 = vmatmul.f32.gmra.mxu1 %v14252_v36  ;;  %v2743_v19 = vld [vmem:[%s14022_s2 + $0x2d8] sm:$0xff] }
 0x606   : > { %3822 = vmatmul.f32.gmra.mxu2 %v7371_v24  ;;  %4078 = vmatpush.msrb.mxu1 %v2711_v3  ;;  %v2741_v24 = vld [vmem:[%s14022_s2 + $0x2c8] sm:$0xff]  ;;  %v2739_v18 = vld [vmem:[%s14022_s2 + $0x2b8] sm:$0xff] }
 0x607   : > { %v2737_v3 = vld [vmem:[%s14022_s2 + $0x2a8] sm:$0xff] }
 0x608   : > { %v3442_v42 = vpop.f32.mrf.mxu3  ;;  %4079 = vmatpush.msrb.mxu1 %v2709_v29 }
 0x609   : > { %v3443_v10 = vadd.f32 %v3442_v42, %v3330_v14  ;;  %v3775_v63 = vpop.f32.mrf.mxu2  ;;  %v3561_v51 = vpop.f32.mrf.mxu0  ;;  %v14266_v14 = vld [vmem:[#allocation37_spill] sm:$0xff] }
 0x60a   : > { %v10743_v13 = vadd.f32 %v3775_v63, %v3663_v38  ;;  %v3668_v11 = vpop.f32.mrf.mxu1  ;;  %v2747_v38 = vld [vmem:[%s14022_s2 + $0x2f8] sm:$0xff]  ;;  %4080 = vmatpush.msrb.mxu1 %v2707_v7  ;;  %v3000_v42 = vadd.f32 %v14266_v14, %v10525_v22 }
 0x60b   : > { %v3556_v21 = vadd.f32 %v3555_v9, %v3443_v10  ;;  %v2908_v9 = vld [vmem:[%s14022_s2 + $0x800] sm:$0xff]  ;;  %4189 = vmatpush.msra.mxu2 %v2747_v38 }
 0x60c   : > { %3608 = vmatmul.f32.gmra.mxu0 %v14260_v30  ;;  %3865 = vmatpush.msrb.mxu3 %v2908_v9  ;;  %v3113_v54 = vadd.f32 %v14268_v45, %v3000_v42  ;;  %v14269_v30 = vld [vmem:[#allocation34_spill] sm:$0xff]  ;;  %v2687_v45 = vld [vmem:[%s14022_s2 + $0x118] sm:$0xff] }
 0x60d   : > { %v3669_v61 = vadd.f32 %v3668_v11, %v3556_v21  ;;  %3492 = vmatmul.f32.gmra.mxu3 %v7372_v6  ;;  %3715 = vmatmul.f32.gmra.mxu1 %v14259_v26  ;;  %v2699_v11 = vld [vmem:[%s14022_s2 + $0x178] sm:$0xff]  ;;  %v7375_v42 = vld [vmem:[#allocation3 + $0x1f0] sm:$0xff] }
 0x60e   : > { %3825 = vmatmul.f32.gmra.mxu2 %v7372_v6  ;;  %4081 = vmatpush.msrb.mxu1 %v2705_v59  ;;  %v2697_v6 = vld [vmem:[%s14022_s2 + $0x168] sm:$0xff]  ;;  %v2735_v26 = vld [vmem:[%s14022_s2 + $0x298] sm:$0xff]  ;;  %v3226_v9 = vadd.f32 %v14269_v30, %v3113_v54 }
 0x60f   : > { %4190 = vmatpush.msra.mxu2 %v2745_v37  ;;  %v2733_v59 = vld [vmem:[%s14022_s2 + $0x288] sm:$0xff]  ;;  %v2779_v37 = vld [vmem:[%s14022_s2 + $0x3f8] sm:$0xff] }
 0x610   : > { %v3445_v39 = vpop.f32.mrf.mxu3  ;;  %4082 = vmatpush.msrb.mxu1 %v2703_v0  ;;  %4302 = vmatpush.msra.mxu3 %v2779_v37  ;;  %v2725_v54 = vld [vmem:[%s14022_s2 + $0x248] sm:$0xff] }
 0x611   : > { %v3446_v32 = vadd.f32 %v3445_v39, %v3333_v47  ;;  %v3778_v4 = vpop.f32.mrf.mxu2  ;;  %v3564_v2 = vpop.f32.mrf.mxu0  ;;  %4191 = vmatpush.msra.mxu2 %v2743_v19  ;;  %v14272_v47 = vld [vmem:[#allocation56_spill] sm:$0xff]  ;;  %v2695_v39 = vld [vmem:[%s14022_s2 + $0x158] sm:$0xff] }
 0x612   : > { %v10774_v60 = vadd.f32 %v3778_v4, %v3666_v55  ;;  %v3671_v62 = vpop.f32.mrf.mxu1  ;;  %v14263_v55 = vld [vmem:[#allocation27_spill] sm:$0xff]  ;;  %4083 = vmatpush.msrb.mxu1 %v2701_v53  ;;  %v2693_v4 = vld [vmem:[%s14022_s2 + $0x148] sm:$0xff]  ;;  %v14274_v19 = vld [vmem:[#allocation32_spill] sm:$0xff] }
 0x613   : > { %v3559_v58 = vadd.f32 %v3558_v40, %v3446_v32  ;;  %v3223_v36 = vadd.f32 %v14263_v55, %v3110_v33  ;;  %v2653_v40 = vld [vmem:[%s14022_s2 + $0x8] sm:$0xff]  ;;  %4192 = vmatpush.msra.mxu2 %v2741_v24  ;;  %v3339_v33 = vadd.f32 %v14273_v49, %v3226_v9  ;;  %v14275_v53 = vld [vmem:[#allocation42_spill] sm:$0xff] }
 0x614   : > { %3611 = vmatmul.f32.gmra.mxu0 %v14265_v28  ;;  %4084 = vmatpush.msrb.mxu1 %v2699_v11  ;;  %v2729_v28 = vld [vmem:[%s14022_s2 + $0x268] sm:$0xff]  ;;  %v14279_v9 = vld [vmem:[#allocation38_spill] sm:$0xff] }
 0x615   : > { %v3672_v46 = vadd.f32 %v3671_v62, %v3559_v58  ;;  %3495 = vmatmul.f32.gmra.mxu3 %v7373_v12  ;;  %3718 = vmatmul.f32.gmra.mxu1 %v14264_v44  ;;  %v3336_v10 = vadd.f32 %v14267_v17, %v3223_v36  ;;  %v2731_v62 = vld [vmem:[%s14022_s2 + $0x278] sm:$0xff]  ;;  %v10847_v17 = vld [vmem:[#allocation3 + $0x209] sm:$0xff] }
 0x616   : > { %3828 = vmatmul.f32.gmra.mxu2 %v7373_v12  ;;  %3978 = vmatpush.msrb.mxu0 %v2653_v40  ;;  %v2691_v40 = vld [vmem:[%s14022_s2 + $0x138] sm:$0xff]  ;;  %v14277_v11 = vld [vmem:[#allocation49_spill] sm:$0xff] }
 0x617   : > { %4193 = vmatpush.msra.mxu2 %v2739_v18  ;;  %4085 = vmatpush.msrb.mxu1 %v2697_v6 }
 0x618   : > { %v3448_v63 = vpop.f32.mrf.mxu3 }
 0x619   : > { %v3449_v27 = vadd.f32 %v3448_v63, %v3336_v10  ;;  %v3781_v23 = vpop.f32.mrf.mxu2  ;;  %v3567_v5 = vpop.f32.mrf.mxu0  ;;  %4194 = vmatpush.msra.mxu2 %v2737_v3  ;;  %4086 = vmatpush.msrb.mxu1 %v2695_v39  ;;  %v2727_v10 = vld [vmem:[%s14022_s2 + $0x258] sm:$0xff]  ;;  %v3006_v3 = vadd.f32 %v14277_v11, %v10525_v22 }
 0x61a   : > { %v10806_v21 = vadd.f32 %v3781_v23, %v3669_v61  ;;  %v3674_v29 = vpop.f32.mrf.mxu1  ;;  %v14270_v61 = vld [vmem:[#allocation43_spill] sm:$0xff] }
 0x61b   : > { %v3562_v57 = vadd.f32 %v3561_v51, %v3449_v27  ;;  %v3003_v7 = vadd.f32 %v14270_v61, %v10525_v22  ;;  %v14271_v51 = vld [vmem:[#allocation51_spill] sm:$0xff]  ;;  %4195 = vmatpush.msra.mxu2 %v2735_v26  ;;  %4087 = vmatpush.msrb.mxu1 %v2693_v4  ;;  %v14278_v27 = vld [vmem:[#allocation53_spill] sm:$0xff]  ;;  %v3119_v61 = vadd.f32 %v14279_v9, %v3006_v3 }
 0x61c   : > { %3614 = vmatmul.f32.gmra.mxu0 %v14272_v47  ;;  %v2811_v63 = vld [vmem:[%s14022_s2 + $0x4f8] sm:$0xff]  ;;  %v2685_v47 = vld [vmem:[%s14022_s2 + $0x108] sm:$0xff] }
 0x61d   : > { %v3675_v38 = vadd.f32 %v3674_v29, %v3562_v57  ;;  %3498 = vmatmul.f32.gmra.mxu3 %v7374_v20  ;;  %3721 = vmatmul.f32.gmra.mxu1 %v14271_v51  ;;  %v3116_v58 = vadd.f32 %v14274_v19, %v3003_v7  ;;  %v2612_v51 = vld [vmem:[#allocation3 + $0x208] sm:$0xff]  ;;  %v2723_v39 = vld [vmem:[%s14022_s2 + $0x238] sm:$0xff]  ;;  %v14282_v19 = vld [vmem:[#allocation58_spill] sm:$0xff] }
 0x61e   : > { %3831 = vmatmul.f32.gmra.mxu2 %v7374_v20  ;;  %4088 = vmatpush.msrb.mxu1 %v2691_v40  ;;  %v2721_v4 = vld [vmem:[%s14022_s2 + $0x228] sm:$0xff] }
 0x61f   : > { %4196 = vmatpush.msra.mxu2 %v2733_v59  ;;  %v3229_v18 = vadd.f32 %v14275_v53, %v3116_v58  ;;  %4415 = vmatpush.msra.mxu0 %v2811_v63  ;;  %v14280_v59 = vld [vmem:[#allocation48_spill] sm:$0xff]  ;;  %v14284_v63 = vld [vmem:[#allocation55_spill] sm:$0xff] }
 0x620   : > { %v3451_v32 = vpop.f32.mrf.mxu3  ;;  %v3232_v37 = vadd.f32 %v14280_v59, %v3119_v61 }
 0x621   : > { %v3452_v0 = vadd.f32 %v3451_v32, %v3339_v33  ;;  %v3784_v24 = vpop.f32.mrf.mxu2  ;;  %v3570_v44 = vpop.f32.mrf.mxu0  ;;  %4197 = vmatpush.msra.mxu2 %v2731_v62  ;;  %v3342_v23 = vadd.f32 %v14278_v27, %v3229_v18  ;;  %v10880_v32 = vld [vmem:[#allocation3 + $0x211] sm:$0xff]  ;;  %v2777_v62 = vld [vmem:[%s14022_s2 + $0x3e8] sm:$0xff] }
 0x622   : > { %v10837_v55 = vadd.f32 %v3784_v24, %v3672_v46  ;;  %v3677_v36 = vpop.f32.mrf.mxu1  ;;  %v14276_v46 = vld [vmem:[#allocation57_spill] sm:$0xff]  ;;  %v3345_v58 = vadd.f32 %v14282_v19, %v3232_v37  ;;  %v2719_v24 = vld [vmem:[%s14022_s2 + $0x218] sm:$0xff]  ;;  %4303 = vmatpush.msra.mxu3 %v2777_v62  ;;  %v7377_v27 = vld [vmem:[#allocation3 + $0x210] sm:$0xff] }
 0x623   : > { %v3565_v12 = vadd.f32 %v3564_v2, %v3452_v0  ;;  %v2689_v2 = vld [vmem:[%s14022_s2 + $0x128] sm:$0xff]  ;;  %4198 = vmatpush.msra.mxu2 %v2729_v28  ;;  %v14288_v37 = vld [vmem:[#allocation60_spill] sm:$0xff]  ;;  %v14289_v62 = vld [vmem:[#allocation62_spill] sm:$0xff] }
 0x624   : > { %3617 = vmatmul.f32.gmra.mxu0 %v10847_v17  ;;  %4089 = vmatpush.msrb.mxu1 %v2689_v2 }
 0x625   : > { %v3678_v14 = vadd.f32 %v3677_v36, %v3565_v12  ;;  %3501 = vmatmul.f32.gmra.mxu3 %v7375_v42  ;;  %3724 = vmatmul.f32.gmra.mxu1 %v14276_v46  ;;  %v14283_v36 = vld [vmem:[#allocation44_spill] sm:$0xff] }
 0x626   : > { %3834 = vmatmul.f32.gmra.mxu2 %v7375_v42  ;;  %4090 = vmatpush.msrb.mxu1 %v2687_v45  ;;  %v2578_v42 = vld [vmem:[#allocation3 + $0x227] sm:$0xff] }
 0x627   : > { %4199 = vmatpush.msra.mxu2 %v2727_v10  ;;  %v2717_v10 = vld [vmem:[%s14022_s2 + $0x208] sm:$0xff] }
 0x628   : > { %v3454_v29 = vpop.f32.mrf.mxu3  ;;  %4091 = vmatpush.msrb.mxu1 %v2685_v47  ;;  %v14286_v45 = vld [vmem:[#allocation61_spill] sm:$0xff] }
 0x629   : > { %v3455_v57 = vadd.f32 %v3454_v29, %v3342_v23  ;;  %v3787_v6 = vpop.f32.mrf.mxu2  ;;  %v3573_v20 = vpop.f32.mrf.mxu0  ;;  %4200 = vmatpush.msra.mxu2 %v2725_v54  ;;  %v7378_v23 = vld [vmem:[#allocation3 + $0x7] sm:$0xff] }
 0x62a   : > { %v10868_v26 = vadd.f32 %v3787_v6, %v3675_v38  ;;  %v3680_v30 = vpop.f32.mrf.mxu1  ;;  %v14281_v38 = vld [vmem:[#allocation54_spill] sm:$0xff] }
 0x62b   : > { %v3568_v7 = vadd.f32 %v3567_v5, %v3455_v57  ;;  %v3009_v49 = vadd.f32 %v14281_v38, %v10525_v22  ;;  %v7376_v5 = vld [vmem:[#allocation3 + $0x20f] sm:$0xff]  ;;  %4201 = vmatpush.msra.mxu2 %v2723_v39 }
 0x62c   : > { %3620 = vmatmul.f32.gmra.mxu0 %v10880_v32 }
 0x62d   : > { %v3681_v33 = vadd.f32 %v3680_v30, %v3568_v7  ;;  %3504 = vmatmul.f32.gmra.mxu3 %v2612_v51  ;;  %3727 = vmatmul.f32.gmra.mxu1 %v7376_v5  ;;  %v3122_v12 = vadd.f32 %v14283_v36, %v3009_v49  ;;  %v2579_v7 = vld [vmem:[#allocation3 + $0x22f] sm:$0xff] }
 0x62e   : > { %3837 = vmatmul.f32.gmra.mxu2 %v2612_v51  ;;  %v14287_v51 = vld [vmem:[#allocation50_spill] sm:$0xff]  ;;  %v7380_v5 = vld [vmem:[#allocation3 + $0x8] sm:$0xff] }
 0x62f   : > { %4202 = vmatpush.msra.mxu2 %v2721_v4  ;;  %v3235_v11 = vadd.f32 %v14284_v63, %v3122_v12  ;;  %v7381_v4 = vld [vmem:[#allocation3 + $0xf] sm:$0xff] }
 0x630   : > { %v3457_v0 = vpop.f32.mrf.mxu3 }
 0x631   : > { %v3458_v40 = vadd.f32 %v3457_v0, %v3345_v58  ;;  %v3790_v28 = vpop.f32.mrf.mxu2  ;;  %v3576_v2 = vpop.f32.mrf.mxu0  ;;  %4203 = vmatpush.msra.mxu2 %v2719_v24  ;;  %v3348_v54 = vadd.f32 %v14286_v45, %v3235_v11  ;;  %v10934_v45 = vld [vmem:[#allocation3 + $0x2f] sm:$0xff] }
 0x632   : > { %v10894_v53 = vadd.f32 %v3790_v28, %v3678_v14  ;;  %v3683_v18 = vpop.f32.mrf.mxu1  ;;  %v2809_v14 = vld [vmem:[%s14022_s2 + $0x4e8] sm:$0xff] }
 0x633   : > { %v3571_v46 = vadd.f32 %v3570_v44, %v3458_v40  ;;  %v14285_v44 = vld [vmem:[#allocation59_spill] sm:$0xff]  ;;  %4204 = vmatpush.msra.mxu2 %v2717_v10  ;;  %4416 = vmatpush.msra.mxu0 %v2809_v14 }
 0x634   : > { %3979 = vmatmul.f32.vlgmr.msrb.gmra.mxu0 %v7378_v23  ;;  %v3012_v29 = vadd.f32 %v14285_v44, %v10525_v22  ;;  %v10910_v22 = vld [vmem:[#allocation3 + $0x49] sm:$0xff] }
 0x635   : > { %v3684_v3 = vadd.f32 %v3683_v18, %v3571_v46  ;;  %3507 = vmatmul.f32.gmra.mxu3 %v7377_v27  ;;  %3730 = vmatmul.f32.gmra.mxu1 %v2578_v42  ;;  %v10919_v18 = vld [vmem:[#allocation3 + $0x51] sm:$0xff]  ;;  %v10922_v42 = vld [vmem:[#allocation3 + $0x27] sm:$0xff] }
 0x636   : > { %3840 = vmatmul.f32.gmra.mxu2 %v7377_v27  ;;  %v3125_v47 = vadd.f32 %v14287_v51, %v3012_v29  ;;  %v2807_v46 = vld [vmem:[%s14022_s2 + $0x4d8] sm:$0xff]  ;;  %v10931_v44 = vld [vmem:[#allocation3 + $0x69] sm:$0xff] }
 0x637   : > { %4417 = vmatpush.msra.mxu0 %v2807_v46  ;;  %14290 = vst [vmem:[#allocation23_spill] sm:$0xff] %v10931_v44  ;;  %v7385_v29 = vld [vmem:[#allocation3 + $0x9] sm:$0xff] }
 0x638   : > { %v3460_v57 = vpop.f32.mrf.mxu3  ;;  %v3238_v38 = vadd.f32 %v14288_v37, %v3125_v47  ;;  %v10946_v37 = vld [vmem:[#allocation3 + $0x28] sm:$0xff] }
 0x639   : > { %v3461_v6 = vadd.f32 %v3460_v57, %v3348_v54  ;;  %v3793_v30 = vpop.f32.mrf.mxu2  ;;  %v3579_v59 = vpop.f32.mrf.mxu0  ;;  %v14291_v57 = vld [vmem:[#allocation63_spill] sm:$0xff]  ;;  %v10964_v46 = vld [vmem:[#allocation3 + $0x29] sm:$0xff] }
 0x63a   : > { %v10906_v9 = vadd.f32 %v3793_v30, %v3681_v33  ;;  %v3686_v61 = vpop.f32.mrf.mxu1  ;;  %v2775_v33 = vld [vmem:[%s14022_s2 + $0x3d8] sm:$0xff]  ;;  %v3351_v19 = vadd.f32 %v14289_v62, %v3238_v38 }
 0x63b   : > { %v3574_v39 = vadd.f32 %v3573_v20, %v3461_v6  ;;  %4304 = vmatpush.msra.mxu3 %v2775_v33  ;;  %v7389_v38 = vld [vmem:[#allocation3 + $0x11] sm:$0xff]  ;;  %v14293_v33 = vld [vmem:[#allocation64_spill] sm:$0xff] }
 0x63c   : > { %3982 = vmatmul.f32.gmra.mxu0 %v7381_v4 }
 0x63d   : > { %v3687_v49 = vadd.f32 %v3686_v61, %v3574_v39  ;;  %3733 = vmatmul.f32.gmra.mxu1 %v2579_v7  ;;  %3866 = vmatmul.f32.vlgmr.msrb.gmra.mxu3 %v10910_v22 }
 0x63e   : > { %3843 = vmatmul.f32.gmra.mxu2 %v7380_v5 }
 0x640   : > { %v3463_v20 = vpop.f32.mrf.mxu3 }
 0x641   : > { %v3464_v58 = vadd.f32 %v3463_v20, %v3351_v19  ;;  %v3796_v0 = vpop.f32.mrf.mxu2  ;;  %v3582_v40 = vpop.f32.mrf.mxu0 }
 0x642   : > { %v10917_v24 = vadd.f32 %v3796_v0, %v3684_v3  ;;  %v3689_v36 = vpop.f32.mrf.mxu1 }
 0x643   : > { %v3577_v12 = vadd.f32 %v3576_v2, %v3464_v58 }
 0x644   : > { %3985 = vmatmul.f32.gmra.mxu0 %v10922_v42 }
 0x645   : > { %v3690_v28 = vadd.f32 %v3689_v36, %v3577_v12  ;;  %3869 = vmatmul.f32.gmra.mxu3 %v10919_v18  ;;  %4092 = vmatmul.f32.vlgmr.msrb.gmra.mxu1 %v7380_v5 }
 0x646   : > { %3846 = vmatmul.f32.gmra.mxu2 %v7380_v5 }
 0x648   : > { %v3466_v10 = vpop.f32.mrf.mxu3 }
 0x649   : > { %v3467_v2 = vadd.f32 %v3466_v10, %v10538_v31  ;;  %v3799_v63 = vpop.f32.mrf.mxu2  ;;  %v3585_v23 = vpop.f32.mrf.mxu0  ;;  %v2773_v31 = vld [vmem:[%s14022_s2 + $0x3c8] sm:$0xff] }
 0x64a   : > { %v10929_v11 = vadd.f32 %v3799_v63, %v3687_v49  ;;  %v3692_v3 = vpop.f32.mrf.mxu1  ;;  %4305 = vmatpush.msra.mxu3 %v2773_v31  ;;  %v10949_v49 = vld [vmem:[#allocation3 + $0x47] sm:$0xff]  ;;  %v10967_v10 = vld [vmem:[#allocation3 + $0x4f] sm:$0xff] }
 0x64b   : > { %v3580_v27 = vadd.f32 %v3579_v59, %v3467_v2  ;;  %v10943_v59 = vld [vmem:[#allocation3 + $0x71] sm:$0xff] }
 0x64c   : > { %3988 = vmatmul.f32.gmra.mxu0 %v10934_v45  ;;  %14292 = vst [vmem:[#allocation11_spill] sm:$0xff] %v10943_v59  ;;  %v2771_v2 = vld [vmem:[%s14022_s2 + $0x3b8] sm:$0xff] }
 0x64d   : > { %v3693_v14 = vadd.f32 %v3692_v3, %v3580_v27  ;;  %3872 = vmatmul.f32.gmra.mxu3 %v10931_v44  ;;  %4095 = vmatmul.f32.gmra.mxu1 %v7380_v5  ;;  %v2805_v5 = vld [vmem:[%s14022_s2 + $0x4c8] sm:$0xff] }
 0x64e   : > { %4205 = vmatmul.f32.vlgmr.msra.gmra.mxu2 %v7385_v29  ;;  %4418 = vmatpush.msra.mxu0 %v2805_v5  ;;  %v14295_v3 = vld [vmem:[#allocation65_spill] sm:$0xff] }
 0x64f   : > { %4306 = vmatpush.msra.mxu3 %v2771_v2  ;;  %v10994_v2 = vld [vmem:[#allocation3 + $0xa9] sm:$0xff] }
 0x650   : > { %v3469_v54 = vpop.f32.mrf.mxu3  ;;  %14298 = vst [vmem:[#allocation10_spill] sm:$0xff] %v10994_v2 }
 0x651   : > { %v3470_v6 = vadd.f32 %v3469_v54, %v14291_v57  ;;  %v3802_v30 = vpop.f32.mrf.mxu2  ;;  %v3588_v47 = vpop.f32.mrf.mxu0 }
 0x652   : > { %v10941_v61 = vadd.f32 %v3802_v30, %v3690_v28  ;;  %v3695_v7 = vpop.f32.mrf.mxu1  ;;  %v10961_v28 = vld [vmem:[#allocation3 + $0x30] sm:$0xff]  ;;  %v10979_v30 = vld [vmem:[#allocation3 + $0x48] sm:$0xff] }
 0x653   : > { %v3583_v51 = vadd.f32 %v3582_v40, %v3470_v6  ;;  %v10958_v40 = vld [vmem:[#allocation3 + $0x89] sm:$0xff]  ;;  %v10976_v6 = vld [vmem:[#allocation3 + $0x91] sm:$0xff] }
 0x654   : > { %3991 = vmatmul.f32.gmra.mxu0 %v10949_v49  ;;  %14294 = vst [vmem:[#allocation14_spill] sm:$0xff] %v10958_v40 }
 0x655   : > { %v3696_v39 = vadd.f32 %v3695_v7, %v3583_v51  ;;  %3875 = vmatmul.f32.gmra.mxu3 %v10943_v59  ;;  %4098 = vmatmul.f32.gmra.mxu1 %v10946_v37  ;;  %14296 = vst [vmem:[#allocation8_spill] sm:$0xff] %v10976_v6  ;;  %v10982_v7 = vld [vmem:[#allocation3 + $0x31] sm:$0xff]  ;;  %v10985_v51 = vld [vmem:[#allocation3 + $0x67] sm:$0xff] }
 0x656   : > { %4208 = vmatmul.f32.gmra.mxu2 %v7389_v38  ;;  %v14297_v38 = vld [vmem:[#allocation66_spill] sm:$0xff] }
 0x658   : > { %v3472_v4 = vpop.f32.mrf.mxu3 }
 0x659   : > { %v3473_v62 = vadd.f32 %v3472_v4, %v14293_v33  ;;  %v3805_v19 = vpop.f32.mrf.mxu2  ;;  %v3591_v36 = vpop.f32.mrf.mxu0 }
 0x65a   : > { %v10956_v20 = vadd.f32 %v3805_v19, %v3693_v14  ;;  %v3698_v58 = vpop.f32.mrf.mxu1 }
 0x65b   : > { %v3586_v0 = vadd.f32 %v3585_v23, %v3473_v62 }
 0x65c   : > { %3994 = vmatmul.f32.gmra.mxu0 %v10967_v10 }
 0x65d   : > { %v3699_v12 = vadd.f32 %v3698_v58, %v3586_v0  ;;  %3878 = vmatmul.f32.gmra.mxu3 %v10958_v40  ;;  %4101 = vmatmul.f32.gmra.mxu1 %v10961_v28 }
 0x65e   : > { %4211 = vmatmul.f32.gmra.mxu2 %v10964_v46 }
 0x660   : > { %v3475_v63 = vpop.f32.mrf.mxu3 }
 0x661   : > { %v3476_v27 = vadd.f32 %v3475_v63, %v14295_v3  ;;  %v3808_v23 = vpop.f32.mrf.mxu2  ;;  %v3594_v54 = vpop.f32.mrf.mxu0  ;;  %v10997_v63 = vld [vmem:[#allocation3 + $0x50] sm:$0xff] }
 0x662   : > { %v10974_v14 = vadd.f32 %v3808_v23, %v3696_v39  ;;  %v3701_v29 = vpop.f32.mrf.mxu1  ;;  %v11001_v3 = vld [vmem:[#allocation3 + $0x6f] sm:$0xff] }
 0x663   : > { %v3589_v31 = vadd.f32 %v3588_v47, %v3476_v27  ;;  %v2803_v47 = vld [vmem:[%s14022_s2 + $0x4b8] sm:$0xff]  ;;  %14299 = vst [vmem:[#allocation22_spill] sm:$0xff] %v11001_v3 }
 0x664   : > { %3997 = vmatmul.f32.gmra.mxu0 %v10985_v51  ;;  %v14300_v27 = vld [vmem:[#allocation67_spill] sm:$0xff] }
 0x665   : > { %v3702_v57 = vadd.f32 %v3701_v29, %v3589_v31  ;;  %3881 = vmatmul.f32.gmra.mxu3 %v10976_v6  ;;  %4104 = vmatmul.f32.gmra.mxu1 %v10979_v30 }
 0x666   : > { %4214 = vmatmul.f32.gmra.mxu2 %v10982_v7  ;;  %4419 = vmatpush.msra.mxu0 %v2803_v47 }
 0x668   : > { %v3478_v39 = vpop.f32.mrf.mxu3 }
 0x669   : > { %v3479_v5 = vadd.f32 %v3478_v39, %v14297_v38  ;;  %v3811_v4 = vpop.f32.mrf.mxu2  ;;  %v3597_v58 = vpop.f32.mrf.mxu0 }
 0x66a   : > { %v10992_v33 = vadd.f32 %v3811_v4, %v3699_v12  ;;  %v3704_v62 = vpop.f32.mrf.mxu1  ;;  %v11010_v4 = vld [vmem:[#allocation3 + $0xb1] sm:$0xff] }
 0x66b   : > { %v3592_v19 = vadd.f32 %v3591_v36, %v3479_v5  ;;  %v2769_v36 = vld [vmem:[%s14022_s2 + $0x3a8] sm:$0xff]  ;;  %14302 = vst [vmem:[#allocation18_spill] sm:$0xff] %v11010_v4 }
 0x66c   : > { %4000 = vmatmul.f32.gmra.mxu0 %v11001_v3  ;;  %4307 = vmatpush.msra.mxu3 %v2769_v36  ;;  %v14304_v36 = vld [vmem:[#allocation68_spill] sm:$0xff] }
 0x66d   : > { %v3705_v0 = vadd.f32 %v3704_v62, %v3592_v19  ;;  %3884 = vmatmul.f32.gmra.mxu3 %v10994_v2  ;;  %4107 = vmatmul.f32.gmra.mxu1 %v10997_v63  ;;  %v11013_v62 = vld [vmem:[#allocation3 + $0x68] sm:$0xff] }
 0x66e   : > { %4217 = vmatmul.f32.gmra.mxu2 %v10910_v22  ;;  %v11017_v19 = vld [vmem:[#allocation3 + $0x87] sm:$0xff] }
 0x66f   : > { %14303 = vst [vmem:[#allocation15_spill] sm:$0xff] %v11017_v19 }
 0x670   : > { %v3481_v12 = vpop.f32.mrf.mxu3 }
 0x671   : > { %v3482_v23 = vadd.f32 %v3481_v12, %v14300_v27  ;;  %v3814_v29 = vpop.f32.mrf.mxu2  ;;  %v3600_v38 = vpop.f32.mrf.mxu0 }
 0x672   : > { %v11008_v31 = vadd.f32 %v3814_v29, %v3702_v57  ;;  %v3707_v47 = vpop.f32.mrf.mxu1 }
 0x673   : > { %v3595_v39 = vadd.f32 %v3594_v54, %v3482_v23  ;;  %v2801_v54 = vld [vmem:[%s14022_s2 + $0x4a8] sm:$0xff] }
 0x674   : > { %14301 = vst [vmem:[#allocation29_spill] sm:$0xff] %v11008_v31  ;;  %4003 = vmatmul.f32.gmra.mxu0 %v11017_v19  ;;  %v11026_v31 = vld [vmem:[#allocation3 + $0xc9] sm:$0xff] }
 0x675   : > { %v3708_v5 = vadd.f32 %v3707_v47, %v3595_v39  ;;  %3887 = vmatmul.f32.gmra.mxu3 %v11010_v4  ;;  %4110 = vmatmul.f32.gmra.mxu1 %v11013_v62  ;;  %14306 = vst [vmem:[#allocation12_spill] sm:$0xff] %v11026_v31  ;;  %v11029_v19 = vld [vmem:[#allocation3 + $0x70] sm:$0xff] }
 0x676   : > { %4220 = vmatmul.f32.gmra.mxu2 %v10919_v18  ;;  %4420 = vmatpush.msra.mxu0 %v2801_v54  ;;  %14307 = vst [vmem:[#allocation19_spill] sm:$0xff] %v11029_v19  ;;  %v11033_v54 = vld [vmem:[#allocation3 + $0x8f] sm:$0xff] }
 0x677   : > { %14308 = vst [vmem:[#allocation28_spill] sm:$0xff] %v11033_v54 }
 0x678   : > { %v3484_v57 = vpop.f32.mrf.mxu3 }
 0x679   : > { %v3485_v12 = vadd.f32 %v3484_v57, %v14304_v36  ;;  %v3817_v27 = vpop.f32.mrf.mxu2  ;;  %v3603_v39 = vpop.f32.mrf.mxu0  ;;  %v14309_v57 = vld [vmem:[#allocation69_spill] sm:$0xff] }
 0x67a   : > { %v11024_v23 = vadd.f32 %v3817_v27, %v3705_v0  ;;  %v3710_v29 = vpop.f32.mrf.mxu1 }
 0x67b   : > { %v3598_v47 = vadd.f32 %v3597_v58, %v3485_v12  ;;  %v2767_v58 = vld [vmem:[%s14022_s2 + $0x398] sm:$0xff] }
 0x67c   : > { %14305 = vst [vmem:[#allocation9_spill] sm:$0xff] %v11024_v23  ;;  %4006 = vmatmul.f32.gmra.mxu0 %v11033_v54  ;;  %4308 = vmatpush.msra.mxu3 %v2767_v58  ;;  %v11045_v54 = vld [vmem:[#allocation3 + $0x88] sm:$0xff] }
 0x67d   : > { %v3711_v3 = vadd.f32 %v3710_v29, %v3598_v47  ;;  %3890 = vmatmul.f32.gmra.mxu3 %v11026_v31  ;;  %4113 = vmatmul.f32.gmra.mxu1 %v11029_v19  ;;  %14311 = vst [vmem:[#allocation24_spill] sm:$0xff] %v11045_v54  ;;  %v11049_v58 = vld [vmem:[#allocation3 + $0xa7] sm:$0xff] }
 0x67e   : > { %4223 = vmatmul.f32.gmra.mxu2 %v10931_v44  ;;  %v11042_v44 = vld [vmem:[#allocation3 + $0xd1] sm:$0xff]  ;;  %14312 = vst [vmem:[#allocation13_spill] sm:$0xff] %v11049_v58 }
 0x680   : > { %v3487_v0 = vpop.f32.mrf.mxu3 }
 0x681   : > { %v3488_v36 = vadd.f32 %v3487_v0, %v14309_v57  ;;  %v3820_v12 = vpop.f32.mrf.mxu2  ;;  %v3606_v23 = vpop.f32.mrf.mxu0  ;;  %v14313_v0 = vld [vmem:[#allocation70_spill] sm:$0xff] }
 0x682   : > { %v11040_v27 = vadd.f32 %v3820_v12, %v3708_v5  ;;  %v3713_v29 = vpop.f32.mrf.mxu1 }
 0x683   : > { %v3601_v47 = vadd.f32 %v3600_v38, %v3488_v36  ;;  %v2799_v38 = vld [vmem:[%s14022_s2 + $0x498] sm:$0xff] }
 0x684   : > { %14310 = vst [vmem:[#allocation33_spill] sm:$0xff] %v11040_v27  ;;  %4009 = vmatmul.f32.gmra.mxu0 %v11049_v58  ;;  %v11061_v58 = vld [vmem:[#allocation3 + $0x90] sm:$0xff] }
 0x685   : > { %v3714_v19 = vadd.f32 %v3713_v29, %v3601_v47  ;;  %3893 = vmatmul.f32.gmra.mxu3 %v11042_v44  ;;  %4116 = vmatmul.f32.gmra.mxu1 %v11045_v54 }
 0x686   : > { %4226 = vmatmul.f32.gmra.mxu2 %v10943_v59  ;;  %4421 = vmatpush.msra.mxu0 %v2799_v38  ;;  %v11058_v59 = vld [vmem:[#allocation3 + $0xe9] sm:$0xff] }
 0x687   : > { %v11065_v38 = vld [vmem:[#allocation3 + $0xaf] sm:$0xff] }
 0x688   : > { %v3490_v5 = vpop.f32.mrf.mxu3  ;;  %14315 = vst [vmem:[#allocation35_spill] sm:$0xff] %v11065_v38 }
 0x689   : > { %v3491_v57 = vadd.f32 %v3490_v5, %v14313_v0  ;;  %v3823_v36 = vpop.f32.mrf.mxu2  ;;  %v3609_v27 = vpop.f32.mrf.mxu0 }
 0x68a   : > { %v11056_v12 = vadd.f32 %v3823_v36, %v3711_v3  ;;  %v3716_v29 = vpop.f32.mrf.mxu1  ;;  %v2765_v3 = vld [vmem:[%s14022_s2 + $0x388] sm:$0xff] }
 0x68b   : > { %v3604_v47 = vadd.f32 %v3603_v39, %v3491_v57  ;;  %4309 = vmatpush.msra.mxu3 %v2765_v3  ;;  %v11081_v3 = vld [vmem:[#allocation3 + $0xc7] sm:$0xff] }
 0x68c   : > { %14314 = vst [vmem:[#allocation17_spill] sm:$0xff] %v11056_v12  ;;  %4012 = vmatmul.f32.gmra.mxu0 %v11065_v38  ;;  %v11077_v38 = vld [vmem:[#allocation3 + $0xa8] sm:$0xff] }
 0x68d   : > { %v3717_v54 = vadd.f32 %v3716_v29, %v3604_v47  ;;  %3896 = vmatmul.f32.gmra.mxu3 %v11058_v59  ;;  %4119 = vmatmul.f32.gmra.mxu1 %v11061_v58  ;;  %14318 = vst [vmem:[#allocation30_spill] sm:$0xff] %v11081_v3 }
 0x68e   : > { %4229 = vmatmul.f32.gmra.mxu2 %v10958_v40  ;;  %v11074_v40 = vld [vmem:[#allocation3 + $0xf1] sm:$0xff] }
 0x68f   : > { %14317 = vst [vmem:[#allocation25_spill] sm:$0xff] %v11074_v40 }
 0x690   : > { %v3493_v39 = vpop.f32.mrf.mxu3 }
 0x691   : > { %v3494_v5 = vadd.f32 %v3493_v39, %v10592_v35  ;;  %v3826_v0 = vpop.f32.mrf.mxu2  ;;  %v3612_v47 = vpop.f32.mrf.mxu0  ;;  %v2797_v35 = vld [vmem:[%s14022_s2 + $0x488] sm:$0xff] }
 0x692   : > { %v11072_v57 = vadd.f32 %v3826_v0, %v3714_v19  ;;  %v3719_v36 = vpop.f32.mrf.mxu1  ;;  %4422 = vmatpush.msra.mxu0 %v2797_v35  ;;  %v11097_v35 = vld [vmem:[#allocation3 + $0xcf] sm:$0xff] }
 0x693   : > { %v3607_v29 = vadd.f32 %v3606_v23, %v3494_v5  ;;  %14320 = vst [vmem:[#allocation21_spill] sm:$0xff] %v11097_v35 }
 0x694   : > { %14316 = vst [vmem:[#allocation40_spill] sm:$0xff] %v11072_v57  ;;  %4015 = vmatmul.f32.gmra.mxu0 %v11081_v3  ;;  %v11093_v3 = vld [vmem:[#allocation3 + $0xb0] sm:$0xff] }
 0x695   : > { %v3720_v12 = vadd.f32 %v3719_v36, %v3607_v29  ;;  %3899 = vmatmul.f32.gmra.mxu3 %v11074_v40  ;;  %4122 = vmatmul.f32.gmra.mxu1 %v11077_v38 }
 0x696   : > { %4232 = vmatmul.f32.gmra.mxu2 %v10976_v6  ;;  %v11090_v6 = vld [vmem:[#allocation3 + $0x109] sm:$0xff] }
 0x698   : > { %v3496_v19 = vpop.f32.mrf.mxu3 }
 0x699   : > { %v3497_v23 = vadd.f32 %v3496_v19, %v10599_v50  ;;  %v3829_v39 = vpop.f32.mrf.mxu2  ;;  %v3615_v29 = vpop.f32.mrf.mxu0  ;;  %v2763_v50 = vld [vmem:[%s14022_s2 + $0x378] sm:$0xff] }
 0x69a   : > { %v11088_v5 = vadd.f32 %v3829_v39, %v3717_v54  ;;  %v3722_v0 = vpop.f32.mrf.mxu1  ;;  %4310 = vmatpush.msra.mxu3 %v2763_v50  ;;  %v11113_v50 = vld [vmem:[#allocation3 + $0xe7] sm:$0xff] }
 0x69b   : > { %v3610_v36 = vadd.f32 %v3609_v27, %v3497_v23  ;;  %14323 = vst [vmem:[#allocation45_spill] sm:$0xff] %v11113_v50 }
 0x69c   : > { %14319 = vst [vmem:[#allocation16_spill] sm:$0xff] %v11088_v5  ;;  %4018 = vmatmul.f32.gmra.mxu0 %v11097_v35  ;;  %v11109_v35 = vld [vmem:[#allocation3 + $0xc8] sm:$0xff] }
 0x69d   : > { %v3723_v57 = vadd.f32 %v3722_v0, %v3610_v36  ;;  %3902 = vmatmul.f32.gmra.mxu3 %v11090_v6  ;;  %4125 = vmatmul.f32.gmra.mxu1 %v11093_v3 }
 0x69e   : > { %4235 = vmatmul.f32.gmra.mxu2 %v10994_v2  ;;  %v11106_v2 = vld [vmem:[#allocation3 + $0x111] sm:$0xff] }
 0x69f   : > { %14322 = vst [vmem:[#allocation39_spill] sm:$0xff] %v11106_v2 }
 0x6a0   : > { %v3499_v54 = vpop.f32.mrf.mxu3 }
 0x6a1   : > { %v3500_v27 = vadd.f32 %v3499_v54, %v10607_v52  ;;  %v3832_v19 = vpop.f32.mrf.mxu2  ;;  %v3618_v36 = vpop.f32.mrf.mxu0  ;;  %v2795_v52 = vld [vmem:[%s14022_s2 + $0x478] sm:$0xff] }
 0x6a2   : > { %v11104_v23 = vadd.f32 %v3832_v19, %v3720_v12  ;;  %v3725_v39 = vpop.f32.mrf.mxu1  ;;  %4423 = vmatpush.msra.mxu0 %v2795_v52  ;;  %v11129_v52 = vld [vmem:[#allocation3 + $0xef] sm:$0xff] }
 0x6a3   : > { %v3613_v0 = vadd.f32 %v3612_v47, %v3500_v27  ;;  %14326 = vst [vmem:[#allocation27_spill] sm:$0xff] %v11129_v52 }
 0x6a4   : > { %14321 = vst [vmem:[#allocation31_spill] sm:$0xff] %v11104_v23  ;;  %4021 = vmatmul.f32.gmra.mxu0 %v11113_v50  ;;  %v11125_v50 = vld [vmem:[#allocation3 + $0xd0] sm:$0xff] }
 0x6a5   : > { %v3726_v5 = vadd.f32 %v3725_v39, %v3613_v0  ;;  %3905 = vmatmul.f32.gmra.mxu3 %v11106_v2  ;;  %4128 = vmatmul.f32.gmra.mxu1 %v11109_v35 }
 0x6a6   : > { %4238 = vmatmul.f32.gmra.mxu2 %v11010_v4  ;;  %v11122_v4 = vld [vmem:[#allocation3 + $0x129] sm:$0xff] }
 0x6a7   : > { %14325 = vst [vmem:[#allocation20_spill] sm:$0xff] %v11122_v4 }
 0x6a8   : > { %v3502_v12 = vpop.f32.mrf.mxu3 }
 0x6a9   : > { %v3503_v47 = vadd.f32 %v3502_v12, %v10618_v1  ;;  %v3835_v54 = vpop.f32.mrf.mxu2  ;;  %v3621_v0 = vpop.f32.mrf.mxu0  ;;  %v2761_v1 = vld [vmem:[%s14022_s2 + $0x368] sm:$0xff] }
 0x6aa   : > { %v11120_v27 = vadd.f32 %v3835_v54, %v3723_v57  ;;  %v3728_v19 = vpop.f32.mrf.mxu1  ;;  %4311 = vmatpush.msra.mxu3 %v2761_v1  ;;  %v11147_v1 = vld [vmem:[#allocation3 + $0x107] sm:$0xff] }
 0x6ab   : > { %v3616_v39 = vadd.f32 %v3615_v29, %v3503_v47  ;;  %14330 = vst [vmem:[#allocation41_spill] sm:$0xff] %v11147_v1 }
 0x6ac   : > { %14324 = vst [vmem:[#allocation36_spill] sm:$0xff] %v11120_v27  ;;  %4024 = vmatmul.f32.gmra.mxu0 %v11129_v52  ;;  %v11143_v52 = vld [vmem:[#allocation3 + $0xe8] sm:$0xff] }
 0x6ad   : > { %v3729_v23 = vadd.f32 %v3728_v19, %v3616_v39  ;;  %3908 = vmatmul.f32.gmra.mxu3 %v11122_v4  ;;  %4131 = vmatmul.f32.gmra.mxu1 %v11125_v50 }
 0x6ae   : > { %4241 = vmatmul.f32.gmra.mxu2 %v11026_v31  ;;  %v11140_v31 = vld [vmem:[#allocation3 + $0x131] sm:$0xff] }
 0x6af   : > { %14329 = vst [vmem:[#allocation37_spill] sm:$0xff] %v11140_v31 }
 0x6b0   : > { %v3505_v57 = vpop.f32.mrf.mxu3 }
 0x6b1   : > { %v3506_v29 = vadd.f32 %v3505_v57, %v10630_v16  ;;  %v3838_v12 = vpop.f32.mrf.mxu2  ;;  %v11138_v39 = vpop.f32.mrf.mxu0  ;;  %v2793_v16 = vld [vmem:[%s14022_s2 + $0x468] sm:$0xff] }
 0x6b2   : > { %v11136_v47 = vadd.f32 %v3838_v12, %v3726_v5  ;;  %v3731_v54 = vpop.f32.mrf.mxu1  ;;  %14328 = vst [vmem:[#allocation52_spill] sm:$0xff] %v11138_v39  ;;  %4424 = vmatpush.msra.mxu0 %v2793_v16  ;;  %v11165_v16 = vld [vmem:[#allocation3 + $0x10f] sm:$0xff] }
 0x6b3   : > { %v3619_v19 = vadd.f32 %v3618_v36, %v3506_v29  ;;  %14333 = vst [vmem:[#allocation43_spill] sm:$0xff] %v11165_v16 }
 0x6b4   : > { %14327 = vst [vmem:[#allocation46_spill] sm:$0xff] %v11136_v47  ;;  %4027 = vmatmul.f32.gmra.mxu0 %v11147_v1  ;;  %v11158_v47 = vld [vmem:[#allocation3 + $0x149] sm:$0xff] }
 0x6b5   : > { %v3732_v27 = vadd.f32 %v3731_v54, %v3619_v19  ;;  %3911 = vmatmul.f32.gmra.mxu3 %v11140_v31  ;;  %4134 = vmatmul.f32.gmra.mxu1 %v11143_v52  ;;  %14332 = vst [vmem:[#allocation34_spill] sm:$0xff] %v11158_v47  ;;  %v11161_v1 = vld [vmem:[#allocation3 + $0xf0] sm:$0xff] }
 0x6b6   : > { %4244 = vmatmul.f32.gmra.mxu2 %v11042_v44 }
 0x6b8   : > { %v3508_v5 = vpop.f32.mrf.mxu3 }
 0x6b9   : > { %v3509_v36 = vadd.f32 %v3508_v5, %v10642_v56  ;;  %v3841_v57 = vpop.f32.mrf.mxu2  ;;  %v11156_v19 = vpop.f32.mrf.mxu0  ;;  %v2759_v56 = vld [vmem:[%s14022_s2 + $0x358] sm:$0xff] }
 0x6ba   : > { %v11154_v29 = vadd.f32 %v3841_v57, %v3729_v23  ;;  %v3734_v12 = vpop.f32.mrf.mxu1  ;;  %14331 = vst [vmem:[#allocation26_spill] sm:$0xff] %v11156_v19  ;;  %4312 = vmatpush.msra.mxu3 %v2759_v56  ;;  %v11181_v19 = vld [vmem:[#allocation3 + $0x151] sm:$0xff] }
 0x6bb   : > { %v3622_v54 = vadd.f32 %v3621_v0, %v3509_v36  ;;  %14338 = vst [vmem:[#allocation42_spill] sm:$0xff] %v11181_v19 }
 0x6bc   : > { %4030 = vmatmul.f32.gmra.mxu0 %v11165_v16  ;;  %v11184_v16 = vld [vmem:[#allocation3 + $0x108] sm:$0xff] }
 0x6bd   : > { %v3735_v39 = vadd.f32 %v3734_v12, %v3622_v54  ;;  %3914 = vmatmul.f32.gmra.mxu3 %v11158_v47  ;;  %4137 = vmatmul.f32.gmra.mxu1 %v11161_v1 }
 0x6be   : > { %4247 = vmatmul.f32.gmra.mxu2 %v11058_v59 }
 0x6c0   : > { %v3867_v23 = vpop.f32.mrf.mxu3 }
 0x6c1   : > { %v3844_v0 = vpop.f32.mrf.mxu2  ;;  %v11172_v5 = vadd.f32 %v3867_v23, %v10654_v43  ;;  %v11179_v54 = vpop.f32.mrf.mxu0  ;;  %v2791_v43 = vld [vmem:[%s14022_s2 + $0x458] sm:$0xff] }
 0x6c2   : > { %v11174_v36 = vadd.f32 %v3844_v0, %v3732_v27  ;;  %v11176_v57 = vpop.f32.mrf.mxu1  ;;  %14337 = vst [vmem:[#allocation32_spill] sm:$0xff] %v11179_v54  ;;  %v11194_v27 = vld [vmem:[#allocation3 + $0x127] sm:$0xff]  ;;  %4425 = vmatpush.msra.mxu0 %v2791_v43 }
 0x6c3   : > { %14334 = vst [vmem:[#allocation51_spill] sm:$0xff] %v11172_v5  ;;  %v14078_v12 = vmax.f32 %v11172_v5, 0.0 }
 0x6c4   : > { %14335 = vst [vmem:[#allocation56_spill] sm:$0xff] %v11174_v36  ;;  %4033 = vmatmul.f32.gmra.mxu0 %v11194_v27  ;;  %v11207_v36 = vld [vmem:[#allocation3 + $0x169] sm:$0xff] }
 0x6c5   : > { %14336 = vst [vmem:[#allocation47_spill] sm:$0xff] %v11176_v57  ;;  %3917 = vmatmul.f32.gmra.mxu3 %v11181_v19  ;;  %4140 = vmatmul.f32.gmra.mxu1 %v11184_v16 }
 0x6c6   : > { %4250 = vmatmul.f32.gmra.mxu2 %v11074_v40  ;;  %5314 = vrot.lane.b32.xlu2 %v14078_v12, %s7699_s15  ;;  %14342 = vst [vmem:[#allocation38_spill] sm:$0xff] %v11207_v36  ;;  %v11210_v40 = vld [vmem:[#allocation3 + $0x110] sm:$0xff] }
 0x6c8   : > { %v3870_v56 = vpop.f32.mrf.mxu3 }
 0x6c9   : > { %v3847_v23 = vpop.f32.mrf.mxu2  ;;  %v11198_v0 = vadd.f32 %v3870_v56, %v10666_v8  ;;  %v11205_v5 = vpop.f32.mrf.mxu0  ;;  %v2757_v8 = vld [vmem:[%s14022_s2 + $0x348] sm:$0xff] }
 0x6ca   : > { %v11200_v54 = vadd.f32 %v3847_v23, %v3735_v39  ;;  %v11202_v57 = vpop.f32.mrf.mxu1  ;;  %14341 = vst [vmem:[#allocation53_spill] sm:$0xff] %v11205_v5  ;;  %v11220_v39 = vld [vmem:[#allocation3 + $0x12f] sm:$0xff]  ;;  %4313 = vmatpush.msra.mxu3 %v2757_v8  ;;  %v11242_v8 = vld [vmem:[#allocation3 + $0x147] sm:$0xff] }
 0x6cb   : > { %14339 = vst [vmem:[#allocation57_spill] sm:$0xff] %v11198_v0  ;;  %v14081_v12 = vmax.f32 %v11198_v0, 0.0  ;;  %v11235_v0 = vld [vmem:[#allocation3 + $0x128] sm:$0xff] }
 0x6cc   : > { %14340 = vst [vmem:[#allocation49_spill] sm:$0xff] %v11202_v57  ;;  %4036 = vmatmul.f32.gmra.mxu0 %v11220_v39 }
 0x6cd   : > { %3920 = vmatmul.f32.gmra.mxu3 %v11207_v36  ;;  %4143 = vmatmul.f32.gmra.mxu1 %v11210_v40  ;;  %14343 = vst [vmem:[#allocation48_spill] sm:$0xff] %v11220_v39 }
 0x6ce   : > { %4253 = vmatmul.f32.gmra.mxu2 %v11090_v6  ;;  %5318 = vrot.lane.b32.xlu1 %v14081_v12, %s7699_s15  ;;  %v11232_v12 = vld [vmem:[#allocation3 + $0x171] sm:$0xff]  ;;  %14349 = vst [vmem:[#allocation61_spill] sm:$0xff] %v11242_v8 }
 0x6cf   : > { %14348 = vst [vmem:[#allocation59_spill] sm:$0xff] %v11232_v12 }
 0x6d0   : > { %v3873_v43 = vpop.f32.mrf.mxu3 }
 0x6d1   : > { %v11224_v56 = vadd.f32 %v3873_v43, %v10678_v34  ;;  %v11226_v23 = vpop.f32.mrf.mxu2  ;;  %v11230_v57 = vpop.f32.mrf.mxu0  ;;  %v2789_v34 = vld [vmem:[%s14022_s2 + $0x448] sm:$0xff] }
 0x6d2   : > { %14345 = vst [vmem:[#allocation58_spill] sm:$0xff] %v11226_v23  ;;  %v11228_v5 = vpop.f32.mrf.mxu1  ;;  %4426 = vmatpush.msra.mxu0 %v2789_v34  ;;  %v11254_v23 = vld [vmem:[#allocation3 + $0x189] sm:$0xff] }
 0x6d3   : > { %14344 = vst [vmem:[#allocation54_spill] sm:$0xff] %v11224_v56  ;;  %v11264_v34 = vld [vmem:[#allocation3 + $0x14f] sm:$0xff] }
 0x6d4   : > { %14346 = vst [vmem:[#allocation44_spill] sm:$0xff] %v11228_v5  ;;  %4039 = vmatmul.f32.gmra.mxu0 %v11242_v8 }
 0x6d5   : > { %14347 = vst [vmem:[#allocation55_spill] sm:$0xff] %v11230_v57  ;;  %3923 = vmatmul.f32.gmra.mxu3 %v11232_v12  ;;  %4146 = vmatmul.f32.gmra.mxu1 %v11235_v0 }
 0x6d6   : > { %4256 = vmatmul.f32.gmra.mxu2 %v11106_v2  ;;  %14354 = vst [vmem:[#allocation64_spill] sm:$0xff] %v11254_v23  ;;  %v11257_v2 = vld [vmem:[#allocation3 + $0x130] sm:$0xff] }
 0x6d7   : > { %14355 = vst [vmem:[#allocation65_spill] sm:$0xff] %v11264_v34 }
 0x6d8   : > { %v3876_v43 = vpop.f32.mrf.mxu3 }
 0x6d9   : > { %v11246_v56 = vadd.f32 %v3876_v43, %v10690_v15  ;;  %v11248_v57 = vpop.f32.mrf.mxu2  ;;  %v11252_v39 = vpop.f32.mrf.mxu0  ;;  %v2755_v15 = vld [vmem:[%s14022_s2 + $0x338] sm:$0xff] }
 0x6da   : > { %14351 = vst [vmem:[#allocation60_spill] sm:$0xff] %v11248_v57  ;;  %v11250_v5 = vpop.f32.mrf.mxu1  ;;  %4314 = vmatpush.msra.mxu3 %v2755_v15  ;;  %v11276_v57 = vld [vmem:[#allocation3 + $0x191] sm:$0xff]  ;;  %v11286_v15 = vld [vmem:[#allocation3 + $0x167] sm:$0xff] }
 0x6db   : > { %14350 = vst [vmem:[#allocation50_spill] sm:$0xff] %v11246_v56 }
 0x6dc   : > { %14352 = vst [vmem:[#allocation62_spill] sm:$0xff] %v11250_v5  ;;  %4042 = vmatmul.f32.gmra.mxu0 %v11264_v34 }
 0x6dd   : > { %14353 = vst [vmem:[#allocation63_spill] sm:$0xff] %v11252_v39  ;;  %3926 = vmatmul.f32.gmra.mxu3 %v11254_v23  ;;  %4149 = vmatmul.f32.gmra.mxu1 %v11257_v2 }
 0x6de   : > { %4259 = vmatmul.f32.gmra.mxu2 %v11122_v4  ;;  %14360 = vst [vmem:[#allocation70_spill] sm:$0xff] %v11276_v57  ;;  %v11279_v4 = vld [vmem:[#allocation3 + $0x148] sm:$0xff] }
 0x6df   : > { %14361 = vst [vmem:[#allocation71_spill] sm:$0xff] %v11286_v15 }
 0x6e0   : > { %v3879_v43 = vpop.f32.mrf.mxu3 }
 0x6e1   : > { %v11268_v56 = vadd.f32 %v3879_v43, %v10702_v25  ;;  %v11270_v39 = vpop.f32.mrf.mxu2  ;;  %v11274_v8 = vpop.f32.mrf.mxu0  ;;  %v2787_v25 = vld [vmem:[%s14022_s2 + $0x438] sm:$0xff] }
 0x6e2   : > { %14357 = vst [vmem:[#allocation67_spill] sm:$0xff] %v11270_v39  ;;  %v11272_v5 = vpop.f32.mrf.mxu1  ;;  %4427 = vmatpush.msra.mxu0 %v2787_v25  ;;  %v11298_v39 = vld [vmem:[#allocation3 + $0x1a9] sm:$0xff] }
 0x6e3   : > { %14356 = vst [vmem:[#allocation66_spill] sm:$0xff] %v11268_v56  ;;  %v11308_v25 = vld [vmem:[#allocation3 + $0x16f] sm:$0xff] }
 0x6e4   : > { %14358 = vst [vmem:[#allocation68_spill] sm:$0xff] %v11272_v5  ;;  %4045 = vmatmul.f32.gmra.mxu0 %v11286_v15 }
 0x6e5   : > { %14359 = vst [vmem:[#allocation69_spill] sm:$0xff] %v11274_v8  ;;  %3929 = vmatmul.f32.gmra.mxu3 %v11276_v57  ;;  %4152 = vmatmul.f32.gmra.mxu1 %v11279_v4 }
 0x6e6   : > { %4262 = vmatmul.f32.gmra.mxu2 %v11140_v31  ;;  %v11301_v31 = vld [vmem:[#allocation3 + $0x150] sm:$0xff]  ;;  %14366 = vst [vmem:[#allocation76_spill] sm:$0xff] %v11308_v25 }
 0x6e8   : > { %v3882_v43 = vpop.f32.mrf.mxu3 }
 0x6e9   : > { %v11290_v56 = vadd.f32 %v3882_v43, %v10713_v48  ;;  %v11292_v8 = vpop.f32.mrf.mxu2  ;;  %v11296_v34 = vpop.f32.mrf.mxu0  ;;  %v2753_v48 = vld [vmem:[%s14022_s2 + $0x328] sm:$0xff] }
 0x6ea   : > { %14363 = vst [vmem:[#allocation73_spill] sm:$0xff] %v11292_v8  ;;  %v11294_v5 = vpop.f32.mrf.mxu1  ;;  %4315 = vmatpush.msra.mxu3 %v2753_v48  ;;  %v11320_v8 = vld [vmem:[#allocation3 + $0x1b1] sm:$0xff]  ;;  %v11330_v48 = vld [vmem:[#allocation3 + $0x187] sm:$0xff] }
 0x6eb   : > { %14362 = vst [vmem:[#allocation72_spill] sm:$0xff] %v11290_v56 }
 0x6ec   : > { %14364 = vst [vmem:[#allocation74_spill] sm:$0xff] %v11294_v5  ;;  %4048 = vmatmul.f32.gmra.mxu0 %v11308_v25 }
 0x6ed   : > { %14365 = vst [vmem:[#allocation75_spill] sm:$0xff] %v11296_v34  ;;  %3932 = vmatmul.f32.gmra.mxu3 %v11298_v39  ;;  %4155 = vmatmul.f32.gmra.mxu1 %v11301_v31 }
 0x6ee   : > { %4265 = vmatmul.f32.gmra.mxu2 %v11158_v47  ;;  %v11323_v47 = vld [vmem:[#allocation3 + $0x168] sm:$0xff]  ;;  %14371 = vst [vmem:[#allocation81_spill] sm:$0xff] %v11330_v48 }
 0x6f0   : > { %v3885_v43 = vpop.f32.mrf.mxu3 }
 0x6f1   : > { %v11312_v56 = vadd.f32 %v3885_v43, %v10726_v41  ;;  %v11314_v34 = vpop.f32.mrf.mxu2  ;;  %v11318_v15 = vpop.f32.mrf.mxu0  ;;  %v2785_v41 = vld [vmem:[%s14022_s2 + $0x428] sm:$0xff] }
 0x6f2   : > { %14368 = vst [vmem:[#allocation78_spill] sm:$0xff] %v11314_v34  ;;  %v11316_v5 = vpop.f32.mrf.mxu1  ;;  %4428 = vmatpush.msra.mxu0 %v2785_v41  ;;  %v11342_v34 = vld [vmem:[#allocation3 + $0x1c9] sm:$0xff] }
 0x6f3   : > { %14367 = vst [vmem:[#allocation77_spill] sm:$0xff] %v11312_v56  ;;  %v11352_v41 = vld [vmem:[#allocation3 + $0x18f] sm:$0xff] }
 0x6f4   : > { %14369 = vst [vmem:[#allocation79_spill] sm:$0xff] %v11316_v5  ;;  %4051 = vmatmul.f32.gmra.mxu0 %v11330_v48 }
 0x6f5   : > { %14370 = vst [vmem:[#allocation80_spill] sm:$0xff] %v11318_v15  ;;  %3935 = vmatmul.f32.gmra.mxu3 %v11320_v8  ;;  %4158 = vmatmul.f32.gmra.mxu1 %v11323_v47 }
 0x6f6   : > { %4268 = vmatmul.f32.gmra.mxu2 %v11181_v19  ;;  %v11345_v19 = vld [vmem:[#allocation3 + $0x170] sm:$0xff]  ;;  %14376 = vst [vmem:[#allocation86_spill] sm:$0xff] %v11352_v41 }
 0x6f8   : > { %v3888_v43 = vpop.f32.mrf.mxu3 }
 0x6f9   : > { %v11334_v56 = vadd.f32 %v3888_v43, %v10743_v13  ;;  %v11336_v15 = vpop.f32.mrf.mxu2  ;;  %v11340_v25 = vpop.f32.mrf.mxu0  ;;  %v2751_v13 = vld [vmem:[%s14022_s2 + $0x318] sm:$0xff] }
 0x6fa   : > { %14373 = vst [vmem:[#allocation83_spill] sm:$0xff] %v11336_v15  ;;  %v11338_v5 = vpop.f32.mrf.mxu1  ;;  %4316 = vmatpush.msra.mxu3 %v2751_v13  ;;  %v11364_v15 = vld [vmem:[#allocation3 + $0x1d1] sm:$0xff] }
 0x6fb   : > { %14372 = vst [vmem:[#allocation82_spill] sm:$0xff] %v11334_v56  ;;  %v2843_v13 = vld [vmem:[%s14022_s2 + $0x5f8] sm:$0xff] }
 0x6fc   : > { %14374 = vst [vmem:[#allocation84_spill] sm:$0xff] %v11338_v5  ;;  %4054 = vmatmul.f32.gmra.mxu0 %v11352_v41  ;;  %4528 = vmatpush.msra.mxu1 %v2843_v13  ;;  %v2841_v41 = vld [vmem:[%s14022_s2 + $0x5e8] sm:$0xff]  ;;  %v2839_v13 = vld [vmem:[%s14022_s2 + $0x5d8] sm:$0xff] }
 0x6fd   : > { %14375 = vst [vmem:[#allocation85_spill] sm:$0xff] %v11340_v25  ;;  %3938 = vmatmul.f32.gmra.mxu3 %v11342_v34  ;;  %4161 = vmatmul.f32.gmra.mxu1 %v11345_v19 }
 0x6fe   : > { %4271 = vmatmul.f32.gmra.mxu2 %v11207_v36  ;;  %v11367_v36 = vld [vmem:[#allocation3 + $0x188] sm:$0xff]  ;;  %4529 = vmatpush.msra.mxu1 %v2841_v41 }
 0x6ff   : > { %v2749_v41 = vld [vmem:[%s14022_s2 + $0x308] sm:$0xff] }
 0x700   : > { %v3891_v43 = vpop.f32.mrf.mxu3  ;;  %4530 = vmatpush.msra.mxu1 %v2839_v13  ;;  %v2875_v13 = vld [vmem:[%s14022_s2 + $0x6f8] sm:$0xff]  ;;  %4317 = vmatpush.msra.mxu3 %v2749_v41 }
 0x701   : > { %v11356_v56 = vadd.f32 %v3891_v43, %v10774_v60  ;;  %v11358_v25 = vpop.f32.mrf.mxu2  ;;  %v11362_v48 = vpop.f32.mrf.mxu0  ;;  %v2783_v60 = vld [vmem:[%s14022_s2 + $0x418] sm:$0xff]  ;;  %v11377_v43 = vld [vmem:[#allocation3 + $0x1a7] sm:$0xff]  ;;  %4641 = vmatpush.msrb.mxu2 %v2875_v13 }
 0x702   : > { %14378 = vst [vmem:[#allocation88_spill] sm:$0xff] %v11358_v25  ;;  %v11360_v5 = vpop.f32.mrf.mxu1  ;;  %4429 = vmatpush.msra.mxu0 %v2783_v60  ;;  %v11401_v60 = vld [vmem:[#allocation3 + $0x190] sm:$0xff]  ;;  %v11447_v13 = vld [vmem:[#allocation3 + $0x1a8] sm:$0xff] }
 0x703   : > { %14377 = vst [vmem:[#allocation87_spill] sm:$0xff] %v11356_v56 }
 0x704   : > { %14379 = vst [vmem:[#allocation89_spill] sm:$0xff] %v11360_v5  ;;  %4057 = vmatmul.f32.gmra.mxu0 %v11377_v43 }
 0x705   : > { %14380 = vst [vmem:[#allocation90_spill] sm:$0xff] %v11362_v48  ;;  %3941 = vmatmul.f32.gmra.mxu3 %v11364_v15  ;;  %4164 = vmatmul.f32.gmra.mxu1 %v11367_v36 }
 0x706   : > { %4274 = vmatmul.f32.gmra.mxu2 %v11232_v12  ;;  %14381 = vst [vmem:[#allocation91_spill] sm:$0xff] %v11377_v43 }
 0x707   : > { %14386 = vst [vmem:[#allocation96_spill] sm:$0xff] %v11401_v60 }
 0x708   : > { %v3894_v56 = vpop.f32.mrf.mxu3  ;;  %14392 = vst [vmem:[#allocation102_spill] sm:$0xff] %v11447_v13 }
 0x709   : > { %v11381_v48 = vadd.f32 %v3894_v56, %v10806_v21  ;;  %v11383_v5 = vpop.f32.mrf.mxu2  ;;  %v11390_v12 = vpop.f32.mrf.mxu0  ;;  %v2837_v21 = vld [vmem:[%s14022_s2 + $0x5c8] sm:$0xff] }
 0x70a   : > { %14383 = vst [vmem:[#allocation93_spill] sm:$0xff] %v11383_v5  ;;  %v11388_v25 = vpop.f32.mrf.mxu1  ;;  %v11398_v56 = vld [vmem:[#allocation3 + $0x1e9] sm:$0xff]  ;;  %4531 = vmatpush.msra.mxu1 %v2837_v21 }
 0x70b   : > { %14382 = vst [vmem:[#allocation92_spill] sm:$0xff] %v11381_v48  ;;  %v2835_v48 = vld [vmem:[%s14022_s2 + $0x5b8] sm:$0xff]  ;;  %v2833_v5 = vld [vmem:[%s14022_s2 + $0x5a8] sm:$0xff] }
 0x70c   : > { %14384 = vst [vmem:[#allocation94_spill] sm:$0xff] %v11388_v25  ;;  %4532 = vmatpush.msra.mxu1 %v2835_v48  ;;  %v2829_v48 = vld [vmem:[%s14022_s2 + $0x588] sm:$0xff] }
 0x70d   : > { %14385 = vst [vmem:[#allocation95_spill] sm:$0xff] %v11390_v12  ;;  %3944 = vmatmul.f32.gmra.mxu3 %v11398_v56  ;;  %4167 = vmatmul.f32.gmra.mxu1 %v11401_v60  ;;  %v11414_v12 = vld [vmem:[#allocation3 + $0x1af] sm:$0xff] }
 0x70e   : > { %4277 = vmatmul.f32.gmra.mxu2 %v11254_v23  ;;  %14387 = vst [vmem:[#allocation97_spill] sm:$0xff] %v11414_v12  ;;  %4060 = vmatmul.f32.gmra.mxu0 %v11414_v12  ;;  %v2873_v23 = vld [vmem:[%s14022_s2 + $0x6e8] sm:$0xff] }
 0x70f   : > { %4533 = vmatpush.msra.mxu1 %v2833_v5  ;;  %4642 = vmatpush.msrb.mxu2 %v2873_v23  ;;  %v2869_v5 = vld [vmem:[%s14022_s2 + $0x6c8] sm:$0xff]  ;;  %v11444_v23 = vld [vmem:[#allocation3 + $0x1f1] sm:$0xff] }
 0x710   : > { %v3897_v25 = vpop.f32.mrf.mxu3 }
 0x711   : > { %v11418_v21 = vadd.f32 %v3897_v25, %v10837_v55  ;;  %v11420_v43 = vpop.f32.mrf.mxu2  ;;  %v11430_v41 = vpop.f32.mrf.mxu0  ;;  %v2831_v55 = vld [vmem:[%s14022_s2 + $0x598] sm:$0xff] }
 0x712   : > { %14389 = vst [vmem:[#allocation99_spill] sm:$0xff] %v11420_v43  ;;  %v11428_v60 = vpop.f32.mrf.mxu1  ;;  %v2871_v25 = vld [vmem:[%s14022_s2 + $0x6d8] sm:$0xff]  ;;  %4534 = vmatpush.msra.mxu1 %v2831_v55  ;;  %v2825_v43 = vld [vmem:[%s14022_s2 + $0x568] sm:$0xff] }
 0x713   : > { %14388 = vst [vmem:[#allocation98_spill] sm:$0xff] %v11418_v21  ;;  %4643 = vmatpush.msrb.mxu2 %v2871_v25  ;;  %v2781_v21 = vld [vmem:[%s14022_s2 + $0x408] sm:$0xff]  ;;  %v2827_v55 = vld [vmem:[%s14022_s2 + $0x578] sm:$0xff] }
 0x714   : > { %14390 = vst [vmem:[#allocation100_spill] sm:$0xff] %v11428_v60  ;;  %4535 = vmatpush.msra.mxu1 %v2829_v48  ;;  %v2867_v25 = vld [vmem:[%s14022_s2 + $0x6b8] sm:$0xff]  ;;  %4430 = vmatpush.msra.mxu0 %v2781_v21 }
 0x715   : > { %14391 = vst [vmem:[#allocation101_spill] sm:$0xff] %v11430_v41  ;;  %3947 = vmatmul.f32.gmra.mxu3 %v11444_v23  ;;  %4170 = vmatmul.f32.gmra.mxu1 %v11447_v13  ;;  %v11460_v41 = vld [vmem:[#allocation3 + $0x1c7] sm:$0xff]  ;;  %v2863_v21 = vld [vmem:[%s14022_s2 + $0x698] sm:$0xff] }
 0x716   : > { %4280 = vmatmul.f32.gmra.mxu2 %v11276_v57  ;;  %14393 = vst [vmem:[#allocation103_spill] sm:$0xff] %v11460_v41  ;;  %4063 = vmatmul.f32.gmra.mxu0 %v11460_v41  ;;  %v2865_v57 = vld [vmem:[%s14022_s2 + $0x6a8] sm:$0xff] }
 0x717   : > { %4644 = vmatpush.msrb.mxu2 %v2869_v5  ;;  %4536 = vmatpush.msra.mxu1 %v2827_v55  ;;  %v11488_v55 = vld [vmem:[#allocation3 + $0x1b0] sm:$0xff] }
 0x718   : > { %v3900_v60 = vpop.f32.mrf.mxu3 }
 0x719   : > { %v11464_v12 = vadd.f32 %v3900_v60, %v10868_v26  ;;  %v11466_v48 = vpop.f32.mrf.mxu2  ;;  %4645 = vmatpush.msrb.mxu2 %v2867_v25  ;;  %4537 = vmatpush.msra.mxu1 %v2825_v43  ;;  %v11476_v5 = vpop.f32.mrf.mxu0  ;;  %v2823_v26 = vld [vmem:[%s14022_s2 + $0x558] sm:$0xff]  ;;  %v2821_v60 = vld [vmem:[%s14022_s2 + $0x548] sm:$0xff] }
 0x71a   : > { %v11474_v13 = vpop.f32.mrf.mxu1  ;;  %14396 = vst [vmem:[#allocation106_spill] sm:$0xff] %v11476_v5  ;;  %v2907_v43 = vld [vmem:[%s14022_s2 + $0x7f8] sm:$0xff] }
 0x71b   : > { %14394 = vst [vmem:[#allocation104_spill] sm:$0xff] %v11464_v12  ;;  %4646 = vmatpush.msrb.mxu2 %v2865_v57  ;;  %4538 = vmatpush.msra.mxu1 %v2823_v26  ;;  %v2861_v57 = vld [vmem:[%s14022_s2 + $0x688] sm:$0xff]  ;;  %v2819_v25 = vld [vmem:[%s14022_s2 + $0x538] sm:$0xff] }
 0x71c   : > { %14395 = vst [vmem:[#allocation105_spill] sm:$0xff] %v11474_v13  ;;  %4754 = vmatpush.msrb.mxu3 %v2907_v43  ;;  %v2817_v13 = vld [vmem:[%s14022_s2 + $0x528] sm:$0xff]  ;;  %v2815_v43 = vld [vmem:[%s14022_s2 + $0x518] sm:$0xff] }
 0x71d   : > { %3950 = vmatmul.f32.gmra.mxu3 %v10847_v17  ;;  %4173 = vmatmul.f32.gmra.mxu1 %v11488_v55  ;;  %v11501_v17 = vld [vmem:[#allocation3 + $0x1cf] sm:$0xff] }
 0x71e   : > { %4283 = vmatmul.f32.gmra.mxu2 %v11298_v39  ;;  %4539 = vmatpush.msra.mxu1 %v2821_v60  ;;  %14397 = vst [vmem:[#allocation107_spill] sm:$0xff] %v11501_v17  ;;  %v2859_v60 = vld [vmem:[%s14022_s2 + $0x678] sm:$0xff] }
 0x71f   : > { %4066 = vmatmul.f32.gmra.mxu0 %v11501_v17  ;;  %4647 = vmatpush.msrb.mxu2 %v2863_v21 }
 0x720   : > { %v3903_v26 = vpop.f32.mrf.mxu3  ;;  %4540 = vmatpush.msra.mxu1 %v2819_v25  ;;  %v11529_v25 = vld [vmem:[#allocation3 + $0x1c8] sm:$0xff] }
 0x721   : > { %v11508_v12 = vadd.f32 %v3903_v26, %v10894_v53  ;;  %v11510_v5 = vpop.f32.mrf.mxu2  ;;  %4648 = vmatpush.msrb.mxu2 %v2861_v57  ;;  %v11517_v21 = vpop.f32.mrf.mxu0  ;;  %v2813_v53 = vld [vmem:[%s14022_s2 + $0x508] sm:$0xff]  ;;  %v2939_v26 = vld [vmem:[%s14022_s2 + $0x8f8] sm:$0xff] }
 0x722   : > { %v11515_v41 = vpop.f32.mrf.mxu1  ;;  %4541 = vmatpush.msra.mxu1 %v2817_v13  ;;  %14400 = vst [vmem:[#allocation110_spill] sm:$0xff] %v11517_v21  ;;  %v2857_v57 = vld [vmem:[%s14022_s2 + $0x668] sm:$0xff]  ;;  %v2855_v13 = vld [vmem:[%s14022_s2 + $0x658] sm:$0xff]  ;;  %4867 = vmatpush.msrb.mxu0 %v2939_v26 }
 0x723   : > { %14398 = vst [vmem:[#allocation108_spill] sm:$0xff] %v11508_v12  ;;  %4649 = vmatpush.msrb.mxu2 %v2859_v60  ;;  %v11539_v60 = vld [vmem:[#allocation3 + $0x1e7] sm:$0xff]  ;;  %v11567_v26 = vld [vmem:[#allocation3 + $0x1ef] sm:$0xff] }
 0x724   : > { %14399 = vst [vmem:[#allocation109_spill] sm:$0xff] %v11515_v41  ;;  %4542 = vmatpush.msra.mxu1 %v2815_v43  ;;  %v2853_v43 = vld [vmem:[%s14022_s2 + $0x648] sm:$0xff] }
 0x725   : > { %3953 = vmatmul.f32.gmra.mxu3 %v10880_v32  ;;  %4176 = vmatmul.f32.gmra.mxu1 %v11529_v25  ;;  %14401 = vst [vmem:[#allocation111_spill] sm:$0xff] %v11539_v60  ;;  %v2650_v41 = vld [vmem:[#allocation3 + $0x229] sm:$0xff] }
 0x726   : > { %4286 = vmatmul.f32.gmra.mxu2 %v11320_v8  ;;  %4543 = vmatpush.msra.mxu1 %v2813_v53  ;;  %14406 = vst [vmem:[#allocation116_spill] sm:$0xff] %v11567_v26 }
 0x727   : > { %4069 = vmatmul.f32.gmra.mxu0 %v11539_v60  ;;  %4650 = vmatpush.msrb.mxu2 %v2857_v57  ;;  %v2851_v57 = vld [vmem:[%s14022_s2 + $0x638] sm:$0xff]  ;;  %v11557_v60 = vld [vmem:[#allocation3 + $0x1d0] sm:$0xff] }
 0x728   : > { %v3906_v32 = vpop.f32.mrf.mxu3 }
 0x729   : > { %v11546_v12 = vadd.f32 %v3906_v32, %v10906_v9  ;;  %v11548_v21 = vpop.f32.mrf.mxu2  ;;  %4651 = vmatpush.msrb.mxu2 %v2855_v13  ;;  %v11552_v17 = vpop.f32.mrf.mxu0  ;;  %v2849_v9 = vld [vmem:[%s14022_s2 + $0x628] sm:$0xff]  ;;  %v2847_v32 = vld [vmem:[%s14022_s2 + $0x618] sm:$0xff] }
 0x72a   : > { %14403 = vst [vmem:[#allocation113_spill] sm:$0xff] %v11548_v21  ;;  %v11550_v53 = vpop.f32.mrf.mxu1  ;;  %v2905_v13 = vld [vmem:[%s14022_s2 + $0x7e8] sm:$0xff] }
 0x72b   : > { %14402 = vst [vmem:[#allocation112_spill] sm:$0xff] %v11546_v12  ;;  %4652 = vmatpush.msrb.mxu2 %v2853_v43  ;;  %4755 = vmatpush.msrb.mxu3 %v2905_v13 }
 0x72c   : > { %14404 = vst [vmem:[#allocation114_spill] sm:$0xff] %v11550_v53  ;;  %v2651_v53 = vld [vmem:[#allocation3 + $0x231] sm:$0xff] }
 0x72d   : > { %14405 = vst [vmem:[#allocation115_spill] sm:$0xff] %v11552_v17  ;;  %3956 = vmatmul.f32.gmra.mxu3 %v2650_v41  ;;  %4179 = vmatmul.f32.gmra.mxu1 %v11557_v60 }
 0x72e   : > { %4289 = vmatmul.f32.gmra.mxu2 %v11342_v34 }
 0x72f   : > { %4072 = vmatmul.f32.gmra.mxu0 %v11567_v26  ;;  %4653 = vmatpush.msrb.mxu2 %v2851_v57  ;;  %v2845_v57 = vld [vmem:[%s14022_s2 + $0x608] sm:$0xff] }
 0x730   : > { %v3909_v41 = vpop.f32.mrf.mxu3  ;;  %v11585_v26 = vld [vmem:[#allocation3 + $0x1e8] sm:$0xff] }
 0x731   : > { %v11574_v43 = vadd.f32 %v3909_v41, %v10917_v24  ;;  %v11576_v12 = vpop.f32.mrf.mxu2  ;;  %4654 = vmatpush.msrb.mxu2 %v2849_v9  ;;  %v11580_v21 = vpop.f32.mrf.mxu0  ;;  %v2937_v24 = vld [vmem:[%s14022_s2 + $0x8e8] sm:$0xff] }
 0x732   : > { %v11578_v17 = vpop.f32.mrf.mxu1  ;;  %4868 = vmatpush.msrb.mxu0 %v2937_v24 }
 0x733   : > { %14407 = vst [vmem:[#allocation117_spill] sm:$0xff] %v11574_v43  ;;  %4655 = vmatpush.msrb.mxu2 %v2847_v32  ;;  %v11602_v43 = vld [vmem:[#allocation3 + $0x1f0] sm:$0xff] }
 0x735   : > { %3959 = vmatmul.f32.gmra.mxu3 %v2651_v53  ;;  %4182 = vmatmul.f32.gmra.mxu1 %v11585_v26 }
 0x736   : > { %4292 = vmatmul.f32.gmra.mxu2 %v11364_v15 }
 0x737   : > { %4431 = vmatmul.f32.vlgmr.msra.gmra.mxu0 %v10946_v37  ;;  %4656 = vmatpush.msrb.mxu2 %v2845_v57  ;;  %v2903_v37 = vld [vmem:[%s14022_s2 + $0x7d8] sm:$0xff] }
 0x738   : > { %v3912_v9 = vpop.f32.mrf.mxu3  ;;  %4756 = vmatpush.msrb.mxu3 %v2903_v37 }
 0x739   : > { %v11594_v13 = vadd.f32 %v3912_v9, %v10929_v11  ;;  %v11596_v41 = vpop.f32.mrf.mxu2  ;;  %v11600_v32 = vpop.f32.mrf.mxu0 }
 0x73a   : > { %v11598_v53 = vpop.f32.mrf.mxu1 }
 0x73b   : > { %14408 = vst [vmem:[#allocation118_spill] sm:$0xff] %v11594_v13 }
 0x73d   : > { %4185 = vmatmul.f32.gmra.mxu1 %v11602_v43  ;;  %4318 = vmatmul.f32.vlgmr.msra.gmra.mxu3 %v10922_v42  ;;  %v2935_v42 = vld [vmem:[%s14022_s2 + $0x8d8] sm:$0xff] }
 0x73e   : > { %4295 = vmatmul.f32.gmra.mxu2 %v11398_v56  ;;  %4869 = vmatpush.msrb.mxu0 %v2935_v42 }
 0x73f   : > { %4434 = vmatmul.f32.gmra.mxu0 %v10961_v28 }
 0x740   : > { %v3915_v11 = vpop.f32.mrf.mxu3 }
 0x741   : > { %v11612_v15 = vadd.f32 %v3915_v11, %v10941_v61  ;;  %v11614_v57 = vpop.f32.mrf.mxu2  ;;  %v11618_v9 = vpop.f32.mrf.mxu0 }
 0x742   : > { %v11616_v24 = vpop.f32.mrf.mxu1 }
 0x743   : > { %14409 = vst [vmem:[#allocation119_spill] sm:$0xff] %v11612_v15 }
 0x745   : > { %4321 = vmatmul.f32.gmra.mxu3 %v10934_v45  ;;  %4544 = vmatmul.f32.vlgmr.msra.gmra.mxu1 %v10964_v46  ;;  %v2901_v46 = vld [vmem:[%s14022_s2 + $0x7c8] sm:$0xff] }
 0x746   : > { %4298 = vmatmul.f32.gmra.mxu2 %v11444_v23  ;;  %4757 = vmatpush.msrb.mxu3 %v2901_v46 }
 0x747   : > { %4437 = vmatmul.f32.gmra.mxu0 %v10979_v30 }
 0x748   : > { %v3918_v61 = vpop.f32.mrf.mxu3 }
 0x749   : > { %v11628_v28 = vadd.f32 %v3918_v61, %v10956_v20  ;;  %v11630_v37 = vpop.f32.mrf.mxu2  ;;  %v11634_v45 = vpop.f32.mrf.mxu0 }
 0x74a   : > { %v11632_v11 = vpop.f32.mrf.mxu1 }
 0x74b   : > { %14410 = vst [vmem:[#allocation120_spill] sm:$0xff] %v11628_v28 }
 0x74d   : > { %4324 = vmatmul.f32.gmra.mxu3 %v10949_v49  ;;  %4547 = vmatmul.f32.gmra.mxu1 %v10982_v7 }
 0x74e   : > { %4657 = vmatmul.f32.vlgmr.msrb.gmra.mxu2 %v10949_v49  ;;  %v2933_v49 = vld [vmem:[%s14022_s2 + $0x8c8] sm:$0xff] }
 0x74f   : > { %4440 = vmatmul.f32.gmra.mxu0 %v10997_v63 }
 0x750   : > { %v3921_v20 = vpop.f32.mrf.mxu3  ;;  %4870 = vmatpush.msrb.mxu0 %v2933_v49 }
 0x751   : > { %v11644_v30 = vadd.f32 %v3921_v20, %v10974_v14  ;;  %v11646_v42 = vpop.f32.mrf.mxu2  ;;  %v11650_v28 = vpop.f32.mrf.mxu0 }
 0x752   : > { %v11648_v61 = vpop.f32.mrf.mxu1 }
 0x753   : > { %14411 = vst [vmem:[#allocation121_spill] sm:$0xff] %v11644_v30 }
 0x755   : > { %4327 = vmatmul.f32.gmra.mxu3 %v10967_v10  ;;  %4550 = vmatmul.f32.gmra.mxu1 %v10910_v22  ;;  %v2899_v22 = vld [vmem:[%s14022_s2 + $0x7b8] sm:$0xff] }
 0x756   : > { %4660 = vmatmul.f32.gmra.mxu2 %v10967_v10  ;;  %v14413_v10 = vld [vmem:[#allocation19_spill] sm:$0xff]  ;;  %4758 = vmatpush.msrb.mxu3 %v2899_v22 }
 0x757   : > { %4443 = vmatmul.f32.gmra.mxu0 %v11013_v62  ;;  %v14414_v62 = vld [vmem:[#allocation29_spill] sm:$0xff]  ;;  %v2931_v22 = vld [vmem:[%s14022_s2 + $0x8b8] sm:$0xff] }
 0x758   : > { %v3924_v14 = vpop.f32.mrf.mxu3  ;;  %4871 = vmatpush.msrb.mxu0 %v2931_v22 }
 0x759   : > { %v11660_v7 = vadd.f32 %v3924_v14, %v10992_v33  ;;  %v11662_v63 = vpop.f32.mrf.mxu2  ;;  %v11666_v20 = vpop.f32.mrf.mxu0 }
 0x75a   : > { %v11664_v46 = vpop.f32.mrf.mxu1 }
 0x75b   : > { %14412 = vst [vmem:[#allocation122_spill] sm:$0xff] %v11660_v7 }
 0x75d   : > { %4330 = vmatmul.f32.gmra.mxu3 %v10985_v51  ;;  %4553 = vmatmul.f32.gmra.mxu1 %v10919_v18  ;;  %v14417_v18 = vld [vmem:[#allocation22_spill] sm:$0xff] }
 0x75e   : > { %4663 = vmatmul.f32.gmra.mxu2 %v10985_v51  ;;  %v14418_v51 = vld [vmem:[#allocation23_spill] sm:$0xff] }
 0x75f   : > { %4446 = vmatmul.f32.gmra.mxu0 %v14413_v10  ;;  %v14419_v10 = vld [vmem:[#allocation24_spill] sm:$0xff] }
 0x760   : > { %v3927_v33 = vpop.f32.mrf.mxu3 }
 0x761   : > { %v11676_v49 = vadd.f32 %v3927_v33, %v14414_v62  ;;  %v11678_v14 = vpop.f32.mrf.mxu2  ;;  %v11682_v30 = vpop.f32.mrf.mxu0  ;;  %v14420_v62 = vld [vmem:[#allocation9_spill] sm:$0xff] }
 0x762   : > { %v11680_v7 = vpop.f32.mrf.mxu1  ;;  %14416 = vst [vmem:[#allocation29_spill] sm:$0xff] %v11682_v30 }
 0x763   : > { %14415 = vst [vmem:[#allocation19_spill] sm:$0xff] %v11676_v49 }
 0x765   : > { %4333 = vmatmul.f32.gmra.mxu3 %v14417_v18  ;;  %4556 = vmatmul.f32.gmra.mxu1 %v14418_v51  ;;  %v14424_v51 = vld [vmem:[#allocation15_spill] sm:$0xff] }
 0x766   : > { %4666 = vmatmul.f32.gmra.mxu2 %v14417_v18  ;;  %v14425_v18 = vld [vmem:[#allocation11_spill] sm:$0xff] }
 0x767   : > { %4449 = vmatmul.f32.gmra.mxu0 %v14419_v10  ;;  %v2897_v10 = vld [vmem:[%s14022_s2 + $0x7a8] sm:$0xff] }
 0x768   : > { %v3930_v33 = vpop.f32.mrf.mxu3  ;;  %4759 = vmatpush.msrb.mxu3 %v2897_v10 }
 0x769   : > { %v11692_v49 = vadd.f32 %v3930_v33, %v14420_v62  ;;  %v11694_v15 = vpop.f32.mrf.mxu2  ;;  %v11698_v30 = vpop.f32.mrf.mxu0  ;;  %v14426_v33 = vld [vmem:[#allocation33_spill] sm:$0xff] }
 0x76a   : > { %v11696_v13 = vpop.f32.mrf.mxu1  ;;  %14423 = vst [vmem:[#allocation24_spill] sm:$0xff] %v11698_v30 }
 0x76b   : > { %14421 = vst [vmem:[#allocation22_spill] sm:$0xff] %v11692_v49 }
 0x76c   : > { %14422 = vst [vmem:[#allocation23_spill] sm:$0xff] %v11696_v13 }
 0x76d   : > { %4336 = vmatmul.f32.gmra.mxu3 %v14424_v51  ;;  %4559 = vmatmul.f32.gmra.mxu1 %v14425_v18  ;;  %v14430_v18 = vld [vmem:[#allocation28_spill] sm:$0xff] }
 0x76e   : > { %4669 = vmatmul.f32.gmra.mxu2 %v14424_v51  ;;  %v14431_v51 = vld [vmem:[#allocation14_spill] sm:$0xff] }
 0x76f   : > { %4452 = vmatmul.f32.gmra.mxu0 %v11061_v58  ;;  %v2929_v58 = vld [vmem:[%s14022_s2 + $0x8a8] sm:$0xff] }
 0x770   : > { %v3933_v22 = vpop.f32.mrf.mxu3  ;;  %4872 = vmatpush.msrb.mxu0 %v2929_v58 }
 0x771   : > { %v11708_v62 = vadd.f32 %v3933_v22, %v14426_v33  ;;  %v11710_v49 = vpop.f32.mrf.mxu2  ;;  %v11714_v13 = vpop.f32.mrf.mxu0  ;;  %v14432_v22 = vld [vmem:[#allocation17_spill] sm:$0xff] }
 0x772   : > { %v11712_v30 = vpop.f32.mrf.mxu1  ;;  %14429 = vst [vmem:[#allocation11_spill] sm:$0xff] %v11714_v13 }
 0x773   : > { %14427 = vst [vmem:[#allocation9_spill] sm:$0xff] %v11708_v62 }
 0x774   : > { %14428 = vst [vmem:[#allocation15_spill] sm:$0xff] %v11712_v30 }
 0x775   : > { %4339 = vmatmul.f32.gmra.mxu3 %v14430_v18  ;;  %4562 = vmatmul.f32.gmra.mxu1 %v14431_v51  ;;  %v14436_v51 = vld [vmem:[#allocation13_spill] sm:$0xff] }
 0x776   : > { %4672 = vmatmul.f32.gmra.mxu2 %v14430_v18  ;;  %v14437_v18 = vld [vmem:[#allocation8_spill] sm:$0xff] }
 0x777   : > { %4455 = vmatmul.f32.gmra.mxu0 %v11077_v38  ;;  %v2895_v38 = vld [vmem:[%s14022_s2 + $0x798] sm:$0xff] }
 0x778   : > { %v3936_v10 = vpop.f32.mrf.mxu3  ;;  %4760 = vmatpush.msrb.mxu3 %v2895_v38 }
 0x779   : > { %v11724_v33 = vadd.f32 %v3936_v10, %v14432_v22  ;;  %v11726_v62 = vpop.f32.mrf.mxu2  ;;  %v11730_v30 = vpop.f32.mrf.mxu0  ;;  %v14438_v10 = vld [vmem:[#allocation40_spill] sm:$0xff] }
 0x77a   : > { %v11728_v13 = vpop.f32.mrf.mxu1  ;;  %14435 = vst [vmem:[#allocation14_spill] sm:$0xff] %v11730_v30 }
 0x77b   : > { %14433 = vst [vmem:[#allocation33_spill] sm:$0xff] %v11724_v33 }
 0x77c   : > { %14434 = vst [vmem:[#allocation28_spill] sm:$0xff] %v11728_v13 }
 0x77d   : > { %4342 = vmatmul.f32.gmra.mxu3 %v14436_v51  ;;  %4565 = vmatmul.f32.gmra.mxu1 %v14437_v18  ;;  %v14442_v18 = vld [vmem:[#allocation35_spill] sm:$0xff] }
 0x77e   : > { %4675 = vmatmul.f32.gmra.mxu2 %v14436_v51  ;;  %v14443_v51 = vld [vmem:[#allocation10_spill] sm:$0xff] }
 0x77f   : > { %4458 = vmatmul.f32.gmra.mxu0 %v11093_v3  ;;  %v2927_v3 = vld [vmem:[%s14022_s2 + $0x898] sm:$0xff] }
 0x780   : > { %v3939_v58 = vpop.f32.mrf.mxu3  ;;  %4873 = vmatpush.msrb.mxu0 %v2927_v3 }
 0x781   : > { %v11740_v22 = vadd.f32 %v3939_v58, %v14438_v10  ;;  %v11742_v33 = vpop.f32.mrf.mxu2  ;;  %v11746_v13 = vpop.f32.mrf.mxu0  ;;  %v14444_v58 = vld [vmem:[#allocation16_spill] sm:$0xff] }
 0x782   : > { %v11744_v30 = vpop.f32.mrf.mxu1  ;;  %14441 = vst [vmem:[#allocation8_spill] sm:$0xff] %v11746_v13 }
 0x783   : > { %14439 = vst [vmem:[#allocation17_spill] sm:$0xff] %v11740_v22 }
 0x784   : > { %14440 = vst [vmem:[#allocation13_spill] sm:$0xff] %v11744_v30 }
 0x785   : > { %4345 = vmatmul.f32.gmra.mxu3 %v14442_v18  ;;  %4568 = vmatmul.f32.gmra.mxu1 %v14443_v51  ;;  %v14448_v51 = vld [vmem:[#allocation30_spill] sm:$0xff] }
 0x786   : > { %4678 = vmatmul.f32.gmra.mxu2 %v14442_v18  ;;  %v14449_v18 = vld [vmem:[#allocation18_spill] sm:$0xff] }
 0x787   : > { %4461 = vmatmul.f32.gmra.mxu0 %v11109_v35  ;;  %v2893_v35 = vld [vmem:[%s14022_s2 + $0x788] sm:$0xff] }
 0x788   : > { %v3942_v38 = vpop.f32.mrf.mxu3  ;;  %4761 = vmatpush.msrb.mxu3 %v2893_v35 }
 0x789   : > { %v11756_v10 = vadd.f32 %v3942_v38, %v14444_v58  ;;  %v11758_v22 = vpop.f32.mrf.mxu2  ;;  %v14450_v38 = vld [vmem:[#allocation31_spill] sm:$0xff] }
 0x78a   : > { %v11760_v13 = vpop.f32.mrf.mxu1 }
 0x78b   : > { %14445 = vst [vmem:[#allocation40_spill] sm:$0xff] %v11756_v10  ;;  %v11762_v30 = vpop.f32.mrf.mxu0 }
 0x78c   : > { %14446 = vst [vmem:[#allocation35_spill] sm:$0xff] %v11760_v13 }
 0x78d   : > { %14447 = vst [vmem:[#allocation10_spill] sm:$0xff] %v11762_v30  ;;  %4348 = vmatmul.f32.gmra.mxu3 %v14448_v51  ;;  %4571 = vmatmul.f32.gmra.mxu1 %v14449_v18  ;;  %v14454_v18 = vld [vmem:[#allocation21_spill] sm:$0xff] }
 0x78e   : > { %4681 = vmatmul.f32.gmra.mxu2 %v14448_v51  ;;  %v14455_v51 = vld [vmem:[#allocation12_spill] sm:$0xff] }
 0x78f   : > { %4464 = vmatmul.f32.gmra.mxu0 %v11125_v50  ;;  %v2925_v50 = vld [vmem:[%s14022_s2 + $0x888] sm:$0xff] }
 0x790   : > { %v3945_v3 = vpop.f32.mrf.mxu3  ;;  %4874 = vmatpush.msrb.mxu0 %v2925_v50  ;;  %v14462_v50 = vld [vmem:[#allocation46_spill] sm:$0xff] }
 0x791   : > { %v11772_v58 = vadd.f32 %v3945_v3, %v14450_v38  ;;  %v11774_v10 = vpop.f32.mrf.mxu2  ;;  %v14456_v3 = vld [vmem:[#allocation36_spill] sm:$0xff] }
 0x792   : > { %v11776_v30 = vpop.f32.mrf.mxu1 }
 0x793   : > { %14451 = vst [vmem:[#allocation16_spill] sm:$0xff] %v11772_v58  ;;  %v11778_v13 = vpop.f32.mrf.mxu0 }
 0x794   : > { %14452 = vst [vmem:[#allocation30_spill] sm:$0xff] %v11776_v30 }
 0x795   : > { %14453 = vst [vmem:[#allocation18_spill] sm:$0xff] %v11778_v13  ;;  %4351 = vmatmul.f32.gmra.mxu3 %v14454_v18  ;;  %4574 = vmatmul.f32.gmra.mxu1 %v14455_v51  ;;  %v14461_v51 = vld [vmem:[#allocation45_spill] sm:$0xff] }
 0x796   : > { %4684 = vmatmul.f32.gmra.mxu2 %v14454_v18 }
 0x797   : > { %4467 = vmatmul.f32.gmra.mxu0 %v11143_v52  ;;  %v2891_v52 = vld [vmem:[%s14022_s2 + $0x778] sm:$0xff] }
 0x798   : > { %v3948_v35 = vpop.f32.mrf.mxu3  ;;  %4762 = vmatpush.msrb.mxu3 %v2891_v52 }
 0x799   : > { %v11788_v38 = vadd.f32 %v3948_v35, %v14456_v3  ;;  %v11790_v58 = vpop.f32.mrf.mxu2 }
 0x79a   : > { %14458 = vst [vmem:[#allocation21_spill] sm:$0xff] %v11790_v58  ;;  %v11792_v13 = vpop.f32.mrf.mxu1  ;;  %v14490_v58 = vld [vmem:[#allocation20_spill] sm:$0xff] }
 0x79b   : > { %14457 = vst [vmem:[#allocation31_spill] sm:$0xff] %v11788_v38 }
 0x79c   : > { %14459 = vst [vmem:[#allocation12_spill] sm:$0xff] %v11792_v13  ;;  %v11794_v30 = vpop.f32.mrf.mxu0 }
 0x79d   : > { %14460 = vst [vmem:[#allocation36_spill] sm:$0xff] %v11794_v30  ;;  %4354 = vmatmul.f32.gmra.mxu3 %v14461_v51  ;;  %4577 = vmatmul.f32.gmra.mxu1 %v11042_v44  ;;  %v14467_v44 = vld [vmem:[#allocation27_spill] sm:$0xff] }
 0x79e   : > { %4687 = vmatmul.f32.gmra.mxu2 %v14461_v51 }
 0x79f   : > { %4470 = vmatmul.f32.gmra.mxu0 %v11161_v1  ;;  %v2923_v1 = vld [vmem:[%s14022_s2 + $0x878] sm:$0xff] }
 0x7a0   : > { %v3951_v18 = vpop.f32.mrf.mxu3  ;;  %4875 = vmatpush.msrb.mxu0 %v2923_v1  ;;  %v14474_v1 = vld [vmem:[#allocation56_spill] sm:$0xff] }
 0x7a1   : > { %v11804_v35 = vadd.f32 %v3951_v18, %v14462_v50  ;;  %v11806_v3 = vpop.f32.mrf.mxu2 }
 0x7a2   : > { %14464 = vst [vmem:[#allocation46_spill] sm:$0xff] %v11806_v3  ;;  %v11808_v38 = vpop.f32.mrf.mxu1  ;;  %v14489_v3 = vld [vmem:[#allocation48_spill] sm:$0xff] }
 0x7a3   : > { %14463 = vst [vmem:[#allocation45_spill] sm:$0xff] %v11804_v35 }
 0x7a4   : > { %14465 = vst [vmem:[#allocation123_spill] sm:$0xff] %v11808_v38  ;;  %v11810_v30 = vpop.f32.mrf.mxu0  ;;  %v14484_v38 = vld [vmem:[#allocation39_spill] sm:$0xff] }
 0x7a5   : > { %14466 = vst [vmem:[#allocation124_spill] sm:$0xff] %v11810_v30  ;;  %4357 = vmatmul.f32.gmra.mxu3 %v14467_v44  ;;  %4580 = vmatmul.f32.gmra.mxu1 %v11058_v59  ;;  %v14472_v59 = vld [vmem:[#allocation41_spill] sm:$0xff] }
 0x7a6   : > { %4690 = vmatmul.f32.gmra.mxu2 %v14467_v44  ;;  %v14473_v44 = vld [vmem:[#allocation25_spill] sm:$0xff] }
 0x7a7   : > { %4473 = vmatmul.f32.gmra.mxu0 %v11184_v16  ;;  %v2889_v16 = vld [vmem:[%s14022_s2 + $0x768] sm:$0xff] }
 0x7a8   : > { %v3954_v51 = vpop.f32.mrf.mxu3  ;;  %4763 = vmatpush.msrb.mxu3 %v2889_v16 }
 0x7a9   : > { %v11820_v52 = vadd.f32 %v3954_v51, %v11154_v29  ;;  %v11822_v18 = vpop.f32.mrf.mxu2 }
 0x7aa   : > { %14469 = vst [vmem:[#allocation125_spill] sm:$0xff] %v11822_v18  ;;  %v11824_v50 = vpop.f32.mrf.mxu1 }
 0x7ab   : > { %14468 = vst [vmem:[#allocation27_spill] sm:$0xff] %v11820_v52 }
 0x7ac   : > { %14470 = vst [vmem:[#allocation126_spill] sm:$0xff] %v11824_v50  ;;  %v11826_v35 = vpop.f32.mrf.mxu0  ;;  %v14478_v50 = vld [vmem:[#allocation43_spill] sm:$0xff] }
 0x7ad   : > { %14471 = vst [vmem:[#allocation127_spill] sm:$0xff] %v11826_v35  ;;  %4360 = vmatmul.f32.gmra.mxu3 %v14472_v59  ;;  %4583 = vmatmul.f32.gmra.mxu1 %v14473_v44 }
 0x7ae   : > { %4693 = vmatmul.f32.gmra.mxu2 %v14472_v59  ;;  %v7473_v59 = vld [vmem:[%s14024_s4 + $0x3] sm:$0x3] }
 0x7af   : > { %4476 = vmatmul.f32.gmra.mxu0 %v11210_v40  ;;  %v11845_v44 = vperm.slane %v7473_v59, 1  ;;  %v2921_v40 = vld [vmem:[%s14022_s2 + $0x868] sm:$0xff] }
 0x7b0   : > { %v3957_v29 = vpop.f32.mrf.mxu3  ;;  %4876 = vmatpush.msrb.mxu0 %v2921_v40  ;;  %v14485_v40 = vld [vmem:[#allocation58_spill] sm:$0xff] }
 0x7b1   : > { %v11836_v51 = vadd.f32 %v3957_v29, %v14474_v1  ;;  %v11838_v52 = vpop.f32.mrf.mxu2  ;;  %v14479_v29 = vld [vmem:[#allocation52_spill] sm:$0xff] }
 0x7b2   : > { %14476 = vst [vmem:[#allocation25_spill] sm:$0xff] %v11838_v52  ;;  %v11840_v35 = vpop.f32.mrf.mxu1  ;;  %v3981_v1 = vadd.f32 %v14479_v29, %v11845_v44  ;;  %v14486_v29 = vld [vmem:[#allocation26_spill] sm:$0xff] }
 0x7b3   : > { %14475 = vst [vmem:[#allocation41_spill] sm:$0xff] %v11836_v51 }
 0x7b4   : > { %14477 = vst [vmem:[#allocation56_spill] sm:$0xff] %v11840_v35  ;;  %v4432_v30 = vpop.f32.mrf.mxu0 }
 0x7b5   : > { %4363 = vmatmul.f32.gmra.mxu3 %v14478_v50  ;;  %4586 = vmatmul.f32.gmra.mxu1 %v11090_v6 }
 0x7b6   : > { %4696 = vmatmul.f32.gmra.mxu2 %v14478_v50  ;;  %v14483_v50 = vld [vmem:[#allocation47_spill] sm:$0xff] }
 0x7b7   : > { %4479 = vmatmul.f32.gmra.mxu0 %v11235_v0  ;;  %v4094_v52 = vadd.f32 %v14483_v50, %v3981_v1  ;;  %v2887_v0 = vld [vmem:[%s14022_s2 + $0x758] sm:$0xff] }
 0x7b8   : > { %v3960_v16 = vpop.f32.mrf.mxu3  ;;  %4764 = vmatpush.msrb.mxu3 %v2887_v0 }
 0x7b9   : > { %v11857_v59 = vadd.f32 %v3960_v16, %v11200_v54  ;;  %v11859_v51 = vpop.f32.mrf.mxu2  ;;  %v4207_v54 = vadd.f32 %v14485_v40, %v4094_v52  ;;  %v14491_v52 = vld [vmem:[#allocation60_spill] sm:$0xff] }
 0x7ba   : > { %14481 = vst [vmem:[#allocation52_spill] sm:$0xff] %v11859_v51  ;;  %v11861_v35 = vpop.f32.mrf.mxu1 }
 0x7bb   : > { %14480 = vst [vmem:[#allocation43_spill] sm:$0xff] %v11857_v59  ;;  %v3984_v59 = vadd.f32 %v14486_v29, %v11845_v44 }
 0x7bc   : > { %14482 = vst [vmem:[#allocation128_spill] sm:$0xff] %v11861_v35  ;;  %v4435_v6 = vpop.f32.mrf.mxu0 }
 0x7bd   : > { %4366 = vmatmul.f32.gmra.mxu3 %v11194_v27  ;;  %4589 = vmatmul.f32.gmra.mxu1 %v14484_v38 }
 0x7be   : > { %4699 = vmatmul.f32.gmra.mxu2 %v11194_v27  ;;  %v14488_v27 = vld [vmem:[#allocation49_spill] sm:$0xff] }
 0x7bf   : > { %4482 = vmatmul.f32.gmra.mxu0 %v11257_v2  ;;  %v4097_v18 = vadd.f32 %v14488_v27, %v3984_v59  ;;  %v2919_v2 = vld [vmem:[%s14022_s2 + $0x858] sm:$0xff]  ;;  %v14495_v27 = vld [vmem:[#allocation61_spill] sm:$0xff] }
 0x7c0   : > { %v4319_v16 = vpop.f32.mrf.mxu3  ;;  %4877 = vmatpush.msrb.mxu0 %v2919_v2 }
 0x7c1   : > { %v11874_v1 = vpop.f32.mrf.mxu2  ;;  %v4320_v50 = vadd.f32 %v4319_v16, %v4207_v54  ;;  %v4210_v0 = vadd.f32 %v14491_v52, %v4097_v18  ;;  %v14493_v54 = vld [vmem:[#allocation32_spill] sm:$0xff]  ;;  %v14497_v18 = vld [vmem:[#allocation67_spill] sm:$0xff] }
 0x7c2   : > { %14487 = vst [vmem:[#allocation47_spill] sm:$0xff] %v11874_v1  ;;  %v4545_v35 = vpop.f32.mrf.mxu1  ;;  %v3987_v16 = vadd.f32 %v14493_v54, %v11845_v44  ;;  %v14496_v1 = vld [vmem:[#allocation37_spill] sm:$0xff] }
 0x7c3   : > { %v4433_v38 = vadd.f32 %v4432_v30, %v4320_v50 }
 0x7c4   : > { %v4438_v51 = vpop.f32.mrf.mxu0 }
 0x7c5   : > { %v4546_v13 = vadd.f32 %v4545_v35, %v4433_v38  ;;  %4369 = vmatmul.f32.gmra.mxu3 %v14489_v3  ;;  %4592 = vmatmul.f32.gmra.mxu1 %v14490_v58 }
 0x7c6   : > { %4702 = vmatmul.f32.gmra.mxu2 %v14489_v3  ;;  %v14494_v3 = vld [vmem:[#allocation44_spill] sm:$0xff] }
 0x7c7   : > { %4485 = vmatmul.f32.gmra.mxu0 %v11279_v4  ;;  %v4100_v50 = vadd.f32 %v14494_v3, %v3987_v16  ;;  %v2885_v4 = vld [vmem:[%s14022_s2 + $0x748] sm:$0xff] }
 0x7c8   : > { %v4322_v40 = vpop.f32.mrf.mxu3  ;;  %4765 = vmatpush.msrb.mxu3 %v2885_v4 }
 0x7c9   : > { %v11885_v30 = vpop.f32.mrf.mxu2  ;;  %v4323_v59 = vadd.f32 %v4322_v40, %v4210_v0  ;;  %v4213_v2 = vadd.f32 %v14497_v18, %v4100_v50  ;;  %v14501_v50 = vld [vmem:[#allocation34_spill] sm:$0xff] }
 0x7ca   : > { %14492 = vst [vmem:[#allocation39_spill] sm:$0xff] %v11885_v30  ;;  %v4548_v35 = vpop.f32.mrf.mxu1  ;;  %v14500_v30 = vld [vmem:[#allocation65_spill] sm:$0xff] }
 0x7cb   : > { %v4436_v58 = vadd.f32 %v4435_v6, %v4323_v59 }
 0x7cc   : > { %v4441_v29 = vpop.f32.mrf.mxu0 }
 0x7cd   : > { %v4549_v38 = vadd.f32 %v4548_v35, %v4436_v58  ;;  %4372 = vmatmul.f32.gmra.mxu3 %v14495_v27  ;;  %4595 = vmatmul.f32.gmra.mxu1 %v14496_v1  ;;  %v14498_v35 = vld [vmem:[#allocation53_spill] sm:$0xff]  ;;  %v14499_v58 = vld [vmem:[#allocation62_spill] sm:$0xff] }
 0x7ce   : > { %4705 = vmatmul.f32.gmra.mxu2 %v14495_v27  ;;  %v3990_v1 = vadd.f32 %v14498_v35, %v11845_v44 }
 0x7cf   : > { %4488 = vmatmul.f32.gmra.mxu0 %v11301_v31  ;;  %v2917_v31 = vld [vmem:[%s14022_s2 + $0x848] sm:$0xff] }
 0x7d0   : > { %v4325_v6 = vpop.f32.mrf.mxu3  ;;  %v4103_v3 = vadd.f32 %v14499_v58, %v3990_v1  ;;  %4878 = vmatpush.msrb.mxu0 %v2917_v31  ;;  %v14504_v1 = vld [vmem:[#allocation68_spill] sm:$0xff] }
 0x7d1   : > { %v4326_v52 = vadd.f32 %v4325_v6, %v4213_v2  ;;  %v4658_v0 = vpop.f32.mrf.mxu2 }
 0x7d2   : > { %v11898_v40 = vadd.f32 %v4658_v0, %v4546_v13  ;;  %v4551_v59 = vpop.f32.mrf.mxu1  ;;  %v14502_v13 = vld [vmem:[#allocation73_spill] sm:$0xff]  ;;  %v14503_v0 = vld [vmem:[#allocation55_spill] sm:$0xff] }
 0x7d3   : > { %v4439_v54 = vadd.f32 %v4438_v51, %v4326_v52  ;;  %v4216_v4 = vadd.f32 %v14502_v13, %v4103_v3  ;;  %v14506_v3 = vld [vmem:[#allocation42_spill] sm:$0xff] }
 0x7d4   : > { %v4444_v16 = vpop.f32.mrf.mxu0 }
 0x7d5   : > { %v4552_v27 = vadd.f32 %v4551_v59, %v4439_v54  ;;  %4375 = vmatmul.f32.gmra.mxu3 %v14500_v30  ;;  %4598 = vmatmul.f32.gmra.mxu1 %v14501_v50  ;;  %v3993_v59 = vadd.f32 %v14503_v0, %v11845_v44  ;;  %v14505_v50 = vld [vmem:[#allocation71_spill] sm:$0xff] }
 0x7d6   : > { %4708 = vmatmul.f32.gmra.mxu2 %v14500_v30 }
 0x7d7   : > { %4491 = vmatmul.f32.gmra.mxu0 %v11323_v47  ;;  %v4106_v54 = vadd.f32 %v14504_v1, %v3993_v59  ;;  %v2883_v47 = vld [vmem:[%s14022_s2 + $0x738] sm:$0xff] }
 0x7d8   : > { %v4328_v18 = vpop.f32.mrf.mxu3  ;;  %4766 = vmatpush.msrb.mxu3 %v2883_v47 }
 0x7d9   : > { %v4329_v51 = vadd.f32 %v4328_v18, %v4216_v4  ;;  %v4661_v2 = vpop.f32.mrf.mxu2 }
 0x7da   : > { %v11911_v6 = vadd.f32 %v4661_v2, %v4549_v38  ;;  %v4554_v52 = vpop.f32.mrf.mxu1  ;;  %v14507_v38 = vld [vmem:[#allocation78_spill] sm:$0xff]  ;;  %v14508_v2 = vld [vmem:[#allocation63_spill] sm:$0xff] }
 0x7db   : > { %v4442_v35 = vadd.f32 %v4441_v29, %v4329_v51  ;;  %v4219_v31 = vadd.f32 %v14507_v38, %v4106_v54  ;;  %v14511_v54 = vld [vmem:[#allocation38_spill] sm:$0xff] }
 0x7dc   : > { %v4447_v30 = vpop.f32.mrf.mxu0 }
 0x7dd   : > { %v4555_v58 = vadd.f32 %v4554_v52, %v4442_v35  ;;  %4378 = vmatmul.f32.gmra.mxu3 %v14505_v50  ;;  %4601 = vmatmul.f32.gmra.mxu1 %v14506_v3  ;;  %v3996_v52 = vadd.f32 %v14508_v2, %v11845_v44  ;;  %v14509_v35 = vld [vmem:[#allocation74_spill] sm:$0xff]  ;;  %v14510_v3 = vld [vmem:[#allocation76_spill] sm:$0xff] }
 0x7de   : > { %4711 = vmatmul.f32.gmra.mxu2 %v14505_v50 }
 0x7df   : > { %4494 = vmatmul.f32.gmra.mxu0 %v11345_v19  ;;  %v4109_v1 = vadd.f32 %v14509_v35, %v3996_v52  ;;  %v2915_v19 = vld [vmem:[%s14022_s2 + $0x838] sm:$0xff] }
 0x7e0   : > { %v4331_v29 = vpop.f32.mrf.mxu3  ;;  %4879 = vmatpush.msrb.mxu0 %v2915_v19 }
 0x7e1   : > { %v4332_v13 = vadd.f32 %v4331_v29, %v4219_v31  ;;  %v4664_v4 = vpop.f32.mrf.mxu2 }
 0x7e2   : > { %v11924_v18 = vadd.f32 %v4664_v4, %v4552_v27  ;;  %v4557_v51 = vpop.f32.mrf.mxu1  ;;  %v14512_v27 = vld [vmem:[#allocation83_spill] sm:$0xff]  ;;  %v14514_v4 = vld [vmem:[#allocation69_spill] sm:$0xff] }
 0x7e3   : > { %v4445_v0 = vadd.f32 %v4444_v16, %v4332_v13  ;;  %v4222_v47 = vadd.f32 %v14512_v27, %v4109_v1  ;;  %v14517_v1 = vld [vmem:[#allocation59_spill] sm:$0xff]  ;;  %v14519_v27 = vld [vmem:[#allocation96_spill] sm:$0xff] }
 0x7e4   : > { %v4450_v59 = vpop.f32.mrf.mxu0 }
 0x7e5   : > { %v4558_v50 = vadd.f32 %v4557_v51, %v4445_v0  ;;  %4381 = vmatmul.f32.gmra.mxu3 %v14510_v3  ;;  %4604 = vmatmul.f32.gmra.mxu1 %v14511_v54  ;;  %v3999_v51 = vadd.f32 %v14514_v4, %v11845_v44  ;;  %v14515_v0 = vld [vmem:[#allocation79_spill] sm:$0xff]  ;;  %v14516_v54 = vld [vmem:[#allocation81_spill] sm:$0xff] }
 0x7e6   : > { %4714 = vmatmul.f32.gmra.mxu2 %v14510_v3 }
 0x7e7   : > { %4497 = vmatmul.f32.gmra.mxu0 %v11367_v36  ;;  %v4112_v35 = vadd.f32 %v14515_v0, %v3999_v51  ;;  %v2881_v36 = vld [vmem:[%s14022_s2 + $0x728] sm:$0xff]  ;;  %v14522_v0 = vld [vmem:[#allocation84_spill] sm:$0xff] }
 0x7e8   : > { %v4334_v38 = vpop.f32.mrf.mxu3  ;;  %4767 = vmatpush.msrb.mxu3 %v2881_v36  ;;  %v14525_v36 = vld [vmem:[#allocation93_spill] sm:$0xff] }
 0x7e9   : > { %v4335_v16 = vadd.f32 %v4334_v38, %v4222_v47  ;;  %v4667_v31 = vpop.f32.mrf.mxu2 }
 0x7ea   : > { %v11937_v29 = vadd.f32 %v4667_v31, %v4555_v58  ;;  %v4560_v13 = vpop.f32.mrf.mxu1  ;;  %v14518_v58 = vld [vmem:[#allocation88_spill] sm:$0xff] }
 0x7eb   : > { %v4448_v2 = vadd.f32 %v4447_v30, %v4335_v16  ;;  %v4225_v19 = vadd.f32 %v14518_v58, %v4112_v35  ;;  %v14524_v35 = vld [vmem:[#allocation64_spill] sm:$0xff] }
 0x7ec   : > { %14513 = vst [vmem:[#allocation58_spill] sm:$0xff] %v11937_v29  ;;  %v4453_v52 = vpop.f32.mrf.mxu0  ;;  %v14523_v29 = vld [vmem:[#allocation86_spill] sm:$0xff] }
 0x7ed   : > { %v4561_v3 = vadd.f32 %v4560_v13, %v4448_v2  ;;  %4384 = vmatmul.f32.gmra.mxu3 %v14516_v54  ;;  %4607 = vmatmul.f32.gmra.mxu1 %v14517_v1  ;;  %v14521_v13 = vld [vmem:[#allocation75_spill] sm:$0xff] }
 0x7ee   : > { %4717 = vmatmul.f32.gmra.mxu2 %v14516_v54  ;;  %v4002_v4 = vadd.f32 %v14521_v13, %v11845_v44 }
 0x7ef   : > { %4500 = vmatmul.f32.gmra.mxu0 %v14519_v27 }
 0x7f0   : > { %v4337_v30 = vpop.f32.mrf.mxu3  ;;  %v4115_v54 = vadd.f32 %v14522_v0, %v4002_v4 }
 0x7f1   : > { %v4338_v47 = vadd.f32 %v4337_v30, %v4225_v19  ;;  %v4670_v38 = vpop.f32.mrf.mxu2  ;;  %v14526_v19 = vld [vmem:[#allocation102_spill] sm:$0xff] }
 0x7f2   : > { %v11950_v16 = vadd.f32 %v4670_v38, %v4558_v50  ;;  %v4563_v31 = vpop.f32.mrf.mxu1  ;;  %v2913_v50 = vld [vmem:[%s14022_s2 + $0x828] sm:$0xff]  ;;  %v4228_v58 = vadd.f32 %v14525_v36, %v4115_v54  ;;  %v14527_v38 = vld [vmem:[#allocation80_spill] sm:$0xff]  ;;  %v14530_v54 = vld [vmem:[#allocation70_spill] sm:$0xff] }
 0x7f3   : > { %v4451_v51 = vadd.f32 %v4450_v59, %v4338_v47  ;;  %4880 = vmatpush.msrb.mxu0 %v2913_v50  ;;  %v14531_v50 = vld [vmem:[#allocation99_spill] sm:$0xff] }
 0x7f4   : > { %14520 = vst [vmem:[#allocation26_spill] sm:$0xff] %v11950_v16  ;;  %v4456_v2 = vpop.f32.mrf.mxu0  ;;  %v14529_v16 = vld [vmem:[#allocation91_spill] sm:$0xff] }
 0x7f5   : > { %v4564_v1 = vadd.f32 %v4563_v31, %v4451_v51  ;;  %4387 = vmatmul.f32.gmra.mxu3 %v14523_v29  ;;  %4610 = vmatmul.f32.gmra.mxu1 %v14524_v35  ;;  %v4005_v31 = vadd.f32 %v14527_v38, %v11845_v44  ;;  %v14528_v51 = vld [vmem:[#allocation89_spill] sm:$0xff] }
 0x7f6   : > { %4720 = vmatmul.f32.gmra.mxu2 %v14523_v29 }
 0x7f7   : > { %4503 = vmatmul.f32.gmra.mxu0 %v14526_v19  ;;  %v4118_v0 = vadd.f32 %v14528_v51, %v4005_v31  ;;  %v14533_v31 = vld [vmem:[#allocation94_spill] sm:$0xff] }
 0x7f8   : > { %v4340_v27 = vpop.f32.mrf.mxu3 }
 0x7f9   : > { %v4341_v59 = vadd.f32 %v4340_v27, %v4228_v58  ;;  %v4673_v30 = vpop.f32.mrf.mxu2  ;;  %v4231_v36 = vadd.f32 %v14531_v50, %v4118_v0 }
 0x7fa   : > { %v11963_v47 = vadd.f32 %v4673_v30, %v4561_v3  ;;  %v4566_v4 = vpop.f32.mrf.mxu1  ;;  %v2879_v3 = vld [vmem:[%s14022_s2 + $0x718] sm:$0xff] }
 0x7fb   : > { %v4454_v13 = vadd.f32 %v4453_v52, %v4341_v59  ;;  %4768 = vmatpush.msrb.mxu3 %v2879_v3  ;;  %v14532_v59 = vld [vmem:[#allocation85_spill] sm:$0xff]  ;;  %v14535_v3 = vld [vmem:[#allocation90_spill] sm:$0xff] }
 0x7fc   : > { %v4459_v29 = vpop.f32.mrf.mxu0  ;;  %v4008_v30 = vadd.f32 %v14532_v59, %v11845_v44  ;;  %v4011_v50 = vadd.f32 %v14535_v3, %v11845_v44  ;;  %v14538_v59 = vld [vmem:[#allocation95_spill] sm:$0xff] }
 0x7fd   : > { %v4567_v35 = vadd.f32 %v4566_v4, %v4454_v13  ;;  %4390 = vmatmul.f32.gmra.mxu3 %v14529_v16  ;;  %4613 = vmatmul.f32.gmra.mxu1 %v14530_v54  ;;  %v14534_v4 = vld [vmem:[#allocation97_spill] sm:$0xff] }
 0x7fe   : > { %4723 = vmatmul.f32.gmra.mxu2 %v14529_v16  ;;  %v4121_v13 = vadd.f32 %v14533_v31, %v4008_v30  ;;  %v4014_v30 = vadd.f32 %v14538_v59, %v11845_v44 }
 0x7ff   : > { %4506 = vmatmul.f32.gmra.mxu0 %v11488_v55  ;;  %v2911_v55 = vld [vmem:[%s14022_s2 + $0x818] sm:$0xff] }
 0x800   : > { %v4343_v52 = vpop.f32.mrf.mxu3  ;;  %4881 = vmatpush.msrb.mxu0 %v2911_v55  ;;  %v14540_v55 = vld [vmem:[#allocation107_spill] sm:$0xff] }
 0x801   : > { %v4344_v58 = vadd.f32 %v4343_v52, %v4231_v36  ;;  %v4676_v19 = vpop.f32.mrf.mxu2  ;;  %v14536_v52 = vld [vmem:[#allocation100_spill] sm:$0xff] }
 0x802   : > { %v11976_v27 = vadd.f32 %v4676_v19, %v4564_v1  ;;  %v4234_v1 = vadd.f32 %v11466_v48, %v4121_v13  ;;  %v14537_v19 = vld [vmem:[#allocation103_spill] sm:$0xff]  ;;  %v2877_v48 = vld [vmem:[%s14022_s2 + $0x708] sm:$0xff] }
 0x803   : > { %v11980_v38 = vadd.f32 %v4456_v2, %v4344_v58  ;;  %v4124_v58 = vadd.f32 %v14536_v52, %v4011_v50  ;;  %4769 = vmatpush.msrb.mxu3 %v2877_v48  ;;  %v14543_v52 = vld [vmem:[#allocation109_spill] sm:$0xff]  ;;  %v12028_v48 = vld [vmem:[#allocation3 + $0x1d1] sm:$0xff] }
 0x804   : > { %v4462_v16 = vpop.f32.mrf.mxu0 }
 0x805   : > { %4393 = vmatmul.f32.gmra.mxu3 %v14534_v4  ;;  %4616 = vmatmul.f32.gmra.mxu1 %v11298_v39 }
 0x806   : > { %4726 = vmatmul.f32.gmra.mxu2 %v14534_v4 }
 0x807   : > { %4509 = vmatmul.f32.gmra.mxu0 %v11529_v25  ;;  %v4237_v25 = vadd.f32 %v11510_v5, %v4124_v58  ;;  %v5696_v5 = vld [vmem:[%s14023_s3 + $0x78] sm:$0xff] }
 0x808   : > { %v4346_v51 = vpop.f32.mrf.mxu3  ;;  %5829 = vmatpush.msrb.mxu1 %v5696_v5  ;;  %v12046_v5 = vld [vmem:[#allocation3 + $0x208] sm:$0xff] }
 0x809   : > { %v4347_v2 = vadd.f32 %v4346_v51, %v4234_v1  ;;  %v4679_v0 = vpop.f32.mrf.mxu2 }
 0x80a   : > { %v11991_v54 = vadd.f32 %v4679_v0, %v4567_v35 }
 0x80b   : > { %v11995_v39 = vadd.f32 %v4459_v29, %v4347_v2 }
 0x80c   : > { %v4465_v36 = vpop.f32.mrf.mxu0 }
 0x80d   : > { %4396 = vmatmul.f32.gmra.mxu3 %v14537_v19  ;;  %4619 = vmatmul.f32.gmra.mxu1 %v11320_v8  ;;  %v14539_v8 = vld [vmem:[#allocation105_spill] sm:$0xff] }
 0x80e   : > { %4729 = vmatmul.f32.gmra.mxu2 %v14537_v19  ;;  %v4127_v4 = vadd.f32 %v14539_v8, %v4014_v30  ;;  %v14544_v19 = vld [vmem:[#allocation111_spill] sm:$0xff]  ;;  %v14546_v8 = vld [vmem:[#allocation114_spill] sm:$0xff] }
 0x80f   : > { %4512 = vmatmul.f32.gmra.mxu0 %v11557_v60  ;;  %v2909_v60 = vld [vmem:[%s14022_s2 + $0x808] sm:$0xff] }
 0x810   : > { %v4349_v29 = vpop.f32.mrf.mxu3  ;;  %4882 = vmatpush.msrb.mxu0 %v2909_v60 }
 0x811   : > { %v4350_v35 = vadd.f32 %v4349_v29, %v4237_v25 }
 0x813   : > { %v12008_v31 = vadd.f32 %v4462_v16, %v4350_v35  ;;  %v14541_v16 = vld [vmem:[#allocation113_spill] sm:$0xff] }
 0x814   : > { %v4468_v13 = vpop.f32.mrf.mxu0  ;;  %v4240_v1 = vadd.f32 %v14541_v16, %v4127_v4  ;;  %v14548_v16 = vld [vmem:[#allocation110_spill] sm:$0xff] }
 0x815   : > { %4399 = vmatmul.f32.gmra.mxu3 %v14540_v55  ;;  %4622 = vmatmul.f32.gmra.mxu1 %v11342_v34  ;;  %v14542_v34 = vld [vmem:[#allocation101_spill] sm:$0xff] }
 0x816   : > { %4732 = vmatmul.f32.gmra.mxu2 %v14540_v55  ;;  %v4017_v0 = vadd.f32 %v14542_v34, %v11845_v44  ;;  %v14547_v55 = vld [vmem:[#allocation116_spill] sm:$0xff] }
 0x817   : > { %4515 = vmatmul.f32.gmra.mxu0 %v11585_v26  ;;  %v7476_v34 = vld [vmem:[#allocation3 + $0x207] sm:$0xff] }
 0x818   : > { %v4352_v51 = vpop.f32.mrf.mxu3  ;;  %v4130_v58 = vadd.f32 %v14543_v52, %v4017_v0  ;;  %v12056_v0 = vld [vmem:[#allocation3 + $0x210] sm:$0xff] }
 0x819   : > { %v4353_v2 = vadd.f32 %v4352_v51, %v4240_v1  ;;  %v4023_v1 = vadd.f32 %v14548_v16, %v11845_v44  ;;  %v7484_v16 = vld [vmem:[#allocation3 + $0x51] sm:$0xff] }
 0x81a   : > { %v4243_v26 = vadd.f32 %v11576_v12, %v4130_v58  ;;  %v5695_v12 = vld [vmem:[%s14023_s3 + $0x70] sm:$0xff] }
 0x81b   : > { %v12024_v3 = vadd.f32 %v4465_v36, %v4353_v2  ;;  %v14545_v36 = vld [vmem:[#allocation106_spill] sm:$0xff]  ;;  %5830 = vmatpush.msrb.mxu1 %v5695_v12  ;;  %v4136_v2 = vadd.f32 %v11578_v17, %v4023_v1 }
 0x81c   : > { %v4471_v50 = vpop.f32.mrf.mxu0  ;;  %v4020_v35 = vadd.f32 %v14545_v36, %v11845_v44 }
 0x81d   : > { %4402 = vmatmul.f32.gmra.mxu3 %v14544_v19  ;;  %4625 = vmatmul.f32.gmra.mxu1 %v12028_v48 }
 0x81e   : > { %4735 = vmatmul.f32.gmra.mxu2 %v14544_v19  ;;  %v4133_v4 = vadd.f32 %v14546_v8, %v4020_v35  ;;  %v14549_v19 = vld [vmem:[#allocation115_spill] sm:$0xff]  ;;  %v7480_v35 = vld [vmem:[#allocation3 + $0x49] sm:$0xff] }
 0x81f   : > { %4518 = vmatmul.f32.gmra.mxu0 %v11602_v43 }
 0x820   : > { %v4355_v25 = vpop.f32.mrf.mxu3  ;;  %v4246_v43 = vadd.f32 %v11596_v41, %v4133_v4  ;;  %v4249_v41 = vadd.f32 %v11614_v57, %v4136_v2  ;;  %v5694_v57 = vld [vmem:[%s14023_s3 + $0x68] sm:$0xff] }
 0x821   : > { %v4356_v29 = vadd.f32 %v4355_v25, %v4243_v26  ;;  %5831 = vmatpush.msrb.mxu1 %v5694_v57  ;;  %v7488_v57 = vld [vmem:[#allocation3 + $0x68] sm:$0xff] }
 0x823   : > { %v12036_v59 = vadd.f32 %v4468_v13, %v4356_v29  ;;  %v7478_v29 = vld [vmem:[#allocation3 + $0x20f] sm:$0xff] }
 0x824   : > { %v4474_v30 = vpop.f32.mrf.mxu0 }
 0x825   : > { %4405 = vmatmul.f32.gmra.mxu3 %v14547_v55  ;;  %4628 = vmatmul.f32.gmra.mxu1 %v11398_v56 }
 0x826   : > { %4738 = vmatmul.f32.gmra.mxu2 %v14547_v55 }
 0x827   : > { %4521 = vmatmul.f32.gmra.mxu0 %v12046_v5 }
 0x828   : > { %v4358_v13 = vpop.f32.mrf.mxu3 }
 0x829   : > { %v4359_v60 = vadd.f32 %v4358_v13, %v4246_v43  ;;  %v12076_v43 = vld [vmem:[#allocation3 + $0x211] sm:$0xff]  ;;  %v7482_v13 = vld [vmem:[#allocation3 + $0x48] sm:$0xff] }
 0x82b   : > { %v12051_v51 = vadd.f32 %v4471_v50, %v4359_v60  ;;  %v4026_v50 = vadd.f32 %v14549_v19, %v11845_v44  ;;  %v7483_v60 = vld [vmem:[#allocation3 + $0x227] sm:$0xff] }
 0x82c   : > { %v4477_v56 = vpop.f32.mrf.mxu0  ;;  %v7487_v19 = vld [vmem:[#allocation3 + $0x69] sm:$0xff] }
 0x82d   : > { %4408 = vmatmul.f32.gmra.mxu3 %v7476_v34  ;;  %4631 = vmatmul.f32.gmra.mxu1 %v11444_v23  ;;  %v4139_v17 = vadd.f32 %v11598_v53, %v4026_v50  ;;  %v12064_v23 = vld [vmem:[#allocation3 + $0x209] sm:$0xff]  ;;  %v4029_v53 = vadd.f32 %v11580_v21, %v11845_v44  ;;  %v4032_v21 = vadd.f32 %v11600_v32, %v11845_v44 }
 0x82e   : > { %4741 = vmatmul.f32.gmra.mxu2 %v7476_v34 }
 0x82f   : > { %4524 = vmatmul.f32.gmra.mxu0 %v12056_v0  ;;  %v4252_v36 = vadd.f32 %v11630_v37, %v4139_v17  ;;  %v4142_v12 = vadd.f32 %v11616_v24, %v4029_v53  ;;  %v4145_v34 = vadd.f32 %v11632_v11, %v4032_v21 }
 0x830   : > { %v4361_v52 = vpop.f32.mrf.mxu3 }
 0x831   : > { %v4362_v58 = vadd.f32 %v4361_v52, %v4249_v41  ;;  %v4255_v37 = vadd.f32 %v11646_v42, %v4142_v12  ;;  %v7485_v41 = vld [vmem:[#allocation3 + $0x50] sm:$0xff]  ;;  %v5693_v52 = vld [vmem:[%s14023_s3 + $0x60] sm:$0xff]  ;;  %v4258_v42 = vadd.f32 %v11662_v63, %v4145_v34 }
 0x832   : > { %5832 = vmatpush.msrb.mxu1 %v5693_v52 }
 0x833   : > { %v12061_v26 = vadd.f32 %v4474_v30, %v4362_v58  ;;  %v7486_v58 = vld [vmem:[#allocation3 + $0x22f] sm:$0xff] }
 0x834   : > { %v4480_v25 = vpop.f32.mrf.mxu0 }
 0x835   : > { %4411 = vmatmul.f32.gmra.mxu3 %v7478_v29  ;;  %4634 = vmatmul.f32.gmra.mxu1 %v12064_v23 }
 0x836   : > { %4744 = vmatmul.f32.gmra.mxu2 %v7478_v29 }
 0x837   : > { %4883 = vmatmul.f32.vlgmr.msrb.gmra.mxu0 %v7480_v35  ;;  %v7489_v35 = vld [vmem:[#allocation3 + $0x71] sm:$0xff] }
 0x838   : > { %v4364_v30 = vpop.f32.mrf.mxu3 }
 0x839   : > { %v4365_v8 = vadd.f32 %v4364_v30, %v4252_v36 }
 0x83b   : > { %v12073_v4 = vadd.f32 %v4477_v56, %v4365_v8  ;;  %v4038_v8 = vadd.f32 %v11634_v45, %v11845_v44  ;;  %v4041_v45 = vadd.f32 %v11650_v28, %v11845_v44  ;;  %v14550_v28 = vld [vmem:[#allocation23_spill] sm:$0xff] }
 0x83c   : > { %v4483_v55 = vpop.f32.mrf.mxu0 }
 0x83d   : > { %4637 = vmatmul.f32.gmra.mxu1 %v12076_v43  ;;  %4770 = vmatmul.f32.vlgmr.msrb.gmra.mxu3 %v7482_v13  ;;  %v7491_v13 = vld [vmem:[#allocation3 + $0x89] sm:$0xff] }
 0x83e   : > { %4747 = vmatmul.f32.gmra.mxu2 %v7483_v60 }
 0x83f   : > { %4886 = vmatmul.f32.gmra.mxu0 %v7484_v16 }
 0x840   : > { %v4367_v1 = vpop.f32.mrf.mxu3 }
 0x841   : > { %v4368_v2 = vadd.f32 %v4367_v1, %v4255_v37 }
 0x843   : > { %v12082_v56 = vadd.f32 %v4480_v25, %v4368_v2  ;;  %v4035_v25 = vadd.f32 %v11618_v9, %v11845_v44  ;;  %v4151_v9 = vadd.f32 %v11664_v46, %v4038_v8  ;;  %v4154_v46 = vadd.f32 %v11680_v7, %v4041_v45  ;;  %v7492_v2 = vld [vmem:[#allocation3 + $0x88] sm:$0xff]  ;;  %v5691_v7 = vld [vmem:[%s14023_s3 + $0x50] sm:$0xff] }
 0x844   : > { %v4486_v24 = vpop.f32.mrf.mxu0  ;;  %v7497_v8 = vld [vmem:[#allocation3 + $0xb1] sm:$0xff]  ;;  %v5690_v45 = vld [vmem:[%s14023_s3 + $0x48] sm:$0xff] }
 0x845   : > { %4773 = vmatmul.f32.gmra.mxu3 %v7485_v41  ;;  %v4148_v29 = vadd.f32 %v11648_v61, %v4035_v25  ;;  %v5692_v61 = vld [vmem:[%s14023_s3 + $0x58] sm:$0xff]  ;;  %v4267_v21 = vadd.f32 %v11710_v49, %v4154_v46  ;;  %v4044_v41 = vadd.f32 %v11666_v20, %v11845_v44  ;;  %v14551_v20 = vld [vmem:[#allocation29_spill] sm:$0xff] }
 0x846   : > { %4750 = vmatmul.f32.gmra.mxu2 %v7486_v58  ;;  %5833 = vmatpush.msrb.mxu1 %v5692_v61 }
 0x847   : > { %4889 = vmatmul.f32.gmra.mxu0 %v7487_v19  ;;  %v4261_v36 = vadd.f32 %v11678_v14, %v4148_v29  ;;  %v4264_v14 = vadd.f32 %v11694_v15, %v4151_v9  ;;  %v7494_v19 = vld [vmem:[#allocation3 + $0x90] sm:$0xff]  ;;  %v14553_v9 = vld [vmem:[#allocation24_spill] sm:$0xff] }
 0x848   : > { %v4370_v50 = vpop.f32.mrf.mxu3  ;;  %5834 = vmatpush.msrb.mxu1 %v5691_v7 }
 0x849   : > { %v4371_v32 = vadd.f32 %v4370_v50, %v4258_v42  ;;  %v4157_v42 = vadd.f32 %v14550_v28, %v4044_v41  ;;  %v7495_v50 = vld [vmem:[#allocation3 + $0xa9] sm:$0xff] }
 0x84a   : > { %5835 = vmatpush.msrb.mxu1 %v5690_v45  ;;  %v14556_v41 = vld [vmem:[#allocation13_spill] sm:$0xff] }
 0x84b   : > { %v12091_v17 = vadd.f32 %v4483_v55, %v4371_v32  ;;  %v7490_v55 = vld [vmem:[#allocation3 + $0x70] sm:$0xff]  ;;  %v4270_v49 = vadd.f32 %v11726_v62, %v4157_v42  ;;  %v7500_v28 = vld [vmem:[#allocation3 + $0xc8] sm:$0xff] }
 0x84c   : > { %v4489_v11 = vpop.f32.mrf.mxu0 }
 0x84d   : > { %4776 = vmatmul.f32.gmra.mxu3 %v7488_v57 }
 0x84f   : > { %4892 = vmatmul.f32.gmra.mxu0 %v7489_v35 }
 0x850   : > { %v4373_v30 = vpop.f32.mrf.mxu3 }
 0x851   : > { %v4374_v63 = vadd.f32 %v4373_v30, %v4261_v36  ;;  %v14552_v36 = vld [vmem:[#allocation15_spill] sm:$0xff]  ;;  %v7496_v30 = vld [vmem:[#allocation3 + $0xa8] sm:$0xff] }
 0x853   : > { %v12097_v53 = vadd.f32 %v4486_v24, %v4374_v63  ;;  %v7493_v24 = vld [vmem:[#allocation3 + $0x91] sm:$0xff] }
 0x854   : > { %v4492_v12 = vpop.f32.mrf.mxu0 }
 0x855   : > { %4779 = vmatmul.f32.gmra.mxu3 %v7490_v55  ;;  %v4050_v55 = vadd.f32 %v14553_v9, %v11845_v44 }
 0x857   : > { %4895 = vmatmul.f32.gmra.mxu0 %v7491_v13  ;;  %v14554_v13 = vld [vmem:[#allocation28_spill] sm:$0xff] }
 0x858   : > { %v4376_v60 = vpop.f32.mrf.mxu3 }
 0x859   : > { %v4377_v37 = vadd.f32 %v4376_v60, %v4264_v14  ;;  %v4163_v60 = vadd.f32 %v14554_v13, %v4050_v55 }
 0x85b   : > { %v12106_v16 = vadd.f32 %v4489_v11, %v4377_v37  ;;  %v4047_v11 = vadd.f32 %v14551_v20, %v11845_v44  ;;  %v7498_v37 = vld [vmem:[#allocation3 + $0xb0] sm:$0xff]  ;;  %v14558_v20 = vld [vmem:[#allocation35_spill] sm:$0xff] }
 0x85c   : > { %v4495_v1 = vpop.f32.mrf.mxu0 }
 0x85d   : > { %4782 = vmatmul.f32.gmra.mxu3 %v7492_v2  ;;  %v4160_v35 = vadd.f32 %v14552_v36, %v4047_v11  ;;  %v5689_v36 = vld [vmem:[%s14023_s3 + $0x40] sm:$0xff] }
 0x85e   : > { %5836 = vmatpush.msrb.mxu1 %v5689_v36  ;;  %v14567_v36 = vld [vmem:[#allocation123_spill] sm:$0xff] }
 0x85f   : > { %4898 = vmatmul.f32.gmra.mxu0 %v7493_v24  ;;  %v4273_v63 = vadd.f32 %v11742_v33, %v4160_v35  ;;  %v4276_v33 = vadd.f32 %v11758_v22, %v4163_v60  ;;  %v7504_v60 = vld [vmem:[#allocation3 + $0xe8] sm:$0xff] }
 0x860   : > { %v4379_v34 = vpop.f32.mrf.mxu3 }
 0x861   : > { %v4380_v15 = vadd.f32 %v4379_v34, %v4267_v21  ;;  %v14555_v21 = vld [vmem:[#allocation11_spill] sm:$0xff] }
 0x862   : > { %v4053_v24 = vadd.f32 %v14555_v21, %v11845_v44 }
 0x863   : > { %v12112_v52 = vadd.f32 %v4492_v12, %v4380_v15 }
 0x864   : > { %v4498_v58 = vpop.f32.mrf.mxu0 }
 0x865   : > { %4785 = vmatmul.f32.gmra.mxu3 %v7494_v19  ;;  %v7501_v19 = vld [vmem:[#allocation3 + $0xd1] sm:$0xff] }
 0x867   : > { %4901 = vmatmul.f32.gmra.mxu0 %v7495_v50 }
 0x868   : > { %v4382_v32 = vpop.f32.mrf.mxu3 }
 0x869   : > { %v4383_v25 = vadd.f32 %v4382_v32, %v4270_v49  ;;  %v14557_v49 = vld [vmem:[#allocation14_spill] sm:$0xff] }
 0x86a   : > { %v4056_v50 = vadd.f32 %v14557_v49, %v11845_v44 }
 0x86b   : > { %v12121_v29 = vadd.f32 %v4495_v1, %v4383_v25  ;;  %v7499_v1 = vld [vmem:[#allocation3 + $0xc9] sm:$0xff] }
 0x86c   : > { %v4501_v57 = vpop.f32.mrf.mxu0  ;;  %v4169_v11 = vadd.f32 %v14558_v20, %v4056_v50  ;;  %v14566_v20 = vld [vmem:[#allocation18_spill] sm:$0xff] }
 0x86d   : > { %4788 = vmatmul.f32.gmra.mxu3 %v7496_v30  ;;  %v7503_v30 = vld [vmem:[#allocation3 + $0xe9] sm:$0xff] }
 0x86f   : > { %4904 = vmatmul.f32.gmra.mxu0 %v7497_v8 }
 0x870   : > { %v4385_v12 = vpop.f32.mrf.mxu3 }
 0x871   : > { %v4386_v62 = vadd.f32 %v4385_v12, %v4273_v63  ;;  %v14560_v12 = vld [vmem:[#allocation8_spill] sm:$0xff] }
 0x873   : > { %v12127_v61 = vadd.f32 %v4498_v58, %v4386_v62  ;;  %v4166_v58 = vadd.f32 %v14556_v41, %v4053_v24  ;;  %v4059_v62 = vadd.f32 %v14560_v12, %v11845_v44 }
 0x874   : > { %v4504_v14 = vpop.f32.mrf.mxu0 }
 0x875   : > { %4791 = vmatmul.f32.gmra.mxu3 %v7498_v37  ;;  %v4279_v42 = vadd.f32 %v11774_v10, %v4166_v58  ;;  %v14559_v10 = vld [vmem:[#allocation21_spill] sm:$0xff]  ;;  %v14562_v37 = vld [vmem:[#allocation46_spill] sm:$0xff]  ;;  %v14564_v58 = vld [vmem:[#allocation12_spill] sm:$0xff] }
 0x876   : > { %v4282_v35 = vadd.f32 %v14559_v10, %v4169_v11 }
 0x877   : > { %4907 = vmatmul.f32.gmra.mxu0 %v7499_v1 }
 0x878   : > { %v4388_v46 = vpop.f32.mrf.mxu3 }
 0x879   : > { %v4389_v2 = vadd.f32 %v4388_v46, %v4276_v33  ;;  %v7505_v33 = vld [vmem:[#allocation3 + $0xf1] sm:$0xff] }
 0x87b   : > { %v12136_v34 = vadd.f32 %v4501_v57, %v4389_v2  ;;  %v7502_v57 = vld [vmem:[#allocation3 + $0xd0] sm:$0xff] }
 0x87c   : > { %v4507_v15 = vpop.f32.mrf.mxu0  ;;  %v14563_v2 = vld [vmem:[#allocation10_spill] sm:$0xff] }
 0x87d   : > { %4794 = vmatmul.f32.gmra.mxu3 %v7500_v28  ;;  %v4062_v21 = vadd.f32 %v14563_v2, %v11845_v44  ;;  %v7506_v28 = vld [vmem:[#allocation3 + $0xf0] sm:$0xff] }
 0x87f   : > { %4910 = vmatmul.f32.gmra.mxu0 %v7501_v19  ;;  %v14565_v19 = vld [vmem:[#allocation125_spill] sm:$0xff] }
 0x880   : > { %v4391_v7 = vpop.f32.mrf.mxu3 }
 0x881   : > { %v4392_v22 = vadd.f32 %v4391_v7, %v4279_v42  ;;  %v5688_v42 = vld [vmem:[%s14023_s3 + $0x38] sm:$0xff] }
 0x882   : > { %5837 = vmatpush.msrb.mxu1 %v5688_v42 }
 0x883   : > { %v12142_v32 = vadd.f32 %v4504_v14, %v4392_v22  ;;  %v14561_v14 = vld [vmem:[#allocation30_spill] sm:$0xff] }
 0x884   : > { %v4510_v25 = vpop.f32.mrf.mxu0  ;;  %v4172_v13 = vadd.f32 %v14561_v14, %v4059_v62  ;;  %v7507_v22 = vld [vmem:[#allocation3 + $0x109] sm:$0xff]  ;;  %v14569_v14 = vld [vmem:[#allocation36_spill] sm:$0xff] }
 0x885   : > { %4797 = vmatmul.f32.gmra.mxu3 %v7502_v57 }
 0x886   : > { %v4285_v45 = vadd.f32 %v14562_v37, %v4172_v13  ;;  %v4068_v13 = vadd.f32 %v14569_v14, %v11845_v44  ;;  %v5686_v14 = vld [vmem:[%s14023_s3 + $0x28] sm:$0xff] }
 0x887   : > { %4913 = vmatmul.f32.gmra.mxu0 %v7503_v30  ;;  %v14568_v30 = vld [vmem:[#allocation25_spill] sm:$0xff] }
 0x888   : > { %v4394_v63 = vpop.f32.mrf.mxu3 }
 0x889   : > { %v4395_v8 = vadd.f32 %v4394_v63, %v4282_v35  ;;  %v7508_v35 = vld [vmem:[#allocation3 + $0x108] sm:$0xff] }
 0x88b   : > { %v12151_v9 = vadd.f32 %v4507_v15, %v4395_v8  ;;  %v4175_v15 = vadd.f32 %v14564_v58, %v4062_v21  ;;  %v7509_v8 = vld [vmem:[#allocation3 + $0x111] sm:$0xff]  ;;  %v7511_v21 = vld [vmem:[#allocation3 + $0x129] sm:$0xff] }
 0x88c   : > { %v4513_v55 = vpop.f32.mrf.mxu0 }
 0x88d   : > { %4800 = vmatmul.f32.gmra.mxu3 %v7504_v60  ;;  %v4288_v7 = vadd.f32 %v14565_v19, %v4175_v15 }
 0x88f   : > { %4916 = vmatmul.f32.gmra.mxu0 %v7505_v33  ;;  %v7510_v33 = vld [vmem:[#allocation3 + $0x110] sm:$0xff] }
 0x890   : > { %v4397_v1 = vpop.f32.mrf.mxu3 }
 0x891   : > { %v4398_v46 = vadd.f32 %v4397_v1, %v4285_v45  ;;  %v14570_v45 = vld [vmem:[#allocation126_spill] sm:$0xff] }
 0x892   : > { %v5687_v1 = vld [vmem:[%s14023_s3 + $0x30] sm:$0xff] }
 0x893   : > { %v12157_v24 = vadd.f32 %v4510_v25, %v4398_v46  ;;  %v4065_v25 = vadd.f32 %v14566_v20, %v11845_v44  ;;  %5838 = vmatpush.msrb.mxu1 %v5687_v1  ;;  %v14571_v46 = vld [vmem:[#allocation52_spill] sm:$0xff] }
 0x894   : > { %v4516_v41 = vpop.f32.mrf.mxu0 }
 0x895   : > { %4803 = vmatmul.f32.gmra.mxu3 %v7506_v28  ;;  %v4178_v10 = vadd.f32 %v14567_v36, %v4065_v25  ;;  %v14572_v28 = vld [vmem:[#allocation124_spill] sm:$0xff]  ;;  %v7513_v25 = vld [vmem:[#allocation3 + $0x131] sm:$0xff]  ;;  %5839 = vmatpush.msrb.mxu1 %v5686_v14 }
 0x897   : > { %4919 = vmatmul.f32.gmra.mxu0 %v7507_v22  ;;  %v4291_v63 = vadd.f32 %v14568_v30, %v4178_v10 }
 0x898   : > { %v4400_v49 = vpop.f32.mrf.mxu3 }
 0x899   : > { %v4401_v50 = vadd.f32 %v4400_v49, %v4288_v7  ;;  %v14573_v7 = vld [vmem:[#allocation56_spill] sm:$0xff]  ;;  %v7512_v49 = vld [vmem:[#allocation3 + $0x128] sm:$0xff] }
 0x89b   : > { %v12166_v11 = vadd.f32 %v4513_v55, %v4401_v50  ;;  %v4181_v55 = vadd.f32 %v14570_v45, %v4068_v13  ;;  %v14574_v50 = vld [vmem:[#allocation47_spill] sm:$0xff] }
 0x89c   : > { %v4519_v57 = vpop.f32.mrf.mxu0  ;;  %v14577_v13 = vld [vmem:[#allocation39_spill] sm:$0xff] }
 0x89d   : > { %4806 = vmatmul.f32.gmra.mxu3 %v7508_v35  ;;  %v4294_v2 = vadd.f32 %v14571_v46, %v4181_v55  ;;  %v14575_v35 = vld [vmem:[#allocation127_spill] sm:$0xff]  ;;  %v7515_v55 = vld [vmem:[#allocation3 + $0x149] sm:$0xff]  ;;  %v12194_v46 = vpop.f32.mrf.mxu1 }
 0x89e   : > { %v4074_v30 = vadd.f32 %v14575_v35, %v11845_v44  ;;  %v14578_v35 = vld [vmem:[#allocation54_spill] sm:$0xff] }
 0x89f   : > { %4922 = vmatmul.f32.gmra.mxu0 %v7509_v8 }
 0x8a0   : > { %v4403_v12 = vpop.f32.mrf.mxu3 }
 0x8a1   : > { %v4404_v62 = vadd.f32 %v4403_v12, %v4291_v63  ;;  %v14576_v12 = vld [vmem:[#allocation128_spill] sm:$0xff] }
 0x8a3   : > { %v12172_v60 = vadd.f32 %v4516_v41, %v4404_v62  ;;  %v4071_v41 = vadd.f32 %v14572_v28, %v11845_v44  ;;  %v7514_v62 = vld [vmem:[#allocation3 + $0x130] sm:$0xff]  ;;  %v12199_v28 = vpop.f32.mrf.mxu2 }
 0x8a4   : > { %v4522_v37 = vpop.f32.mrf.mxu0 }
 0x8a5   : > { %4809 = vmatmul.f32.gmra.mxu3 %v7510_v33  ;;  %v4184_v22 = vadd.f32 %v14573_v7, %v4071_v41 }
 0x8a7   : > { %4925 = vmatmul.f32.gmra.mxu0 %v7511_v21  ;;  %v4297_v20 = vadd.f32 %v14574_v50, %v4184_v22  ;;  %v7517_v21 = vld [vmem:[#allocation3 + $0x151] sm:$0xff]  ;;  %v12201_v22 = vpop.f32.mrf.mxu1 }
 0x8a8   : > { %v4406_v58 = vpop.f32.mrf.mxu3  ;;  %v7518_v50 = vld [vmem:[#allocation3 + $0x150] sm:$0xff] }
 0x8a9   : > { %v4407_v15 = vadd.f32 %v4406_v58, %v4294_v2  ;;  %v7516_v2 = vld [vmem:[#allocation3 + $0x148] sm:$0xff] }
 0x8ab   : > { %v12181_v42 = vadd.f32 %v4519_v57, %v4407_v15  ;;  %v4187_v57 = vadd.f32 %v14576_v12, %v4074_v30  ;;  %v14153_v30 = vmax.f32 %v14578_v35, 0.0 }
 0x8ac   : > { %v4525_v19 = vpop.f32.mrf.mxu0 }
 0x8ad   : > { %4812 = vmatmul.f32.gmra.mxu3 %v7512_v49  ;;  %v4300_v45 = vadd.f32 %v14577_v13, %v4187_v57  ;;  %v7520_v57 = vld [vmem:[#allocation3 + $0x168] sm:$0xff]  ;;  %v7521_v13 = vld [vmem:[#allocation3 + $0x171] sm:$0xff] }
 0x8af   : > { %4928 = vmatmul.f32.gmra.mxu0 %v7513_v25 }
 0x8b0   : > { %v4409_v36 = vpop.f32.mrf.mxu3 }
 0x8b1   : > { %v4410_v10 = vadd.f32 %v4409_v36, %v4297_v20  ;;  %v7519_v20 = vld [vmem:[#allocation3 + $0x169] sm:$0xff] }
 0x8b3   : > { %v12187_v63 = vadd.f32 %v4522_v37, %v4410_v10 }
 0x8b4   : > { %v4884_v8 = vpop.f32.mrf.mxu0 }
 0x8b5   : > { %4815 = vmatmul.f32.gmra.mxu3 %v7514_v62  ;;  %v12211_v62 = vpop.f32.mrf.mxu1 }
 0x8b7   : > { %4931 = vmatmul.f32.gmra.mxu0 %v7515_v55 }
 0x8b8   : > { %v4412_v33 = vpop.f32.mrf.mxu3 }
 0x8b9   : > { %v4413_v1 = vadd.f32 %v4412_v33, %v4300_v45  ;;  %v14579_v33 = vld [vmem:[#allocation50_spill] sm:$0xff] }
 0x8bb   : > { %v12196_v44 = vadd.f32 %v4525_v19, %v4413_v1  ;;  %v5685_v19 = vld [vmem:[%s14023_s3 + $0x20] sm:$0xff]  ;;  %v14154_v1 = vmax.f32 %v14579_v33, 0.0 }
 0x8bc   : > { %v4887_v37 = vpop.f32.mrf.mxu0  ;;  %5840 = vmatpush.msrb.mxu1 %v5685_v19 }
 0x8bd   : > { %4818 = vmatmul.f32.gmra.mxu3 %v7516_v2  ;;  %v7522_v2 = vld [vmem:[#allocation3 + $0x170] sm:$0xff] }
 0x8bf   : > { %4934 = vmatmul.f32.gmra.mxu0 %v7517_v21  ;;  %v5684_v21 = vld [vmem:[%s14023_s3 + $0x18] sm:$0xff] }
 0x8c0   : > { %v4771_v58 = vpop.f32.mrf.mxu3  ;;  %5841 = vmatpush.msrb.mxu1 %v5684_v21 }
 0x8c1   : > { %v4772_v15 = vadd.f32 %v4771_v58, %v11898_v40 }
 0x8c3   : > { %v4885_v41 = vadd.f32 %v4884_v8, %v4772_v15  ;;  %v12209_v8 = vpop.f32.mrf.mxu2  ;;  %v7523_v15 = vld [vmem:[#allocation3 + $0x189] sm:$0xff] }
 0x8c4   : > { %v4890_v7 = vpop.f32.mrf.mxu0 }
 0x8c5   : > { %v4981_v49 = vmax.f32 %v4885_v41, 0.0  ;;  %4821 = vmatmul.f32.gmra.mxu3 %v7518_v50  ;;  %v12228_v41 = vpop.f32.mrf.mxu1 }
 0x8c7   : > { %5316 = vrot.lane.b32.xlu0 %v4981_v49, %s7699_s15  ;;  %4937 = vmatmul.f32.gmra.mxu0 %v7519_v20  ;;  %v14581_v20 = vld [vmem:[#allocation66_spill] sm:$0xff] }
 0x8c8   : > { %v4774_v25 = vpop.f32.mrf.mxu3 }
 0x8c9   : > { %v4775_v40 = vadd.f32 %v4774_v25, %v11911_v6  ;;  %v14155_v25 = vmax.f32 %v14581_v20, 0.0 }
 0x8cb   : > { %v4888_v36 = vadd.f32 %v4887_v37, %v4775_v40  ;;  %v12222_v58 = vpop.f32.mrf.mxu2 }
 0x8cc   : > { %v4893_v10 = vpop.f32.mrf.mxu0 }
 0x8cd   : > { %v4983_v12 = vmax.f32 %v4888_v36, 0.0  ;;  %4824 = vmatmul.f32.gmra.mxu3 %v7520_v57  ;;  %v7524_v36 = vld [vmem:[#allocation3 + $0x188] sm:$0xff]  ;;  %v7525_v57 = vld [vmem:[#allocation3 + $0x191] sm:$0xff] }
 0x8cf   : > { %5322 = vrot.lane.b32.xlu0 %v14153_v30, %s7699_s15  ;;  %5320 = vrot.lane.b32.xlu2 %v4983_v12, %s7699_s15  ;;  %v4570_v30 = vadd.f32 %v12194_v46, %v11980_v38  ;;  %v5705_v46 = vld [vmem:[%s14023_s3 + $0xc0] sm:$0xff] }
 0x8d0   : > { %v4777_v14 = vpop.f32.mrf.mxu3  ;;  %4940 = vmatmul.f32.gmra.mxu0 %v7521_v13  ;;  %v14582_v13 = vld [vmem:[#allocation26_spill] sm:$0xff] }
 0x8d1   : > { %v4778_v6 = vadd.f32 %v4777_v14, %v11924_v18 }
 0x8d3   : > { %v4891_v45 = vadd.f32 %v4890_v7, %v4778_v6  ;;  %v14580_v7 = vld [vmem:[#allocation58_spill] sm:$0xff]  ;;  %v12236_v14 = vpop.f32.mrf.mxu2 }
 0x8d4   : > { %v4896_v55 = vpop.f32.mrf.mxu0 }
 0x8d5   : > { %v4985_v37 = vmax.f32 %v4891_v45, 0.0  ;;  %4827 = vmatmul.f32.gmra.mxu3 %v7522_v2  ;;  %v14583_v2 = vld [vmem:[#allocation72_spill] sm:$0xff] }
 0x8d6   : > { %v14150_v21 = vmax.f32 %v14583_v2, 0.0 }
 0x8d7   : > { %5324 = vrot.lane.b32.xlu1 %v4985_v37, %s7699_s15  ;;  %5326 = vrot.lane.b32.xlu2 %v14154_v1, %s7699_s15 }
 0x8d8   : > { %v4780_v18 = vpop.f32.mrf.mxu3  ;;  %4943 = vmatmul.f32.gmra.mxu0 %v7523_v15  ;;  %v7526_v15 = vld [vmem:[#allocation3 + $0x190] sm:$0xff] }
 0x8d9   : > { %v4781_v49 = vadd.f32 %v4780_v18, %v14580_v7  ;;  %v5683_v7 = vld [vmem:[%s14023_s3 + $0x10] sm:$0xff] }
 0x8da   : > { %5842 = vmatpush.msrb.mxu1 %v5683_v7  ;;  %v7529_v7 = vld [vmem:[#allocation3 + $0x1b1] sm:$0xff] }
 0x8db   : > { %v4894_v50 = vadd.f32 %v4893_v10, %v4781_v49  ;;  %v12239_v10 = vpop.f32.mrf.mxu1 }
 0x8dc   : > { %v4899_v19 = vpop.f32.mrf.mxu0 }
 0x8dd   : > { %v4987_v40 = vmax.f32 %v4894_v50, 0.0  ;;  %4830 = vmatmul.f32.gmra.mxu3 %v7524_v36  ;;  %v7527_v50 = vld [vmem:[#allocation3 + $0x1a9] sm:$0xff] }
 0x8df   : > { %5328 = vrot.lane.b32.xlu0 %v4987_v40, %s7699_s15  ;;  %5330 = vrot.lane.b32.xlu1 %v14155_v25, %s7699_s15  ;;  %v12250_v40 = vpop.f32.mrf.mxu2  ;;  %v7532_v25 = vld [vmem:[#allocation3 + $0x1c8] sm:$0xff] }
 0x8e0   : > { %v4783_v12 = vpop.f32.mrf.mxu3  ;;  %4946 = vmatmul.f32.gmra.mxu0 %v7525_v57  ;;  %v14584_v57 = vld [vmem:[#allocation77_spill] sm:$0xff] }
 0x8e1   : > { %v4784_v6 = vadd.f32 %v4783_v12, %v14582_v13  ;;  %v14151_v13 = vmax.f32 %v14584_v57, 0.0 }
 0x8e3   : > { %v4897_v45 = vadd.f32 %v4896_v55, %v4784_v6  ;;  %v12253_v6 = vpop.f32.mrf.mxu1 }
 0x8e4   : > { %v4902_v37 = vpop.f32.mrf.mxu0 }
 0x8e5   : > { %v4989_v18 = vmax.f32 %v4897_v45, 0.0  ;;  %4833 = vmatmul.f32.gmra.mxu3 %v7526_v15  ;;  %v7528_v15 = vld [vmem:[#allocation3 + $0x1a8] sm:$0xff] }
 0x8e7   : > { %5334 = vrot.lane.b32.xlu0 %v14150_v21, %s7699_s15  ;;  %5332 = vrot.lane.b32.xlu2 %v4989_v18, %s7699_s15  ;;  %v7530_v21 = vld [vmem:[#allocation3 + $0x1b0] sm:$0xff] }
 0x8e8   : > { %v4786_v49 = vpop.f32.mrf.mxu3  ;;  %4949 = vmatmul.f32.gmra.mxu0 %v7527_v50 }
 0x8e9   : > { %v4787_v55 = vadd.f32 %v4786_v49, %v11963_v47  ;;  %v5712_v49 = vld [vmem:[%s14023_s3 + $0xf8] sm:$0xff] }
 0x8ea   : > { %5942 = vmatpush.msra.mxu2 %v5712_v49 }
 0x8eb   : > { %v4900_v36 = vadd.f32 %v4899_v19, %v4787_v55  ;;  %v14585_v55 = vld [vmem:[#allocation82_spill] sm:$0xff] }
 0x8ec   : > { %v4905_v12 = vpop.f32.mrf.mxu0 }
 0x8ed   : > { %v4991_v45 = vmax.f32 %v4900_v36, 0.0  ;;  %4836 = vmatmul.f32.gmra.mxu3 %v7528_v15  ;;  %v14152_v36 = vmax.f32 %v14585_v55, 0.0  ;;  %v12264_v15 = vpop.f32.mrf.mxu2 }
 0x8ef   : > { %5336 = vrot.lane.b32.xlu1 %v4991_v45, %s7699_s15  ;;  %5338 = vrot.lane.b32.xlu2 %v14151_v13, %s7699_s15  ;;  %v14586_v13 = vld [vmem:[#allocation87_spill] sm:$0xff] }
 0x8f0   : > { %v4789_v18 = vpop.f32.mrf.mxu3  ;;  %4952 = vmatmul.f32.gmra.mxu0 %v7529_v7  ;;  %v5711_v7 = vld [vmem:[%s14023_s3 + $0xf0] sm:$0xff] }
 0x8f1   : > { %v4790_v47 = vadd.f32 %v4789_v18, %v11976_v27  ;;  %v5682_v27 = vld [vmem:[%s14023_s3 + $0x8] sm:$0xff]  ;;  %5943 = vmatpush.msra.mxu2 %v5711_v7  ;;  %v12275_v18 = vpop.f32.mrf.mxu1 }
 0x8f2   : > { %5843 = vmatpush.msrb.mxu1 %v5682_v27 }
 0x8f3   : > { %v4903_v19 = vadd.f32 %v4902_v37, %v4790_v47  ;;  %v5710_v37 = vld [vmem:[%s14023_s3 + $0xe8] sm:$0xff] }
 0x8f4   : > { %v4908_v50 = vpop.f32.mrf.mxu0  ;;  %5944 = vmatpush.msra.mxu2 %v5710_v37  ;;  %v5728_v37 = vld [vmem:[%s14023_s3 + $0x178] sm:$0xff] }
 0x8f5   : > { %v4993_v45 = vmax.f32 %v4903_v19, 0.0  ;;  %4839 = vmatmul.f32.gmra.mxu3 %v7530_v21  ;;  %v5709_v21 = vld [vmem:[%s14023_s3 + $0xe0] sm:$0xff]  ;;  %v7531_v19 = vld [vmem:[#allocation3 + $0x1c9] sm:$0xff]  ;;  %v12301_v38 = vpop.f32.mrf.mxu2 }
 0x8f6   : > { %5945 = vmatpush.msra.mxu2 %v5709_v21  ;;  %6055 = vmatpush.msra.mxu3 %v5728_v37  ;;  %v4683_v21 = vadd.f32 %v12199_v28, %v4570_v30  ;;  %v5727_v28 = vld [vmem:[%s14023_s3 + $0x170] sm:$0xff] }
 0x8f7   : > { %5340 = vrot.lane.b32.xlu0 %v4993_v45, %s7699_s15  ;;  %5342 = vrot.lane.b32.xlu1 %v14152_v36, %s7699_s15  ;;  %v5708_v45 = vld [vmem:[%s14023_s3 + $0xd8] sm:$0xff]  ;;  %v14156_v36 = vmax.f32 %v14586_v13, 0.0  ;;  %v7533_v37 = vld [vmem:[#allocation3 + $0x1d0] sm:$0xff] }
 0x8f8   : > { %v4792_v47 = vpop.f32.mrf.mxu3  ;;  %4955 = vmatmul.f32.gmra.mxu0 %v7531_v19  ;;  %5946 = vmatpush.msra.mxu2 %v5708_v45 }
 0x8f9   : > { %v4793_v49 = vadd.f32 %v4792_v47, %v11991_v54  ;;  %v5707_v54 = vld [vmem:[%s14023_s3 + $0xd0] sm:$0xff]  ;;  %v12311_v47 = vpop.f32.mrf.mxu1  ;;  %6056 = vmatpush.msra.mxu3 %v5727_v28 }
 0x8fa   : > { %5947 = vmatpush.msra.mxu2 %v5707_v54  ;;  %v4573_v54 = vadd.f32 %v12201_v22, %v11995_v39  ;;  %v5702_v39 = vld [vmem:[%s14023_s3 + $0xa8] sm:$0xff] }
 0x8fb   : > { %v4906_v7 = vadd.f32 %v4905_v12, %v4793_v49  ;;  %v5706_v12 = vld [vmem:[%s14023_s3 + $0xc8] sm:$0xff] }
 0x8fc   : > { %v4911_v27 = vpop.f32.mrf.mxu0  ;;  %5948 = vmatpush.msra.mxu2 %v5706_v12  ;;  %v4686_v22 = vadd.f32 %v12209_v8, %v4573_v54  ;;  %v7534_v28 = vld [vmem:[#allocation3 + $0x1e9] sm:$0xff]  ;;  %v5701_v8 = vld [vmem:[%s14023_s3 + $0xa0] sm:$0xff] }
 0x8fd   : > { %v4995_v1 = vmax.f32 %v4906_v7, 0.0  ;;  %4842 = vmatmul.f32.gmra.mxu3 %v7532_v25  ;;  %v14587_v7 = vld [vmem:[#allocation92_spill] sm:$0xff]  ;;  %v5743_v54 = vld [vmem:[%s14023_s3 + $0x1f0] sm:$0xff] }
 0x8fe   : > { %5949 = vmatpush.msra.mxu2 %v5705_v46  ;;  %v4998_v45 = vmax.f32 %v14587_v7, 0.0  ;;  %v5725_v46 = vld [vmem:[%s14023_s3 + $0x160] sm:$0xff] }
 0x8ff   : > { %5346 = vrot.lane.b32.xlu0 %v14156_v36, %s7699_s15  ;;  %5344 = vrot.lane.b32.xlu2 %v4995_v1, %s7699_s15  ;;  %v5704_v1 = vld [vmem:[%s14023_s3 + $0xb8] sm:$0xff]  ;;  %v7537_v36 = vld [vmem:[#allocation3 + $0x1f0] sm:$0xff] }
 0x900   : > { %v4795_v25 = vpop.f32.mrf.mxu3  ;;  %4958 = vmatmul.f32.gmra.mxu0 %v12028_v48  ;;  %5950 = vmatpush.msra.mxu2 %v5704_v1  ;;  %v5726_v48 = vld [vmem:[%s14023_s3 + $0x168] sm:$0xff]  ;;  %v12353_v1 = vpop.f32.mrf.mxu2 }
 0x901   : > { %v4796_v19 = vadd.f32 %v4795_v25, %v4683_v21  ;;  %v5681_v21 = vld [vmem:[%s14023_s3] sm:$0xff]  ;;  %6057 = vmatpush.msra.mxu3 %v5726_v48  ;;  %v5744_v25 = vld [vmem:[%s14023_s3 + $0x1f8] sm:$0xff] }
 0x902   : > { %5844 = vmatpush.msrb.mxu1 %v5681_v21  ;;  %6168 = vmatpush.msra.mxu0 %v5744_v25  ;;  %v5700_v21 = vld [vmem:[%s14023_s3 + $0x98] sm:$0xff] }
 0x903   : > { %v4909_v30 = vadd.f32 %v4908_v50, %v4796_v19  ;;  %v5703_v50 = vld [vmem:[%s14023_s3 + $0xb0] sm:$0xff]  ;;  %6058 = vmatpush.msra.mxu3 %v5725_v46 }
 0x904   : > { %v12319_v49 = vpop.f32.mrf.mxu0  ;;  %5951 = vmatpush.msra.mxu2 %v5703_v50  ;;  %v5723_v50 = vld [vmem:[%s14023_s3 + $0x150] sm:$0xff]  ;;  %6169 = vmatpush.msra.mxu0 %v5743_v54 }
 0x905   : > { %v4997_v12 = vmax.f32 %v4909_v30, 0.0  ;;  %4845 = vmatmul.f32.gmra.mxu3 %v7533_v37  ;;  %v5724_v30 = vld [vmem:[%s14023_s3 + $0x158] sm:$0xff] }
 0x906   : > { %5952 = vmatpush.msra.mxu2 %v5702_v39  ;;  %6059 = vmatpush.msra.mxu3 %v5724_v30  ;;  %v5742_v39 = vld [vmem:[%s14023_s3 + $0x1e8] sm:$0xff] }
 0x907   : > { %5348 = vrot.lane.b32.xlu1 %v4997_v12, %s7699_s15  ;;  %5350 = vrot.lane.b32.xlu2 %v4998_v45, %s7699_s15  ;;  %v12358_v12 = vpop.f32.mrf.mxu1  ;;  %v5722_v30 = vld [vmem:[%s14023_s3 + $0x148] sm:$0xff] }
 0x908   : > { %v4798_v19 = vpop.f32.mrf.mxu3  ;;  %4961 = vmatmul.f32.gmra.mxu0 %v7534_v28  ;;  %5953 = vmatpush.msra.mxu2 %v5701_v8  ;;  %v7535_v28 = vld [vmem:[#allocation3 + $0x1e8] sm:$0xff]  ;;  %v5699_v8 = vld [vmem:[%s14023_s3 + $0x90] sm:$0xff] }
 0x909   : > { %v4799_v48 = vadd.f32 %v4798_v19, %v4686_v22  ;;  %v14588_v22 = vld [vmem:[#allocation98_spill] sm:$0xff]  ;;  %6060 = vmatpush.msra.mxu3 %v5723_v50  ;;  %6170 = vmatpush.msra.mxu0 %v5742_v39  ;;  %v5698_v50 = vld [vmem:[%s14023_s3 + $0x88] sm:$0xff]  ;;  %v5720_v39 = vld [vmem:[%s14023_s3 + $0x138] sm:$0xff] }
 0x90a   : > { %v5000_v25 = vmax.f32 %v14588_v22, 0.0  ;;  %5954 = vmatpush.msra.mxu2 %v5700_v21 }
 0x90b   : > { %v4912_v37 = vadd.f32 %v4911_v27, %v4799_v48  ;;  %v4576_v27 = vadd.f32 %v12211_v62, %v12008_v31  ;;  %v5741_v48 = vld [vmem:[%s14023_s3 + $0x1e0] sm:$0xff]  ;;  %6061 = vmatpush.msra.mxu3 %v5722_v30  ;;  %v5719_v30 = vld [vmem:[%s14023_s3 + $0x130] sm:$0xff] }
 0x90c   : > { %v12366_v46 = vpop.f32.mrf.mxu0  ;;  %v5721_v62 = vld [vmem:[%s14023_s3 + $0x140] sm:$0xff]  ;;  %5955 = vmatpush.msra.mxu2 %v5699_v8  ;;  %6171 = vmatpush.msra.mxu0 %v5741_v48 }
 0x90d   : > { %v4999_v19 = vmax.f32 %v4912_v37, 0.0  ;;  %4848 = vmatmul.f32.gmra.mxu3 %v7535_v28  ;;  %v4689_v31 = vadd.f32 %v12222_v58, %v4576_v27  ;;  %v7536_v37 = vld [vmem:[#allocation3 + $0x1f1] sm:$0xff]  ;;  %v5697_v27 = vld [vmem:[%s14023_s3 + $0x80] sm:$0xff] }
 0x90e   : > { %v5740_v58 = vld [vmem:[%s14023_s3 + $0x1d8] sm:$0xff]  ;;  %6062 = vmatpush.msra.mxu3 %v5721_v62  ;;  %5956 = vmatpush.msra.mxu2 %v5698_v50  ;;  %v14589_v48 = vld [vmem:[#allocation104_spill] sm:$0xff]  ;;  %v4579_v62 = vadd.f32 %v12228_v41, %v12024_v3  ;;  %v12417_v50 = vld [vmem:[#allocation3 + $0x8] sm:$0xff] }
 0x90f   : > { %5352 = vrot.lane.b32.xlu0 %v4999_v19, %s7699_s15  ;;  %5354 = vrot.lane.b32.xlu1 %v5000_v25, %s7699_s15  ;;  %v12403_v19 = vpop.f32.mrf.mxu2  ;;  %v5573_v3 = vld [vmem:[#allocation4 + $0x7] sm:$0xff] }
 0x910   : > { %v4801_v54 = vpop.f32.mrf.mxu3  ;;  %4964 = vmatmul.f32.gmra.mxu0 %v7536_v37  ;;  %6063 = vmatpush.msra.mxu3 %v5720_v39  ;;  %v4692_v41 = vadd.f32 %v12236_v14, %v4579_v62  ;;  %v5738_v14 = vld [vmem:[%s14023_s3 + $0x1c8] sm:$0xff]  ;;  %v5715_v62 = vld [vmem:[%s14023_s3 + $0x110] sm:$0xff] }
 0x911   : > { %v4802_v21 = vadd.f32 %v4801_v54, %v4689_v31  ;;  %6172 = vmatpush.msra.mxu0 %v5740_v58  ;;  %v14157_v31 = vmax.f32 %v14589_v48, 0.0  ;;  %v12412_v54 = vpop.f32.mrf.mxu1  ;;  %5957 = vmatpush.msra.mxu2 %v5697_v27  ;;  %v5739_v58 = vld [vmem:[%s14023_s3 + $0x1d0] sm:$0xff] }
 0x912   : > { %5958 = vmatmul.f32.vlgmr.msra.gmra.mxu2 %v12417_v50  ;;  %6064 = vmatpush.msra.mxu3 %v5719_v30  ;;  %v5737_v30 = vld [vmem:[%s14023_s3 + $0x1c0] sm:$0xff] }
 0x913   : > { %v4915_v28 = vadd.f32 %v12319_v49, %v4802_v21  ;;  %v5718_v49 = vld [vmem:[%s14023_s3 + $0x128] sm:$0xff]  ;;  %v5760_v21 = vld [vmem:[%s14023_s3 + $0x278] sm:$0xff]  ;;  %6173 = vmatpush.msra.mxu0 %v5739_v58  ;;  %5845 = vmatmul.f32.vlgmr.msrb.gmra.mxu1 %v5573_v3  ;;  %v4582_v3 = vadd.f32 %v12239_v10, %v12036_v59 }
 0x914   : > { %v4920_v8 = vpop.f32.mrf.mxu0  ;;  %6065 = vmatpush.msra.mxu3 %v5718_v49  ;;  %6281 = vmatpush.msra.mxu1 %v5760_v21  ;;  %v14590_v49 = vld [vmem:[#allocation108_spill] sm:$0xff]  ;;  %v5736_v21 = vld [vmem:[%s14023_s3 + $0x1b8] sm:$0xff] }
 0x915   : > { %v5001_v37 = vmax.f32 %v4915_v28, 0.0  ;;  %4851 = vmatmul.f32.gmra.mxu3 %v7537_v36  ;;  %v5717_v36 = vld [vmem:[%s14023_s3 + $0x120] sm:$0xff]  ;;  %v5716_v28 = vld [vmem:[%s14023_s3 + $0x118] sm:$0xff]  ;;  %6174 = vmatpush.msra.mxu0 %v5738_v14  ;;  %v5004_v58 = vmax.f32 %v14590_v49, 0.0  ;;  %v4695_v59 = vadd.f32 %v12250_v40, %v4582_v3  ;;  %v12475_v40 = vpop.permute.xlu2 %5314 }
 0x916   : > { %6066 = vmatpush.msra.mxu3 %v5717_v36  ;;  %v14591_v3 = vld [vmem:[#allocation112_spill] sm:$0xff] }
 0x917   : > { %5358 = vrot.lane.b32.xlu0 %v14157_v31, %s7699_s15  ;;  %5356 = vrot.lane.b32.xlu2 %v5001_v37, %s7699_s15 }
 0x918   : > { %v4804_v39 = vpop.f32.mrf.mxu3  ;;  %4967 = vmatmul.f32.gmra.mxu0 %v12064_v23  ;;  %6067 = vmatpush.msra.mxu3 %v5716_v28 }
 0x919   : > { %v4805_v27 = vadd.f32 %v4804_v39, %v4692_v41  ;;  %v12451_v41 = vpop.f32.mrf.mxu2  ;;  %6175 = vmatpush.msra.mxu0 %v5737_v30  ;;  %v5574_v39 = vld [vmem:[#allocation4 + $0xf] sm:$0xff]  ;;  %v12462_v10 = vpop.f32.mrf.mxu1 }
 0x91a   : > { %5961 = vmatmul.f32.gmra.mxu2 %v12417_v50  ;;  %6068 = vmatpush.msra.mxu3 %v5715_v62  ;;  %v5734_v30 = vld [vmem:[%s14023_s3 + $0x1a8] sm:$0xff] }
 0x91b   : > { %v4918_v23 = vadd.f32 %v12366_v46, %v4805_v27  ;;  %v5714_v46 = vld [vmem:[%s14023_s3 + $0x108] sm:$0xff]  ;;  %v5735_v27 = vld [vmem:[%s14023_s3 + $0x1b0] sm:$0xff]  ;;  %6176 = vmatpush.msra.mxu0 %v5736_v21  ;;  %5848 = vmatmul.f32.gmra.mxu1 %v5574_v39  ;;  %v5733_v21 = vld [vmem:[%s14023_s3 + $0x1a0] sm:$0xff] }
 0x91c   : > { %v4923_v37 = vpop.f32.mrf.mxu0  ;;  %6069 = vmatpush.msra.mxu3 %v5714_v46  ;;  %v5759_v46 = vld [vmem:[%s14023_s3 + $0x270] sm:$0xff] }
 0x91d   : > { %v5003_v36 = vmax.f32 %v4918_v23, 0.0  ;;  %4854 = vmatmul.f32.gmra.mxu3 %v12046_v5  ;;  %v5713_v5 = vld [vmem:[%s14023_s3 + $0x100] sm:$0xff]  ;;  %6177 = vmatpush.msra.mxu0 %v5735_v27  ;;  %v5731_v27 = vld [vmem:[%s14023_s3 + $0x190] sm:$0xff] }
 0x91e   : > { %6070 = vmatpush.msra.mxu3 %v5713_v5  ;;  %6282 = vmatpush.msra.mxu1 %v5759_v46  ;;  %v4588_v46 = vadd.f32 %v12275_v18, %v12061_v26  ;;  %v5729_v26 = vld [vmem:[%s14023_s3 + $0x180] sm:$0xff] }
 0x91f   : > { %5360 = vrot.lane.b32.xlu1 %v5003_v36, %s7699_s15  ;;  %5362 = vrot.lane.b32.xlu2 %v5004_v58, %s7699_s15  ;;  %v4585_v36 = vadd.f32 %v12253_v6, %v12051_v51  ;;  %v5319_v51 = vpop.permute.xlu1 %5318  ;;  %v7539_v6 = vld [vmem:[#allocation3 + $0x229] sm:$0xff] }
 0x920   : > { %v4807_v14 = vpop.f32.mrf.mxu3  ;;  %4970 = vmatmul.f32.gmra.mxu0 %v12076_v43  ;;  %v5006_v43 = vmax.f32 %v14591_v3, 0.0 }
 0x921   : > { %v4808_v28 = vadd.f32 %v4807_v14, %v4695_v59  ;;  %6178 = vmatpush.msra.mxu0 %v5734_v30  ;;  %v12491_v39 = vpop.f32.mrf.mxu2  ;;  %v5732_v59 = vld [vmem:[%s14023_s3 + $0x198] sm:$0xff]  ;;  %v12500_v5 = vpop.f32.mrf.mxu1 }
 0x923   : > { %v4921_v23 = vadd.f32 %v4920_v8, %v4808_v28  ;;  %v4698_v8 = vadd.f32 %v12264_v15, %v4585_v36  ;;  %6179 = vmatpush.msra.mxu0 %v5733_v21 }
 0x924   : > { %v4926_v62 = vpop.f32.mrf.mxu0 }
 0x925   : > { %v5005_v31 = vmax.f32 %v4921_v23, 0.0  ;;  %4857 = vmatmul.f32.gmra.mxu3 %v12056_v0  ;;  %6180 = vmatpush.msra.mxu0 %v5732_v59  ;;  %v14592_v23 = vld [vmem:[#allocation117_spill] sm:$0xff] }
 0x926   : > { %v5008_v36 = vmax.f32 %v14592_v23, 0.0 }
 0x927   : > { %5364 = vrot.lane.b32.xlu0 %v5005_v31, %s7699_s15  ;;  %5366 = vrot.lane.b32.xlu1 %v5006_v43, %s7699_s15 }
 0x928   : > { %v4810_v0 = vpop.f32.mrf.mxu3  ;;  %4973 = vmatmul.f32.gmra.mxu0 %v7539_v6 }
 0x929   : > { %v4811_v15 = vadd.f32 %v4810_v0, %v4698_v8  ;;  %v5321_v14 = vpop.permute.xlu2 %5320  ;;  %6181 = vmatpush.msra.mxu0 %v5731_v27  ;;  %v4701_v8 = vadd.f32 %v12301_v38, %v4588_v46  ;;  %v7540_v0 = vld [vmem:[#allocation3 + $0x231] sm:$0xff]  ;;  %v12524_v18 = vpop.f32.mrf.mxu2  ;;  %v4591_v27 = vadd.f32 %v12311_v47, %v12073_v4  ;;  %v5758_v46 = vld [vmem:[%s14023_s3 + $0x268] sm:$0xff] }
 0x92a   : > { %v5443_v31 = vsel %vm1547_vm9, %v5319_v51, %v5321_v14  ;;  %v12526_v59 = vpop.f32.mrf.mxu1  ;;  %v14593_v14 = vld [vmem:[#allocation118_spill] sm:$0xff]  ;;  %6283 = vmatpush.msra.mxu1 %v5758_v46 }
 0x92b   : > { %v4924_v28 = vadd.f32 %v4923_v37, %v4811_v15  ;;  %5509 = vst.msk [vmem:[#allocation4 + $0x30] sm:$0xff] %vm5507_vm12, %v5443_v31  ;;  %v5730_v37 = vld [vmem:[%s14023_s3 + $0x188] sm:$0xff]  ;;  %v5010_v31 = vmax.f32 %v14593_v14, 0.0 }
 0x92c   : > { %5542 = vst.msk [vmem:[#allocation4 + $0x30] sm:$0xff] %vm5540_vm13, %v12417_v50  ;;  %v4929_v30 = vpop.f32.mrf.mxu0  ;;  %6182 = vmatpush.msra.mxu0 %v5730_v37  ;;  %v5645_v47 = vld [vmem:[#allocation4 + $0x9] sm:$0xff] }
 0x92d   : > { %v5007_v21 = vmax.f32 %v4924_v28, 0.0  ;;  %4860 = vmatmul.f32.gmra.mxu3 %v12417_v50 }
 0x92e   : > { %6183 = vmatpush.msra.mxu0 %v5729_v26  ;;  %v14594_v26 = vld [vmem:[#allocation119_spill] sm:$0xff] }
 0x92f   : > { %5370 = vrot.lane.b32.xlu0 %v5008_v36, %s7699_s15  ;;  %5368 = vrot.lane.b32.xlu2 %v5007_v21, %s7699_s15  ;;  %v4704_v21 = vadd.f32 %v12353_v1, %v4591_v27 }
 0x930   : > { %v4813_v51 = vpop.f32.mrf.mxu3  ;;  %4976 = vmatmul.f32.gmra.mxu0 %v7540_v0 }
 0x931   : > { %v4814_v6 = vadd.f32 %v4813_v51, %v4701_v8  ;;  %v12542_v51 = vpop.f32.mrf.mxu2 }
 0x932   : > { %v12550_v27 = vpop.f32.mrf.mxu1 }
 0x933   : > { %v4927_v38 = vadd.f32 %v4926_v62, %v4814_v6  ;;  %v5012_v6 = vmax.f32 %v14594_v26, 0.0 }
 0x934   : > { %v4932_v15 = vpop.f32.mrf.mxu0 }
 0x935   : > { %v5009_v28 = vmax.f32 %v4927_v38, 0.0  ;;  %4863 = vmatmul.f32.gmra.mxu3 %v12417_v50  ;;  %v4594_v38 = vadd.f32 %v12358_v12, %v12082_v56  ;;  %v14595_v12 = vld [vmem:[#allocation120_spill] sm:$0xff] }
 0x937   : > { %5372 = vrot.lane.b32.xlu1 %v5009_v28, %s7699_s15  ;;  %5374 = vrot.lane.b32.xlu2 %v5010_v31, %s7699_s15 }
 0x938   : > { %v4816_v62 = vpop.f32.mrf.mxu3 }
 0x939   : > { %v4817_v37 = vadd.f32 %v4816_v62, %v4704_v21  ;;  %v5317_v8 = vpop.permute.xlu0 %5316  ;;  %v5646_v21 = vld [vmem:[#allocation4 + $0x11] sm:$0xff] }
 0x93a   : > { %v5442_v4 = vsel %vm1547_vm9, %v12475_v40, %v5317_v8  ;;  %v4707_v40 = vadd.f32 %v12403_v19, %v4594_v38  ;;  %v4597_v19 = vadd.f32 %v12412_v54, %v12091_v17  ;;  %v5757_v38 = vld [vmem:[%s14023_s3 + $0x260] sm:$0xff]  ;;  %v5327_v17 = vpop.permute.xlu2 %5326 }
 0x93b   : > { %v4930_v0 = vadd.f32 %v4929_v30, %v4817_v37  ;;  %5508 = vst.msk [vmem:[#allocation4 + $0x28] sm:$0xff] %vm5507_vm12, %v5442_v4  ;;  %v14158_v4 = vmax.f32 %v14595_v12, 0.0  ;;  %6284 = vmatpush.msra.mxu1 %v5757_v38 }
 0x93c   : > { %5541 = vst.msk [vmem:[#allocation4 + $0x28] sm:$0xff] %vm5540_vm13, %v12417_v50  ;;  %v4935_v1 = vpop.f32.mrf.mxu0 }
 0x93d   : > { %v5011_v28 = vmax.f32 %v4930_v0, 0.0  ;;  %6071 = vmatmul.f32.vlgmr.msra.gmra.mxu3 %v5645_v47  ;;  %v12560_v47 = vpop.f32.mrf.mxu2 }
 0x93f   : > { %5376 = vrot.lane.b32.xlu0 %v5011_v28, %s7699_s15  ;;  %5378 = vrot.lane.b32.xlu1 %v5012_v6, %s7699_s15  ;;  %v12566_v28 = vpop.f32.mrf.mxu1 }
 0x940   : > { %v4819_v30 = vpop.f32.mrf.mxu3 }
 0x941   : > { %v4820_v46 = vadd.f32 %v4819_v30, %v4707_v40  ;;  %v5323_v40 = vpop.permute.xlu0 %5322 }
 0x943   : > { %v4933_v62 = vadd.f32 %v4932_v15, %v4820_v46  ;;  %v5575_v37 = vld [vmem:[#allocation4 + $0x27] sm:$0xff]  ;;  %v4710_v15 = vadd.f32 %v12451_v41, %v4597_v19 }
 0x944   : > { %v5611_v8 = vld [vmem:[#allocation4 + $0x28] sm:$0xff]  ;;  %5851 = vmatmul.f32.gmra.mxu1 %v5575_v37  ;;  %v4938_v56 = vpop.f32.mrf.mxu0  ;;  %6184 = vmatmul.f32.vlgmr.msra.gmra.mxu0 %v5575_v37 }
 0x945   : > { %5964 = vmatmul.f32.gmra.mxu2 %v5611_v8  ;;  %v5013_v0 = vmax.f32 %v4933_v62, 0.0  ;;  %6074 = vmatmul.f32.gmra.mxu3 %v5646_v21  ;;  %v5576_v21 = vld [vmem:[#allocation4 + $0x2f] sm:$0xff] }
 0x946   : > { %v5612_v62 = vld [vmem:[#allocation4 + $0x30] sm:$0xff]  ;;  %v14596_v41 = vld [vmem:[#allocation121_spill] sm:$0xff] }
 0x947   : > { %5382 = vrot.lane.b32.xlu0 %v14158_v4, %s7699_s15  ;;  %5380 = vrot.lane.b32.xlu2 %v5013_v0, %s7699_s15  ;;  %v5647_v8 = vld [vmem:[#allocation4 + $0x29] sm:$0xff]  ;;  %v14159_v19 = vmax.f32 %v14596_v41, 0.0  ;;  %v4600_v0 = vadd.f32 %v12462_v10, %v12097_v53  ;;  %v14622_v23 = vmax.f32 %v14596_v41, 0.0 }
 0x948   : > { %v4822_v54 = vpop.f32.mrf.mxu3 }
 0x949   : > { %v4823_v30 = vadd.f32 %v4822_v54, %v4710_v15  ;;  %v5325_v46 = vpop.permute.xlu1 %5324 }
 0x94a   : > { %v5444_v37 = vsel %vm1547_vm9, %v5323_v40, %v5325_v46  ;;  %v4713_v40 = vadd.f32 %v12491_v39, %v4600_v0  ;;  %v12580_v46 = vpop.f32.mrf.mxu2 }
 0x94b   : > { %v4936_v38 = vadd.f32 %v4935_v1, %v4823_v30  ;;  %5510 = vst.msk [vmem:[#allocation4 + $0x48] sm:$0xff] %vm5507_vm12, %v5444_v37  ;;  %v5333_v1 = vpop.permute.xlu2 %5332 }
 0x94c   : > { %5543 = vst.msk [vmem:[#allocation4 + $0x48] sm:$0xff] %vm5540_vm13, %v12417_v50  ;;  %5854 = vmatmul.f32.gmra.mxu1 %v5576_v21  ;;  %6187 = vmatmul.f32.gmra.mxu0 %v5576_v21  ;;  %v5648_v21 = vld [vmem:[#allocation4 + $0x31] sm:$0xff] }
 0x94d   : > { %5967 = vmatmul.f32.gmra.mxu2 %v5612_v62  ;;  %v5015_v15 = vmax.f32 %v4936_v38, 0.0  ;;  %6077 = vmatmul.f32.gmra.mxu3 %v5647_v8  ;;  %v4941_v54 = vpop.f32.mrf.mxu0  ;;  %v12588_v8 = vpop.f32.mrf.mxu1 }
 0x94f   : > { %5384 = vrot.lane.b32.xlu1 %v5015_v15, %s7699_s15  ;;  %5386 = vrot.lane.b32.xlu2 %v14159_v19, %s7699_s15  ;;  %v14597_v15 = vld [vmem:[#allocation122_spill] sm:$0xff] }
 0x950   : > { %v4825_v30 = vpop.f32.mrf.mxu3 }
 0x951   : > { %v4826_v62 = vadd.f32 %v4825_v30, %v4713_v40  ;;  %v5329_v37 = vpop.permute.xlu0 %5328  ;;  %v5331_v4 = vpop.permute.xlu1 %5330  ;;  %v5018_v40 = vmax.f32 %v14597_v15, 0.0 }
 0x952   : > { %v5445_v53 = vsel %vm1547_vm9, %v5327_v17, %v5329_v37  ;;  %v5446_v10 = vsel %vm1547_vm9, %v5331_v4, %v5333_v1  ;;  %v4603_v17 = vadd.f32 %v12500_v5, %v12106_v16  ;;  %v5756_v4 = vld [vmem:[%s14023_s3 + $0x258] sm:$0xff]  ;;  %v12607_v5 = vpop.f32.mrf.mxu2 }
 0x953   : > { %v4939_v39 = vadd.f32 %v4938_v56, %v4826_v62  ;;  %5511 = vst.msk [vmem:[#allocation4 + $0x50] sm:$0xff] %vm5507_vm12, %v5445_v53  ;;  %v5577_v38 = vld [vmem:[#allocation4 + $0x47] sm:$0xff]  ;;  %6285 = vmatpush.msra.mxu1 %v5756_v4 }
 0x954   : > { %v5613_v0 = vld [vmem:[#allocation4 + $0x48] sm:$0xff]  ;;  %5544 = vst.msk [vmem:[#allocation4 + $0x50] sm:$0xff] %vm5540_vm13, %v12417_v50  ;;  %5857 = vmatmul.f32.gmra.mxu1 %v5577_v38  ;;  %6190 = vmatmul.f32.gmra.mxu0 %v5577_v38  ;;  %v4716_v1 = vadd.f32 %v12524_v18, %v4603_v17  ;;  %v4606_v18 = vadd.f32 %v12526_v59, %v12112_v52 }
 0x955   : > { %5970 = vmatmul.f32.gmra.mxu2 %v5613_v0  ;;  %v5017_v30 = vmax.f32 %v4939_v39, 0.0  ;;  %5512 = vst.msk [vmem:[#allocation4 + $0x68] sm:$0xff] %vm5507_vm12, %v5446_v10  ;;  %6080 = vmatmul.f32.gmra.mxu3 %v5648_v21  ;;  %v4944_v56 = vpop.f32.mrf.mxu0  ;;  %v14598_v39 = vld [vmem:[#allocation19_spill] sm:$0xff]  ;;  %v12612_v0 = vpop.f32.mrf.mxu1 }
 0x956   : > { %5545 = vst.msk [vmem:[#allocation4 + $0x68] sm:$0xff] %vm5540_vm13, %v12417_v50  ;;  %v14160_v38 = vmax.f32 %v14598_v39, 0.0  ;;  %v4719_v4 = vadd.f32 %v12542_v51, %v4606_v18  ;;  %v14599_v51 = vld [vmem:[#allocation22_spill] sm:$0xff] }
 0x957   : > { %5388 = vrot.lane.b32.xlu0 %v5017_v30, %s7699_s15  ;;  %5390 = vrot.lane.b32.xlu1 %v5018_v40, %s7699_s15  ;;  %v14162_v18 = vmax.f32 %v14599_v51, 0.0 }
 0x958   : > { %v4828_v16 = vpop.f32.mrf.mxu3 }
 0x959   : > { %v4829_v62 = vadd.f32 %v4828_v16, %v4716_v1  ;;  %v5335_v16 = vpop.permute.xlu0 %5334 }
 0x95b   : > { %v4942_v37 = vadd.f32 %v4941_v54, %v4829_v62  ;;  %v5578_v53 = vld [vmem:[#allocation4 + $0x4f] sm:$0xff]  ;;  %v5339_v54 = vpop.permute.xlu2 %5338 }
 0x95c   : > { %v5614_v10 = vld [vmem:[#allocation4 + $0x50] sm:$0xff]  ;;  %5860 = vmatmul.f32.gmra.mxu1 %v5578_v53  ;;  %6193 = vmatmul.f32.gmra.mxu0 %v5578_v53  ;;  %v12620_v53 = vpop.f32.mrf.mxu2 }
 0x95d   : > { %v5649_v21 = vld [vmem:[#allocation4 + $0x49] sm:$0xff]  ;;  %5973 = vmatmul.f32.gmra.mxu2 %v5614_v10  ;;  %v5019_v17 = vmax.f32 %v4942_v37, 0.0  ;;  %v4947_v30 = vpop.f32.mrf.mxu0 }
 0x95e   : > { %6083 = vmatmul.f32.gmra.mxu3 %v5649_v21  ;;  %v5579_v52 = vld [vmem:[#allocation4 + $0x67] sm:$0xff]  ;;  %v5650_v21 = vld [vmem:[#allocation4 + $0x51] sm:$0xff] }
 0x95f   : > { %5394 = vrot.lane.b32.xlu0 %v14160_v38, %s7699_s15  ;;  %5392 = vrot.lane.b32.xlu2 %v5019_v17, %s7699_s15  ;;  %v5615_v59 = vld [vmem:[#allocation4 + $0x68] sm:$0xff]  ;;  %v4609_v17 = vadd.f32 %v12550_v27, %v12121_v29 }
 0x960   : > { %v4831_v1 = vpop.f32.mrf.mxu3  ;;  %v14600_v38 = vld [vmem:[#allocation9_spill] sm:$0xff] }
 0x961   : > { %v4832_v62 = vadd.f32 %v4831_v1, %v4719_v4  ;;  %v5337_v10 = vpop.permute.xlu1 %5336 }
 0x962   : > { %v5447_v37 = vsel %vm1547_vm9, %v5335_v16, %v5337_v10  ;;  %v4722_v16 = vadd.f32 %v12560_v47, %v4609_v17 }
 0x963   : > { %v4945_v19 = vadd.f32 %v4944_v56, %v4832_v62  ;;  %5513 = vst.msk [vmem:[#allocation4 + $0x70] sm:$0xff] %vm5507_vm12, %v5447_v37  ;;  %v5755_v56 = vld [vmem:[%s14023_s3 + $0x250] sm:$0xff]  ;;  %v12632_v62 = vpop.f32.mrf.mxu1  ;;  %v5345_v10 = vpop.permute.xlu2 %5344 }
 0x964   : > { %5546 = vst.msk [vmem:[#allocation4 + $0x70] sm:$0xff] %vm5540_vm13, %v12417_v50  ;;  %5863 = vmatmul.f32.gmra.mxu1 %v5579_v52  ;;  %6196 = vmatmul.f32.gmra.mxu0 %v5579_v52 }
 0x965   : > { %5976 = vmatmul.f32.gmra.mxu2 %v5615_v59  ;;  %v5021_v4 = vmax.f32 %v4945_v19, 0.0  ;;  %v4950_v1 = vpop.f32.mrf.mxu0  ;;  %6286 = vmatpush.msra.mxu1 %v5755_v56  ;;  %v5024_v56 = vmax.f32 %v14600_v38, 0.0 }
 0x966   : > { %6086 = vmatmul.f32.gmra.mxu3 %v5650_v21 }
 0x967   : > { %5396 = vrot.lane.b32.xlu1 %v5021_v4, %s7699_s15  ;;  %5398 = vrot.lane.b32.xlu2 %v14162_v18, %s7699_s15 }
 0x968   : > { %v4834_v29 = vpop.f32.mrf.mxu3 }
 0x969   : > { %v4835_v27 = vadd.f32 %v4834_v29, %v4722_v16  ;;  %v5341_v19 = vpop.permute.xlu0 %5340  ;;  %v5343_v52 = vpop.permute.xlu1 %5342  ;;  %v4612_v16 = vadd.f32 %v12566_v28, %v12127_v61 }
 0x96a   : > { %v5448_v59 = vsel %vm1547_vm9, %v5339_v54, %v5341_v19  ;;  %v5449_v37 = vsel %vm1547_vm9, %v5343_v52, %v5345_v10  ;;  %v12646_v29 = vpop.f32.mrf.mxu2 }
 0x96b   : > { %v4948_v21 = vadd.f32 %v4947_v30, %v4835_v27  ;;  %5514 = vst.msk [vmem:[#allocation4 + $0x88] sm:$0xff] %vm5507_vm12, %v5448_v59  ;;  %v5580_v47 = vld [vmem:[#allocation4 + $0x6f] sm:$0xff]  ;;  %v4725_v10 = vadd.f32 %v12580_v46, %v4612_v16  ;;  %v12656_v28 = vpop.f32.mrf.mxu1  ;;  %v4615_v46 = vadd.f32 %v12588_v8, %v12136_v34 }
 0x96c   : > { %v5616_v17 = vld [vmem:[#allocation4 + $0x70] sm:$0xff]  ;;  %5547 = vst.msk [vmem:[#allocation4 + $0x88] sm:$0xff] %vm5540_vm13, %v12417_v50  ;;  %5866 = vmatmul.f32.gmra.mxu1 %v5580_v47  ;;  %6199 = vmatmul.f32.gmra.mxu0 %v5580_v47  ;;  %v5754_v16 = vld [vmem:[%s14023_s3 + $0x248] sm:$0xff] }
 0x96d   : > { %v5651_v4 = vld [vmem:[#allocation4 + $0x69] sm:$0xff]  ;;  %5979 = vmatmul.f32.gmra.mxu2 %v5616_v17  ;;  %v5023_v54 = vmax.f32 %v4948_v21, 0.0  ;;  %5515 = vst.msk [vmem:[#allocation4 + $0x90] sm:$0xff] %vm5507_vm12, %v5449_v37  ;;  %v4953_v30 = vpop.f32.mrf.mxu0  ;;  %v5652_v19 = vld [vmem:[#allocation4 + $0x71] sm:$0xff]  ;;  %6287 = vmatpush.msra.mxu1 %v5754_v16 }
 0x96e   : > { %6089 = vmatmul.f32.gmra.mxu3 %v5651_v4  ;;  %5548 = vst.msk [vmem:[#allocation4 + $0x90] sm:$0xff] %vm5540_vm13, %v12417_v50  ;;  %v14601_v21 = vld [vmem:[#allocation33_spill] sm:$0xff] }
 0x96f   : > { %5400 = vrot.lane.b32.xlu0 %v5023_v54, %s7699_s15  ;;  %5402 = vrot.lane.b32.xlu1 %v5024_v56, %s7699_s15  ;;  %v14161_v47 = vmax.f32 %v14601_v21, 0.0  ;;  %v4728_v54 = vadd.f32 %v12607_v5, %v4615_v46 }
 0x970   : > { %v4837_v61 = vpop.f32.mrf.mxu3 }
 0x971   : > { %v4838_v27 = vadd.f32 %v4837_v61, %v4725_v10  ;;  %v5351_v10 = vpop.permute.xlu2 %5350  ;;  %v5347_v8 = vpop.permute.xlu0 %5346 }
 0x973   : > { %v4951_v52 = vadd.f32 %v4950_v1, %v4838_v27  ;;  %v5581_v59 = vld [vmem:[#allocation4 + $0x87] sm:$0xff]  ;;  %v12665_v1 = vpop.f32.mrf.mxu2  ;;  %v12672_v5 = vpop.f32.mrf.mxu1 }
 0x974   : > { %v5617_v37 = vld [vmem:[#allocation4 + $0x88] sm:$0xff]  ;;  %5869 = vmatmul.f32.gmra.mxu1 %v5581_v59  ;;  %6202 = vmatmul.f32.gmra.mxu0 %v5581_v59 }
 0x975   : > { %5982 = vmatmul.f32.gmra.mxu2 %v5617_v37  ;;  %v5025_v17 = vmax.f32 %v4951_v52, 0.0  ;;  %v4956_v4 = vpop.f32.mrf.mxu0  ;;  %v5618_v52 = vld [vmem:[#allocation4 + $0x90] sm:$0xff] }
 0x976   : > { %6092 = vmatmul.f32.gmra.mxu3 %v5652_v19  ;;  %v5582_v19 = vld [vmem:[#allocation4 + $0x8f] sm:$0xff] }
 0x977   : > { %5406 = vrot.lane.b32.xlu0 %v14161_v47, %s7699_s15  ;;  %5404 = vrot.lane.b32.xlu2 %v5025_v17, %s7699_s15  ;;  %v5653_v37 = vld [vmem:[#allocation4 + $0x89] sm:$0xff] }
 0x978   : > { %v4840_v34 = vpop.f32.mrf.mxu3  ;;  %v14602_v17 = vld [vmem:[#allocation17_spill] sm:$0xff] }
 0x979   : > { %v4841_v61 = vadd.f32 %v4840_v34, %v4728_v54  ;;  %v5349_v27 = vpop.permute.xlu1 %5348  ;;  %v5028_v16 = vmax.f32 %v14602_v17, 0.0  ;;  %v4618_v54 = vadd.f32 %v12612_v0, %v12142_v32  ;;  %v5654_v0 = vld [vmem:[#allocation4 + $0x91] sm:$0xff] }
 0x97a   : > { %v5450_v59 = vsel %vm1547_vm9, %v5347_v8, %v5349_v27  ;;  %v5791_v17 = vld [vmem:[%s14023_s3 + $0x370] sm:$0xff] }
 0x97b   : > { %v4954_v46 = vadd.f32 %v4953_v30, %v4841_v61  ;;  %5516 = vst.msk [vmem:[#allocation4 + $0xa8] sm:$0xff] %vm5507_vm12, %v5450_v59  ;;  %v4731_v27 = vadd.f32 %v12620_v53, %v4618_v54  ;;  %v5357_v30 = vpop.permute.xlu2 %5356  ;;  %v14603_v54 = vld [vmem:[#allocation40_spill] sm:$0xff] }
 0x97c   : > { %5549 = vst.msk [vmem:[#allocation4 + $0xa8] sm:$0xff] %vm5540_vm13, %v12417_v50  ;;  %5872 = vmatmul.f32.gmra.mxu1 %v5582_v19  ;;  %6205 = vmatmul.f32.gmra.mxu0 %v5582_v19  ;;  %v4739_v19 = vpop.f32.mrf.mxu2 }
 0x97d   : > { %5985 = vmatmul.f32.gmra.mxu2 %v5618_v52  ;;  %v5027_v34 = vmax.f32 %v4954_v46, 0.0  ;;  %v4959_v8 = vpop.f32.mrf.mxu0 }
 0x97e   : > { %6095 = vmatmul.f32.gmra.mxu3 %v5653_v37 }
 0x97f   : > { %5408 = vrot.lane.b32.xlu1 %v5027_v34, %s7699_s15  ;;  %5410 = vrot.lane.b32.xlu2 %v5028_v16, %s7699_s15  ;;  %v5030_v34 = vmax.f32 %v14603_v54, 0.0 }
 0x980   : > { %v4843_v61 = vpop.f32.mrf.mxu3 }
 0x981   : > { %v4844_v52 = vadd.f32 %v4843_v61, %v4731_v27  ;;  %v5353_v59 = vpop.permute.xlu0 %5352  ;;  %v5355_v47 = vpop.permute.xlu1 %5354  ;;  %v4621_v27 = vadd.f32 %v12632_v62, %v12151_v9 }
 0x982   : > { %v5451_v18 = vsel %vm1547_vm9, %v5351_v10, %v5353_v59  ;;  %v5452_v32 = vsel %vm1547_vm9, %v5355_v47, %v5357_v30  ;;  %v12693_v10 = vpop.f32.mrf.mxu1 }
 0x983   : > { %v4957_v37 = vadd.f32 %v4956_v4, %v4844_v52  ;;  %5517 = vst.msk [vmem:[#allocation4 + $0xb0] sm:$0xff] %vm5507_vm12, %v5451_v18  ;;  %v5583_v53 = vld [vmem:[#allocation4 + $0xa7] sm:$0xff]  ;;  %v4734_v4 = vadd.f32 %v12646_v29, %v4621_v27  ;;  %v4624_v29 = vadd.f32 %v12656_v28, %v12157_v24 }
 0x984   : > { %v5619_v46 = vld [vmem:[#allocation4 + $0xa8] sm:$0xff]  ;;  %5550 = vst.msk [vmem:[#allocation4 + $0xb0] sm:$0xff] %vm5540_vm13, %v12417_v50  ;;  %5875 = vmatmul.f32.gmra.mxu1 %v5583_v53  ;;  %6208 = vmatmul.f32.gmra.mxu0 %v5583_v53  ;;  %v5753_v18 = vld [vmem:[%s14023_s3 + $0x240] sm:$0xff]  ;;  %v4742_v53 = vpop.f32.mrf.mxu2 }
 0x985   : > { %5988 = vmatmul.f32.gmra.mxu2 %v5619_v46  ;;  %v5029_v47 = vmax.f32 %v4957_v37, 0.0  ;;  %5518 = vst.msk [vmem:[#allocation4 + $0xc8] sm:$0xff] %vm5507_vm12, %v5452_v32  ;;  %6288 = vmatpush.msra.mxu1 %v5753_v18  ;;  %v4962_v62 = vpop.f32.mrf.mxu0  ;;  %v4737_v27 = vadd.f32 %v12665_v1, %v4624_v29 }
 0x986   : > { %6098 = vmatmul.f32.gmra.mxu3 %v5654_v0  ;;  %5551 = vst.msk [vmem:[#allocation4 + $0xc8] sm:$0xff] %vm5540_vm13, %v12417_v50  ;;  %v14604_v0 = vld [vmem:[#allocation16_spill] sm:$0xff] }
 0x987   : > { %5412 = vrot.lane.b32.xlu0 %v5029_v47, %s7699_s15  ;;  %5414 = vrot.lane.b32.xlu1 %v5030_v34, %s7699_s15  ;;  %v14163_v37 = vmax.f32 %v14604_v0, 0.0 }
 0x988   : > { %v4846_v9 = vpop.f32.mrf.mxu3 }
 0x989   : > { %v4847_v30 = vadd.f32 %v4846_v9, %v4734_v4  ;;  %v5359_v4 = vpop.permute.xlu0 %5358 }
 0x98a   : > { %v12710_v47 = vpop.f32.mrf.mxu1 }
 0x98b   : > { %v4960_v61 = vadd.f32 %v4959_v8, %v4847_v30  ;;  %v5584_v52 = vld [vmem:[#allocation4 + $0xaf] sm:$0xff]  ;;  %v5363_v8 = vpop.permute.xlu2 %5362 }
 0x98c   : > { %v5620_v59 = vld [vmem:[#allocation4 + $0xb0] sm:$0xff]  ;;  %5878 = vmatmul.f32.gmra.mxu1 %v5584_v52  ;;  %6211 = vmatmul.f32.gmra.mxu0 %v5584_v52 }
 0x98d   : > { %v5655_v32 = vld [vmem:[#allocation4 + $0xa9] sm:$0xff]  ;;  %5991 = vmatmul.f32.gmra.mxu2 %v5620_v59  ;;  %v5031_v46 = vmax.f32 %v4960_v61, 0.0  ;;  %v4965_v52 = vpop.f32.mrf.mxu0  ;;  %v5656_v59 = vld [vmem:[#allocation4 + $0xb1] sm:$0xff] }
 0x98e   : > { %6101 = vmatmul.f32.gmra.mxu3 %v5655_v32  ;;  %v5585_v24 = vld [vmem:[#allocation4 + $0xc7] sm:$0xff]  ;;  %v14605_v32 = vld [vmem:[#allocation31_spill] sm:$0xff] }
 0x98f   : > { %5418 = vrot.lane.b32.xlu0 %v14163_v37, %s7699_s15  ;;  %5416 = vrot.lane.b32.xlu2 %v5031_v46, %s7699_s15  ;;  %v5621_v28 = vld [vmem:[#allocation4 + $0xc8] sm:$0xff]  ;;  %v14164_v29 = vmax.f32 %v14605_v32, 0.0  ;;  %v4627_v46 = vadd.f32 %v12672_v5, %v12166_v11 }
 0x990   : > { %v4849_v18 = vpop.f32.mrf.mxu3 }
 0x991   : > { %v4850_v9 = vadd.f32 %v4849_v18, %v4737_v27  ;;  %v5361_v30 = vpop.permute.xlu1 %5360  ;;  %v5752_v18 = vld [vmem:[%s14023_s3 + $0x238] sm:$0xff] }
 0x992   : > { %v5453_v61 = vsel %vm1547_vm9, %v5359_v4, %v5361_v30  ;;  %v4745_v4 = vpop.f32.mrf.mxu2  ;;  %6289 = vmatpush.msra.mxu1 %v5752_v18  ;;  %v14606_v18 = vld [vmem:[#allocation45_spill] sm:$0xff] }
 0x993   : > { %v4963_v1 = vadd.f32 %v4962_v62, %v4850_v9  ;;  %5519 = vst.msk [vmem:[#allocation4 + $0xd0] sm:$0xff] %vm5507_vm12, %v5453_v61  ;;  %v4740_v62 = vadd.f32 %v4739_v19, %v4627_v46  ;;  %v5369_v9 = vpop.permute.xlu2 %5368 }
 0x994   : > { %5552 = vst.msk [vmem:[#allocation4 + $0xd0] sm:$0xff] %vm5540_vm13, %v12417_v50  ;;  %5881 = vmatmul.f32.gmra.mxu1 %v5585_v24  ;;  %6214 = vmatmul.f32.gmra.mxu0 %v5585_v24 }
 0x995   : > { %5994 = vmatmul.f32.gmra.mxu2 %v5621_v28  ;;  %v5033_v27 = vmax.f32 %v4963_v1, 0.0  ;;  %v4968_v37 = vpop.f32.mrf.mxu0 }
 0x996   : > { %6104 = vmatmul.f32.gmra.mxu3 %v5656_v59  ;;  %v4635_v59 = vpop.f32.mrf.mxu1 }
 0x997   : > { %5420 = vrot.lane.b32.xlu1 %v5033_v27, %s7699_s15  ;;  %5422 = vrot.lane.b32.xlu2 %v14164_v29, %s7699_s15 }
 0x998   : > { %v4852_v30 = vpop.f32.mrf.mxu3 }
 0x999   : > { %v4853_v28 = vadd.f32 %v4852_v30, %v4740_v62  ;;  %v5365_v11 = vpop.permute.xlu0 %5364  ;;  %v5367_v5 = vpop.permute.xlu1 %5366  ;;  %v5036_v62 = vmax.f32 %v14606_v18, 0.0 }
 0x99a   : > { %v5454_v24 = vsel %vm1547_vm9, %v5363_v8, %v5365_v11  ;;  %v5455_v61 = vsel %vm1547_vm9, %v5367_v5, %v5369_v9  ;;  %v4630_v8 = vadd.f32 %v12693_v10, %v12172_v60  ;;  %v4748_v5 = vpop.f32.mrf.mxu2 }
 0x99b   : > { %v4966_v1 = vadd.f32 %v4965_v52, %v4853_v28  ;;  %5520 = vst.msk [vmem:[#allocation4 + $0xe8] sm:$0xff] %vm5507_vm12, %v5454_v24  ;;  %v5586_v19 = vld [vmem:[#allocation4 + $0xcf] sm:$0xff] }
 0x99c   : > { %v5622_v46 = vld [vmem:[#allocation4 + $0xd0] sm:$0xff]  ;;  %5553 = vst.msk [vmem:[#allocation4 + $0xe8] sm:$0xff] %vm5540_vm13, %v12417_v50  ;;  %5884 = vmatmul.f32.gmra.mxu1 %v5586_v19  ;;  %6217 = vmatmul.f32.gmra.mxu0 %v5586_v19  ;;  %v4743_v52 = vadd.f32 %v4742_v53, %v4630_v8  ;;  %v14607_v53 = vld [vmem:[#allocation27_spill] sm:$0xff]  ;;  %v4633_v19 = vadd.f32 %v12710_v47, %v12181_v42 }
 0x99d   : > { %v5657_v27 = vld [vmem:[#allocation4 + $0xc9] sm:$0xff]  ;;  %5997 = vmatmul.f32.gmra.mxu2 %v5622_v46  ;;  %v5035_v30 = vmax.f32 %v4966_v1, 0.0  ;;  %5521 = vst.msk [vmem:[#allocation4 + $0xf0] sm:$0xff] %vm5507_vm12, %v5455_v61  ;;  %v5658_v11 = vld [vmem:[#allocation4 + $0xd1] sm:$0xff]  ;;  %v14165_v1 = vmax.f32 %v14607_v53, 0.0  ;;  %v4971_v8 = vpop.f32.mrf.mxu0 }
 0x99e   : > { %6107 = vmatmul.f32.gmra.mxu3 %v5657_v27  ;;  %5554 = vst.msk [vmem:[#allocation4 + $0xf0] sm:$0xff] %vm5540_vm13, %v12417_v50  ;;  %v5751_v61 = vld [vmem:[%s14023_s3 + $0x230] sm:$0xff]  ;;  %v4638_v46 = vpop.f32.mrf.mxu1 }
 0x99f   : > { %5424 = vrot.lane.b32.xlu0 %v5035_v30, %s7699_s15  ;;  %5426 = vrot.lane.b32.xlu1 %v5036_v62, %s7699_s15  ;;  %v5375_v30 = vpop.permute.xlu2 %5374 }
 0x9a0   : > { %v4855_v9 = vpop.f32.mrf.mxu3  ;;  %6290 = vmatpush.msra.mxu1 %v5751_v61  ;;  %v4636_v61 = vadd.f32 %v4635_v59, %v12187_v63 }
 0x9a1   : > { %v4856_v28 = vadd.f32 %v4855_v9, %v4743_v52  ;;  %v5371_v9 = vpop.permute.xlu0 %5370 }
 0x9a3   : > { %v4969_v60 = vadd.f32 %v4968_v37, %v4856_v28  ;;  %v5587_v10 = vld [vmem:[#allocation4 + $0xe7] sm:$0xff]  ;;  %v4746_v37 = vadd.f32 %v4745_v4, %v4633_v19  ;;  %v4751_v19 = vpop.f32.mrf.mxu2 }
 0x9a4   : > { %v5623_v24 = vld [vmem:[#allocation4 + $0xe8] sm:$0xff]  ;;  %5887 = vmatmul.f32.gmra.mxu1 %v5587_v10  ;;  %6220 = vmatmul.f32.gmra.mxu0 %v5587_v10 }
 0x9a5   : > { %6000 = vmatmul.f32.gmra.mxu2 %v5623_v24  ;;  %v5037_v27 = vmax.f32 %v4969_v60, 0.0  ;;  %v5588_v29 = vld [vmem:[#allocation4 + $0xef] sm:$0xff] }
 0x9a6   : > { %6110 = vmatmul.f32.gmra.mxu3 %v5658_v11  ;;  %v5624_v42 = vld [vmem:[#allocation4 + $0xf0] sm:$0xff]  ;;  %v14608_v4 = vld [vmem:[#allocation41_spill] sm:$0xff] }
 0x9a7   : > { %5430 = vrot.lane.b32.xlu0 %v14165_v1, %s7699_s15  ;;  %5428 = vrot.lane.b32.xlu2 %v5037_v27, %s7699_s15  ;;  %v5659_v11 = vld [vmem:[#allocation4 + $0xe9] sm:$0xff]  ;;  %v5040_v10 = vmax.f32 %v14608_v4, 0.0 }
 0x9a8   : > { %v4858_v52 = vpop.f32.mrf.mxu3  ;;  %v13068_v4 = vld [vmem:[%s14023_s3 + $0x3e8] sm:$0xff] }
 0x9a9   : > { %v4859_v28 = vadd.f32 %v4858_v52, %v4746_v37  ;;  %v5373_v24 = vpop.permute.xlu1 %5372  ;;  %v12761_v37 = vpop.f32.mrf.mxu1 }
 0x9aa   : > { %v5456_v47 = vsel %vm1547_vm9, %v5371_v9, %v5373_v24  ;;  %v4974_v52 = vpop.f32.mrf.mxu0  ;;  %v4749_v9 = vadd.f32 %v4748_v5, %v4636_v61  ;;  %v5750_v61 = vld [vmem:[%s14023_s3 + $0x228] sm:$0xff] }
 0x9ab   : > { %v4972_v60 = vadd.f32 %v4971_v8, %v4859_v28  ;;  %5522 = vst.msk [vmem:[#allocation4 + $0x108] sm:$0xff] %vm5507_vm12, %v5456_v47  ;;  %v5381_v8 = vpop.permute.xlu2 %5380  ;;  %6291 = vmatpush.msra.mxu1 %v5750_v61  ;;  %v14612_v61 = vld [vmem:[#allocation51_spill] sm:$0xff] }
 0x9ac   : > { %5555 = vst.msk [vmem:[#allocation4 + $0x108] sm:$0xff] %vm5540_vm13, %v12417_v50  ;;  %5890 = vmatmul.f32.gmra.mxu1 %v5588_v29  ;;  %6223 = vmatmul.f32.gmra.mxu0 %v5588_v29  ;;  %v5660_v29 = vld [vmem:[#allocation4 + $0xf1] sm:$0xff] }
 0x9ad   : > { %6003 = vmatmul.f32.gmra.mxu2 %v5624_v42  ;;  %v5039_v27 = vmax.f32 %v4972_v60, 0.0 }
 0x9ae   : > { %6113 = vmatmul.f32.gmra.mxu3 %v5659_v11 }
 0x9af   : > { %5432 = vrot.lane.b32.xlu1 %v5039_v27, %s7699_s15  ;;  %5434 = vrot.lane.b32.xlu2 %v5040_v10, %s7699_s15  ;;  %v14609_v27 = vld [vmem:[#allocation43_spill] sm:$0xff] }
 0x9b0   : > { %v4861_v28 = vpop.f32.mrf.mxu3 }
 0x9b1   : > { %v4862_v24 = vadd.f32 %v4861_v28, %v4749_v9  ;;  %v5377_v42 = vpop.permute.xlu0 %5376  ;;  %v5379_v47 = vpop.permute.xlu1 %5378  ;;  %v5042_v9 = vmax.f32 %v14609_v27, 0.0  ;;  %v5786_v27 = vld [vmem:[%s14023_s3 + $0x348] sm:$0xff] }
 0x9b2   : > { %v5457_v63 = vsel %vm1547_vm9, %v5375_v30, %v5377_v42  ;;  %v5458_v59 = vsel %vm1547_vm9, %v5379_v47, %v5381_v8  ;;  %v4639_v30 = vadd.f32 %v4638_v46, %v12196_v44  ;;  %v12778_v28 = vpop.f32.mrf.mxu2  ;;  %v4977_v46 = vpop.f32.mrf.mxu0 }
 0x9b3   : > { %5523 = vst.msk [vmem:[#allocation4 + $0x110] sm:$0xff] %vm5507_vm12, %v5457_v63  ;;  %v4975_v11 = vadd.f32 %v4974_v52, %v4862_v24  ;;  %v5589_v5 = vld [vmem:[#allocation4 + $0x107] sm:$0xff]  ;;  %v12786_v24 = vpop.f32.mrf.mxu1 }
 0x9b4   : > { %v5625_v60 = vld [vmem:[#allocation4 + $0x108] sm:$0xff]  ;;  %5556 = vst.msk [vmem:[#allocation4 + $0x110] sm:$0xff] %vm5540_vm13, %v12417_v50  ;;  %5893 = vmatmul.f32.gmra.mxu1 %v5589_v5  ;;  %6226 = vmatmul.f32.gmra.mxu0 %v5589_v5  ;;  %v4752_v52 = vadd.f32 %v4751_v19, %v4639_v30  ;;  %v5387_v19 = vpop.permute.xlu2 %5386  ;;  %v14613_v30 = vmax.f32 %v14612_v61, 0.0  ;;  %v14615_v61 = vmax.f32 %v14579_v33, 0.0 }
 0x9b5   : > { %6006 = vmatmul.f32.gmra.mxu2 %v5625_v60  ;;  %5524 = vst.msk [vmem:[#allocation4 + $0x128] sm:$0xff] %vm5507_vm12, %v5458_v59  ;;  %v5041_v8 = vmax.f32 %v4975_v11, 0.0  ;;  %v14610_v5 = vld [vmem:[#allocation57_spill] sm:$0xff] }
 0x9b6   : > { %6116 = vmatmul.f32.gmra.mxu3 %v5660_v29  ;;  %5557 = vst.msk [vmem:[#allocation4 + $0x128] sm:$0xff] %vm5540_vm13, %v12417_v50  ;;  %v14611_v60 = vmax.f32 %v14610_v5, 0.0  ;;  %v12803_v5 = vld [vmem:[#allocation3 + $0x8] sm:$0xff] }
 0x9b7   : > { %5436 = vrot.lane.b32.xlu0 %v5041_v8, %s7699_s15  ;;  %5438 = vrot.lane.b32.xlu1 %v5042_v9, %s7699_s15 }
 0x9b8   : > { %v4864_v44 = vpop.f32.mrf.mxu3 }
 0x9b9   : > { %v4865_v42 = vadd.f32 %v4864_v44, %v4752_v52  ;;  %v5383_v8 = vpop.permute.xlu0 %5382 }
 0x9ba   : > { %v12788_v11 = vpop.f32.mrf.mxu2 }
 0x9bb   : > { %v4978_v47 = vadd.f32 %v4977_v46, %v4865_v42  ;;  %v5590_v63 = vld [vmem:[#allocation4 + $0x10f] sm:$0xff] }
 0x9bc   : > { %v5626_v59 = vld [vmem:[#allocation4 + $0x110] sm:$0xff]  ;;  %5896 = vmatmul.f32.gmra.mxu1 %v5590_v63  ;;  %6229 = vmatmul.f32.gmra.mxu0 %v5590_v63 }
 0x9bd   : > { %v5661_v29 = vld [vmem:[#allocation4 + $0x109] sm:$0xff]  ;;  %6009 = vmatmul.f32.gmra.mxu2 %v5626_v59  ;;  %v5043_v50 = vmax.f32 %v4978_v47, 0.0 }
 0x9be   : > { %6119 = vmatmul.f32.gmra.mxu3 %v5661_v29  ;;  %v5591_v42 = vld [vmem:[#allocation4 + $0x127] sm:$0xff]  ;;  %v5662_v29 = vld [vmem:[#allocation4 + $0x111] sm:$0xff] }
 0x9bf   : > { %5078 = vrot.lane.b32.xlu1 %v14611_v60, %s7702_s11  ;;  %5076 = vrot.lane.b32.xlu0 %v14613_v30, %s7702_s11  ;;  %v5627_v47 = vld [vmem:[#allocation4 + $0x128] sm:$0xff]  ;;  %v14614_v60 = vmax.f32 %v14581_v20, 0.0  ;;  %v12824_v20 = vld [vmem:[%s14024_s4 + $0x5] ss:$0 sm:$0xff] }
 0x9c0   : > { %5440 = vrot.lane.b32.xlu2 %v5043_v50, %s7699_s15  ;;  %v12797_v52 = vpop.f32.mrf.mxu3  ;;  %v5749_v50 = vld [vmem:[%s14023_s3 + $0x220] sm:$0xff] }
 0x9c1   : > { %v5385_v44 = vpop.permute.xlu1 %5384  ;;  %v5852_v46 = vpop.f32.mrf.mxu1  ;;  %6292 = vmatpush.msra.mxu1 %v5749_v50 }
 0x9c2   : > { %v5459_v63 = vsel %vm1547_vm9, %v5383_v8, %v5385_v44  ;;  %v12800_v59 = vpop.f32.mrf.mxu0  ;;  %v5393_v8 = vpop.permute.xlu2 %5392  ;;  %v14616_v44 = vmax.f32 %v14578_v35, 0.0  ;;  %v5853_v50 = vadd.f32 %v12824_v20, %v5852_v46  ;;  %v14619_v46 = vmax.f32 %v14583_v2, 0.0 }
 0x9c3   : > { %5525 = vst.msk [vmem:[#allocation4 + $0x130] sm:$0xff] %vm5507_vm12, %v5459_v63 }
 0x9c4   : > { %5558 = vst.msk [vmem:[#allocation4 + $0x130] sm:$0xff] %vm5540_vm13, %v12803_v5  ;;  %5899 = vmatmul.f32.gmra.mxu1 %v5591_v42  ;;  %6232 = vmatmul.f32.gmra.mxu0 %v5591_v42 }
 0x9c5   : > { %6012 = vmatmul.f32.gmra.mxu2 %v5627_v47 }
 0x9c6   : > { %6122 = vmatmul.f32.gmra.mxu3 %v5662_v29 }
 0x9c7   : > { %5084 = vrot.lane.b32.xlu1 %v14614_v60, %s7702_s11  ;;  %5082 = vrot.lane.b32.xlu0 %v14615_v61, %s7702_s11 }
 0x9c8   : > { %v5965_v30 = vpop.f32.mrf.mxu2  ;;  %5080 = vrot.lane.b32.xlu2 %v14616_v44, %s7702_s11  ;;  %v12819_v47 = vpop.f32.mrf.mxu3 }
 0x9c9   : > { %v5389_v42 = vpop.permute.xlu0 %5388  ;;  %v5391_v63 = vpop.permute.xlu1 %5390 }
 0x9ca   : > { %v5460_v29 = vsel %vm1547_vm9, %v5387_v19, %v5389_v42  ;;  %v5461_v33 = vsel %vm1547_vm9, %v5391_v63, %v5393_v8  ;;  %v5855_v60 = vpop.f32.mrf.mxu1  ;;  %v12828_v61 = vpop.f32.mrf.mxu0  ;;  %v5966_v19 = vadd.f32 %v5965_v30, %v5853_v50  ;;  %v14617_v8 = vmax.f32 %v14585_v55, 0.0 }
 0x9cb   : > { %5526 = vst.msk [vmem:[#allocation4 + $0x148] sm:$0xff] %vm5507_vm12, %v5460_v29  ;;  %v5592_v35 = vld [vmem:[#allocation4 + $0x12f] sm:$0xff]  ;;  %v14618_v42 = vmax.f32 %v14584_v57, 0.0  ;;  %v5748_v57 = vld [vmem:[%s14023_s3 + $0x218] sm:$0xff]  ;;  %v5856_v55 = vadd.f32 %v12824_v20, %v5855_v60 }
 0x9cc   : > { %v5628_v44 = vld [vmem:[#allocation4 + $0x130] sm:$0xff]  ;;  %5559 = vst.msk [vmem:[#allocation4 + $0x148] sm:$0xff] %vm5540_vm13, %v12803_v5  ;;  %5902 = vmatmul.f32.gmra.mxu1 %v5592_v35  ;;  %6235 = vmatmul.f32.gmra.mxu0 %v5592_v35 }
 0x9cd   : > { %v5663_v1 = vld [vmem:[#allocation4 + $0x129] sm:$0xff]  ;;  %6015 = vmatmul.f32.gmra.mxu2 %v5628_v44  ;;  %5527 = vst.msk [vmem:[#allocation4 + $0x150] sm:$0xff] %vm5507_vm12, %v5461_v33  ;;  %v5664_v30 = vld [vmem:[#allocation4 + $0x131] sm:$0xff]  ;;  %6293 = vmatpush.msra.mxu1 %v5748_v57 }
 0x9ce   : > { %6125 = vmatmul.f32.gmra.mxu3 %v5663_v1  ;;  %5560 = vst.msk [vmem:[#allocation4 + $0x150] sm:$0xff] %vm5540_vm13, %v12803_v5 }
 0x9cf   : > { %5090 = vrot.lane.b32.xlu1 %v14617_v8, %s7702_s11  ;;  %5088 = vrot.lane.b32.xlu0 %v14618_v42, %s7702_s11  ;;  %v5399_v8 = vpop.permute.xlu2 %5398  ;;  %v14620_v42 = vmax.f32 %v14586_v13, 0.0 }
 0x9d0   : > { %v5968_v63 = vpop.f32.mrf.mxu2  ;;  %5086 = vrot.lane.b32.xlu2 %v14619_v46, %s7702_s11  ;;  %v6078_v29 = vpop.f32.mrf.mxu3 }
 0x9d1   : > { %v12846_v1 = vadd.f32 %v6078_v29, %v5966_v19  ;;  %v5969_v2 = vadd.f32 %v5968_v63, %v5856_v55  ;;  %v5395_v60 = vpop.permute.xlu0 %5394 }
 0x9d2   : > { %v5858_v33 = vpop.f32.mrf.mxu1  ;;  %v12848_v35 = vpop.f32.mrf.mxu0 }
 0x9d3   : > { %v5593_v44 = vld [vmem:[#allocation4 + $0x147] sm:$0xff]  ;;  %v5859_v13 = vadd.f32 %v12824_v20, %v5858_v33 }
 0x9d4   : > { %v5629_v50 = vld [vmem:[#allocation4 + $0x148] sm:$0xff]  ;;  %5905 = vmatmul.f32.gmra.mxu1 %v5593_v44  ;;  %6238 = vmatmul.f32.gmra.mxu0 %v5593_v44 }
 0x9d5   : > { %6018 = vmatmul.f32.gmra.mxu2 %v5629_v50  ;;  %v5594_v63 = vld [vmem:[#allocation4 + $0x14f] sm:$0xff] }
 0x9d6   : > { %6128 = vmatmul.f32.gmra.mxu3 %v5664_v30  ;;  %v5630_v44 = vld [vmem:[#allocation4 + $0x150] sm:$0xff] }
 0x9d7   : > { %5096 = vrot.lane.b32.xlu1 %v5000_v25, %s7702_s11  ;;  %5094 = vrot.lane.b32.xlu0 %v4998_v45, %s7702_s11  ;;  %v5665_v7 = vld [vmem:[#allocation4 + $0x149] sm:$0xff]  ;;  %v5405_v55 = vpop.permute.xlu2 %5404  ;;  %v5666_v49 = vld [vmem:[#allocation4 + $0x151] sm:$0xff] }
 0x9d8   : > { %v5971_v19 = vpop.f32.mrf.mxu2  ;;  %5092 = vrot.lane.b32.xlu2 %v14620_v42, %s7702_s11  ;;  %v6081_v46 = vpop.f32.mrf.mxu3 }
 0x9d9   : > { %v12863_v29 = vadd.f32 %v6081_v46, %v5969_v2  ;;  %v5397_v30 = vpop.permute.xlu1 %5396  ;;  %v5972_v45 = vadd.f32 %v5971_v19, %v5859_v13  ;;  %v14621_v2 = vmax.f32 %v14589_v48, 0.0  ;;  %v5747_v48 = vld [vmem:[%s14023_s3 + $0x210] sm:$0xff] }
 0x9da   : > { %v5462_v22 = vsel %vm1547_vm9, %v5395_v60, %v5397_v30  ;;  %v5861_v25 = vpop.f32.mrf.mxu1  ;;  %v12866_v50 = vpop.f32.mrf.mxu0  ;;  %6294 = vmatpush.msra.mxu1 %v5747_v48  ;;  %v5776_v48 = vld [vmem:[%s14023_s3 + $0x2f8] sm:$0xff] }
 0x9db   : > { %5528 = vst.msk [vmem:[#allocation4 + $0x168] sm:$0xff] %vm5507_vm12, %v5462_v22  ;;  %6394 = vmatpush.msrb.mxu2 %v5776_v48 }
 0x9dc   : > { %5561 = vst.msk [vmem:[#allocation4 + $0x168] sm:$0xff] %vm5540_vm13, %v12803_v5  ;;  %5908 = vmatmul.f32.gmra.mxu1 %v5594_v63  ;;  %6241 = vmatmul.f32.gmra.mxu0 %v5594_v63 }
 0x9dd   : > { %6021 = vmatmul.f32.gmra.mxu2 %v5630_v44 }
 0x9de   : > { %6131 = vmatmul.f32.gmra.mxu3 %v5665_v7 }
 0x9df   : > { %5102 = vrot.lane.b32.xlu1 %v5006_v43, %s7702_s11  ;;  %5100 = vrot.lane.b32.xlu0 %v5004_v58, %s7702_s11  ;;  %v5411_v14 = vpop.permute.xlu2 %5410 }
 0x9e0   : > { %v5974_v57 = vpop.f32.mrf.mxu2  ;;  %5098 = vrot.lane.b32.xlu2 %v14621_v2, %s7702_s11 }
 0x9e1   : > { %v6084_v42 = vpop.f32.mrf.mxu3  ;;  %v5401_v33 = vpop.permute.xlu0 %5400 }
 0x9e2   : > { %v12881_v46 = vadd.f32 %v6084_v42, %v5972_v45  ;;  %v5403_v60 = vpop.permute.xlu1 %5402  ;;  %v5463_v19 = vsel %vm1547_vm9, %v5399_v8, %v5401_v33  ;;  %v5864_v43 = vpop.f32.mrf.mxu1  ;;  %v5862_v8 = vadd.f32 %v12824_v20, %v5861_v25 }
 0x9e3   : > { %v5464_v3 = vsel %vm1547_vm9, %v5403_v60, %v5405_v55  ;;  %v12885_v30 = vpop.f32.mrf.mxu0  ;;  %5529 = vst.msk [vmem:[#allocation4 + $0x170] sm:$0xff] %vm5507_vm12, %v5463_v19  ;;  %v5595_v58 = vld [vmem:[#allocation4 + $0x167] sm:$0xff]  ;;  %v5865_v26 = vadd.f32 %v12824_v20, %v5864_v43 }
 0x9e4   : > { %v5631_v63 = vld [vmem:[#allocation4 + $0x168] sm:$0xff]  ;;  %5562 = vst.msk [vmem:[#allocation4 + $0x170] sm:$0xff] %vm5540_vm13, %v12803_v5  ;;  %5911 = vmatmul.f32.gmra.mxu1 %v5595_v58  ;;  %6244 = vmatmul.f32.gmra.mxu0 %v5595_v58  ;;  %v5975_v44 = vadd.f32 %v5974_v57, %v5862_v8 }
 0x9e5   : > { %6024 = vmatmul.f32.gmra.mxu2 %v5631_v63  ;;  %5530 = vst.msk [vmem:[#allocation4 + $0x188] sm:$0xff] %vm5507_vm12, %v5464_v3  ;;  %v5746_v63 = vld [vmem:[%s14023_s3 + $0x208] sm:$0xff] }
 0x9e6   : > { %6134 = vmatmul.f32.gmra.mxu3 %v5666_v49  ;;  %5563 = vst.msk [vmem:[#allocation4 + $0x188] sm:$0xff] %vm5540_vm13, %v12803_v5  ;;  %6295 = vmatpush.msra.mxu1 %v5746_v63 }
 0x9e7   : > { %5108 = vrot.lane.b32.xlu1 %v5012_v6, %s7702_s11  ;;  %5106 = vrot.lane.b32.xlu0 %v5010_v31, %s7702_s11  ;;  %v14623_v6 = vmax.f32 %v14595_v12, 0.0 }
 0x9e8   : > { %v5977_v22 = vpop.f32.mrf.mxu2  ;;  %5104 = vrot.lane.b32.xlu2 %v5008_v36, %s7702_s11 }
 0x9e9   : > { %v6087_v25 = vpop.f32.mrf.mxu3  ;;  %v5978_v31 = vadd.f32 %v5977_v22, %v5865_v26  ;;  %v5407_v33 = vpop.permute.xlu0 %5406 }
 0x9ea   : > { %v12906_v7 = vadd.f32 %v6087_v25, %v5975_v44  ;;  %v5867_v13 = vpop.f32.mrf.mxu1  ;;  %v5417_v41 = vpop.permute.xlu2 %5416  ;;  %v14624_v44 = vmax.f32 %v14599_v51, 0.0  ;;  %v14625_v25 = vmax.f32 %v14598_v39, 0.0  ;;  %v5774_v39 = vld [vmem:[%s14023_s3 + $0x2e8] sm:$0xff] }
 0x9eb   : > { %v12908_v45 = vpop.f32.mrf.mxu0  ;;  %v5596_v57 = vld [vmem:[#allocation4 + $0x16f] sm:$0xff]  ;;  %v5868_v12 = vadd.f32 %v12824_v20, %v5867_v13 }
 0x9ec   : > { %v5632_v55 = vld [vmem:[#allocation4 + $0x170] sm:$0xff]  ;;  %5914 = vmatmul.f32.gmra.mxu1 %v5596_v57  ;;  %6247 = vmatmul.f32.gmra.mxu0 %v5596_v57 }
 0x9ed   : > { %v5667_v2 = vld [vmem:[#allocation4 + $0x169] sm:$0xff]  ;;  %6027 = vmatmul.f32.gmra.mxu2 %v5632_v55  ;;  %v5668_v58 = vld [vmem:[#allocation4 + $0x171] sm:$0xff] }
 0x9ee   : > { %6137 = vmatmul.f32.gmra.mxu3 %v5667_v2  ;;  %v5597_v3 = vld [vmem:[#allocation4 + $0x187] sm:$0xff]  ;;  %v5775_v57 = vld [vmem:[%s14023_s3 + $0x2f0] sm:$0xff] }
 0x9ef   : > { %5114 = vrot.lane.b32.xlu1 %v5018_v40, %s7702_s11  ;;  %5112 = vrot.lane.b32.xlu0 %v14622_v23, %s7702_s11  ;;  %v5633_v43 = vld [vmem:[#allocation4 + $0x188] sm:$0xff] }
 0x9f0   : > { %v5980_v36 = vpop.f32.mrf.mxu2  ;;  %5110 = vrot.lane.b32.xlu2 %v14623_v6, %s7702_s11  ;;  %6395 = vmatpush.msrb.mxu2 %v5775_v57  ;;  %v5769_v57 = vld [vmem:[%s14023_s3 + $0x2c0] sm:$0xff] }
 0x9f1   : > { %v6090_v42 = vpop.f32.mrf.mxu3  ;;  %v5409_v19 = vpop.permute.xlu1 %5408  ;;  %v5981_v8 = vadd.f32 %v5980_v36, %v5868_v12 }
 0x9f2   : > { %v12920_v60 = vadd.f32 %v6090_v42, %v5978_v31  ;;  %v5465_v49 = vsel %vm1547_vm9, %v5407_v33, %v5409_v19  ;;  %v5870_v15 = vpop.f32.mrf.mxu1  ;;  %v5773_v42 = vld [vmem:[%s14023_s3 + $0x2e0] sm:$0xff]  ;;  %v5792_v33 = vld [vmem:[%s14023_s3 + $0x378] sm:$0xff]  ;;  %6396 = vmatpush.msrb.mxu2 %v5774_v39 }
 0x9f3   : > { %v12923_v40 = vpop.f32.mrf.mxu0  ;;  %5531 = vst.msk [vmem:[#allocation4 + $0x190] sm:$0xff] %vm5507_vm12, %v5465_v49  ;;  %6507 = vmatpush.msrb.mxu3 %v5792_v33  ;;  %v12978_v49 = vpop.permute.xlu2 %5422  ;;  %v5788_v33 = vld [vmem:[%s14023_s3 + $0x358] sm:$0xff] }
 0x9f4   : > { %5564 = vst.msk [vmem:[#allocation4 + $0x190] sm:$0xff] %vm5540_vm13, %v12803_v5  ;;  %5917 = vmatmul.f32.gmra.mxu1 %v5597_v3  ;;  %6250 = vmatmul.f32.gmra.mxu0 %v5597_v3 }
 0x9f5   : > { %6030 = vmatmul.f32.gmra.mxu2 %v5633_v43  ;;  %v5772_v43 = vld [vmem:[%s14023_s3 + $0x2d8] sm:$0xff]  ;;  %6508 = vmatpush.msrb.mxu3 %v5791_v17 }
 0x9f6   : > { %6140 = vmatmul.f32.gmra.mxu3 %v5668_v58  ;;  %6397 = vmatpush.msrb.mxu2 %v5773_v42  ;;  %v5768_v42 = vld [vmem:[%s14023_s3 + $0x2b8] sm:$0xff] }
 0x9f7   : > { %5120 = vrot.lane.b32.xlu1 %v5024_v56, %s7702_s11  ;;  %5118 = vrot.lane.b32.xlu0 %v14624_v44, %s7702_s11  ;;  %v5790_v44 = vld [vmem:[%s14023_s3 + $0x368] sm:$0xff] }
 0x9f8   : > { %v5983_v22 = vpop.f32.mrf.mxu2  ;;  %5116 = vrot.lane.b32.xlu2 %v14625_v25, %s7702_s11  ;;  %6398 = vmatpush.msrb.mxu2 %v5772_v43  ;;  %v14627_v25 = vmax.f32 %v14605_v32, 0.0  ;;  %v5789_v32 = vld [vmem:[%s14023_s3 + $0x360] sm:$0xff]  ;;  %v5767_v43 = vld [vmem:[%s14023_s3 + $0x2b0] sm:$0xff] }
 0x9f9   : > { %v6093_v13 = vpop.f32.mrf.mxu3  ;;  %v5413_v2 = vpop.permute.xlu0 %5412  ;;  %6509 = vmatpush.msrb.mxu3 %v5790_v44 }
 0x9fa   : > { %v12947_v55 = vadd.f32 %v6093_v13, %v5981_v8  ;;  %v5415_v38 = vpop.permute.xlu1 %5414  ;;  %v5466_v56 = vsel %vm1547_vm9, %v5411_v14, %v5413_v2  ;;  %v5873_v26 = vpop.f32.mrf.mxu1  ;;  %v5871_v14 = vadd.f32 %v12824_v20, %v5870_v15  ;;  %v14626_v15 = vmax.f32 %v14601_v21, 0.0  ;;  %v5771_v21 = vld [vmem:[%s14023_s3 + $0x2d0] sm:$0xff]  ;;  %v5770_v8 = vld [vmem:[%s14023_s3 + $0x2c8] sm:$0xff]  ;;  %v5745_v2 = vld [vmem:[%s14023_s3 + $0x200] sm:$0xff] }
 0x9fb   : > { %v5467_v51 = vsel %vm1547_vm9, %v5415_v38, %v5417_v41  ;;  %v12951_v31 = vpop.f32.mrf.mxu0  ;;  %5532 = vst.msk [vmem:[#allocation4 + $0x1a8] sm:$0xff] %vm5507_vm12, %v5466_v56  ;;  %v5598_v23 = vld [vmem:[#allocation4 + $0x18f] sm:$0xff]  ;;  %v5874_v48 = vadd.f32 %v12824_v20, %v5873_v26  ;;  %6399 = vmatpush.msrb.mxu2 %v5771_v21  ;;  %v14628_v56 = vmax.f32 %v14604_v0, 0.0  ;;  %6296 = vmatpush.msra.mxu1 %v5745_v2  ;;  %v13091_v2 = vld [vmem:[%s14023_s3 + $0x3e0] sm:$0xff] }
 0x9fc   : > { %v5634_v36 = vld [vmem:[#allocation4 + $0x190] sm:$0xff]  ;;  %5565 = vst.msk [vmem:[#allocation4 + $0x1a8] sm:$0xff] %vm5540_vm13, %v12803_v5  ;;  %5920 = vmatmul.f32.gmra.mxu1 %v5598_v23  ;;  %6253 = vmatmul.f32.gmra.mxu0 %v5598_v23  ;;  %v5984_v19 = vadd.f32 %v5983_v22, %v5871_v14 }
 0x9fd   : > { %v5669_v6 = vld [vmem:[#allocation4 + $0x189] sm:$0xff]  ;;  %6033 = vmatmul.f32.gmra.mxu2 %v5634_v36  ;;  %5533 = vst.msk [vmem:[#allocation4 + $0x1b0] sm:$0xff] %vm5507_vm12, %v5467_v51  ;;  %v5670_v54 = vld [vmem:[#allocation4 + $0x191] sm:$0xff]  ;;  %6510 = vmatpush.msrb.mxu3 %v5789_v32 }
 0x9fe   : > { %6143 = vmatmul.f32.gmra.mxu3 %v5669_v6  ;;  %5566 = vst.msk [vmem:[#allocation4 + $0x1b0] sm:$0xff] %vm5540_vm13, %v12803_v5  ;;  %6400 = vmatpush.msrb.mxu2 %v5770_v8  ;;  %v13106_v32 = vld [vmem:[%s14023_s3 + $0x3d8] sm:$0xff] }
 0x9ff   : > { %5126 = vrot.lane.b32.xlu1 %v5030_v34, %s7702_s11  ;;  %5124 = vrot.lane.b32.xlu0 %v5028_v16, %s7702_s11 }
 0xa00   : > { %v5986_v3 = vpop.f32.mrf.mxu2  ;;  %5122 = vrot.lane.b32.xlu2 %v14626_v15, %s7702_s11  ;;  %6401 = vmatpush.msrb.mxu2 %v5769_v57  ;;  %v5787_v15 = vld [vmem:[%s14023_s3 + $0x350] sm:$0xff] }
 0xa01   : > { %v6096_v58 = vpop.f32.mrf.mxu3  ;;  %v5987_v22 = vadd.f32 %v5986_v3, %v5874_v48  ;;  %v5429_v38 = vpop.permute.xlu2 %5428  ;;  %6511 = vmatpush.msrb.mxu3 %v5788_v33 }
 0xa02   : > { %v12983_v12 = vadd.f32 %v6096_v58, %v5984_v19  ;;  %v5876_v16 = vpop.f32.mrf.mxu1  ;;  %v5419_v51 = vpop.permute.xlu0 %5418  ;;  %6402 = vmatpush.msrb.mxu2 %v5768_v42  ;;  %v13048_v58 = vld [vmem:[%s14023_s3 + $0x3f0] sm:$0xff]  ;;  %v5824_v42 = vld [vmem:[%s14023_s3 + $0x478] sm:$0xff] }
 0xa03   : > { %v12988_v34 = vpop.f32.mrf.mxu0  ;;  %v5599_v41 = vld [vmem:[#allocation4 + $0x1a7] sm:$0xff]  ;;  %v5877_v19 = vadd.f32 %v12824_v20, %v5876_v16  ;;  %6512 = vmatpush.msrb.mxu3 %v5787_v15  ;;  %6733 = vmatpush.msrb.mxu1 %v5824_v42  ;;  %v5779_v42 = vld [vmem:[%s14023_s3 + $0x310] sm:$0xff] }
 0xa04   : > { %v5635_v63 = vld [vmem:[#allocation4 + $0x1a8] sm:$0xff]  ;;  %5923 = vmatmul.f32.gmra.mxu1 %v5599_v41  ;;  %6256 = vmatmul.f32.gmra.mxu0 %v5599_v41  ;;  %v14629_v41 = vmax.f32 %v14607_v53, 0.0 }
 0xa05   : > { %6036 = vmatmul.f32.gmra.mxu2 %v5635_v63  ;;  %v5600_v23 = vld [vmem:[#allocation4 + $0x1af] sm:$0xff]  ;;  %6513 = vmatpush.msrb.mxu3 %v5786_v27 }
 0xa06   : > { %6146 = vmatmul.f32.gmra.mxu3 %v5670_v54  ;;  %v5636_v36 = vld [vmem:[#allocation4 + $0x1b0] sm:$0xff]  ;;  %v5766_v54 = vld [vmem:[%s14023_s3 + $0x2a8] sm:$0xff]  ;;  %6403 = vmatpush.msrb.mxu2 %v5767_v43 }
 0xa07   : > { %5132 = vrot.lane.b32.xlu1 %v5036_v62, %s7702_s11  ;;  %5130 = vrot.lane.b32.xlu0 %v14627_v25, %s7702_s11  ;;  %v13021_v62 = vld [vmem:[%s14023_s3 + $0x3f8] sm:$0xff]  ;;  %v5671_v14 = vld [vmem:[#allocation4 + $0x1a9] sm:$0xff]  ;;  %v5765_v25 = vld [vmem:[%s14023_s3 + $0x2a0] sm:$0xff] }
 0xa08   : > { %v5989_v13 = vpop.f32.mrf.mxu2  ;;  %5128 = vrot.lane.b32.xlu2 %v14628_v56, %s7702_s11  ;;  %6620 = vmatpush.msrb.mxu0 %v13021_v62  ;;  %v5764_v56 = vld [vmem:[%s14023_s3 + $0x298] sm:$0xff]  ;;  %v5762_v15 = vld [vmem:[%s14023_s3 + $0x288] sm:$0xff] }
 0xa09   : > { %v6099_v18 = vpop.f32.mrf.mxu3  ;;  %v5421_v39 = vpop.permute.xlu1 %5420  ;;  %v5990_v17 = vadd.f32 %v5989_v13, %v5877_v19  ;;  %6404 = vmatpush.msrb.mxu2 %v5766_v54 }
 0xa0a   : > { %v13023_v26 = vadd.f32 %v6099_v18, %v5987_v22  ;;  %v5468_v0 = vsel %vm1547_vm9, %v5419_v51, %v5421_v39  ;;  %v5879_v6 = vpop.f32.mrf.mxu1  ;;  %6621 = vmatpush.msrb.mxu0 %v13048_v58  ;;  %v13073_v53 = vpop.permute.xlu2 %5434  ;;  %v5672_v22 = vld [vmem:[#allocation4 + $0x1b1] sm:$0xff] }
 0xa0b   : > { %5534 = vst.msk [vmem:[#allocation4 + $0x1c8] sm:$0xff] %vm5507_vm12, %v5468_v0  ;;  %v13037_v3 = vpop.f32.mrf.mxu0  ;;  %v5784_v18 = vld [vmem:[%s14023_s3 + $0x338] sm:$0xff]  ;;  %6405 = vmatpush.msrb.mxu2 %v5765_v25  ;;  %v5783_v0 = vld [vmem:[%s14023_s3 + $0x330] sm:$0xff] }
 0xa0c   : > { %5567 = vst.msk [vmem:[#allocation4 + $0x1c8] sm:$0xff] %vm5540_vm13, %v12803_v5  ;;  %5926 = vmatmul.f32.gmra.mxu1 %v5600_v23  ;;  %6259 = vmatmul.f32.gmra.mxu0 %v5600_v23 }
 0xa0d   : > { %6039 = vmatmul.f32.gmra.mxu2 %v5636_v36  ;;  %6622 = vmatpush.msrb.mxu0 %v13068_v4  ;;  %v5763_v36 = vld [vmem:[%s14023_s3 + $0x290] sm:$0xff] }
 0xa0e   : > { %6149 = vmatmul.f32.gmra.mxu3 %v5671_v14  ;;  %6406 = vmatpush.msrb.mxu2 %v5764_v56  ;;  %v13120_v14 = vld [vmem:[%s14023_s3 + $0x3d0] sm:$0xff] }
 0xa0f   : > { %5138 = vrot.lane.b32.xlu1 %v5042_v9, %s7702_s11  ;;  %5136 = vrot.lane.b32.xlu0 %v5040_v10, %s7702_s11 }
 0xa10   : > { %v5992_v16 = vpop.f32.mrf.mxu2  ;;  %5134 = vrot.lane.b32.xlu2 %v14629_v41, %s7702_s11  ;;  %6623 = vmatpush.msrb.mxu0 %v13091_v2  ;;  %s7052_s11 = sshll.u32 %s8394_s23, 4  ;;  %s7053_s11 = int_to_ptr.vmem [resolvable:$true] %s7052_s11 }
 0xa11   : > { %v6102_v63 = vpop.f32.mrf.mxu3  ;;  %v5425_v9 = vpop.permute.xlu0 %5424  ;;  %6407 = vmatpush.msrb.mxu2 %v5763_v36 }
 0xa12   : > { %v13070_v10 = vadd.f32 %v6102_v63, %v5990_v17  ;;  %v5427_v21 = vpop.permute.xlu1 %5426  ;;  %v5469_v48 = vsel %vm1547_vm9, %v12978_v49, %v5425_v9  ;;  %v5882_v44 = vpop.f32.mrf.mxu1  ;;  %v5785_v49 = vld [vmem:[%s14023_s3 + $0x340] sm:$0xff]  ;;  %6624 = vmatpush.msrb.mxu0 %v13106_v32  ;;  %v5782_v17 = vld [vmem:[%s14023_s3 + $0x328] sm:$0xff] }
 0xa13   : > { %v5470_v8 = vsel %vm1547_vm9, %v5427_v21, %v5429_v38  ;;  %5535 = vst.msk [vmem:[#allocation4 + $0x1d0] sm:$0xff] %vm5507_vm12, %v5469_v48  ;;  %v5601_v13 = vld [vmem:[#allocation4 + $0x1c7] sm:$0xff]  ;;  %v5880_v38 = vadd.f32 %v12824_v20, %v5879_v6  ;;  %6514 = vmatpush.msrb.mxu3 %v5785_v49  ;;  %v13108_v39 = vpop.f32.mrf.mxu0  ;;  %v5883_v27 = vadd.f32 %v12824_v20, %v5882_v44  ;;  %v5780_v44 = vld [vmem:[%s14023_s3 + $0x318] sm:$0xff] }
 0xa14   : > { %14630 = vst [vmem:[#allocation49_spill] sm:$0xff] %v13070_v10  ;;  %v5637_v57 = vld [vmem:[#allocation4 + $0x1c8] sm:$0xff]  ;;  %5929 = vmatmul.f32.gmra.mxu1 %v5601_v13  ;;  %6262 = vmatmul.f32.gmra.mxu0 %v5601_v13  ;;  %v5761_v9 = vld [vmem:[%s14023_s3 + $0x280] sm:$0xff] }
 0xa15   : > { %5568 = vst.msk [vmem:[#allocation4 + $0x1d0] sm:$0xff] %vm5540_vm13, %v12803_v5  ;;  %6042 = vmatmul.f32.gmra.mxu2 %v5637_v57  ;;  %v5993_v51 = vadd.f32 %v5992_v16, %v5880_v38  ;;  %6515 = vmatpush.msrb.mxu3 %v5784_v18  ;;  %v13140_v63 = vld [vmem:[%s14023_s3 + $0x3c8] sm:$0xff]  ;;  %v5781_v21 = vld [vmem:[%s14023_s3 + $0x320] sm:$0xff]  ;;  %v13161_v57 = vld [vmem:[%s14023_s3 + $0x3b8] sm:$0xff] }
 0xa16   : > { %5536 = vst.msk [vmem:[#allocation4 + $0x1e8] sm:$0xff] %vm5507_vm12, %v5470_v8  ;;  %6152 = vmatmul.f32.gmra.mxu3 %v5672_v22  ;;  %6625 = vmatpush.msrb.mxu0 %v13120_v14  ;;  %v13152_v48 = vld [vmem:[%s14023_s3 + $0x3c0] sm:$0xff]  ;;  %v7590_v10 = vld [vmem:[#allocation4 + $0x128] sm:$0xff] }
 0xa17   : > { %5569 = vst.msk [vmem:[#allocation4 + $0x1e8] sm:$0xff] %vm5540_vm13, %v12803_v5  ;;  %6516 = vmatpush.msrb.mxu3 %v5783_v0  ;;  %6408 = vmatpush.msrb.mxu2 %v5762_v15 }
 0xa18   : > { %14631 = vst [vmem:[#allocation48_spill] sm:$0xff] %v13108_v39  ;;  %v5995_v23 = vpop.f32.mrf.mxu2  ;;  %6626 = vmatpush.msrb.mxu0 %v13140_v63  ;;  %v13557_v39 = vld [vmem:[#allocation4 + $0x111] sm:$0xff] }
 0xa19   : > { %v6105_v6 = vpop.f32.mrf.mxu3  ;;  %6517 = vmatpush.msrb.mxu3 %v5782_v17  ;;  %v5996_v8 = vadd.f32 %v5995_v23, %v5883_v27  ;;  %v5431_v25 = vpop.permute.xlu0 %5430  ;;  %6409 = vmatpush.msrb.mxu2 %v5761_v9  ;;  %v5778_v17 = vld [vmem:[%s14023_s3 + $0x308] sm:$0xff]  ;;  %v5823_v27 = vld [vmem:[%s14023_s3 + $0x470] sm:$0xff] }
 0xa1a   : > { %v13125_v33 = vadd.f32 %v6105_v6, %v5993_v51  ;;  %v5885_v19 = vpop.f32.mrf.mxu1  ;;  %v13128_v43 = vpop.permute.xlu2 %5440  ;;  %6627 = vmatpush.msrb.mxu0 %v13152_v48  ;;  %6734 = vmatpush.msrb.mxu1 %v5823_v27 }
 0xa1b   : > { %6518 = vmatpush.msrb.mxu3 %v5781_v21  ;;  %v13163_v49 = vpop.f32.mrf.mxu0  ;;  %7236 = vmatpush.msra.mxu2 %v13021_v62  ;;  %v13184_v62 = vld [vmem:[%s14023_s3 + $0x3b0] sm:$0xff]  ;;  %v5886_v15 = vadd.f32 %v12824_v20, %v5885_v19 }
 0xa1c   : > { %14632 = vst [vmem:[#allocation20_spill] sm:$0xff] %v13125_v33  ;;  %v5602_v16 = vld [vmem:[#allocation4 + $0x1cf] sm:$0xff]  ;;  %6628 = vmatpush.msrb.mxu0 %v13161_v57 }
 0xa1d   : > { %v5638_v54 = vld [vmem:[#allocation4 + $0x1d0] sm:$0xff]  ;;  %5932 = vmatmul.f32.gmra.mxu1 %v5602_v16  ;;  %6265 = vmatmul.f32.gmra.mxu0 %v5602_v16  ;;  %14633 = vst [vmem:[#allocation60_spill] sm:$0xff] %v13163_v49  ;;  %v7583_v49 = vld [vmem:[#allocation4 + $0x107] sm:$0xff] }
 0xa1e   : > { %v5673_v41 = vld [vmem:[#allocation4 + $0x1c9] sm:$0xff]  ;;  %6045 = vmatmul.f32.gmra.mxu2 %v5638_v54  ;;  %v13174_v6 = vld [vmem:[#allocation4 + $0x1d1] sm:$0xff]  ;;  %6519 = vmatpush.msrb.mxu3 %v5780_v44  ;;  %v5777_v54 = vld [vmem:[%s14023_s3 + $0x300] sm:$0xff] }
 0xa1f   : > { %6155 = vmatmul.f32.gmra.mxu3 %v5673_v41  ;;  %v13167_v18 = vld [vmem:[#allocation4 + $0x1e7] sm:$0xff]  ;;  %7237 = vmatpush.msra.mxu2 %v13048_v58  ;;  %v7587_v33 = vld [vmem:[#allocation4 + $0x110] sm:$0xff] }
 0xa20   : > { %v5998_v22 = vpop.f32.mrf.mxu2  ;;  %v13169_v51 = vld [vmem:[#allocation4 + $0x1e8] sm:$0xff]  ;;  %6520 = vmatpush.msrb.mxu3 %v5779_v42  ;;  %6629 = vmatpush.msrb.mxu0 %v13184_v62  ;;  %v13213_v41 = vld [vmem:[%s14023_s3 + $0x3a0] sm:$0xff] }
 0xa21   : > { %v6108_v13 = vpop.f32.mrf.mxu3  ;;  %v5433_v56 = vpop.permute.xlu1 %5432  ;;  %v13202_v58 = vld [vmem:[%s14023_s3 + $0x3a8] sm:$0xff]  ;;  %v5999_v19 = vadd.f32 %v5998_v22, %v5886_v15  ;;  %7238 = vmatpush.msra.mxu2 %v13068_v4  ;;  %v13231_v4 = vld [vmem:[%s14023_s3 + $0x398] sm:$0xff] }
 0xa22   : > { %v13165_v38 = vadd.f32 %v6108_v13, %v5996_v8  ;;  %v5471_v23 = vsel %vm1547_vm9, %v5431_v25, %v5433_v56  ;;  %v5888_v36 = vpop.f32.mrf.mxu1  ;;  %v5081_v0 = vpop.permute.xlu2 %5080  ;;  %6521 = vmatpush.msrb.mxu3 %v5778_v17  ;;  %6630 = vmatpush.msrb.mxu0 %v13202_v58  ;;  %v13265_v15 = vld [vmem:[%s14023_s3 + $0x388] sm:$0xff] }
 0xa23   : > { %5537 = vst.msk [vmem:[#allocation4 + $0x1f0] sm:$0xff] %vm5507_vm12, %v5471_v23  ;;  %7239 = vmatpush.msra.mxu2 %v13091_v2 }
 0xa24   : > { %14634 = vst [vmem:[#allocation32_spill] sm:$0xff] %v13165_v38  ;;  %6522 = vmatpush.msrb.mxu3 %v5777_v54  ;;  %6631 = vmatpush.msrb.mxu0 %v13213_v41  ;;  %v13536_v38 = vld [vmem:[#allocation4 + $0xf1] sm:$0xff] }
 0xa25   : > { %5570 = vst.msk [vmem:[#allocation4 + $0x1f0] sm:$0xff] %vm5540_vm13, %v12803_v5  ;;  %5935 = vmatmul.f32.gmra.mxu1 %v13167_v18  ;;  %6268 = vmatmul.f32.gmra.mxu0 %v13167_v18 }
 0xa26   : > { %6048 = vmatmul.f32.gmra.mxu2 %v13169_v51  ;;  %5177 = vst.msk [vmem:[%s8394_s23 + $0x38] sm:$0xff] %vm5172_vm14, %v5081_v0  ;;  %6632 = vmatpush.msrb.mxu0 %v13231_v4 }
 0xa27   : > { %6158 = vmatmul.f32.gmra.mxu3 %v13174_v6  ;;  %5178 = vst.msk [vmem:[%s8394_s23 + $0x40] sm:$0xff] %vm1547_vm9, %v5081_v0  ;;  %7240 = vmatpush.msra.mxu2 %v13106_v32  ;;  %v5889_v0 = vadd.f32 %v12824_v20, %v5888_v36  ;;  %v13254_v32 = vld [vmem:[%s14023_s3 + $0x390] sm:$0xff] }
 0xa28   : > { %v6001_v16 = vpop.f32.mrf.mxu2  ;;  %6633 = vmatpush.msrb.mxu0 %v13254_v32 }
 0xa29   : > { %v6111_v9 = vpop.f32.mrf.mxu3  ;;  %v5437_v8 = vpop.permute.xlu0 %5436  ;;  %7241 = vmatpush.msra.mxu2 %v13120_v14  ;;  %v6002_v36 = vadd.f32 %v6001_v16, %v5889_v0 }
 0xa2a   : > { %v13220_v21 = vadd.f32 %v6111_v9, %v5999_v19  ;;  %v5439_v22 = vpop.permute.xlu1 %5438  ;;  %v5472_v44 = vsel %vm1547_vm9, %v13073_v53, %v5437_v8  ;;  %v5891_v13 = vpop.f32.mrf.mxu1  ;;  %6634 = vmatpush.msrb.mxu0 %v13265_v15  ;;  %v7542_v8 = vld [vmem:[#allocation4 + $0x28] sm:$0xff] }
 0xa2b   : > { %v5473_v25 = vsel %vm1547_vm9, %v5439_v22, %v13128_v43  ;;  %v5087_v56 = vpop.permute.xlu2 %5086  ;;  %5538 = vst.msk [vmem:[#allocation4 + $0x208] sm:$0xff] %vm5507_vm12, %v5472_v44  ;;  %v13241_v43 = vpop.f32.mrf.mxu0  ;;  %7242 = vmatpush.msra.mxu2 %v13140_v63  ;;  %v13286_v63 = vld [vmem:[%s14023_s3 + $0x380] sm:$0xff]  ;;  %v7543_v22 = vld [vmem:[#allocation4 + $0x29] sm:$0xff]  ;;  %v5892_v44 = vadd.f32 %v12824_v20, %v5891_v13 }
 0xa2c   : > { %14635 = vst [vmem:[#allocation44_spill] sm:$0xff] %v13220_v21  ;;  %v13234_v23 = vld [vmem:[#allocation4 + $0x1ef] sm:$0xff]  ;;  %6635 = vmatpush.msrb.mxu0 %v13286_v63 }
 0xa2d   : > { %v13236_v2 = vld [vmem:[#allocation4 + $0x1f0] sm:$0xff]  ;;  %14636 = vst [vmem:[#allocation61_spill] sm:$0xff] %v13241_v43  ;;  %5938 = vmatmul.f32.gmra.mxu1 %v13234_v23  ;;  %6271 = vmatmul.f32.gmra.mxu0 %v13234_v23 }
 0xa2e   : > { %v13238_v53 = vld [vmem:[#allocation4 + $0x1e9] sm:$0xff]  ;;  %5571 = vst.msk [vmem:[#allocation4 + $0x208] sm:$0xff] %vm5540_vm13, %v12803_v5  ;;  %6051 = vmatmul.f32.gmra.mxu2 %v13236_v2  ;;  %v13275_v27 = vld [vmem:[#allocation4 + $0x1f1] sm:$0xff] }
 0xa2f   : > { %5539 = vst.msk [vmem:[#allocation4 + $0x210] sm:$0xff] %vm5507_vm12, %v5473_v25  ;;  %6161 = vmatmul.f32.gmra.mxu3 %v13238_v53  ;;  %7243 = vmatpush.msra.mxu2 %v13152_v48  ;;  %v7575_v21 = vld [vmem:[#allocation4 + $0xd0] sm:$0xff] }
 0xa30   : > { %5572 = vst.msk [vmem:[#allocation4 + $0x210] sm:$0xff] %vm5540_vm13, %v12803_v5  ;;  %v6004_v42 = vpop.f32.mrf.mxu2  ;;  %v13519_v43 = vld [vmem:[#allocation4 + $0xd1] sm:$0xff] }
 0xa31   : > { %5183 = vst.msk [vmem:[%s8394_s23 + $0x80] sm:$0xff] %vm5172_vm14, %v5087_v56  ;;  %v6114_v17 = vpop.f32.mrf.mxu3  ;;  %v5077_v19 = vpop.permute.xlu0 %5076  ;;  %7244 = vmatpush.msra.mxu2 %v13161_v57  ;;  %v6005_v25 = vadd.f32 %v6004_v42, %v5892_v44 }
 0xa32   : > { %5184 = vst.msk [vmem:[%s8394_s23 + $0x88] sm:$0xff] %vm1547_vm9, %v5087_v56  ;;  %v13271_v5 = vadd.f32 %v6114_v17, %v6002_v36  ;;  %v5079_v14 = vpop.permute.xlu1 %5078  ;;  %v5894_v16 = vpop.f32.mrf.mxu1  ;;  %v5822_v56 = vld [vmem:[%s14023_s3 + $0x468] sm:$0xff] }
 0xa33   : > { %5175 = vst.msk [vmem:[%s8394_s23 + $0x20] sm:$0xff] %vm5172_vm14, %v5079_v14  ;;  %v5093_v54 = vpop.permute.xlu2 %5092  ;;  %v13295_v48 = vpop.f32.mrf.mxu0  ;;  %6735 = vmatpush.msrb.mxu1 %v5822_v56  ;;  %7245 = vmatpush.msra.mxu2 %v13184_v62  ;;  %v7544_v62 = vld [vmem:[#allocation4 + $0x30] sm:$0xff] }
 0xa34   : > { %14637 = vst [vmem:[#allocation37_spill] sm:$0xff] %v13271_v5 }
 0xa35   : > { %5176 = vst.msk [vmem:[%s8394_s23 + $0x28] sm:$0xff] %vm1547_vm9, %v5079_v14  ;;  %v13281_v9 = vld [vmem:[#allocation4 + $0x207] sm:$0xff]  ;;  %6297 = vmatmul.f32.vlgmr.msra.gmra.mxu1 %v7542_v8  ;;  %7246 = vmatpush.msra.mxu2 %v13202_v58  ;;  %v5895_v8 = vadd.f32 %v12824_v20, %v5894_v16 }
 0xa36   : > { %5173 = vst.msk [vmem:[%s8394_s23 + $0x8] sm:$0xff] %vm5172_vm14, %v5077_v19  ;;  %6410 = vmatmul.f32.vlgmr.msrb.gmra.mxu2 %v7543_v22  ;;  %6274 = vmatmul.f32.gmra.mxu0 %v13281_v9  ;;  %v7546_v22 = vld [vmem:[#allocation4 + $0x47] sm:$0xff] }
 0xa37   : > { %5174 = vst.msk [vmem:[%s8394_s23 + $0x10] sm:$0xff] %vm1547_vm9, %v5077_v19  ;;  %6164 = vmatmul.f32.gmra.mxu3 %v13275_v27  ;;  %v13311_v19 = vld [vmem:[#allocation4 + $0x20f] sm:$0xff]  ;;  %7247 = vmatpush.msra.mxu2 %v13213_v41 }
 0xa38   : > { %14638 = vst [vmem:[#allocation67_spill] sm:$0xff] %v13295_v48  ;;  %v6007_v13 = vpop.f32.mrf.mxu2  ;;  %v7547_v41 = vld [vmem:[#allocation4 + $0x48] sm:$0xff] }
 0xa39   : > { %5189 = vst.msk [vmem:[%s8394_s23 + $0xc8] sm:$0xff] %vm5172_vm14, %v5093_v54  ;;  %v6117_v0 = vpop.f32.mrf.mxu3  ;;  %v5083_v14 = vpop.permute.xlu0 %5082  ;;  %v6008_v58 = vadd.f32 %v6007_v13, %v5895_v8  ;;  %7248 = vmatpush.msra.mxu2 %v13231_v4  ;;  %v13339_v13 = vld [vmem:[#allocation4 + $0x49] sm:$0xff] }
 0xa3a   : > { %5190 = vst.msk [vmem:[%s8394_s23 + $0xd0] sm:$0xff] %vm1547_vm9, %v5093_v54  ;;  %v13307_v36 = vadd.f32 %v6117_v0, %v6005_v25  ;;  %v5085_v17 = vpop.permute.xlu1 %5084  ;;  %v5897_v57 = vpop.f32.mrf.mxu1  ;;  %v7545_v54 = vld [vmem:[#allocation4 + $0x31] sm:$0xff] }
 0xa3b   : > { %5181 = vst.msk [vmem:[%s8394_s23 + $0x68] sm:$0xff] %vm5172_vm14, %v5085_v17  ;;  %v5099_v42 = vpop.permute.xlu2 %5098  ;;  %v13327_v25 = vpop.f32.mrf.mxu0  ;;  %7249 = vmatpush.msra.mxu2 %v13254_v32  ;;  %v5898_v4 = vadd.f32 %v12824_v20, %v5897_v57  ;;  %v5821_v57 = vld [vmem:[%s14023_s3 + $0x460] sm:$0xff] }
 0xa3c   : > { %14639 = vst [vmem:[#allocation53_spill] sm:$0xff] %v13307_v36  ;;  %6736 = vmatpush.msrb.mxu1 %v5821_v57 }
 0xa3d   : > { %5182 = vst.msk [vmem:[%s8394_s23 + $0x70] sm:$0xff] %vm1547_vm9, %v5085_v17  ;;  %6300 = vmatmul.f32.gmra.mxu1 %v7544_v62  ;;  %7250 = vmatpush.msra.mxu2 %v13265_v15 }
 0xa3e   : > { %5179 = vst.msk [vmem:[%s8394_s23 + $0x50] sm:$0xff] %vm5172_vm14, %v5083_v14  ;;  %6413 = vmatmul.f32.gmra.mxu2 %v7545_v54  ;;  %6277 = vmatmul.f32.gmra.mxu0 %v13311_v19 }
 0xa3f   : > { %5180 = vst.msk [vmem:[%s8394_s23 + $0x58] sm:$0xff] %vm1547_vm9, %v5083_v14  ;;  %6523 = vmatmul.f32.vlgmr.msrb.gmra.mxu3 %v7546_v22  ;;  %7251 = vmatpush.msra.mxu2 %v13286_v63  ;;  %v13364_v63 = vld [vmem:[#allocation4 + $0x51] sm:$0xff] }
 0xa40   : > { %5195 = vst.msk [vmem:[%s8394_s23 + $0x110] sm:$0xff] %vm5172_vm14, %v5099_v42  ;;  %v6010_v44 = vpop.f32.mrf.mxu2 }
 0xa41   : > { %5196 = vst.msk [vmem:[%s8394_s23 + $0x118] sm:$0xff] %vm1547_vm9, %v5099_v42  ;;  %v6120_v16 = vpop.f32.mrf.mxu3  ;;  %v5089_v17 = vpop.permute.xlu0 %5088  ;;  %v7549_v42 = vld [vmem:[#allocation4 + $0x4f] sm:$0xff]  ;;  %v6011_v32 = vadd.f32 %v6010_v44, %v5898_v4 }
 0xa42   : > { %14640 = vst [vmem:[#allocation62_spill] sm:$0xff] %v13327_v25  ;;  %v13330_v56 = vadd.f32 %v6120_v16, %v6008_v58  ;;  %v5091_v0 = vpop.permute.xlu1 %5090  ;;  %v5900_v14 = vpop.f32.mrf.mxu1 }
 0xa43   : > { %5187 = vst.msk [vmem:[%s8394_s23 + $0xb0] sm:$0xff] %vm5172_vm14, %v5091_v0  ;;  %v5105_v62 = vpop.permute.xlu2 %5104 }
 0xa44   : > { %14641 = vst [vmem:[#allocation65_spill] sm:$0xff] %v13330_v56 }
 0xa45   : > { %5188 = vst.msk [vmem:[%s8394_s23 + $0xb8] sm:$0xff] %vm1547_vm9, %v5091_v0  ;;  %6303 = vmatmul.f32.gmra.mxu1 %v7547_v41  ;;  %v13360_v0 = vpop.f32.mrf.mxu0 }
 0xa46   : > { %5185 = vst.msk [vmem:[%s8394_s23 + $0x98] sm:$0xff] %vm5172_vm14, %v5089_v17  ;;  %6416 = vmatmul.f32.gmra.mxu2 %v13339_v13  ;;  %6636 = vmatmul.f32.vlgmr.msrb.gmra.mxu0 %v7547_v41  ;;  %v7552_v41 = vld [vmem:[#allocation4 + $0x67] sm:$0xff] }
 0xa47   : > { %5186 = vst.msk [vmem:[%s8394_s23 + $0xa0] sm:$0xff] %vm1547_vm9, %v5089_v17  ;;  %6526 = vmatmul.f32.gmra.mxu3 %v7549_v42  ;;  %v7550_v17 = vld [vmem:[#allocation4 + $0x50] sm:$0xff] }
 0xa48   : > { %5201 = vst.msk [vmem:[%s8394_s23 + $0x158] sm:$0xff] %vm5172_vm14, %v5105_v62  ;;  %v6013_v54 = vpop.f32.mrf.mxu2 }
 0xa49   : > { %5202 = vst.msk [vmem:[%s8394_s23 + $0x160] sm:$0xff] %vm1547_vm9, %v5105_v62  ;;  %v6123_v8 = vpop.f32.mrf.mxu3  ;;  %v5095_v16 = vpop.permute.xlu0 %5094  ;;  %v5901_v62 = vadd.f32 %v12824_v20, %v5900_v14 }
 0xa4a   : > { %v13354_v22 = vadd.f32 %v6123_v8, %v6011_v32  ;;  %v5097_v58 = vpop.permute.xlu1 %5096  ;;  %v5903_v15 = vpop.f32.mrf.mxu1  ;;  %14643 = vst [vmem:[#allocation73_spill] sm:$0xff] %v13360_v0 }
 0xa4b   : > { %5193 = vst.msk [vmem:[%s8394_s23 + $0xf8] sm:$0xff] %vm5172_vm14, %v5097_v58  ;;  %v5111_v44 = vpop.permute.xlu2 %5110  ;;  %v6014_v4 = vadd.f32 %v6013_v54, %v5901_v62  ;;  %v7553_v54 = vld [vmem:[#allocation4 + $0x68] sm:$0xff] }
 0xa4c   : > { %14642 = vst [vmem:[#allocation34_spill] sm:$0xff] %v13354_v22  ;;  %v7555_v62 = vld [vmem:[#allocation4 + $0x6f] sm:$0xff] }
 0xa4d   : > { %5194 = vst.msk [vmem:[%s8394_s23 + $0x100] sm:$0xff] %vm1547_vm9, %v5097_v58  ;;  %6306 = vmatmul.f32.gmra.mxu1 %v7550_v17 }
 0xa4e   : > { %5191 = vst.msk [vmem:[%s8394_s23 + $0xe0] sm:$0xff] %vm5172_vm14, %v5095_v16  ;;  %6419 = vmatmul.f32.gmra.mxu2 %v13364_v63  ;;  %6639 = vmatmul.f32.gmra.mxu0 %v7550_v17  ;;  %v5904_v17 = vadd.f32 %v12824_v20, %v5903_v15 }
 0xa4f   : > { %5192 = vst.msk [vmem:[%s8394_s23 + $0xe8] sm:$0xff] %vm1547_vm9, %v5095_v16  ;;  %6529 = vmatmul.f32.gmra.mxu3 %v7552_v41  ;;  %v5820_v41 = vld [vmem:[%s14023_s3 + $0x458] sm:$0xff] }
 0xa50   : > { %5207 = vst.msk [vmem:[%s8394_s23 + $0x1a0] sm:$0xff] %vm5172_vm14, %v5111_v44  ;;  %v6016_v42 = vpop.f32.mrf.mxu2  ;;  %6737 = vmatpush.msrb.mxu1 %v5820_v41 }
 0xa51   : > { %5208 = vst.msk [vmem:[%s8394_s23 + $0x1a8] sm:$0xff] %vm1547_vm9, %v5111_v44  ;;  %v6126_v32 = vpop.f32.mrf.mxu3  ;;  %v5101_v58 = vpop.permute.xlu0 %5100  ;;  %v13382_v44 = vld [vmem:[#allocation4 + $0x69] sm:$0xff] }
 0xa52   : > { %v13374_v57 = vadd.f32 %v6126_v32, %v6014_v4  ;;  %v5103_v8 = vpop.permute.xlu1 %5102  ;;  %v5906_v14 = vpop.f32.mrf.mxu1  ;;  %5197 = vst.msk [vmem:[%s8394_s23 + $0x128] sm:$0xff] %vm5172_vm14, %v5101_v58  ;;  %v6017_v32 = vadd.f32 %v6016_v42, %v5904_v17  ;;  %v7556_v42 = vld [vmem:[#allocation4 + $0x70] sm:$0xff]  ;;  %v13411_v17 = vld [vmem:[%s14024_s4 + $0x5] ss:$0 sm:$0xff] }
 0xa53   : > { %5199 = vst.msk [vmem:[%s8394_s23 + $0x140] sm:$0xff] %vm5172_vm14, %v5103_v8  ;;  %v5117_v16 = vpop.permute.xlu2 %5116  ;;  %v13391_v4 = vpop.f32.mrf.mxu0  ;;  %v5907_v41 = vadd.f32 %v13411_v17, %v5906_v14 }
 0xa54   : > { %14644 = vst [vmem:[#allocation55_spill] sm:$0xff] %v13374_v57 }
 0xa55   : > { %5200 = vst.msk [vmem:[%s8394_s23 + $0x148] sm:$0xff] %vm1547_vm9, %v5103_v8  ;;  %6309 = vmatmul.f32.gmra.mxu1 %v7553_v54 }
 0xa56   : > { %6422 = vmatmul.f32.gmra.mxu2 %v13382_v44  ;;  %5198 = vst.msk [vmem:[%s8394_s23 + $0x130] sm:$0xff] %vm1547_vm9, %v5101_v58  ;;  %6642 = vmatmul.f32.gmra.mxu0 %v7553_v54 }
 0xa57   : > { %6532 = vmatmul.f32.gmra.mxu3 %v7555_v62  ;;  %14645 = vst [vmem:[#allocation68_spill] sm:$0xff] %v13391_v4 }
 0xa58   : > { %5213 = vst.msk [vmem:[%s8394_s23 + $0x1e8] sm:$0xff] %vm5172_vm14, %v5117_v16  ;;  %v6019_v20 = vpop.f32.mrf.mxu2 }
 0xa59   : > { %5214 = vst.msk [vmem:[%s8394_s23 + $0x1f0] sm:$0xff] %vm1547_vm9, %v5117_v16  ;;  %v6129_v15 = vpop.f32.mrf.mxu3  ;;  %v5107_v54 = vpop.permute.xlu0 %5106  ;;  %v13405_v16 = vld [vmem:[#allocation4 + $0x71] sm:$0xff] }
 0xa5a   : > { %v13397_v8 = vadd.f32 %v6129_v15, %v6017_v32  ;;  %v5109_v58 = vpop.permute.xlu1 %5108  ;;  %v5909_v62 = vpop.f32.mrf.mxu1  ;;  %5203 = vst.msk [vmem:[%s8394_s23 + $0x170] sm:$0xff] %vm5172_vm14, %v5107_v54  ;;  %v7559_v32 = vld [vmem:[#allocation4 + $0x87] sm:$0xff]  ;;  %v6020_v15 = vadd.f32 %v6019_v20, %v5907_v41  ;;  %v5819_v41 = vld [vmem:[%s14023_s3 + $0x450] sm:$0xff] }
 0xa5b   : > { %5205 = vst.msk [vmem:[%s8394_s23 + $0x188] sm:$0xff] %vm5172_vm14, %v5109_v58  ;;  %v5123_v57 = vpop.permute.xlu2 %5122  ;;  %v13430_v20 = vld [vmem:[#allocation4 + $0x89] sm:$0xff]  ;;  %6738 = vmatpush.msrb.mxu1 %v5819_v41 }
 0xa5c   : > { %14646 = vst [vmem:[#allocation71_spill] sm:$0xff] %v13397_v8  ;;  %v13420_v8 = vpop.f32.mrf.mxu0  ;;  %v7565_v41 = vld [vmem:[#allocation4 + $0xa7] sm:$0xff] }
 0xa5d   : > { %5206 = vst.msk [vmem:[%s8394_s23 + $0x190] sm:$0xff] %vm1547_vm9, %v5109_v58  ;;  %6312 = vmatmul.f32.gmra.mxu1 %v7556_v42 }
 0xa5e   : > { %6425 = vmatmul.f32.gmra.mxu2 %v13405_v16  ;;  %5204 = vst.msk [vmem:[%s8394_s23 + $0x178] sm:$0xff] %vm1547_vm9, %v5107_v54  ;;  %6645 = vmatmul.f32.gmra.mxu0 %v7556_v42  ;;  %v7562_v42 = vld [vmem:[#allocation4 + $0x8f] sm:$0xff] }
 0xa5f   : > { %6535 = vmatmul.f32.gmra.mxu3 %v7559_v32  ;;  %5219 = vst.msk [vmem:[%s8394_s23 + $0x230] sm:$0xff] %vm5172_vm14, %v5123_v57 }
 0xa60   : > { %5220 = vst.msk [vmem:[%s8394_s23 + $0x238] sm:$0xff] %vm1547_vm9, %v5123_v57  ;;  %v6022_v58 = vpop.f32.mrf.mxu2  ;;  %v7560_v57 = vld [vmem:[#allocation4 + $0x88] sm:$0xff] }
 0xa61   : > { %14647 = vst [vmem:[#allocation42_spill] sm:$0xff] %v13420_v8  ;;  %v6132_v22 = vpop.f32.mrf.mxu3  ;;  %v5113_v56 = vpop.permute.xlu0 %5112 }
 0xa62   : > { %v13422_v4 = vadd.f32 %v6132_v22, %v6020_v15  ;;  %v5115_v14 = vpop.permute.xlu1 %5114  ;;  %v5912_v54 = vpop.f32.mrf.mxu1  ;;  %5209 = vst.msk [vmem:[%s8394_s23 + $0x1b8] sm:$0xff] %vm5172_vm14, %v5113_v56  ;;  %v5910_v22 = vadd.f32 %v13411_v17, %v5909_v62 }
 0xa63   : > { %5211 = vst.msk [vmem:[%s8394_s23 + $0x1d0] sm:$0xff] %vm5172_vm14, %v5115_v14  ;;  %v5129_v32 = vpop.permute.xlu2 %5128 }
 0xa64   : > { %14648 = vst [vmem:[#allocation78_spill] sm:$0xff] %v13422_v4  ;;  %v6023_v15 = vadd.f32 %v6022_v58, %v5910_v22  ;;  %v13449_v0 = vpop.f32.mrf.mxu0  ;;  %v7563_v58 = vld [vmem:[#allocation4 + $0x90] sm:$0xff]  ;;  %v5913_v22 = vadd.f32 %v13411_v17, %v5912_v54 }
 0xa65   : > { %5212 = vst.msk [vmem:[%s8394_s23 + $0x1d8] sm:$0xff] %vm1547_vm9, %v5115_v14  ;;  %6315 = vmatmul.f32.gmra.mxu1 %v7560_v57 }
 0xa66   : > { %6428 = vmatmul.f32.gmra.mxu2 %v13430_v20  ;;  %5210 = vst.msk [vmem:[%s8394_s23 + $0x1c0] sm:$0xff] %vm1547_vm9, %v5113_v56  ;;  %6648 = vmatmul.f32.gmra.mxu0 %v7560_v57 }
 0xa67   : > { %6538 = vmatmul.f32.gmra.mxu3 %v7562_v42  ;;  %5225 = vst.msk [vmem:[%s8394_s23 + $0x278] sm:$0xff] %vm5172_vm14, %v5129_v32 }
 0xa68   : > { %5226 = vst.msk [vmem:[%s8394_s23 + $0x280] sm:$0xff] %vm1547_vm9, %v5129_v32  ;;  %v6025_v14 = vpop.f32.mrf.mxu2  ;;  %v13453_v32 = vld [vmem:[#allocation4 + $0x91] sm:$0xff] }
 0xa69   : > { %v6135_v62 = vpop.f32.mrf.mxu3  ;;  %v5119_v8 = vpop.permute.xlu0 %5118  ;;  %14650 = vst [vmem:[#allocation74_spill] sm:$0xff] %v13449_v0 }
 0xa6a   : > { %v13443_v4 = vadd.f32 %v6135_v62, %v6023_v15  ;;  %v5121_v56 = vpop.permute.xlu1 %5120  ;;  %v5915_v57 = vpop.f32.mrf.mxu1  ;;  %5215 = vst.msk [vmem:[%s8394_s23 + $0x200] sm:$0xff] %vm5172_vm14, %v5119_v8  ;;  %v6026_v15 = vadd.f32 %v6025_v14, %v5913_v22  ;;  %v5818_v14 = vld [vmem:[%s14023_s3 + $0x448] sm:$0xff] }
 0xa6b   : > { %5217 = vst.msk [vmem:[%s8394_s23 + $0x218] sm:$0xff] %vm5172_vm14, %v5121_v56  ;;  %v5135_v42 = vpop.permute.xlu2 %5134  ;;  %6739 = vmatpush.msrb.mxu1 %v5818_v14  ;;  %v7571_v14 = vld [vmem:[#allocation4 + $0xc7] sm:$0xff] }
 0xa6c   : > { %14649 = vst [vmem:[#allocation63_spill] sm:$0xff] %v13443_v4  ;;  %v13480_v22 = vpop.f32.mrf.mxu0 }
 0xa6d   : > { %5218 = vst.msk [vmem:[%s8394_s23 + $0x220] sm:$0xff] %vm1547_vm9, %v5121_v56  ;;  %6318 = vmatmul.f32.gmra.mxu1 %v7563_v58 }
 0xa6e   : > { %6431 = vmatmul.f32.gmra.mxu2 %v13453_v32  ;;  %5216 = vst.msk [vmem:[%s8394_s23 + $0x208] sm:$0xff] %vm1547_vm9, %v5119_v8  ;;  %6651 = vmatmul.f32.gmra.mxu0 %v7563_v58  ;;  %v7566_v8 = vld [vmem:[#allocation4 + $0xa8] sm:$0xff] }
 0xa6f   : > { %6541 = vmatmul.f32.gmra.mxu3 %v7565_v41  ;;  %5231 = vst.msk [vmem:[%s8394_s23 + $0x2c0] sm:$0xff] %vm5172_vm14, %v5135_v42  ;;  %v13471_v58 = vld [vmem:[#allocation4 + $0xa9] sm:$0xff] }
 0xa70   : > { %5232 = vst.msk [vmem:[%s8394_s23 + $0x2c8] sm:$0xff] %vm1547_vm9, %v5135_v42  ;;  %v6028_v62 = vpop.f32.mrf.mxu2  ;;  %v5916_v42 = vadd.f32 %v13411_v17, %v5915_v57 }
 0xa71   : > { %v6138_v56 = vpop.f32.mrf.mxu3  ;;  %v5125_v36 = vpop.permute.xlu0 %5124  ;;  %14652 = vst [vmem:[#allocation38_spill] sm:$0xff] %v13480_v22 }
 0xa72   : > { %v13463_v4 = vadd.f32 %v6138_v56, %v6026_v15  ;;  %v5127_v0 = vpop.permute.xlu1 %5126  ;;  %v5918_v54 = vpop.f32.mrf.mxu1  ;;  %5221 = vst.msk [vmem:[%s8394_s23 + $0x248] sm:$0xff] %vm5172_vm14, %v5125_v36  ;;  %v6029_v41 = vadd.f32 %v6028_v62, %v5916_v42 }
 0xa73   : > { %5223 = vst.msk [vmem:[%s8394_s23 + $0x260] sm:$0xff] %vm5172_vm14, %v5127_v0  ;;  %v5919_v62 = vadd.f32 %v13411_v17, %v5918_v54  ;;  %v13506_v54 = vld [vmem:[#allocation4 + $0xc9] sm:$0xff] }
 0xa74   : > { %14651 = vst [vmem:[#allocation76_spill] sm:$0xff] %v13463_v4 }
 0xa75   : > { %5224 = vst.msk [vmem:[%s8394_s23 + $0x268] sm:$0xff] %vm1547_vm9, %v5127_v0  ;;  %6321 = vmatmul.f32.gmra.mxu1 %v7566_v8  ;;  %v7568_v0 = vld [vmem:[#allocation4 + $0xaf] sm:$0xff] }
 0xa76   : > { %6434 = vmatmul.f32.gmra.mxu2 %v13471_v58  ;;  %5222 = vst.msk [vmem:[%s8394_s23 + $0x250] sm:$0xff] %vm1547_vm9, %v5125_v36  ;;  %6654 = vmatmul.f32.gmra.mxu0 %v7566_v8  ;;  %v7569_v36 = vld [vmem:[#allocation4 + $0xb0] sm:$0xff] }
 0xa77   : > { %6544 = vmatmul.f32.gmra.mxu3 %v7568_v0  ;;  %v13490_v8 = vld [vmem:[#allocation4 + $0xb1] sm:$0xff]  ;;  %v13496_v0 = vpop.f32.mrf.mxu0 }
 0xa78   : > { %v6031_v15 = vpop.f32.mrf.mxu2  ;;  %14654 = vst [vmem:[#allocation69_spill] sm:$0xff] %v13496_v0 }
 0xa79   : > { %v6141_v56 = vpop.f32.mrf.mxu3  ;;  %v5131_v5 = vpop.permute.xlu0 %5130  ;;  %v6032_v42 = vadd.f32 %v6031_v15, %v5919_v62  ;;  %v5817_v15 = vld [vmem:[%s14023_s3 + $0x440] sm:$0xff]  ;;  %v7574_v62 = vld [vmem:[#allocation4 + $0xcf] sm:$0xff] }
 0xa7a   : > { %v13482_v4 = vadd.f32 %v6141_v56, %v6029_v41  ;;  %v5133_v25 = vpop.permute.xlu1 %5132  ;;  %v5921_v57 = vpop.f32.mrf.mxu1  ;;  %5227 = vst.msk [vmem:[%s8394_s23 + $0x290] sm:$0xff] %vm5172_vm14, %v5131_v5  ;;  %6740 = vmatpush.msrb.mxu1 %v5817_v15 }
 0xa7b   : > { %5229 = vst.msk [vmem:[%s8394_s23 + $0x2a8] sm:$0xff] %vm5172_vm14, %v5133_v25 }
 0xa7c   : > { %14653 = vst [vmem:[#allocation83_spill] sm:$0xff] %v13482_v4 }
 0xa7d   : > { %5230 = vst.msk [vmem:[%s8394_s23 + $0x2b0] sm:$0xff] %vm1547_vm9, %v5133_v25  ;;  %6324 = vmatmul.f32.gmra.mxu1 %v7569_v36 }
 0xa7e   : > { %6437 = vmatmul.f32.gmra.mxu2 %v13490_v8  ;;  %5228 = vst.msk [vmem:[%s8394_s23 + $0x298] sm:$0xff] %vm1547_vm9, %v5131_v5  ;;  %6657 = vmatmul.f32.gmra.mxu0 %v7569_v36  ;;  %v7572_v5 = vld [vmem:[#allocation4 + $0xc8] sm:$0xff]  ;;  %v5922_v36 = vadd.f32 %v13411_v17, %v5921_v57 }
 0xa7f   : > { %6547 = vmatmul.f32.gmra.mxu3 %v7571_v14  ;;  %v13517_v0 = vpop.f32.mrf.mxu0  ;;  %v7577_v57 = vld [vmem:[#allocation4 + $0xe7] sm:$0xff] }
 0xa80   : > { %v6034_v25 = vpop.f32.mrf.mxu2  ;;  %14657 = vst [vmem:[#allocation59_spill] sm:$0xff] %v13517_v0  ;;  %v7581_v0 = vld [vmem:[#allocation4 + $0xf0] sm:$0xff] }
 0xa81   : > { %v6144_v41 = vpop.f32.mrf.mxu3  ;;  %v5137_v22 = vpop.permute.xlu0 %5136 }
 0xa82   : > { %v13498_v56 = vadd.f32 %v6144_v41, %v6032_v42  ;;  %v5139_v4 = vpop.permute.xlu1 %5138  ;;  %v5924_v48 = vpop.f32.mrf.mxu1  ;;  %5233 = vst.msk [vmem:[%s8394_s23 + $0x2d8] sm:$0xff] %vm5172_vm14, %v5137_v22 }
 0xa83   : > { %5235 = vst.msk [vmem:[%s8394_s23 + $0x2f0] sm:$0xff] %vm5172_vm14, %v5139_v4 }
 0xa84   : > { %14655 = vst [vmem:[#allocation79_spill] sm:$0xff] %v13498_v56 }
 0xa85   : > { %5236 = vst.msk [vmem:[%s8394_s23 + $0x2f8] sm:$0xff] %vm1547_vm9, %v5139_v4  ;;  %6327 = vmatmul.f32.gmra.mxu1 %v7572_v5  ;;  %v6035_v4 = vadd.f32 %v6034_v25, %v5922_v36 }
 0xa86   : > { %6440 = vmatmul.f32.gmra.mxu2 %v13506_v54  ;;  %5234 = vst.msk [vmem:[%s8394_s23 + $0x2e0] sm:$0xff] %vm1547_vm9, %v5137_v22  ;;  %6660 = vmatmul.f32.gmra.mxu0 %v7572_v5  ;;  %v5925_v22 = vadd.f32 %v13411_v17, %v5924_v48 }
 0xa87   : > { %6550 = vmatmul.f32.gmra.mxu3 %v7574_v62  ;;  %v13531_v48 = vpop.f32.mrf.mxu0 }
 0xa88   : > { %v6037_v14 = vpop.f32.mrf.mxu2  ;;  %14659 = vst [vmem:[#allocation96_spill] sm:$0xff] %v13531_v48 }
 0xa89   : > { %v6147_v42 = vpop.f32.mrf.mxu3  ;;  %v6038_v5 = vadd.f32 %v6037_v14, %v5925_v22  ;;  %v7580_v14 = vld [vmem:[#allocation4 + $0xef] sm:$0xff] }
 0xa8a   : > { %v13515_v41 = vadd.f32 %v6147_v42, %v6035_v4  ;;  %v5927_v56 = vpop.f32.mrf.mxu1  ;;  %v7578_v4 = vld [vmem:[#allocation4 + $0xe8] sm:$0xff] }
 0xa8b   : > { %v13525_v42 = vld [vmem:[#allocation4 + $0xe9] sm:$0xff] }
 0xa8c   : > { %14656 = vst [vmem:[#allocation81_spill] sm:$0xff] %v13515_v41  ;;  %v5816_v41 = vld [vmem:[%s14023_s3 + $0x438] sm:$0xff] }
 0xa8d   : > { %6330 = vmatmul.f32.gmra.mxu1 %v7575_v21 }
 0xa8e   : > { %6443 = vmatmul.f32.gmra.mxu2 %v13519_v43  ;;  %6663 = vmatmul.f32.gmra.mxu0 %v7575_v21  ;;  %v5928_v21 = vadd.f32 %v13411_v17, %v5927_v56 }
 0xa8f   : > { %6553 = vmatmul.f32.gmra.mxu3 %v7577_v57  ;;  %6741 = vmatpush.msrb.mxu1 %v5816_v41  ;;  %v13540_v56 = vpop.f32.mrf.mxu0 }
 0xa90   : > { %v6040_v25 = vpop.f32.mrf.mxu2  ;;  %14661 = vst [vmem:[#allocation84_spill] sm:$0xff] %v13540_v56 }
 0xa91   : > { %v6150_v15 = vpop.f32.mrf.mxu3  ;;  %v6041_v22 = vadd.f32 %v6040_v25, %v5928_v21 }
 0xa92   : > { %v13523_v36 = vadd.f32 %v6150_v15, %v6038_v5  ;;  %v5930_v62 = vpop.f32.mrf.mxu1 }
 0xa93   : > { %v5931_v48 = vadd.f32 %v13411_v17, %v5930_v62  ;;  %v5815_v62 = vld [vmem:[%s14023_s3 + $0x430] sm:$0xff] }
 0xa94   : > { %14658 = vst [vmem:[#allocation88_spill] sm:$0xff] %v13523_v36  ;;  %6742 = vmatpush.msrb.mxu1 %v5815_v62 }
 0xa95   : > { %6333 = vmatmul.f32.gmra.mxu1 %v7578_v4 }
 0xa96   : > { %6446 = vmatmul.f32.gmra.mxu2 %v13525_v42  ;;  %6666 = vmatmul.f32.gmra.mxu0 %v7578_v4 }
 0xa97   : > { %6556 = vmatmul.f32.gmra.mxu3 %v7580_v14 }
 0xa98   : > { %v6043_v57 = vpop.f32.mrf.mxu2 }
 0xa99   : > { %v6153_v5 = vpop.f32.mrf.mxu3  ;;  %v6044_v41 = vadd.f32 %v6043_v57, %v5931_v48 }
 0xa9a   : > { %v13534_v15 = vadd.f32 %v6153_v5, %v6041_v22  ;;  %v5933_v36 = vpop.f32.mrf.mxu1  ;;  %v7584_v22 = vld [vmem:[#allocation4 + $0x108] sm:$0xff] }
 0xa9b   : > { %v13544_v5 = vld [vmem:[#allocation4 + $0x109] sm:$0xff] }
 0xa9c   : > { %14660 = vst [vmem:[#allocation75_spill] sm:$0xff] %v13534_v15  ;;  %v5847_v15 = vadd.f32 %v13411_v17, %v12761_v37 }
 0xa9d   : > { %6336 = vmatmul.f32.gmra.mxu1 %v7581_v0 }
 0xa9e   : > { %6449 = vmatmul.f32.gmra.mxu2 %v13536_v38  ;;  %6669 = vmatmul.f32.gmra.mxu0 %v7581_v0  ;;  %v7586_v0 = vld [vmem:[#allocation4 + $0x10f] sm:$0xff] }
 0xa9f   : > { %6559 = vmatmul.f32.gmra.mxu3 %v7583_v49  ;;  %v5934_v49 = vadd.f32 %v13411_v17, %v5933_v36 }
 0xaa1   : > { %v6046_v25 = vpop.f32.mrf.mxu2 }
 0xaa2   : > { %v6156_v4 = vpop.f32.mrf.mxu3  ;;  %v5936_v14 = vpop.f32.mrf.mxu1  ;;  %v6047_v48 = vadd.f32 %v6046_v25, %v5934_v49  ;;  %v5960_v25 = vadd.f32 %v12778_v28, %v5847_v15  ;;  %v5814_v28 = vld [vmem:[%s14023_s3 + $0x428] sm:$0xff] }
 0xaa3   : > { %v13542_v21 = vadd.f32 %v6156_v4, %v6044_v41  ;;  %v13551_v4 = vpop.f32.mrf.mxu0  ;;  %v5937_v36 = vadd.f32 %v13411_v17, %v5936_v14  ;;  %v7592_v15 = vld [vmem:[#allocation4 + $0x12f] sm:$0xff]  ;;  %6743 = vmatpush.msrb.mxu1 %v5814_v28 }
 0xaa4   : > { %14663 = vst [vmem:[#allocation64_spill] sm:$0xff] %v13551_v4  ;;  %v7596_v28 = vld [vmem:[#allocation4 + $0x148] sm:$0xff] }
 0xaa5   : > { %14662 = vst [vmem:[#allocation86_spill] sm:$0xff] %v13542_v21  ;;  %6339 = vmatmul.f32.gmra.mxu1 %v7584_v22 }
 0xaa6   : > { %6452 = vmatmul.f32.gmra.mxu2 %v13544_v5  ;;  %6672 = vmatmul.f32.gmra.mxu0 %v7584_v22  ;;  %v7589_v22 = vld [vmem:[#allocation4 + $0x127] sm:$0xff] }
 0xaa7   : > { %6562 = vmatmul.f32.gmra.mxu3 %v7586_v0  ;;  %v6073_v0 = vadd.f32 %v12797_v52, %v5960_v25 }
 0xaa9   : > { %v6049_v57 = vpop.f32.mrf.mxu2  ;;  %v6186_v14 = vadd.f32 %v12800_v59, %v6073_v0 }
 0xaaa   : > { %v6159_v41 = vpop.f32.mrf.mxu3  ;;  %v5939_v56 = vpop.f32.mrf.mxu1  ;;  %v6050_v62 = vadd.f32 %v6049_v57, %v5937_v36 }
 0xaab   : > { %v13553_v21 = vadd.f32 %v6159_v41, %v6047_v48  ;;  %v5850_v41 = vadd.f32 %v13411_v17, %v12786_v24  ;;  %v13567_v4 = vpop.f32.mrf.mxu0  ;;  %v5940_v52 = vadd.f32 %v13411_v17, %v5939_v56  ;;  %v13582_v17 = vld [vmem:[#allocation4 + $0x131] sm:$0xff] }
 0xaac   : > { %14666 = vst [vmem:[#allocation80_spill] sm:$0xff] %v13567_v4  ;;  %v7593_v4 = vld [vmem:[#allocation4 + $0x130] sm:$0xff] }
 0xaad   : > { %14664 = vst [vmem:[#allocation93_spill] sm:$0xff] %v13553_v21  ;;  %6342 = vmatmul.f32.gmra.mxu1 %v7587_v33  ;;  %v5963_v24 = vadd.f32 %v12788_v11, %v5850_v41 }
 0xaae   : > { %6455 = vmatmul.f32.gmra.mxu2 %v13557_v39  ;;  %6675 = vmatmul.f32.gmra.mxu0 %v7587_v33  ;;  %v13570_v33 = vld [vmem:[#allocation4 + $0x129] sm:$0xff] }
 0xaaf   : > { %6565 = vmatmul.f32.gmra.mxu3 %v7589_v22  ;;  %v6076_v22 = vadd.f32 %v12819_v47, %v5963_v24 }
 0xab1   : > { %v6052_v49 = vpop.f32.mrf.mxu2 }
 0xab2   : > { %v6162_v48 = vpop.f32.mrf.mxu3  ;;  %v6298_v21 = vpop.f32.mrf.mxu1  ;;  %v6053_v59 = vadd.f32 %v6052_v49, %v5940_v52  ;;  %v13591_v52 = vld [vmem:[#allocation4 + $0x149] sm:$0xff] }
 0xab3   : > { %v13563_v37 = vadd.f32 %v6162_v48, %v6050_v62  ;;  %v6299_v57 = vadd.f32 %v6298_v21, %v6186_v14  ;;  %v13585_v11 = vpop.f32.mrf.mxu0 }
 0xab5   : > { %14665 = vst [vmem:[#allocation102_spill] sm:$0xff] %v13563_v37  ;;  %6345 = vmatmul.f32.gmra.mxu1 %v7590_v10  ;;  %v6189_v37 = vadd.f32 %v12828_v61, %v6076_v22  ;;  %v6192_v61 = vadd.f32 %v12848_v35, %v12846_v1  ;;  %v6195_v22 = vadd.f32 %v12866_v50, %v12863_v29  ;;  %v7602_v50 = vld [vmem:[#allocation4 + $0x168] sm:$0xff] }
 0xab6   : > { %6458 = vmatmul.f32.gmra.mxu2 %v13570_v33  ;;  %6678 = vmatmul.f32.gmra.mxu0 %v7590_v10  ;;  %v7595_v10 = vld [vmem:[#allocation4 + $0x147] sm:$0xff]  ;;  %v6198_v29 = vadd.f32 %v12885_v30, %v12881_v46 }
 0xab7   : > { %6568 = vmatmul.f32.gmra.mxu3 %v7592_v15 }
 0xab9   : > { %v6411_v36 = vpop.f32.mrf.mxu2 }
 0xaba   : > { %v6412_v25 = vadd.f32 %v6411_v36, %v6299_v57  ;;  %v6165_v62 = vpop.f32.mrf.mxu3  ;;  %v6301_v48 = vpop.f32.mrf.mxu1 }
 0xabb   : > { %v13579_v0 = vadd.f32 %v6165_v62, %v6053_v59  ;;  %v6302_v56 = vadd.f32 %v6301_v48, %v6189_v37  ;;  %v7598_v37 = vld [vmem:[#allocation4 + $0x14f] sm:$0xff]  ;;  %v13597_v24 = vpop.f32.mrf.mxu0  ;;  %v7601_v48 = vld [vmem:[#allocation4 + $0x167] sm:$0xff] }
 0xabc   : > { %v13603_v62 = vld [vmem:[#allocation4 + $0x151] sm:$0xff] }
 0xabd   : > { %14667 = vst [vmem:[#allocation89_spill] sm:$0xff] %v13579_v0  ;;  %6348 = vmatmul.f32.gmra.mxu1 %v7593_v4 }
 0xabe   : > { %6461 = vmatmul.f32.gmra.mxu2 %v13582_v17  ;;  %6681 = vmatmul.f32.gmra.mxu0 %v7593_v4  ;;  %v5813_v4 = vld [vmem:[%s14023_s3 + $0x420] sm:$0xff] }
 0xabf   : > { %6571 = vmatmul.f32.gmra.mxu3 %v7595_v10  ;;  %6744 = vmatpush.msrb.mxu1 %v5813_v4  ;;  %v5812_v4 = vld [vmem:[%s14023_s3 + $0x418] sm:$0xff] }
 0xac1   : > { %v6414_v47 = vpop.f32.mrf.mxu2  ;;  %6745 = vmatpush.msrb.mxu1 %v5812_v4  ;;  %v6204_v4 = vadd.f32 %v12923_v40, %v12920_v60 }
 0xac2   : > { %v6415_v21 = vadd.f32 %v6414_v47, %v6302_v56  ;;  %v6524_v49 = vpop.f32.mrf.mxu3  ;;  %v6304_v14 = vpop.f32.mrf.mxu1 }
 0xac3   : > { %v13587_v41 = vadd.f32 %v6524_v49, %v6412_v25  ;;  %v6305_v15 = vadd.f32 %v6304_v14, %v6192_v61  ;;  %v7599_v25 = vld [vmem:[#allocation4 + $0x150] sm:$0xff]  ;;  %v13606_v14 = vpop.f32.mrf.mxu0 }
 0xac5   : > { %6351 = vmatmul.f32.gmra.mxu1 %v7596_v28 }
 0xac6   : > { %6464 = vmatmul.f32.gmra.mxu2 %v13591_v52  ;;  %6684 = vmatmul.f32.gmra.mxu0 %v7596_v28  ;;  %v13612_v28 = vld [vmem:[#allocation4 + $0x169] sm:$0xff] }
 0xac7   : > { %6574 = vmatmul.f32.gmra.mxu3 %v7598_v37  ;;  %v7604_v37 = vld [vmem:[#allocation4 + $0x16f] sm:$0xff] }
 0xac9   : > { %v6417_v57 = vpop.f32.mrf.mxu2 }
 0xaca   : > { %v6418_v59 = vadd.f32 %v6417_v57, %v6305_v15  ;;  %v6527_v1 = vpop.f32.mrf.mxu3  ;;  %v6307_v36 = vpop.f32.mrf.mxu1 }
 0xacb   : > { %v13599_v35 = vadd.f32 %v6527_v1, %v6415_v21  ;;  %v6308_v10 = vadd.f32 %v6307_v36, %v6195_v22  ;;  %v13620_v30 = vpop.f32.mrf.mxu0  ;;  %v6201_v22 = vadd.f32 %v12908_v45, %v12906_v7  ;;  %v7608_v7 = vld [vmem:[#allocation4 + $0x188] sm:$0xff] }
 0xacc   : > { %v13631_v45 = vld [vmem:[#allocation4 + $0x189] sm:$0xff] }
 0xacd   : > { %6354 = vmatmul.f32.gmra.mxu1 %v7599_v25 }
 0xace   : > { %6467 = vmatmul.f32.gmra.mxu2 %v13603_v62  ;;  %6687 = vmatmul.f32.gmra.mxu0 %v7599_v25  ;;  %v7605_v25 = vld [vmem:[#allocation4 + $0x170] sm:$0xff] }
 0xacf   : > { %6577 = vmatmul.f32.gmra.mxu3 %v7601_v48  ;;  %v13624_v48 = vld [vmem:[#allocation4 + $0x171] sm:$0xff] }
 0xad1   : > { %v6420_v56 = vpop.f32.mrf.mxu2 }
 0xad2   : > { %v6421_v47 = vadd.f32 %v6420_v56, %v6308_v10  ;;  %v6530_v49 = vpop.f32.mrf.mxu3  ;;  %v6310_v61 = vpop.f32.mrf.mxu1  ;;  %v7607_v10 = vld [vmem:[#allocation4 + $0x187] sm:$0xff] }
 0xad3   : > { %v13608_v21 = vadd.f32 %v6530_v49, %v6418_v59  ;;  %v6311_v15 = vadd.f32 %v6310_v61, %v6198_v29 }
 0xad5   : > { %6357 = vmatmul.f32.gmra.mxu1 %v7602_v50 }
 0xad6   : > { %6470 = vmatmul.f32.gmra.mxu2 %v13612_v28  ;;  %6690 = vmatmul.f32.gmra.mxu0 %v7602_v50 }
 0xad7   : > { %6580 = vmatmul.f32.gmra.mxu3 %v7604_v37  ;;  %v5811_v37 = vld [vmem:[%s14023_s3 + $0x410] sm:$0xff] }
 0xad8   : > { %6746 = vmatpush.msrb.mxu1 %v5811_v37 }
 0xad9   : > { %v6423_v57 = vpop.f32.mrf.mxu2 }
 0xada   : > { %v6424_v59 = vadd.f32 %v6423_v57, %v6311_v15  ;;  %v6533_v1 = vpop.f32.mrf.mxu3  ;;  %v6313_v46 = vpop.f32.mrf.mxu1  ;;  %v7610_v57 = vld [vmem:[#allocation4 + $0x18f] sm:$0xff] }
 0xadb   : > { %v13618_v36 = vadd.f32 %v6533_v1, %v6421_v47  ;;  %v6314_v56 = vadd.f32 %v6313_v46, %v6201_v22  ;;  %v13637_v15 = vpop.f32.mrf.mxu0 }
 0xadc   : > { %14668 = vst [vmem:[#allocation91_spill] sm:$0xff] %v13637_v15 }
 0xadd   : > { %6360 = vmatmul.f32.gmra.mxu1 %v7605_v25 }
 0xade   : > { %6473 = vmatmul.f32.gmra.mxu2 %v13624_v48  ;;  %6693 = vmatmul.f32.gmra.mxu0 %v7605_v25  ;;  %v6207_v25 = vadd.f32 %v12951_v31, %v12947_v55  ;;  %v6210_v55 = vadd.f32 %v12988_v34, %v12983_v12  ;;  %v7614_v31 = vld [vmem:[#allocation4 + $0x1a8] sm:$0xff] }
 0xadf   : > { %6583 = vmatmul.f32.gmra.mxu3 %v7607_v10  ;;  %v7611_v10 = vld [vmem:[#allocation4 + $0x190] sm:$0xff] }
 0xae1   : > { %v6426_v49 = vpop.f32.mrf.mxu2 }
 0xae2   : > { %v6427_v61 = vadd.f32 %v6426_v49, %v6314_v56  ;;  %v6536_v47 = vpop.f32.mrf.mxu3  ;;  %v6316_v50 = vpop.f32.mrf.mxu1  ;;  %v13643_v56 = vld [vmem:[#allocation4 + $0x191] sm:$0xff]  ;;  %v7613_v49 = vld [vmem:[#allocation4 + $0x1a7] sm:$0xff] }
 0xae3   : > { %v13627_v29 = vadd.f32 %v6536_v47, %v6424_v59  ;;  %v6317_v59 = vadd.f32 %v6316_v50, %v6204_v4  ;;  %v13646_v50 = vpop.f32.mrf.mxu0 }
 0xae4   : > { %14669 = vst [vmem:[#allocation70_spill] sm:$0xff] %v13646_v50 }
 0xae5   : > { %6363 = vmatmul.f32.gmra.mxu1 %v7608_v7 }
 0xae6   : > { %6476 = vmatmul.f32.gmra.mxu2 %v13631_v45  ;;  %6696 = vmatmul.f32.gmra.mxu0 %v7608_v7 }
 0xae7   : > { %6586 = vmatmul.f32.gmra.mxu3 %v7610_v57 }
 0xae9   : > { %v6429_v1 = vpop.f32.mrf.mxu2 }
 0xaea   : > { %v6430_v46 = vadd.f32 %v6429_v1, %v6317_v59  ;;  %v6539_v60 = vpop.f32.mrf.mxu3  ;;  %v6319_v22 = vpop.f32.mrf.mxu1  ;;  %v13652_v59 = vld [vmem:[#allocation4 + $0x1a9] sm:$0xff] }
 0xaeb   : > { %v13639_v40 = vadd.f32 %v6539_v60, %v6427_v61  ;;  %v6320_v47 = vadd.f32 %v6319_v22, %v6207_v25  ;;  %v5810_v1 = vld [vmem:[%s14023_s3 + $0x408] sm:$0xff]  ;;  %v13660_v12 = vpop.f32.mrf.mxu0 }
 0xaec   : > { %v7616_v60 = vld [vmem:[#allocation4 + $0x1af] sm:$0xff]  ;;  %6747 = vmatpush.msrb.mxu1 %v5810_v1 }
 0xaed   : > { %6366 = vmatmul.f32.gmra.mxu1 %v7611_v10  ;;  %v13673_v1 = vld [vmem:[#allocation4 + $0x1c9] sm:$0xff] }
 0xaee   : > { %6479 = vmatmul.f32.gmra.mxu2 %v13643_v56  ;;  %6699 = vmatmul.f32.gmra.mxu0 %v7611_v10 }
 0xaef   : > { %6589 = vmatmul.f32.gmra.mxu3 %v7613_v49 }
 0xaf1   : > { %v6432_v4 = vpop.f32.mrf.mxu2 }
 0xaf2   : > { %v6433_v7 = vadd.f32 %v6432_v4, %v6320_v47  ;;  %v6542_v61 = vpop.f32.mrf.mxu3  ;;  %v6322_v57 = vpop.f32.mrf.mxu1  ;;  %v7617_v47 = vld [vmem:[#allocation4 + $0x1b0] sm:$0xff] }
 0xaf3   : > { %v13648_v37 = vadd.f32 %v6542_v61, %v6430_v46  ;;  %v6323_v22 = vadd.f32 %v6322_v57, %v6210_v55  ;;  %v13666_v4 = vld [vmem:[#allocation4 + $0x1b1] sm:$0xff]  ;;  %v7619_v61 = vld [vmem:[#allocation4 + $0x1c7] sm:$0xff]  ;;  %v13671_v55 = vpop.f32.mrf.mxu0 }
 0xaf5   : > { %6369 = vmatmul.f32.gmra.mxu1 %v7614_v31 }
 0xaf6   : > { %6482 = vmatmul.f32.gmra.mxu2 %v13652_v59  ;;  %6702 = vmatmul.f32.gmra.mxu0 %v7614_v31  ;;  %v7620_v31 = vld [vmem:[#allocation4 + $0x1c8] sm:$0xff] }
 0xaf7   : > { %6592 = vmatmul.f32.gmra.mxu3 %v7616_v60  ;;  %v7622_v60 = vld [vmem:[#allocation4 + $0x1cf] sm:$0xff] }
 0xaf9   : > { %v6435_v46 = vpop.f32.mrf.mxu2 }
 0xafa   : > { %v13658_v25 = vadd.f32 %v6435_v46, %v6323_v22  ;;  %v6545_v10 = vpop.f32.mrf.mxu3  ;;  %v13664_v49 = vpop.f32.mrf.mxu1  ;;  %v7623_v46 = vld [vmem:[#allocation4 + $0x1d0] sm:$0xff] }
 0xafb   : > { %v13662_v34 = vadd.f32 %v6545_v10, %v6433_v7  ;;  %v5809_v7 = vld [vmem:[%s14023_s3 + $0x400] sm:$0xff]  ;;  %v13682_v10 = vpop.f32.mrf.mxu0 }
 0xafc   : > { %6748 = vmatpush.msrb.mxu1 %v5809_v7 }
 0xafd   : > { %6372 = vmatmul.f32.gmra.mxu1 %v7617_v47 }
 0xafe   : > { %6485 = vmatmul.f32.gmra.mxu2 %v13666_v4  ;;  %6705 = vmatmul.f32.gmra.mxu0 %v7617_v47 }
 0xaff   : > { %6595 = vmatmul.f32.gmra.mxu3 %v7619_v61  ;;  %v7624_v61 = vld [vmem:[#allocation4 + $0x1e8] sm:$0xff] }
 0xb02   : > { %v13669_v57 = vpop.f32.mrf.mxu1 }
 0xb05   : > { %6375 = vmatmul.f32.gmra.mxu1 %v7620_v31 }
 0xb06   : > { %6488 = vmatmul.f32.gmra.mxu2 %v13673_v1  ;;  %6708 = vmatmul.f32.gmra.mxu0 %v7620_v31  ;;  %v13690_v31 = vpop.f32.mrf.mxu0 }
 0xb07   : > { %6598 = vmatmul.f32.gmra.mxu3 %v7622_v60  ;;  %v13706_v60 = vld [vmem:[#allocation4 + $0x211] sm:$0xff] }
 0xb0a   : > { %v13679_v22 = vpop.f32.mrf.mxu1 }
 0xb0d   : > { %6378 = vmatmul.f32.gmra.mxu1 %v7623_v46 }
 0xb0e   : > { %6491 = vmatmul.f32.gmra.mxu2 %v13174_v6  ;;  %6711 = vmatmul.f32.gmra.mxu0 %v7623_v46  ;;  %v13700_v6 = vld [vmem:[#allocation4 + $0x209] sm:$0xff] }
 0xb0f   : > { %6601 = vmatmul.f32.gmra.mxu3 %v13167_v18  ;;  %v13698_v18 = vpop.f32.mrf.mxu0 }
 0xb12   : > { %v13685_v47 = vpop.f32.mrf.mxu1 }
 0xb15   : > { %6381 = vmatmul.f32.gmra.mxu1 %v13169_v51  ;;  %v5641_v51 = vld [vmem:[#allocation4 + $0x208] sm:$0xff] }
 0xb16   : > { %6494 = vmatmul.f32.gmra.mxu2 %v13238_v53  ;;  %6714 = vmatmul.f32.gmra.mxu0 %v7624_v61  ;;  %v5642_v53 = vld [vmem:[#allocation4 + $0x210] sm:$0xff] }
 0xb17   : > { %6604 = vmatmul.f32.gmra.mxu3 %v13234_v23  ;;  %v5608_v61 = vld [vmem:[#allocation4 + $0x22f] sm:$0xff] }
 0xb1a   : > { %v13692_v7 = vpop.f32.mrf.mxu1 }
 0xb1d   : > { %6384 = vmatmul.f32.gmra.mxu1 %v13236_v2 }
 0xb1e   : > { %6497 = vmatmul.f32.gmra.mxu2 %v13275_v27  ;;  %6717 = vmatmul.f32.gmra.mxu0 %v13236_v2  ;;  %v13710_v2 = vpop.f32.mrf.mxu0 }
 0xb1f   : > { %6607 = vmatmul.f32.gmra.mxu3 %v13281_v9  ;;  %v5607_v9 = vld [vmem:[#allocation4 + $0x227] sm:$0xff] }
 0xb22   : > { %v13702_v23 = vpop.f32.mrf.mxu1 }
 0xb25   : > { %6387 = vmatmul.f32.gmra.mxu1 %v5641_v51 }
 0xb26   : > { %6500 = vmatmul.f32.gmra.mxu2 %v13700_v6  ;;  %6720 = vmatmul.f32.gmra.mxu0 %v5641_v51  ;;  %v13716_v51 = vpop.f32.mrf.mxu0 }
 0xb27   : > { %6610 = vmatmul.f32.gmra.mxu3 %v13311_v19  ;;  %v7625_v19 = vld [vmem:[#allocation3 + $0x8] sm:$0xff] }
 0xb2a   : > { %v13708_v27 = vpop.f32.mrf.mxu1 }
 0xb2d   : > { %6390 = vmatmul.f32.gmra.mxu1 %v5642_v53 }
 0xb2e   : > { %6503 = vmatmul.f32.gmra.mxu2 %v13706_v60  ;;  %6723 = vmatmul.f32.gmra.mxu0 %v5642_v53  ;;  %v6658_v15 = vpop.f32.mrf.mxu0 }
 0xb2f   : > { %6613 = vmatmul.f32.gmra.mxu3 %v5607_v9 }
 0xb32   : > { %v13713_v46 = vpop.f32.mrf.mxu1 }
 0xb35   : > { %6749 = vmatmul.f32.vlgmr.msrb.gmra.mxu1 %v13339_v13 }
 0xb36   : > { %6729 = vmatmul.f32.vlgmr.msra.gmra.mxu2 %v7625_v19  ;;  %6726 = vmatmul.f32.gmra.mxu0 %v7625_v19 }
 0xb37   : > { %6616 = vmatmul.f32.gmra.mxu3 %v5608_v61 }
 0xb3a   : > { %v13718_v50 = vpop.f32.mrf.mxu1 }
 0xb3d   : > { %6752 = vmatmul.f32.gmra.mxu1 %v13364_v63 }
 0xb42   : > { %v13721_v0 = vpop.f32.mrf.mxu1 }
 0xb45   : > { %6755 = vmatmul.f32.gmra.mxu1 %v13382_v44 }
 0xb4a   : > { %v13724_v53 = vpop.f32.mrf.mxu1 }
 0xb4d   : > { %6758 = vmatmul.f32.gmra.mxu1 %v13405_v16 }
 0xb52   : > { %v13727_v9 = vpop.f32.mrf.mxu1 }
 0xb55   : > { %6761 = vmatmul.f32.gmra.mxu1 %v13430_v20 }
 0xb5a   : > { %v13730_v13 = vpop.f32.mrf.mxu1 }
 0xb5d   : > { %6764 = vmatmul.f32.gmra.mxu1 %v13453_v32 }
 0xb62   : > { %v13733_v61 = vpop.f32.mrf.mxu1 }
 0xb65   : > { %6767 = vmatmul.f32.gmra.mxu1 %v13471_v58 }
 0xb6a   : > { %v13736_v63 = vpop.f32.mrf.mxu1 }
 0xb6d   : > { %6770 = vmatmul.f32.gmra.mxu1 %v13490_v8 }
 0xb72   : > { %v13739_v44 = vpop.f32.mrf.mxu1 }
 0xb75   : > { %6773 = vmatmul.f32.gmra.mxu1 %v13506_v54 }
 0xb7a   : > { %v13742_v16 = vpop.f32.mrf.mxu1 }
 0xb7d   : > { %6776 = vmatmul.f32.gmra.mxu1 %v13519_v43 }
 0xb82   : > { %v13745_v20 = vpop.f32.mrf.mxu1 }
 0xb85   : > { %6779 = vmatmul.f32.gmra.mxu1 %v13525_v42  ;;  %v6638_v42 = vadd.f32 %v13660_v12, %v13587_v41  ;;  %v6644_v41 = vadd.f32 %v13682_v10, %v13608_v21  ;;  %v6438_v12 = vpop.f32.mrf.mxu2 }
 0xb8a   : > { %v13748_v32 = vpop.f32.mrf.mxu1 }
 0xb8d   : > { %6782 = vmatmul.f32.gmra.mxu1 %v13536_v38 }
 0xb92   : > { %v13751_v58 = vpop.f32.mrf.mxu1 }
 0xb95   : > { %6785 = vmatmul.f32.gmra.mxu1 %v13544_v5 }
 0xb9a   : > { %v13754_v8 = vpop.f32.mrf.mxu1 }
 0xb9b   : > { %14670 = vst [vmem:[#allocation99_spill] sm:$0xff] %v13754_v8  ;;  %v6548_v8 = vpop.f32.mrf.mxu3 }
 0xb9d   : > { %6788 = vmatmul.f32.gmra.mxu1 %v13557_v39  ;;  %v6641_v39 = vadd.f32 %v13671_v55, %v13599_v35  ;;  %v6647_v35 = vadd.f32 %v13690_v31, %v13618_v36  ;;  %v6441_v55 = vpop.f32.mrf.mxu2  ;;  %v6653_v31 = vadd.f32 %v13710_v2, %v13639_v40 }
 0xba2   : > { %v13757_v54 = vpop.f32.mrf.mxu1 }
 0xba3   : > { %14671 = vst [vmem:[#allocation85_spill] sm:$0xff] %v13757_v54 }
 0xba5   : > { %6791 = vmatmul.f32.gmra.mxu1 %v13570_v33 }
 0xbaa   : > { %v13760_v43 = vpop.f32.mrf.mxu1 }
 0xbad   : > { %6794 = vmatmul.f32.gmra.mxu1 %v13582_v17 }
 0xbb2   : > { %v6750_v38 = vpop.f32.mrf.mxu1 }
 0xbb3   : > { %v6751_v19 = vadd.f32 %v6750_v38, %v6638_v42 }
 0xbb5   : > { %6797 = vmatmul.f32.gmra.mxu1 %v13591_v52  ;;  %v6846_v5 = vmax.f32 %v6751_v19, 0.0  ;;  %v6661_v52 = vpop.f32.mrf.mxu0 }
 0xbb7   : > { %6910 = vrot.lane.b32.xlu2 %v6846_v5, %s7699_s15  ;;  %v6551_v5 = vpop.f32.mrf.mxu3 }
 0xbba   : > { %v6753_v54 = vpop.f32.mrf.mxu1 }
 0xbbb   : > { %v6754_v33 = vadd.f32 %v6753_v54, %v6641_v39 }
 0xbbd   : > { %6800 = vmatmul.f32.gmra.mxu1 %v13603_v62  ;;  %v6847_v17 = vmax.f32 %v6754_v33, 0.0  ;;  %v6664_v39 = vpop.f32.mrf.mxu0 }
 0xbbf   : > { %6912 = vrot.lane.b32.xlu0 %v6847_v17, %s7699_s15  ;;  %v6554_v10 = vpop.f32.mrf.mxu3 }
 0xbc2   : > { %v6756_v42 = vpop.f32.mrf.mxu1 }
 0xbc3   : > { %v6757_v38 = vadd.f32 %v6756_v42, %v6644_v41  ;;  %v6444_v41 = vpop.f32.mrf.mxu2 }
 0xbc5   : > { %6803 = vmatmul.f32.gmra.mxu1 %v13612_v28  ;;  %v6848_v19 = vmax.f32 %v6757_v38, 0.0  ;;  %v6650_v28 = vadd.f32 %v13698_v18, %v13627_v29  ;;  %v6667_v36 = vpop.f32.mrf.mxu0 }
 0xbc7   : > { %6914 = vrot.lane.b32.xlu1 %v6848_v19, %s7699_s15 }
 0xbca   : > { %v6759_v62 = vpop.f32.mrf.mxu1 }
 0xbcb   : > { %v6760_v54 = vadd.f32 %v6759_v62, %v6647_v35  ;;  %v13786_v62 = vpop.f32.mrf.mxu2 }
 0xbcd   : > { %6806 = vmatmul.f32.gmra.mxu1 %v13624_v48  ;;  %v6849_v21 = vmax.f32 %v6760_v54, 0.0  ;;  %v6557_v48 = vpop.f32.mrf.mxu3  ;;  %v6670_v29 = vpop.f32.mrf.mxu0 }
 0xbcf   : > { %6916 = vrot.lane.b32.xlu2 %v6849_v21, %s7699_s15 }
 0xbd2   : > { %v6762_v33 = vpop.f32.mrf.mxu1 }
 0xbd3   : > { %v6763_v17 = vadd.f32 %v6762_v33, %v6650_v28  ;;  %v13796_v2 = vpop.f32.mrf.mxu2 }
 0xbd5   : > { %6809 = vmatmul.f32.gmra.mxu1 %v13631_v45  ;;  %v6850_v42 = vmax.f32 %v6763_v17, 0.0  ;;  %v6656_v45 = vadd.f32 %v13716_v51, %v13648_v37  ;;  %v13791_v21 = vpop.f32.mrf.mxu3  ;;  %v13798_v28 = vpop.f32.mrf.mxu0  ;;  %v6549_v37 = vadd.f32 %v6548_v8, %v13658_v25  ;;  %v14672_v8 = vld [vmem:[#allocation49_spill] sm:$0xff] }
 0xbd7   : > { %6918 = vrot.lane.b32.xlu0 %v6850_v42, %s7699_s15 }
 0xbda   : > { %v6765_v38 = vpop.f32.mrf.mxu1 }
 0xbdb   : > { %v6766_v19 = vadd.f32 %v6765_v38, %v6653_v31 }
 0xbdd   : > { %6812 = vmatmul.f32.gmra.mxu1 %v13643_v56  ;;  %v6851_v35 = vmax.f32 %v6766_v19, 0.0  ;;  %v6659_v56 = vadd.f32 %v6658_v15, %v13662_v34  ;;  %v13802_v42 = vpop.f32.mrf.mxu3  ;;  %v6662_v34 = vadd.f32 %v6661_v52, %v6549_v37  ;;  %v13808_v19 = vpop.f32.mrf.mxu2  ;;  %v14674_v37 = vld [vmem:[#allocation20_spill] sm:$0xff] }
 0xbdf   : > { %6920 = vrot.lane.b32.xlu1 %v6851_v35, %s7699_s15 }
 0xbe2   : > { %v6768_v18 = vpop.f32.mrf.mxu1 }
 0xbe3   : > { %v6769_v54 = vadd.f32 %v6768_v18, %v6656_v45  ;;  %v13810_v45 = vpop.f32.mrf.mxu0  ;;  %v14673_v18 = vld [vmem:[#allocation48_spill] sm:$0xff] }
 0xbe5   : > { %6815 = vmatmul.f32.gmra.mxu1 %v13652_v59  ;;  %v6852_v40 = vmax.f32 %v6769_v54, 0.0  ;;  %v6213_v59 = vadd.f32 %v13037_v3, %v13023_v26  ;;  %v6216_v54 = vadd.f32 %v14673_v18, %v14672_v8  ;;  %v13816_v26 = vpop.f32.mrf.mxu3 }
 0xbe7   : > { %6922 = vrot.lane.b32.xlu2 %v6852_v40, %s7699_s15  ;;  %v6326_v15 = vadd.f32 %v13664_v49, %v6213_v59  ;;  %v6329_v3 = vadd.f32 %v13669_v57, %v6216_v54 }
 0xbe9   : > { %v6439_v38 = vadd.f32 %v6438_v12, %v6326_v15  ;;  %v6442_v52 = vadd.f32 %v6441_v55, %v6329_v3 }
 0xbea   : > { %v6771_v33 = vpop.f32.mrf.mxu1 }
 0xbeb   : > { %v6772_v17 = vadd.f32 %v6771_v33, %v6659_v56  ;;  %v6552_v25 = vadd.f32 %v6551_v5, %v6439_v38  ;;  %v7626_v56 = vld [vmem:[#allocation4 + $0x1d1] sm:$0xff]  ;;  %v6555_v33 = vadd.f32 %v6554_v10, %v6442_v52  ;;  %v6679_v5 = vpop.f32.mrf.mxu0  ;;  %v7627_v38 = vld [vmem:[#allocation4 + $0x1e9] sm:$0xff] }
 0xbec   : > { %v7628_v52 = vld [vmem:[#allocation4 + $0x1f1] sm:$0xff] }
 0xbed   : > { %6818 = vmatmul.f32.gmra.mxu1 %v13666_v4  ;;  %v6853_v51 = vmax.f32 %v6772_v17, 0.0  ;;  %v6665_v49 = vadd.f32 %v6664_v39, %v6552_v25  ;;  %v13819_v17 = vpop.f32.mrf.mxu2  ;;  %v6569_v57 = vpop.f32.mrf.mxu3  ;;  %v14676_v25 = vld [vmem:[#allocation32_spill] sm:$0xff] }
 0xbef   : > { %6924 = vrot.lane.b32.xlu0 %v6853_v51, %s7699_s15  ;;  %v14675_v51 = vld [vmem:[#allocation60_spill] sm:$0xff] }
 0xbf0   : > { %v6219_v59 = vadd.f32 %v14675_v51, %v14674_v37 }
 0xbf2   : > { %v6774_v31 = vpop.f32.mrf.mxu1  ;;  %v6332_v15 = vadd.f32 %v13679_v22, %v6219_v59 }
 0xbf3   : > { %v6775_v35 = vadd.f32 %v6774_v31, %v6662_v34  ;;  %v6668_v34 = vadd.f32 %v6667_v36, %v6555_v33  ;;  %v6682_v54 = vpop.f32.mrf.mxu0  ;;  %v14679_v33 = vld [vmem:[#allocation67_spill] sm:$0xff] }
 0xbf4   : > { %v6445_v31 = vadd.f32 %v6444_v41, %v6332_v15 }
 0xbf5   : > { %6821 = vmatmul.f32.gmra.mxu1 %v13673_v1  ;;  %v6854_v4 = vmax.f32 %v6775_v35, 0.0  ;;  %v13827_v18 = vpop.f32.mrf.mxu2 }
 0xbf6   : > { %v6558_v35 = vadd.f32 %v6557_v48, %v6445_v31 }
 0xbf7   : > { %6926 = vrot.lane.b32.xlu1 %v6854_v4, %s7699_s15  ;;  %v14677_v4 = vld [vmem:[#allocation61_spill] sm:$0xff] }
 0xbf8   : > { %v6222_v8 = vadd.f32 %v14677_v4, %v14676_v25  ;;  %v6671_v22 = vadd.f32 %v6670_v29, %v6558_v35 }
 0xbfa   : > { %v6777_v12 = vpop.f32.mrf.mxu1  ;;  %v6335_v3 = vadd.f32 %v13685_v47, %v6222_v8 }
 0xbfb   : > { %v6778_v40 = vadd.f32 %v6777_v12, %v6665_v49  ;;  %v6572_v12 = vpop.f32.mrf.mxu3 }
 0xbfc   : > { %v6448_v41 = vadd.f32 %v13786_v62, %v6335_v3  ;;  %v6685_v62 = vpop.f32.mrf.mxu0  ;;  %v14682_v3 = vld [vmem:[#allocation53_spill] sm:$0xff] }
 0xbfd   : > { %6824 = vmatmul.f32.gmra.mxu1 %v7626_v56  ;;  %v6855_v1 = vmax.f32 %v6778_v40, 0.0  ;;  %v14678_v56 = vld [vmem:[#allocation44_spill] sm:$0xff]  ;;  %v6462_v37 = vpop.f32.mrf.mxu2 }
 0xbfe   : > { %v6561_v48 = vadd.f32 %v13791_v21, %v6448_v41 }
 0xbff   : > { %6928 = vrot.lane.b32.xlu2 %v6855_v1, %s7699_s15  ;;  %v6225_v1 = vadd.f32 %v14679_v33, %v14678_v56  ;;  %v14684_v33 = vld [vmem:[#allocation65_spill] sm:$0xff] }
 0xc00   : > { %v6674_v29 = vadd.f32 %v13798_v28, %v6561_v48 }
 0xc01   : > { %v6338_v47 = vadd.f32 %v13692_v7, %v6225_v1  ;;  %v14685_v1 = vld [vmem:[#allocation68_spill] sm:$0xff] }
 0xc02   : > { %v6780_v39 = vpop.f32.mrf.mxu1 }
 0xc03   : > { %v6781_v55 = vadd.f32 %v6780_v39, %v6668_v34  ;;  %v6451_v15 = vadd.f32 %v13796_v2, %v6338_v47  ;;  %v6575_v31 = vpop.f32.mrf.mxu3  ;;  %v6234_v47 = vadd.f32 %v14685_v1, %v14684_v33 }
 0xc04   : > { %v6688_v8 = vpop.f32.mrf.mxu0 }
 0xc05   : > { %6827 = vmatmul.f32.gmra.mxu1 %v7627_v38  ;;  %v6856_v10 = vmax.f32 %v6781_v55, 0.0  ;;  %v6564_v34 = vadd.f32 %v13802_v42, %v6451_v15  ;;  %v14680_v55 = vld [vmem:[#allocation37_spill] sm:$0xff]  ;;  %v14681_v38 = vld [vmem:[#allocation62_spill] sm:$0xff]  ;;  %v6465_v2 = vpop.f32.mrf.mxu2 }
 0xc06   : > { %v6228_v7 = vadd.f32 %v14681_v38, %v14680_v55  ;;  %v14687_v55 = vld [vmem:[#allocation42_spill] sm:$0xff] }
 0xc07   : > { %6930 = vrot.lane.b32.xlu0 %v6856_v10, %s7699_s15  ;;  %v6677_v35 = vadd.f32 %v13810_v45, %v6564_v34 }
 0xc08   : > { %v6341_v28 = vadd.f32 %v13702_v23, %v6228_v7 }
 0xc0a   : > { %v6783_v36 = vpop.f32.mrf.mxu1  ;;  %v6454_v25 = vadd.f32 %v13808_v19, %v6341_v28 }
 0xc0b   : > { %v6784_v49 = vadd.f32 %v6783_v36, %v6671_v22  ;;  %v14683_v22 = vld [vmem:[#allocation73_spill] sm:$0xff]  ;;  %v6578_v41 = vpop.f32.mrf.mxu3 }
 0xc0c   : > { %v6231_v36 = vadd.f32 %v14683_v22, %v14682_v3  ;;  %v6691_v56 = vpop.f32.mrf.mxu0  ;;  %v14689_v3 = vld [vmem:[#allocation74_spill] sm:$0xff] }
 0xc0d   : > { %6830 = vmatmul.f32.gmra.mxu1 %v7628_v52  ;;  %v6857_v40 = vmax.f32 %v6784_v49, 0.0  ;;  %v5679_v49 = vld [vmem:[#allocation4 + $0x229] sm:$0xff] }
 0xc0e   : > { %v6344_v23 = vadd.f32 %v13708_v27, %v6231_v36 }
 0xc0f   : > { %6932 = vrot.lane.b32.xlu1 %v6857_v40, %s7699_s15  ;;  %v6468_v40 = vpop.f32.mrf.mxu2 }
 0xc10   : > { %v6457_v52 = vadd.f32 %v13819_v17, %v6344_v23 }
 0xc11   : > { %v6911_v51 = vpop.permute.xlu2 %6910 }
 0xc12   : > { %7007 = vst.msk [vmem:[%s8394_s23 + $0x10] sm:$0xff] %vm7006_vm15, %v6911_v51  ;;  %v6786_v59 = vpop.f32.mrf.mxu1  ;;  %v5680_v51 = vld [vmem:[#allocation4 + $0x231] sm:$0xff] }
 0xc13   : > { %v6787_v21 = vadd.f32 %v6786_v59, %v6674_v29  ;;  %v6347_v29 = vadd.f32 %v13713_v46, %v6234_v47  ;;  %v6581_v59 = vpop.f32.mrf.mxu3 }
 0xc14   : > { %v6694_v46 = vpop.f32.mrf.mxu0 }
 0xc15   : > { %6833 = vmatmul.f32.gmra.mxu1 %v13700_v6  ;;  %v6858_v39 = vmax.f32 %v6787_v21, 0.0  ;;  %v6567_v6 = vadd.f32 %v13816_v26, %v6454_v25 }
 0xc17   : > { %6934 = vrot.lane.b32.xlu2 %v6858_v39, %s7699_s15  ;;  %v6680_v45 = vadd.f32 %v6679_v5, %v6567_v6  ;;  %v14686_v39 = vld [vmem:[#allocation34_spill] sm:$0xff]  ;;  %v6471_v7 = vpop.f32.mrf.mxu2 }
 0xc18   : > { %v6237_v38 = vadd.f32 %v14687_v55, %v14686_v39 }
 0xc1a   : > { %v6789_v10 = vpop.f32.mrf.mxu1 }
 0xc1b   : > { %v6790_v4 = vadd.f32 %v6789_v10, %v6677_v35 }
 0xc1d   : > { %6836 = vmatmul.f32.gmra.mxu1 %v13706_v60  ;;  %v6859_v42 = vmax.f32 %v6790_v4, 0.0  ;;  %v6570_v60 = vadd.f32 %v6569_v57, %v6457_v52  ;;  %v6460_v57 = vadd.f32 %v13827_v18, %v6347_v29  ;;  %v6584_v4 = vpop.f32.mrf.mxu3 }
 0xc1f   : > { %6936 = vrot.lane.b32.xlu0 %v6859_v42, %s7699_s15  ;;  %v6683_v27 = vadd.f32 %v6682_v54, %v6570_v60  ;;  %v6573_v21 = vadd.f32 %v6572_v12, %v6460_v57  ;;  %v6350_v54 = vadd.f32 %v13718_v50, %v6237_v38  ;;  %v14688_v42 = vld [vmem:[#allocation55_spill] sm:$0xff]  ;;  %v6474_v50 = vpop.f32.mrf.mxu2  ;;  %v14693_v57 = vld [vmem:[#allocation69_spill] sm:$0xff] }
 0xc20   : > { %v6240_v22 = vadd.f32 %v14689_v3, %v14688_v42  ;;  %v14690_v60 = vld [vmem:[#allocation71_spill] sm:$0xff] }
 0xc21   : > { %v6686_v28 = vadd.f32 %v6685_v62, %v6573_v21  ;;  %v6463_v18 = vadd.f32 %v6462_v37, %v6350_v54 }
 0xc22   : > { %v6792_v19 = vpop.f32.mrf.mxu1  ;;  %v6353_v36 = vadd.f32 %v13721_v0, %v6240_v22  ;;  %v14696_v22 = vld [vmem:[#allocation76_spill] sm:$0xff] }
 0xc23   : > { %v6793_v48 = vadd.f32 %v6792_v19, %v6680_v45  ;;  %v6576_v12 = vadd.f32 %v6575_v31, %v6463_v18  ;;  %v6697_v45 = vpop.f32.mrf.mxu0 }
 0xc24   : > { %v6466_v37 = vadd.f32 %v6465_v2, %v6353_v36  ;;  %v14697_v36 = vld [vmem:[#allocation96_spill] sm:$0xff] }
 0xc25   : > { %6839 = vmatmul.f32.gmra.mxu1 %v5679_v49  ;;  %v6860_v26 = vmax.f32 %v6793_v48, 0.0  ;;  %v6689_v23 = vadd.f32 %v6688_v8, %v6576_v12  ;;  %v6587_v48 = vpop.f32.mrf.mxu3 }
 0xc26   : > { %v6579_v52 = vadd.f32 %v6578_v41, %v6466_v37 }
 0xc27   : > { %6938 = vrot.lane.b32.xlu1 %v6860_v26, %s7699_s15  ;;  %v14691_v26 = vld [vmem:[#allocation38_spill] sm:$0xff] }
 0xc28   : > { %v6243_v33 = vadd.f32 %v14691_v26, %v14690_v60  ;;  %v6692_v8 = vadd.f32 %v6691_v56, %v6579_v52  ;;  %v14698_v26 = vld [vmem:[#allocation83_spill] sm:$0xff] }
 0xc29   : > { %v6917_v5 = vpop.permute.xlu2 %6916 }
 0xc2a   : > { %7010 = vst.msk [vmem:[%s8394_s23 + $0x58] sm:$0xff] %vm7006_vm15, %v6917_v5  ;;  %v6795_v17 = vpop.f32.mrf.mxu1  ;;  %v6356_v0 = vadd.f32 %v13724_v53, %v6243_v33  ;;  %v14699_v33 = vld [vmem:[#allocation84_spill] sm:$0xff] }
 0xc2b   : > { %v6796_v15 = vadd.f32 %v6795_v17, %v6683_v27  ;;  %v6477_v27 = vpop.f32.mrf.mxu2  ;;  %v6700_v5 = vpop.f32.mrf.mxu0  ;;  %v14692_v17 = vld [vmem:[#allocation78_spill] sm:$0xff] }
 0xc2c   : > { %v6469_v29 = vadd.f32 %v6468_v40, %v6356_v0  ;;  %v6255_v0 = vadd.f32 %v14699_v33, %v14698_v26 }
 0xc2d   : > { %6842 = vmatmul.f32.gmra.mxu1 %v5680_v51  ;;  %v6861_v34 = vmax.f32 %v6796_v15, 0.0  ;;  %v6246_v15 = vadd.f32 %v14693_v57, %v14692_v17  ;;  %v6590_v21 = vpop.f32.mrf.mxu3  ;;  %v14700_v57 = vld [vmem:[#allocation79_spill] sm:$0xff] }
 0xc2e   : > { %v6582_v41 = vadd.f32 %v6581_v59, %v6469_v29 }
 0xc2f   : > { %6940 = vrot.lane.b32.xlu2 %v6861_v34, %s7699_s15  ;;  %v6359_v53 = vadd.f32 %v13727_v9, %v6246_v15  ;;  %v14701_v15 = vld [vmem:[#allocation64_spill] sm:$0xff] }
 0xc30   : > { %v6695_v56 = vadd.f32 %v6694_v46, %v6582_v41 }
 0xc31   : > { %v6913_v35 = vpop.permute.xlu0 %6912  ;;  %v6472_v40 = vadd.f32 %v6471_v7, %v6359_v53 }
 0xc32   : > { %7008 = vst.msk [vmem:[%s8394_s23 + $0x28] sm:$0xff] %vm7006_vm15, %v6913_v35  ;;  %v6798_v10 = vpop.f32.mrf.mxu1  ;;  %v14694_v35 = vld [vmem:[#allocation63_spill] sm:$0xff] }
 0xc33   : > { %v6799_v25 = vadd.f32 %v6798_v10, %v6686_v28  ;;  %v6585_v38 = vadd.f32 %v6584_v4, %v6472_v40  ;;  %v6480_v54 = vpop.f32.mrf.mxu2  ;;  %v6703_v28 = vpop.f32.mrf.mxu0  ;;  %v14695_v10 = vld [vmem:[#allocation59_spill] sm:$0xff] }
 0xc34   : > { %v6249_v18 = vadd.f32 %v14695_v10, %v14694_v35  ;;  %v14703_v35 = vld [vmem:[#allocation80_spill] sm:$0xff] }
 0xc35   : > { %v6862_v6 = vmax.f32 %v6799_v25, 0.0  ;;  %v6698_v9 = vadd.f32 %v6697_v45, %v6585_v38  ;;  %v6593_v12 = vpop.f32.mrf.mxu3 }
 0xc36   : > { %v6362_v25 = vadd.f32 %v13730_v13, %v6249_v18 }
 0xc37   : > { %6942 = vrot.lane.b32.xlu0 %v6862_v6, %s7699_s15 }
 0xc38   : > { %v6475_v7 = vadd.f32 %v6474_v50, %v6362_v25 }
 0xc39   : > { %v6915_v62 = vpop.permute.xlu1 %6914 }
 0xc3a   : > { %7009 = vst.msk [vmem:[%s8394_s23 + $0x40] sm:$0xff] %vm7006_vm15, %v6915_v62  ;;  %v6801_v49 = vpop.f32.mrf.mxu1  ;;  %v6588_v4 = vadd.f32 %v6587_v48, %v6475_v7 }
 0xc3b   : > { %v6802_v19 = vadd.f32 %v6801_v49, %v6689_v23  ;;  %v6252_v23 = vadd.f32 %v14697_v36, %v14696_v22  ;;  %v6483_v62 = vpop.f32.mrf.mxu2  ;;  %v6706_v49 = vpop.f32.mrf.mxu0  ;;  %v14704_v22 = vld [vmem:[#allocation88_spill] sm:$0xff] }
 0xc3c   : > { %v6701_v45 = vadd.f32 %v6700_v5, %v6588_v4  ;;  %v6264_v36 = vadd.f32 %v13585_v11, %v14704_v22 }
 0xc3d   : > { %v6863_v31 = vmax.f32 %v6802_v19, 0.0  ;;  %v6365_v13 = vadd.f32 %v13733_v61, %v6252_v23 }
 0xc3e   : > { %v6377_v23 = vadd.f32 %v13745_v20, %v6264_v36 }
 0xc3f   : > { %6944 = vrot.lane.b32.xlu1 %v6863_v31, %s7699_s15  ;;  %v6478_v52 = vadd.f32 %v6477_v27, %v6365_v13  ;;  %v6596_v31 = vpop.f32.mrf.mxu3 }
 0xc41   : > { %v6923_v1 = vpop.permute.xlu2 %6922  ;;  %v6591_v48 = vadd.f32 %v6590_v21, %v6478_v52  ;;  %v6258_v21 = vadd.f32 %v14701_v15, %v14700_v57 }
 0xc42   : > { %7013 = vst.msk [vmem:[%s8394_s23 + $0xa0] sm:$0xff] %vm7006_vm15, %v6923_v1  ;;  %v6804_v47 = vpop.f32.mrf.mxu1 }
 0xc43   : > { %v6805_v2 = vadd.f32 %v6804_v47, %v6692_v8  ;;  %v6368_v8 = vadd.f32 %v13736_v63, %v6255_v0  ;;  %v6704_v1 = vadd.f32 %v6703_v28, %v6591_v48  ;;  %v6486_v61 = vpop.f32.mrf.mxu2  ;;  %v6709_v29 = vpop.f32.mrf.mxu0  ;;  %v6371_v63 = vadd.f32 %v13739_v44, %v6258_v21  ;;  %v14702_v28 = vld [vmem:[#allocation81_spill] sm:$0xff] }
 0xc44   : > { %v6261_v10 = vadd.f32 %v14703_v35, %v14702_v28 }
 0xc45   : > { %v6864_v51 = vmax.f32 %v6805_v2, 0.0  ;;  %v6481_v27 = vadd.f32 %v6480_v54, %v6368_v8 }
 0xc46   : > { %v6374_v44 = vadd.f32 %v13742_v16, %v6261_v10  ;;  %v14709_v10 = vld [vmem:[#allocation102_spill] sm:$0xff] }
 0xc47   : > { %6946 = vrot.lane.b32.xlu2 %v6864_v51, %s7699_s15  ;;  %v6594_v41 = vadd.f32 %v6593_v12, %v6481_v27  ;;  %v6599_v17 = vpop.f32.mrf.mxu3 }
 0xc48   : > { %v6487_v12 = vadd.f32 %v6486_v61, %v6374_v44 }
 0xc49   : > { %v6919_v34 = vpop.permute.xlu0 %6918  ;;  %v6707_v53 = vadd.f32 %v6706_v49, %v6594_v41 }
 0xc4a   : > { %7011 = vst.msk [vmem:[%s8394_s23 + $0x70] sm:$0xff] %vm7006_vm15, %v6919_v34  ;;  %v6807_v39 = vpop.f32.mrf.mxu1  ;;  %v6600_v7 = vadd.f32 %v6599_v17, %v6487_v12 }
 0xc4b   : > { %v6808_v55 = vadd.f32 %v6807_v39, %v6695_v56  ;;  %v6484_v39 = vadd.f32 %v6483_v62, %v6371_v63  ;;  %v6489_v40 = vpop.f32.mrf.mxu2  ;;  %v6712_v38 = vpop.f32.mrf.mxu0 }
 0xc4c   : > { %v6713_v16 = vadd.f32 %v6712_v38, %v6600_v7 }
 0xc4d   : > { %v6865_v59 = vmax.f32 %v6808_v55, 0.0  ;;  %v6597_v54 = vadd.f32 %v6596_v31, %v6484_v39 }
 0xc4f   : > { %6948 = vrot.lane.b32.xlu0 %v6865_v59, %s7699_s15  ;;  %v6602_v18 = vpop.f32.mrf.mxu3  ;;  %v6710_v25 = vadd.f32 %v6709_v29, %v6597_v54  ;;  %v14706_v29 = vld [vmem:[#allocation86_spill] sm:$0xff] }
 0xc51   : > { %v6921_v46 = vpop.permute.xlu1 %6920 }
 0xc52   : > { %7012 = vst.msk [vmem:[%s8394_s23 + $0x88] sm:$0xff] %vm7006_vm15, %v6921_v46  ;;  %v6810_v6 = vpop.f32.mrf.mxu1 }
 0xc53   : > { %v6811_v42 = vadd.f32 %v6810_v6, %v6698_v9 }
 0xc55   : > { %v6866_v3 = vmax.f32 %v6811_v42, 0.0  ;;  %v6492_v42 = vpop.f32.mrf.mxu2 }
 0xc57   : > { %6950 = vrot.lane.b32.xlu1 %v6866_v3, %s7699_s15  ;;  %v6715_v3 = vpop.f32.mrf.mxu0  ;;  %v6605_v49 = vpop.f32.mrf.mxu3 }
 0xc59   : > { %v6929_v37 = vpop.permute.xlu2 %6928 }
 0xc5a   : > { %7016 = vst.msk [vmem:[%s8394_s23 + $0xe8] sm:$0xff] %vm7006_vm15, %v6929_v37  ;;  %v6813_v19 = vpop.f32.mrf.mxu1 }
 0xc5b   : > { %v6814_v50 = vadd.f32 %v6813_v19, %v6701_v45  ;;  %v6490_v45 = vadd.f32 %v6489_v40, %v6377_v23  ;;  %v14712_v23 = vld [vmem:[#allocation89_spill] sm:$0xff] }
 0xc5d   : > { %v6867_v60 = vmax.f32 %v6814_v50, 0.0  ;;  %v6603_v19 = vadd.f32 %v6602_v18, %v6490_v45  ;;  %v14705_v50 = vld [vmem:[#allocation75_spill] sm:$0xff]  ;;  %v6495_v48 = vpop.f32.mrf.mxu2 }
 0xc5e   : > { %v6267_v31 = vadd.f32 %v13597_v24, %v14705_v50  ;;  %v6270_v24 = vadd.f32 %v13606_v14, %v14706_v29  ;;  %v14710_v18 = vld [vmem:[#allocation91_spill] sm:$0xff] }
 0xc5f   : > { %6952 = vrot.lane.b32.xlu2 %v6867_v60, %s7699_s15  ;;  %v6718_v11 = vpop.f32.mrf.mxu0  ;;  %v6716_v60 = vadd.f32 %v6715_v3, %v6603_v19  ;;  %v6276_v44 = vadd.f32 %v14710_v18, %v14709_v10 }
 0xc60   : > { %v6380_v20 = vadd.f32 %v13748_v32, %v6267_v31 }
 0xc61   : > { %v6925_v47 = vpop.permute.xlu0 %6924 }
 0xc62   : > { %7014 = vst.msk [vmem:[%s8394_s23 + $0xb8] sm:$0xff] %vm7006_vm15, %v6925_v47  ;;  %v6816_v2 = vpop.f32.mrf.mxu1  ;;  %v6493_v0 = vadd.f32 %v6492_v42, %v6380_v20 }
 0xc63   : > { %v6817_v5 = vadd.f32 %v6816_v2, %v6704_v1  ;;  %v6608_v1 = vpop.f32.mrf.mxu3  ;;  %v6383_v2 = vadd.f32 %v13751_v58, %v6270_v24 }
 0xc64   : > { %v6606_v61 = vadd.f32 %v6605_v49, %v6493_v0 }
 0xc65   : > { %v6868_v51 = vmax.f32 %v6817_v5, 0.0  ;;  %v6498_v32 = vpop.f32.mrf.mxu2  ;;  %v6496_v17 = vadd.f32 %v6495_v48, %v6383_v2 }
 0xc66   : > { %v6719_v27 = vadd.f32 %v6718_v11, %v6606_v61 }
 0xc67   : > { %6954 = vrot.lane.b32.xlu0 %v6868_v51, %s7699_s15  ;;  %v6721_v41 = vpop.f32.mrf.mxu0  ;;  %v6609_v15 = vadd.f32 %v6608_v1, %v6496_v17 }
 0xc69   : > { %v6927_v56 = vpop.permute.xlu1 %6926 }
 0xc6a   : > { %7015 = vst.msk [vmem:[%s8394_s23 + $0xd0] sm:$0xff] %vm7006_vm15, %v6927_v56  ;;  %v6819_v34 = vpop.f32.mrf.mxu1  ;;  %v14708_v56 = vld [vmem:[#allocation99_spill] sm:$0xff] }
 0xc6b   : > { %v6820_v55 = vadd.f32 %v6819_v34, %v6707_v53  ;;  %v6611_v63 = vpop.f32.mrf.mxu3  ;;  %v14707_v53 = vld [vmem:[#allocation93_spill] sm:$0xff]  ;;  %v6722_v34 = vadd.f32 %v6721_v41, %v6609_v15 }
 0xc6c   : > { %v6273_v14 = vadd.f32 %v13620_v30, %v14707_v53 }
 0xc6d   : > { %v6869_v59 = vmax.f32 %v6820_v55, 0.0  ;;  %v6501_v54 = vpop.f32.mrf.mxu2 }
 0xc6e   : > { %v6386_v58 = vadd.f32 %v14708_v56, %v6273_v14 }
 0xc6f   : > { %6956 = vrot.lane.b32.xlu1 %v6869_v59, %s7699_s15  ;;  %v6724_v59 = vpop.f32.mrf.mxu0 }
 0xc70   : > { %v6499_v55 = vadd.f32 %v6498_v32, %v6386_v58 }
 0xc71   : > { %v6935_v9 = vpop.permute.xlu2 %6934 }
 0xc72   : > { %7019 = vst.msk [vmem:[%s8394_s23 + $0x130] sm:$0xff] %vm7006_vm15, %v6935_v9  ;;  %v6822_v46 = vpop.f32.mrf.mxu1  ;;  %v6612_v28 = vadd.f32 %v6611_v63, %v6499_v55 }
 0xc73   : > { %v6823_v6 = vadd.f32 %v6822_v46, %v6710_v25  ;;  %v6614_v30 = vpop.f32.mrf.mxu3  ;;  %v14711_v25 = vld [vmem:[#allocation85_spill] sm:$0xff] }
 0xc74   : > { %v6389_v9 = vadd.f32 %v14711_v25, %v6276_v44  ;;  %v6725_v46 = vadd.f32 %v6724_v59, %v6612_v28 }
 0xc75   : > { %v6870_v4 = vmax.f32 %v6823_v6, 0.0  ;;  %v6504_v22 = vpop.f32.mrf.mxu2 }
 0xc76   : > { %v6502_v7 = vadd.f32 %v6501_v54, %v6389_v9 }
 0xc77   : > { %6958 = vrot.lane.b32.xlu2 %v6870_v4, %s7699_s15  ;;  %v6727_v36 = vpop.f32.mrf.mxu0 }
 0xc78   : > { %v6615_v4 = vadd.f32 %v6614_v30, %v6502_v7 }
 0xc79   : > { %v6931_v62 = vpop.permute.xlu0 %6930 }
 0xc7a   : > { %7017 = vst.msk [vmem:[%s8394_s23 + $0x100] sm:$0xff] %vm7006_vm15, %v6931_v62  ;;  %v6825_v13 = vpop.f32.mrf.mxu1 }
 0xc7b   : > { %v6826_v37 = vadd.f32 %v6825_v13, %v6713_v16  ;;  %v14713_v16 = vld [vmem:[#allocation70_spill] sm:$0xff]  ;;  %v6728_v13 = vadd.f32 %v6727_v36, %v6615_v4 }
 0xc7c   : > { %v6279_v62 = vadd.f32 %v14713_v16, %v14712_v23 }
 0xc7d   : > { %v6871_v52 = vmax.f32 %v6826_v37, 0.0  ;;  %v6617_v37 = vpop.f32.mrf.mxu3  ;;  %v6730_v11 = vpop.f32.mrf.mxu2 }
 0xc7e   : > { %v6392_v49 = vadd.f32 %v13760_v43, %v6279_v62 }
 0xc7f   : > { %6960 = vrot.lane.b32.xlu0 %v6871_v52, %s7699_s15 }
 0xc80   : > { %v6505_v52 = vadd.f32 %v6504_v22, %v6392_v49 }
 0xc81   : > { %v6933_v26 = vpop.permute.xlu1 %6932 }
 0xc82   : > { %7018 = vst.msk [vmem:[%s8394_s23 + $0x118] sm:$0xff] %vm7006_vm15, %v6933_v26  ;;  %v6828_v33 = vpop.f32.mrf.mxu1  ;;  %v6618_v31 = vadd.f32 %v6617_v37, %v6505_v52 }
 0xc83   : > { %v6829_v8 = vadd.f32 %v6828_v33, %v6716_v60 }
 0xc84   : > { %v6731_v20 = vadd.f32 %v6730_v11, %v6618_v31 }
 0xc85   : > { %v6872_v47 = vmax.f32 %v6829_v8, 0.0 }
 0xc87   : > { %6962 = vrot.lane.b32.xlu1 %v6872_v47, %s7699_s15 }
 0xc89   : > { %v6941_v5 = vpop.permute.xlu2 %6940 }
 0xc8a   : > { %7022 = vst.msk [vmem:[%s8394_s23 + $0x178] sm:$0xff] %vm7006_vm15, %v6941_v5  ;;  %v6831_v51 = vpop.f32.mrf.mxu1 }
 0xc8b   : > { %v6832_v57 = vadd.f32 %v6831_v51, %v6719_v27 }
 0xc8d   : > { %v6873_v21 = vmax.f32 %v6832_v57, 0.0 }
 0xc8f   : > { %6964 = vrot.lane.b32.xlu2 %v6873_v21, %s7699_s15 }
 0xc91   : > { %v6937_v39 = vpop.permute.xlu0 %6936 }
 0xc92   : > { %7020 = vst.msk [vmem:[%s8394_s23 + $0x148] sm:$0xff] %vm7006_vm15, %v6937_v39  ;;  %v6834_v40 = vpop.f32.mrf.mxu1 }
 0xc93   : > { %v6835_v38 = vadd.f32 %v6834_v40, %v6722_v34 }
 0xc95   : > { %v6874_v35 = vmax.f32 %v6835_v38, 0.0 }
 0xc97   : > { %6966 = vrot.lane.b32.xlu0 %v6874_v35, %s7699_s15 }
 0xc99   : > { %v6939_v12 = vpop.permute.xlu1 %6938 }
 0xc9a   : > { %7021 = vst.msk [vmem:[%s8394_s23 + $0x160] sm:$0xff] %vm7006_vm15, %v6939_v12  ;;  %v6837_v6 = vpop.f32.mrf.mxu1 }
 0xc9b   : > { %v6838_v42 = vadd.f32 %v6837_v6, %v6725_v46 }
 0xc9d   : > { %v6875_v3 = vmax.f32 %v6838_v42, 0.0 }
 0xc9f   : > { %6968 = vrot.lane.b32.xlu1 %v6875_v3, %s7699_s15 }
 0xca1   : > { %v6947_v45 = vpop.permute.xlu2 %6946 }
 0xca2   : > { %7025 = vst.msk [vmem:[%s8394_s23 + $0x1c0] sm:$0xff] %vm7006_vm15, %v6947_v45  ;;  %v6840_v19 = vpop.f32.mrf.mxu1 }
 0xca3   : > { %v6841_v50 = vadd.f32 %v6840_v19, %v6728_v13 }
 0xca5   : > { %v6876_v48 = vmax.f32 %v6841_v50, 0.0 }
 0xca7   : > { %6970 = vrot.lane.b32.xlu2 %v6876_v48, %s7699_s15 }
 0xca9   : > { %v6943_v43 = vpop.permute.xlu0 %6942 }
 0xcaa   : > { %7023 = vst.msk [vmem:[%s8394_s23 + $0x190] sm:$0xff] %vm7006_vm15, %v6943_v43  ;;  %v6843_v60 = vpop.f32.mrf.mxu1 }
 0xcab   : > { %v6844_v26 = vadd.f32 %v6843_v60, %v6731_v20 }
 0xcad   : > { %v6877_v33 = vmax.f32 %v6844_v26, 0.0 }
 0xcaf   : > { %6972 = vrot.lane.b32.xlu0 %v6877_v33, %s7699_s15  ;;  %s7253_s15 = smul.u32 768, %s7755_s22 }
 0xcb1   : > { %v6945_v0 = vpop.permute.xlu1 %6944  ;;  %s7051_s16 = scalar_lea.hbm %s14025_s5, %s7253_s15 }
 0xcb2   : > { %7024 = vst.msk [vmem:[%s8394_s23 + $0x1a8] sm:$0xff] %vm7006_vm15, %v6945_v0  ;;  %s7054_s8 = sshll.u32 %s7051_s16, 4  ;;  %s7055_s8 = int_to_ptr.hbm [resolvable:$true] %s7054_s8 }
 0xcb3   : > { %s7643_s30 = sshra.s32 %s7055_s8, 4  ;;  %s7644_s30 = int_to_ptr.hbm [resolvable:$true] %s7643_s30 }
 0xcb4   : > { %s7645_s7 = scalar_lea.hbm %s7644_s30, 768  ;;  %p7650_p0 = scmp.lt.s32.totalorder %s7644_s30, %s14025_s5 }
 0xcb5   : > { %p7646_p11 = scmp.ne.s32.totalorder %s7644_s30, %s7645_s7  ;;  %p7651_p1 = scmp.lt.s32.totalorder %s7649_s9, %s7645_s7 }
 0xcb7   : > { %p7647_p12 = pnand %p7646_p11, %p7772_p5  ;;  %p7652_p2 = por %p7651_p1, %p7650_p0 }
 0xcb9   : > { %v6953_v8 = vpop.permute.xlu2 %6952  ;;  %p7648_p13 = pneg %p7647_p12 }
 0xcba   : > { %7028 = vst.msk [vmem:[%s8394_s23 + $0x208] sm:$0xff] %vm7006_vm15, %v6953_v8 }
 0xcbb   : > { %p7653_p3 = pnand %p7652_p2, %p7648_p13 }
 0xcc1   : > { %v6949_v1 = vpop.permute.xlu0 %6948 }
 0xcc2   : > { %7026 = vst.msk [vmem:[%s8394_s23 + $0x1d8] sm:$0xff] %vm7006_vm15, %v6949_v1 }
 0xcc9   : > { %v6951_v61 = vpop.permute.xlu1 %6950 }
 0xcca   : > { %7027 = vst.msk [vmem:[%s8394_s23 + $0x1f0] sm:$0xff] %vm7006_vm15, %v6951_v61 }
 0xcd1   : > { %v6959_v47 = vpop.permute.xlu2 %6958 }
 0xcd2   : > { %7031 = vst.msk [vmem:[%s8394_s23 + $0x250] sm:$0xff] %vm7006_vm15, %v6959_v47 }
 0xcd9   : > { %v6955_v29 = vpop.permute.xlu0 %6954 }
 0xcda   : > { %7029 = vst.msk [vmem:[%s8394_s23 + $0x220] sm:$0xff] %vm7006_vm15, %v6955_v29 }
 0xce1   : > { %v6957_v24 = vpop.permute.xlu1 %6956 }
 0xce2   : > { %7030 = vst.msk [vmem:[%s8394_s23 + $0x238] sm:$0xff] %vm7006_vm15, %v6957_v24 }
 0xce9   : > { %v6965_v2 = vpop.permute.xlu2 %6964 }
 0xcea   : > { %7034 = vst.msk [vmem:[%s8394_s23 + $0x298] sm:$0xff] %vm7006_vm15, %v6965_v2 }
 0xcf1   : > { %v6961_v27 = vpop.permute.xlu0 %6960 }
 0xcf2   : > { %7032 = vst.msk [vmem:[%s8394_s23 + $0x268] sm:$0xff] %vm7006_vm15, %v6961_v27 }
 0xcf9   : > { %v6963_v32 = vpop.permute.xlu1 %6962 }
 0xcfa   : > { %7033 = vst.msk [vmem:[%s8394_s23 + $0x280] sm:$0xff] %vm7006_vm15, %v6963_v32 }
 0xd01   : > { %v6971_v5 = vpop.permute.xlu2 %6970 }
 0xd02   : > { %7037 = vst.msk [vmem:[%s8394_s23 + $0x2e0] sm:$0xff] %vm7006_vm15, %v6971_v5 }
 0xd09   : > { %v6967_v41 = vpop.permute.xlu0 %6966 }
 0xd0a   : > { %7035 = vst.msk [vmem:[%s8394_s23 + $0x2b0] sm:$0xff] %vm7006_vm15, %v6967_v41 }
 0xd11   : > { %v6969_v51 = vpop.permute.xlu1 %6968 }
 0xd12   : > { %7036 = vst.msk [vmem:[%s8394_s23 + $0x2c8] sm:$0xff] %vm7006_vm15, %v6969_v51 }
 0xd21   : > { %v6973_v17 = vpop.permute.xlu0 %6972 }
 0xd22   : > { %7038 = vst.msk [vmem:[%s8394_s23 + $0x2f8] sm:$0xff] %vm7006_vm15, %v6973_v17 }
 0xd23   : > { %7656 = shalt.err (!%p7653_p3)
}
 0xd24   : > { %s7703_s23 = smov 384  }
 0xd25   : > { %7254 = dma.vmem_to_hbm [thread:$0]  (%p7772_p5), %s7053_s11, 12288, %s7055_s8, %s7040_s26, %s7703_s23, %s7703_s23, %s14168_s14  }
 0xd26 PF: > { %p7260_p4 = scmp.ge.s32.totalorder %s7691_s21, 2  ;;  %s7069_s15 = sand.u32 1, %s7679_s18  }
 0xd27   : > { %s7070_s12 = scalar_lea.sflag [#allocation6], %s7069_s15 }
 0xd28   : > { %p7257_p7 = pnand %p7260_p4, %p7776_p6 }
 0xd2a   : > { %p7258_p8 = pneg %p7257_p7 }
 0xd2c   : > { %7674 = dma.done.wait (%p7258_p8), %s7070_s12, 12288  }
 0xd2d   : > { %7676 = vsyncadd (%p7258_p8), %s7070_s12, 4294955008  ;;  %p15_p9 = scmp.ge.s32.totalorder %s7759_s24, 4   ;;  %s14715_s18 = smov %s7683_s19 }
 0xd2e   : > { %s14716_s19 = smov %s7687_s20  ;;  %s14717_s20 = smov %s7770_s27 }
 0xd2f   : > { %s14718_s21 = smov %s7759_s24  ;;  %17 = sbr.rel (!%p15_p9) target bundleno = 3 (0x3), region = 81 }
 0xd34   :  { %7076 = vsyncpa [#allocation6], 1 }
 0xd35   :  { %7078 = vsyncpa [#allocation6 + $0x1], 1 }

</bundles_post_ra>
